<compile_context>
chip_gen: v7x
topology: tpu7x:2x2x1
jax: 0.10.0
libtpu: 0.0.40
codegen_flags: <defaults>
</compile_context>

<pallas_src>
import functools

import jax
import jax.numpy as jnp
from jax.experimental import pallas as pl
from jax.experimental.pallas import tpu as pltpu

LANE = 128
LEAKY_SLOPE = 0.2
VMEM_LIMIT = 40 * 1024 * 1024   # explicit scoped-VMEM budget (safe on v5e/v6e/v7x)


def _round_up(x, m):
    return ((x + m - 1) // m) * m


def _pick_row_tile(ho, wo, target=16):
    """Largest row tile T <= target with T | Ho and (T*Wo) sublane-aligned."""
    for t in range(min(target, ho), 0, -1):
        if ho % t == 0 and ((t * wo) % 8 == 0 or t == ho):
            return t
    return ho


# ----------------------------------------------------------------------------
# Stride-2 4x4 conv (reflect-padded) expressed as a stride-1 2x2 conv over a
# space-to-depth view.  Grid = (batch, row_tiles); the input image stays
# resident in VMEM across row tiles (block index only changes with batch),
# the kernel slices T+1 s2d rows per step and accumulates per tap on the MXU.
# ----------------------------------------------------------------------------
def _conv_s2_kernel(x_ref, w_ref, b_ref, o_ref, *, slope):
    # x_ref: (1, Hs, Ws, Cs) bf16 s2d view; w_ref: (4*Cs, Cout) bf16
    # b_ref: (1, Cout) f32;  o_ref: (1, T*Wo, Cout) bf16 (rows [t*T, t*T+T))
    _, hs, ws, cs = x_ref.shape
    wo = ws - 1
    tile = o_ref.shape[1] // wo
    t = pl.program_id(1)
    row0 = pl.multiple_of(t * tile, tile)
    xs = x_ref[0, pl.ds(row0, tile + 1), :, :]            # (T+1, Ws, Cs)
    m = tile * wo

    def tap(py, px):
        return xs[py:py + tile, px:px + wo, :].reshape(m, cs)

    if 4 * cs <= LANE:
        # tiny-K first layer: concat the four taps -> one lane-dense K=128 dot.
        lhs = jnp.concatenate([tap(0, 0), tap(0, 1), tap(1, 0), tap(1, 1)],
                              axis=-1)
        acc = jnp.dot(lhs, w_ref[...], preferred_element_type=jnp.float32)
    else:
        # per-tap accumulation: K = Cs >= 256 per dot, no k^2 im2col copy.
        acc = None
        for py in range(2):
            for px in range(2):
                k0 = (py * 2 + px) * cs
                part = jnp.dot(tap(py, px), w_ref[k0:k0 + cs, :],
                               preferred_element_type=jnp.float32)
                acc = part if acc is None else acc + part

    acc = acc + b_ref[...]
    acc = jnp.where(acc >= 0.0, acc, acc * slope)          # LeakyReLU(0.2)
    o_ref[0] = acc.astype(o_ref.dtype)


def stride2_layer(x, p, *, row_tile_target=16):
    """x: (N, H, W, Cin_pad) bf16 -> (N, H//2, W//2, Cout_pad) bf16."""
    n, h, w, _ = x.shape
    assert h % 2 == 0 and w % 2 == 0, "stride-2 + reflect-pad(1) needs even H, W"
    # ReflectionPad2d(1) + space-to-depth(2): one fused XLA copy pass.
    # TODO(synk): fuse into the kernel with manual halo DMA to save this pass.
    xp = jnp.pad(x, ((0, 0), (1, 1), (1, 1), (0, 0)), mode="reflect")
    xs = space_to_depth2(xp)                               # (N, Hs, Ws, 4C)
    _, hs, ws, cs = xs.shape
    ho, wo = hs - 1, ws - 1
    kdim, cout = p["w"].shape
    assert kdim == 4 * cs
    tile = _pick_row_tile(ho, wo, row_tile_target)
    n_tiles = ho // tile

    kernel = functools.partial(_conv_s2_kernel, slope=LEAKY_SLOPE)
    out = pl.pallas_call(
        kernel,
        out_shape=jax.ShapeDtypeStruct((n, ho * wo, cout), jnp.bfloat16),
        grid_spec=pltpu.PrefetchScalarGridSpec(
            num_scalar_prefetch=0,
            grid=(n, n_tiles),
            in_specs=[
                # One image per block; re-DMA'd only when the batch index
                # changes, row tiles slice it in-kernel (1-row halo).
                pl.BlockSpec((1, hs, ws, cs), lambda i, t: (i, 0, 0, 0)),
                # Constant-index weight/bias: fetched once for the whole grid.
                pl.BlockSpec((kdim, cout), lambda i, t: (0, 0)),
                pl.BlockSpec((1, cout), lambda i, t: (0, 0)),
            ],
            out_specs=pl.BlockSpec((1, tile * wo, cout), lambda i, t: (i, t, 0)),
        ),
        compiler_params=pltpu.CompilerParams(
            dimension_semantics=("parallel", "parallel"),
            vmem_limit_bytes=VMEM_LIMIT),
    )(xs, p["w"], p["b"])
    return out.reshape(n, ho, wo, cout)


# ----------------------------------------------------------------------------
# Fused tail: [SN-Conv(4ndf->8ndf, k4, s1) + LReLU] -> [Conv(8ndf->1, k4, s1)].
# Both convs run per batch element inside one kernel; the intermediate
# activation stays in VMEM and the final output is only 8 lanes wide.
# ----------------------------------------------------------------------------
def _tail_kernel(x_ref, w3_ref, b3_ref, w4_ref, b4_ref, o_ref, *, slope):
    _, h3p, w3p, c3 = x_ref.shape
    h4, w4 = h3p - 3, w3p - 3
    h5, w5 = h4 - 3, w4 - 3
    c4 = w3_ref.shape[1]
    xp = x_ref[0]                                          # (H3p, W3p, C3)

    # layer 3: 4x4 valid conv via per-tap accumulation (16 dots, K = C3)
    m3 = h4 * w4
    acc = None
    for ky in range(4):
        for kx in range(4):
            lhs = xp[ky:ky + h4, kx:kx + w4, :].reshape(m3, c3)
            k0 = (ky * 4 + kx) * c3
            part = jnp.dot(lhs, w3_ref[k0:k0 + c3, :],
                           preferred_element_type=jnp.float32)
            acc = part if acc is None else acc + part
    acc = acc + b3_ref[...]
    acc = jnp.where(acc >= 0.0, acc, acc * slope)
    hid = acc.astype(jnp.bfloat16).reshape(h4, w4, c4)     # stays in VMEM

    # layer 4: final 4x4 valid conv, Cout padded only to 8 lanes
    m5 = h5 * w5
    acc4 = None
    for ky in range(4):
        for kx in range(4):
            lhs = hid[ky:ky + h5, kx:kx + w5, :].reshape(m5, c4)
            k0 = (ky * 4 + kx) * c4
            part = jnp.dot(lhs, w4_ref[k0:k0 + c4, :],
                           preferred_element_type=jnp.float32)
            acc4 = part if acc4 is None else acc4 + part
    o_ref[0] = (acc4 + b4_ref[...]).astype(o_ref.dtype)


def tail_layers(x, p3, p4):
    """x: (N, H3, W3, C3) bf16 -> (N, H3-4, W3-4, cout_pad_final) f32."""
    n, h3, w3, c3 = x.shape
    assert p3["w"].shape[0] == 16 * c3
    assert p4["w"].shape[0] == 16 * p3["w"].shape[1]
    xp = jnp.pad(x, ((0, 0), (1, 1), (1, 1), (0, 0)), mode="reflect")
    h4, w4 = h3 - 1, w3 - 1
    h5, w5 = h4 - 3, w4 - 3
    assert h5 >= 1 and w5 >= 1, "input too small for the n_layers=5 discriminator"
    coutf = p4["w"].shape[1]

    kernel = functools.partial(_tail_kernel, slope=LEAKY_SLOPE)
    out = pl.pallas_call(
        kernel,
        out_shape=jax.ShapeDtypeStruct((n, h5 * w5, coutf), jnp.float32),
        grid_spec=pltpu.PrefetchScalarGridSpec(
            num_scalar_prefetch=0,
            grid=(n,),
            in_specs=[
                pl.BlockSpec((1, h3 + 2, w3 + 2, c3), lambda i: (i, 0, 0, 0)),
                pl.BlockSpec(p3["w"].shape, lambda i: (0, 0)),
                pl.BlockSpec(p3["b"].shape, lambda i: (0, 0)),
                pl.BlockSpec(p4["w"].shape, lambda i: (0, 0)),
                pl.BlockSpec(p4["b"].shape, lambda i: (0, 0)),
            ],
            out_specs=pl.BlockSpec((1, h5 * w5, coutf), lambda i: (i, 0, 0)),
        ),
        compiler_params=pltpu.CompilerParams(
            dimension_semantics=("parallel",),
            vmem_limit_bytes=VMEM_LIMIT),
    )(xp, p3["w"], p3["b"], p4["w"], p4["b"])
    return out.reshape(n, h5, w5, coutf)


# ----------------------------------------------------------------------------
# JAX-side glue and parameter construction.
# ----------------------------------------------------------------------------
def space_to_depth2(x):
    """(N, 2A, 2B, C) -> (N, A, B, 4C) with channel order (dy, dx, c)."""
    n, h, w, c = x.shape
    x = x.reshape(n, h // 2, 2, w // 2, 2, c)
    x = jnp.transpose(x, (0, 1, 3, 2, 4, 5))
    return x.reshape(n, h // 2, w // 2, 4 * c)


def spectral_normalize(w, key, n_iter=30, eps=1e-12):
    """w: (Cout, Cin, kh, kw) -> w / sigma(w) via power iteration."""
    cout = w.shape[0]
    w_mat = w.reshape(cout, -1)
    u = jax.random.normal(key, (cout,), dtype=w.dtype)
    u = u / (jnp.linalg.norm(u) + eps)
    v = None
    for _ in range(n_iter):
        v = w_mat.T @ u
        v = v / (jnp.linalg.norm(v) + eps)
        u = w_mat @ v
        u = u / (jnp.linalg.norm(u) + eps)
    sigma = u @ (w_mat @ v)
    return w / sigma


def init_discriminator(key, input_nc, ndf=64, n_layers=5):
    """Deterministic synthetic parameters with the module's exact shapes."""
    cfgs = [(input_nc, ndf, 2, True)]                      # (cin, cout, stride, sn)
    for i in range(1, n_layers - 2):
        mult = 2 ** (i - 1)
        cfgs.append((ndf * mult, ndf * mult * 2, 2, True))
    mult = 2 ** (n_layers - 2 - 1)
    cfgs.append((ndf * mult, ndf * mult * 2, 1, True))
    cfgs.append((ndf * mult * 2, 1, 1, False))             # final conv, no SN

    params = []
    for li, (cin, cout, stride, sn) in enumerate(cfgs):
        key, kw_, kb_, ku_ = jax.random.split(key, 4)
        w = jax.random.normal(kw_, (cout, cin, 4, 4), dtype=jnp.float32) * 0.05
        b = jax.random.normal(kb_, (cout,), dtype=jnp.float32) * 0.01
        if sn:
            # TODO(synk): PyTorch persists the power-iteration vector u across
            # forwards; synthetic init runs converged power iteration instead.
            w = spectral_normalize(w, ku_)

        if li == 0:
            # pad cin to 8 so the s2d view is 32 lanes and K = 4*4*8 = 128.
            cin_pad = _round_up(cin, 8)
        else:
            cin_pad = _round_up(cin, LANE)
        if li == len(cfgs) - 1:
            cout_pad = _round_up(cout, 8)                  # final Cout=1 kept narrow
        else:
            cout_pad = _round_up(cout, LANE)

        # (Cout, Cin, kh, kw) -> (kh, kw, Cin, Cout), zero-pad channels.
        w_hwio = jnp.transpose(w, (2, 3, 1, 0))
        w_hwio = jnp.pad(
            w_hwio, ((0, 0), (0, 0), (0, cin_pad - cin), (0, cout_pad - cout)))
        b_pad = jnp.pad(b, (0, cout_pad - cout))

        if stride == 2:
            # stride-2 4x4 conv == stride-1 2x2 conv over the s2d view.
            # K order must be (py, px, dy, dx, ci) to match the kernel taps.
            wk = w_hwio.reshape(2, 2, 2, 2, cin_pad, cout_pad)  # (py,dy,px,dx,ci,co)
            wk = jnp.transpose(wk, (0, 2, 1, 3, 4, 5))          # (py,px,dy,dx,ci,co)
            w_mat = wk.reshape(16 * cin_pad, cout_pad)
        else:
            w_mat = w_hwio.reshape(16 * cin_pad, cout_pad)      # K order (ky,kx,ci)

        params.append(dict(
            w=w_mat.astype(jnp.bfloat16),
            b=b_pad.reshape(1, cout_pad).astype(jnp.float32),
            stride=stride, cin_pad=cin_pad, cout=cout, cout_pad=cout_pad))
    return params


def discriminator_forward(params, x_nchw):
    # layout: NCHW (PyTorch) -> NHWC bf16 for compute -> NCHW f32 out
    x = jnp.transpose(x_nchw, (0, 2, 3, 1)).astype(jnp.bfloat16)
    n, h, w, c = x.shape
    assert h % 2 == 0 and w % 2 == 0, "discriminator expects even H, W"
    p0 = params[0]
    if c < p0["cin_pad"]:
        x = jnp.pad(x, ((0, 0), (0, 0), (0, 0), (0, p0["cin_pad"] - c)))

    for p in params[:-2]:                      # three stride-2 SN-conv + LReLU layers
        x = stride2_layer(x, p)
    out = tail_layers(x, params[-2], params[-1])           # fused final two convs

    out = out[..., : params[-1]["cout"]].astype(jnp.float32)   # drop lane padding
    return jnp.transpose(out, (0, 3, 1, 2))


if __name__ == "__main__":
    key = jax.random.PRNGKey(0)
    k_param, k_in = jax.random.split(key)

    INPUT_NC, NDF, N_LAYERS = 4, 8, 5
    # n_layers=5: three stride-2 convs + two k=4 valid convs;
    # spatial path 48 -> 24 -> 12 -> 6 -> 5 -> 2 keeps every layer valid.
    x = jax.random.normal(k_in, (2, INPUT_NC, 48, 48), dtype=jnp.float32)

    params = init_discriminator(k_param, INPUT_NC, ndf=NDF, n_layers=N_LAYERS)
    fwd = jax.jit(lambda inp: discriminator_forward(params, inp))
    out = jax.block_until_ready(fwd(x))

    assert out.shape == (2, 1, 2, 2), out.shape
    assert bool(jnp.all(jnp.isfinite(out)))
    print("KERNEL_OK")
</pallas_src>

<mosaic_0001>
module attributes {stable_mosaic.version = 11 : i64} {
  func.func @_conv_s2_kernel(%arg0: i32, %arg1: i32, %arg2: memref<1x25x25x32xbf16, #tpu.memory_space<vmem>>, %arg3: memref<128x128xbf16, #tpu.memory_space<vmem>>, %arg4: memref<1x128xf32, #tpu.memory_space<vmem>>, %arg5: memref<1x288x128xbf16, #tpu.memory_space<vmem>>) attributes {dimension_semantics = [#tpu.dimension_semantics<parallel>, #tpu.dimension_semantics<parallel>], iteration_bounds = array<i64: 2, 2>, scalar_prefetch = 0 : i64, scratch_operands = 0 : i64, tpu.core_type = #tpu.core_type<tc>, window_params = [{transform_indices = @transform_0, window_bounds = array<i64: 1, 25, 25, 32>}, {pipeline_mode = #tpu.pipeline_mode<synchronous>, transform_indices = @transform_1, window_bounds = array<i64: 128, 128>}, {pipeline_mode = #tpu.pipeline_mode<synchronous>, transform_indices = @transform_2, window_bounds = array<i64: 1, 128>}, {transform_indices = @transform_3, window_bounds = array<i64: 1, 288, 128>}]} {
    %c12_i32 = arith.constant 12 : i32
    %0 = arith.muli %arg1, %c12_i32 : i32
    %1 = tpu.assume_multiple %0, 12 : i32
    %c0 = arith.constant 0 : index
    %2 = arith.index_cast %1 : i32 to index
    %c0_0 = arith.constant 0 : index
    %c0_1 = arith.constant 0 : index
    %3 = vector.load %arg2[%c0, %2, %c0_0, %c0_1] : memref<1x25x25x32xbf16, #tpu.memory_space<vmem>>, vector<1x13x25x32xbf16>
    %4 = vector.shape_cast %3 : vector<1x13x25x32xbf16> to vector<13x25x32xbf16>
    %5 = vector.extract_strided_slice %4 {offsets = [0, 0, 0], sizes = [12, 24, 32], strides = [1, 1, 1]} : vector<13x25x32xbf16> to vector<12x24x32xbf16>
    %6 = vector.shape_cast %5 : vector<12x24x32xbf16> to vector<288x32xbf16>
    %7 = vector.extract_strided_slice %4 {offsets = [0, 1, 0], sizes = [12, 24, 32], strides = [1, 1, 1]} : vector<13x25x32xbf16> to vector<12x24x32xbf16>
    %8 = vector.shape_cast %7 : vector<12x24x32xbf16> to vector<288x32xbf16>
    %9 = vector.extract_strided_slice %4 {offsets = [1, 0, 0], sizes = [12, 24, 32], strides = [1, 1, 1]} : vector<13x25x32xbf16> to vector<12x24x32xbf16>
    %10 = vector.shape_cast %9 : vector<12x24x32xbf16> to vector<288x32xbf16>
    %11 = vector.extract_strided_slice %4 {offsets = [1, 1, 0], sizes = [12, 24, 32], strides = [1, 1, 1]} : vector<13x25x32xbf16> to vector<12x24x32xbf16>
    %12 = vector.shape_cast %11 : vector<12x24x32xbf16> to vector<288x32xbf16>
    %13 = tpu.concatenate %6, %8, %10, %12 in 1 : vector<288x32xbf16>, vector<288x32xbf16>, vector<288x32xbf16>, vector<288x32xbf16> -> vector<288x128xbf16>
    %c0_2 = arith.constant 0 : index
    %c0_3 = arith.constant 0 : index
    %14 = vector.load %arg3[%c0_2, %c0_3] : memref<128x128xbf16, #tpu.memory_space<vmem>>, vector<128x128xbf16>
    %cst = arith.constant dense<0.000000e+00> : vector<288x128xf32>
    %15 = tpu.matmul %13, %14, %cst {dimension_numbers = #tpu.dot_dimension_numbers<[1], [0], [0], [1], [0, 0, 1, 1], [], []>} : vector<288x128xbf16>, vector<128x128xbf16>, vector<288x128xf32> -> vector<288x128xf32>
    %c0_4 = arith.constant 0 : index
    %c0_5 = arith.constant 0 : index
    %16 = vector.load %arg4[%c0_4, %c0_5] : memref<1x128xf32, #tpu.memory_space<vmem>>, vector<1x128xf32>
    %17 = vector.broadcast %16 : vector<1x128xf32> to vector<288x128xf32>
    %18 = arith.addf %15, %17 : vector<288x128xf32>
    %cst_6 = arith.constant 0.000000e+00 : f32
    %19 = vector.broadcast %cst_6 : f32 to vector<288x128xf32>
    %20 = arith.cmpf oge, %18, %19 : vector<288x128xf32>
    %cst_7 = arith.constant 2.000000e-01 : f32
    %21 = vector.broadcast %cst_7 : f32 to vector<288x128xf32>
    %22 = arith.mulf %18, %21 : vector<288x128xf32>
    %23 = arith.select %20, %18, %22 : vector<288x128xi1>, vector<288x128xf32>
    %24 = arith.truncf %23 : vector<288x128xf32> to vector<288x128xbf16>
    %c0_8 = arith.constant 0 : index
    %c0_9 = arith.constant 0 : index
    %c0_10 = arith.constant 0 : index
    %25 = vector.load %arg5[%c0_8, %c0_9, %c0_10] : memref<1x288x128xbf16, #tpu.memory_space<vmem>>, vector<1x288x128xbf16>
    %26 = vector.shape_cast %25 : vector<1x288x128xbf16> to vector<288x128xbf16>
    %27 = vector.shape_cast %24 : vector<288x128xbf16> to vector<1x288x128xbf16>
    tpu.vector_store %arg5[%c0_8, %c0_9, %c0_10], %27 {strides = array<i32>} : memref<1x288x128xbf16, #tpu.memory_space<vmem>>, vector<1x288x128xbf16>,
    return
  }
  func.func @transform_0(%arg0: i32, %arg1: i32) -> (i32, i32, i32, i32) {
    %c0_i32 = arith.constant 0 : i32
    %c0_i32_0 = arith.constant 0 : i32
    %c0_i32_1 = arith.constant 0 : i32
    %c0_i32_2 = arith.constant 0 : i32
    return %arg0, %c0_i32, %c0_i32_0, %c0_i32_1 : i32, i32, i32, i32
  }
  func.func @transform_1(%arg0: i32, %arg1: i32) -> (i32, i32) {
    %c0_i32 = arith.constant 0 : i32
    %c0_i32_0 = arith.constant 0 : i32
    %c0_i32_1 = arith.constant 0 : i32
    return %c0_i32, %c0_i32_0 : i32, i32
  }
  func.func @transform_2(%arg0: i32, %arg1: i32) -> (i32, i32) {
    %c0_i32 = arith.constant 0 : i32
    %c0_i32_0 = arith.constant 0 : i32
    %c0_i32_1 = arith.constant 0 : i32
    return %c0_i32, %c0_i32_0 : i32, i32
  }
  func.func @transform_3(%arg0: i32, %arg1: i32) -> (i32, i32, i32) {
    %c0_i32 = arith.constant 0 : i32
    %c0_i32_0 = arith.constant 0 : i32
    return %arg0, %arg1, %c0_i32 : i32, i32, i32
  }
}

module attributes {stable_mosaic.version = 11 : i64} {
  func.func @_conv_s2_kernel(%arg0: i32, %arg1: i32, %arg2: memref<1x13x13x512xbf16, #tpu.memory_space<vmem>>, %arg3: memref<2048x128xbf16, #tpu.memory_space<vmem>>, %arg4: memref<1x128xf32, #tpu.memory_space<vmem>>, %arg5: memref<1x144x128xbf16, #tpu.memory_space<vmem>>) attributes {dimension_semantics = [#tpu.dimension_semantics<parallel>, #tpu.dimension_semantics<parallel>], iteration_bounds = array<i64: 2, 1>, scalar_prefetch = 0 : i64, scratch_operands = 0 : i64, tpu.core_type = #tpu.core_type<tc>, window_params = [{transform_indices = @transform_0, window_bounds = array<i64: 1, 13, 13, 512>}, {pipeline_mode = #tpu.pipeline_mode<synchronous>, transform_indices = @transform_1, window_bounds = array<i64: 2048, 128>}, {pipeline_mode = #tpu.pipeline_mode<synchronous>, transform_indices = @transform_2, window_bounds = array<i64: 1, 128>}, {transform_indices = @transform_3, window_bounds = array<i64: 1, 144, 128>}]} {
    %c12_i32 = arith.constant 12 : i32
    %0 = arith.muli %arg1, %c12_i32 : i32
    %1 = tpu.assume_multiple %0, 12 : i32
    %c0 = arith.constant 0 : index
    %2 = arith.index_cast %1 : i32 to index
    %c0_0 = arith.constant 0 : index
    %c0_1 = arith.constant 0 : index
    %3 = vector.load %arg2[%c0, %2, %c0_0, %c0_1] : memref<1x13x13x512xbf16, #tpu.memory_space<vmem>>, vector<1x13x13x512xbf16>
    %4 = vector.shape_cast %3 : vector<1x13x13x512xbf16> to vector<13x13x512xbf16>
    %5 = vector.extract_strided_slice %4 {offsets = [0, 0, 0], sizes = [12, 12, 512], strides = [1, 1, 1]} : vector<13x13x512xbf16> to vector<12x12x512xbf16>
    %6 = vector.shape_cast %5 : vector<12x12x512xbf16> to vector<144x512xbf16>
    %c0_2 = arith.constant 0 : index
    %c0_3 = arith.constant 0 : index
    %7 = vector.load %arg3[%c0_2, %c0_3] : memref<2048x128xbf16, #tpu.memory_space<vmem>>, vector<512x128xbf16>
    %cst = arith.constant dense<0.000000e+00> : vector<144x128xf32>
    %8 = tpu.matmul %6, %7, %cst {dimension_numbers = #tpu.dot_dimension_numbers<[1], [0], [0], [1], [0, 0, 1, 1], [], []>} : vector<144x512xbf16>, vector<512x128xbf16>, vector<144x128xf32> -> vector<144x128xf32>
    %9 = vector.extract_strided_slice %4 {offsets = [0, 1, 0], sizes = [12, 12, 512], strides = [1, 1, 1]} : vector<13x13x512xbf16> to vector<12x12x512xbf16>
    %10 = vector.shape_cast %9 : vector<12x12x512xbf16> to vector<144x512xbf16>
    %c512 = arith.constant 512 : index
    %c0_4 = arith.constant 0 : index
    %11 = vector.load %arg3[%c512, %c0_4] : memref<2048x128xbf16, #tpu.memory_space<vmem>>, vector<512x128xbf16>
    %cst_5 = arith.constant dense<0.000000e+00> : vector<144x128xf32>
    %12 = tpu.matmul %10, %11, %cst_5 {dimension_numbers = #tpu.dot_dimension_numbers<[1], [0], [0], [1], [0, 0, 1, 1], [], []>} : vector<144x512xbf16>, vector<512x128xbf16>, vector<144x128xf32> -> vector<144x128xf32>
    %13 = arith.addf %8, %12 : vector<144x128xf32>
    %14 = vector.extract_strided_slice %4 {offsets = [1, 0, 0], sizes = [12, 12, 512], strides = [1, 1, 1]} : vector<13x13x512xbf16> to vector<12x12x512xbf16>
    %15 = vector.shape_cast %14 : vector<12x12x512xbf16> to vector<144x512xbf16>
    %c1024 = arith.constant 1024 : index
    %c0_6 = arith.constant 0 : index
    %16 = vector.load %arg3[%c1024, %c0_6] : memref<2048x128xbf16, #tpu.memory_space<vmem>>, vector<512x128xbf16>
    %cst_7 = arith.constant dense<0.000000e+00> : vector<144x128xf32>
    %17 = tpu.matmul %15, %16, %cst_7 {dimension_numbers = #tpu.dot_dimension_numbers<[1], [0], [0], [1], [0, 0, 1, 1], [], []>} : vector<144x512xbf16>, vector<512x128xbf16>, vector<144x128xf32> -> vector<144x128xf32>
    %18 = arith.addf %13, %17 : vector<144x128xf32>
    %19 = vector.extract_strided_slice %4 {offsets = [1, 1, 0], sizes = [12, 12, 512], strides = [1, 1, 1]} : vector<13x13x512xbf16> to vector<12x12x512xbf16>
    %20 = vector.shape_cast %19 : vector<12x12x512xbf16> to vector<144x512xbf16>
    %c1536 = arith.constant 1536 : index
    %c0_8 = arith.constant 0 : index
    %21 = vector.load %arg3[%c1536, %c0_8] : memref<2048x128xbf16, #tpu.memory_space<vmem>>, vector<512x128xbf16>
    %cst_9 = arith.constant dense<0.000000e+00> : vector<144x128xf32>
    %22 = tpu.matmul %20, %21, %cst_9 {dimension_numbers = #tpu.dot_dimension_numbers<[1], [0], [0], [1], [0, 0, 1, 1], [], []>} : vector<144x512xbf16>, vector<512x128xbf16>, vector<144x128xf32> -> vector<144x128xf32>
    %23 = arith.addf %18, %22 : vector<144x128xf32>
    %c0_10 = arith.constant 0 : index
    %c0_11 = arith.constant 0 : index
    %24 = vector.load %arg4[%c0_10, %c0_11] : memref<1x128xf32, #tpu.memory_space<vmem>>, vector<1x128xf32>
    %25 = vector.broadcast %24 : vector<1x128xf32> to vector<144x128xf32>
    %26 = arith.addf %23, %25 : vector<144x128xf32>
    %cst_12 = arith.constant 0.000000e+00 : f32
    %27 = vector.broadcast %cst_12 : f32 to vector<144x128xf32>
    %28 = arith.cmpf oge, %26, %27 : vector<144x128xf32>
    %cst_13 = arith.constant 2.000000e-01 : f32
    %29 = vector.broadcast %cst_13 : f32 to vector<144x128xf32>
    %30 = arith.mulf %26, %29 : vector<144x128xf32>
    %31 = arith.select %28, %26, %30 : vector<144x128xi1>, vector<144x128xf32>
    %32 = arith.truncf %31 : vector<144x128xf32> to vector<144x128xbf16>
    %c0_14 = arith.constant 0 : index
    %c0_15 = arith.constant 0 : index
    %c0_16 = arith.constant 0 : index
    %33 = vector.load %arg5[%c0_14, %c0_15, %c0_16] : memref<1x144x128xbf16, #tpu.memory_space<vmem>>, vector<1x144x128xbf16>
    %34 = vector.shape_cast %33 : vector<1x144x128xbf16> to vector<144x128xbf16>
    %35 = vector.shape_cast %32 : vector<144x128xbf16> to vector<1x144x128xbf16>
    tpu.vector_store %arg5[%c0_14, %c0_15, %c0_16], %35 {strides = array<i32>} : memref<1x144x128xbf16, #tpu.memory_space<vmem>>, vector<1x144x128xbf16>,
    return
  }
  func.func @transform_0(%arg0: i32, %arg1: i32) -> (i32, i32, i32, i32) {
    %c0_i32 = arith.constant 0 : i32
    %c0_i32_0 = arith.constant 0 : i32
    %c0_i32_1 = arith.constant 0 : i32
    %c0_i32_2 = arith.constant 0 : i32
    return %arg0, %c0_i32, %c0_i32_0, %c0_i32_1 : i32, i32, i32, i32
  }
  func.func @transform_1(%arg0: i32, %arg1: i32) -> (i32, i32) {
    %c0_i32 = arith.constant 0 : i32
    %c0_i32_0 = arith.constant 0 : i32
    %c0_i32_1 = arith.constant 0 : i32
    return %c0_i32, %c0_i32_0 : i32, i32
  }
  func.func @transform_2(%arg0: i32, %arg1: i32) -> (i32, i32) {
    %c0_i32 = arith.constant 0 : i32
    %c0_i32_0 = arith.constant 0 : i32
    %c0_i32_1 = arith.constant 0 : i32
    return %c0_i32, %c0_i32_0 : i32, i32
  }
  func.func @transform_3(%arg0: i32, %arg1: i32) -> (i32, i32, i32) {
    %c0_i32 = arith.constant 0 : i32
    %c0_i32_0 = arith.constant 0 : i32
    return %arg0, %arg1, %c0_i32 : i32, i32, i32
  }
}

module attributes {stable_mosaic.version = 11 : i64} {
  func.func @_conv_s2_kernel(%arg0: i32, %arg1: i32, %arg2: memref<1x7x7x512xbf16, #tpu.memory_space<vmem>>, %arg3: memref<2048x128xbf16, #tpu.memory_space<vmem>>, %arg4: memref<1x128xf32, #tpu.memory_space<vmem>>, %arg5: memref<1x36x128xbf16, #tpu.memory_space<vmem>>) attributes {dimension_semantics = [#tpu.dimension_semantics<parallel>, #tpu.dimension_semantics<parallel>], iteration_bounds = array<i64: 2, 1>, scalar_prefetch = 0 : i64, scratch_operands = 0 : i64, tpu.core_type = #tpu.core_type<tc>, window_params = [{transform_indices = @transform_0, window_bounds = array<i64: 1, 7, 7, 512>}, {pipeline_mode = #tpu.pipeline_mode<synchronous>, transform_indices = @transform_1, window_bounds = array<i64: 2048, 128>}, {pipeline_mode = #tpu.pipeline_mode<synchronous>, transform_indices = @transform_2, window_bounds = array<i64: 1, 128>}, {transform_indices = @transform_3, window_bounds = array<i64: 1, 36, 128>}]} {
    %c6_i32 = arith.constant 6 : i32
    %0 = arith.muli %arg1, %c6_i32 : i32
    %1 = tpu.assume_multiple %0, 6 : i32
    %c0 = arith.constant 0 : index
    %2 = arith.index_cast %1 : i32 to index
    %c0_0 = arith.constant 0 : index
    %c0_1 = arith.constant 0 : index
    %3 = vector.load %arg2[%c0, %2, %c0_0, %c0_1] : memref<1x7x7x512xbf16, #tpu.memory_space<vmem>>, vector<1x7x7x512xbf16>
    %4 = vector.shape_cast %3 : vector<1x7x7x512xbf16> to vector<7x7x512xbf16>
    %5 = vector.extract_strided_slice %4 {offsets = [0, 0, 0], sizes = [6, 6, 512], strides = [1, 1, 1]} : vector<7x7x512xbf16> to vector<6x6x512xbf16>
    %6 = vector.shape_cast %5 : vector<6x6x512xbf16> to vector<36x512xbf16>
    %c0_2 = arith.constant 0 : index
    %c0_3 = arith.constant 0 : index
    %7 = vector.load %arg3[%c0_2, %c0_3] : memref<2048x128xbf16, #tpu.memory_space<vmem>>, vector<512x128xbf16>
    %cst = arith.constant dense<0.000000e+00> : vector<36x128xf32>
    %8 = tpu.matmul %6, %7, %cst {dimension_numbers = #tpu.dot_dimension_numbers<[1], [0], [0], [1], [0, 0, 1, 1], [], []>} : vector<36x512xbf16>, vector<512x128xbf16>, vector<36x128xf32> -> vector<36x128xf32>
    %9 = vector.extract_strided_slice %4 {offsets = [0, 1, 0], sizes = [6, 6, 512], strides = [1, 1, 1]} : vector<7x7x512xbf16> to vector<6x6x512xbf16>
    %10 = vector.shape_cast %9 : vector<6x6x512xbf16> to vector<36x512xbf16>
    %c512 = arith.constant 512 : index
    %c0_4 = arith.constant 0 : index
    %11 = vector.load %arg3[%c512, %c0_4] : memref<2048x128xbf16, #tpu.memory_space<vmem>>, vector<512x128xbf16>
    %cst_5 = arith.constant dense<0.000000e+00> : vector<36x128xf32>
    %12 = tpu.matmul %10, %11, %cst_5 {dimension_numbers = #tpu.dot_dimension_numbers<[1], [0], [0], [1], [0, 0, 1, 1], [], []>} : vector<36x512xbf16>, vector<512x128xbf16>, vector<36x128xf32> -> vector<36x128xf32>
    %13 = arith.addf %8, %12 : vector<36x128xf32>
    %14 = vector.extract_strided_slice %4 {offsets = [1, 0, 0], sizes = [6, 6, 512], strides = [1, 1, 1]} : vector<7x7x512xbf16> to vector<6x6x512xbf16>
    %15 = vector.shape_cast %14 : vector<6x6x512xbf16> to vector<36x512xbf16>
    %c1024 = arith.constant 1024 : index
    %c0_6 = arith.constant 0 : index
    %16 = vector.load %arg3[%c1024, %c0_6] : memref<2048x128xbf16, #tpu.memory_space<vmem>>, vector<512x128xbf16>
    %cst_7 = arith.constant dense<0.000000e+00> : vector<36x128xf32>
    %17 = tpu.matmul %15, %16, %cst_7 {dimension_numbers = #tpu.dot_dimension_numbers<[1], [0], [0], [1], [0, 0, 1, 1], [], []>} : vector<36x512xbf16>, vector<512x128xbf16>, vector<36x128xf32> -> vector<36x128xf32>
    %18 = arith.addf %13, %17 : vector<36x128xf32>
    %19 = vector.extract_strided_slice %4 {offsets = [1, 1, 0], sizes = [6, 6, 512], strides = [1, 1, 1]} : vector<7x7x512xbf16> to vector<6x6x512xbf16>
    %20 = vector.shape_cast %19 : vector<6x6x512xbf16> to vector<36x512xbf16>
    %c1536 = arith.constant 1536 : index
    %c0_8 = arith.constant 0 : index
    %21 = vector.load %arg3[%c1536, %c0_8] : memref<2048x128xbf16, #tpu.memory_space<vmem>>, vector<512x128xbf16>
    %cst_9 = arith.constant dense<0.000000e+00> : vector<36x128xf32>
    %22 = tpu.matmul %20, %21, %cst_9 {dimension_numbers = #tpu.dot_dimension_numbers<[1], [0], [0], [1], [0, 0, 1, 1], [], []>} : vector<36x512xbf16>, vector<512x128xbf16>, vector<36x128xf32> -> vector<36x128xf32>
    %23 = arith.addf %18, %22 : vector<36x128xf32>
    %c0_10 = arith.constant 0 : index
    %c0_11 = arith.constant 0 : index
    %24 = vector.load %arg4[%c0_10, %c0_11] : memref<1x128xf32, #tpu.memory_space<vmem>>, vector<1x128xf32>
    %25 = vector.broadcast %24 : vector<1x128xf32> to vector<36x128xf32>
    %26 = arith.addf %23, %25 : vector<36x128xf32>
    %cst_12 = arith.constant 0.000000e+00 : f32
    %27 = vector.broadcast %cst_12 : f32 to vector<36x128xf32>
    %28 = arith.cmpf oge, %26, %27 : vector<36x128xf32>
    %cst_13 = arith.constant 2.000000e-01 : f32
    %29 = vector.broadcast %cst_13 : f32 to vector<36x128xf32>
    %30 = arith.mulf %26, %29 : vector<36x128xf32>
    %31 = arith.select %28, %26, %30 : vector<36x128xi1>, vector<36x128xf32>
    %32 = arith.truncf %31 : vector<36x128xf32> to vector<36x128xbf16>
    %c0_14 = arith.constant 0 : index
    %c0_15 = arith.constant 0 : index
    %c0_16 = arith.constant 0 : index
    %33 = vector.load %arg5[%c0_14, %c0_15, %c0_16] : memref<1x36x128xbf16, #tpu.memory_space<vmem>>, vector<1x36x128xbf16>
    %34 = vector.shape_cast %33 : vector<1x36x128xbf16> to vector<36x128xbf16>
    %35 = vector.shape_cast %32 : vector<36x128xbf16> to vector<1x36x128xbf16>
    tpu.vector_store %arg5[%c0_14, %c0_15, %c0_16], %35 {strides = array<i32>} : memref<1x36x128xbf16, #tpu.memory_space<vmem>>, vector<1x36x128xbf16>,
    return
  }
  func.func @transform_0(%arg0: i32, %arg1: i32) -> (i32, i32, i32, i32) {
    %c0_i32 = arith.constant 0 : i32
    %c0_i32_0 = arith.constant 0 : i32
    %c0_i32_1 = arith.constant 0 : i32
    %c0_i32_2 = arith.constant 0 : i32
    return %arg0, %c0_i32, %c0_i32_0, %c0_i32_1 : i32, i32, i32, i32
  }
  func.func @transform_1(%arg0: i32, %arg1: i32) -> (i32, i32) {
    %c0_i32 = arith.constant 0 : i32
    %c0_i32_0 = arith.constant 0 : i32
    %c0_i32_1 = arith.constant 0 : i32
    return %c0_i32, %c0_i32_0 : i32, i32
  }
  func.func @transform_2(%arg0: i32, %arg1: i32) -> (i32, i32) {
    %c0_i32 = arith.constant 0 : i32
    %c0_i32_0 = arith.constant 0 : i32
    %c0_i32_1 = arith.constant 0 : i32
    return %c0_i32, %c0_i32_0 : i32, i32
  }
  func.func @transform_3(%arg0: i32, %arg1: i32) -> (i32, i32, i32) {
    %c0_i32 = arith.constant 0 : i32
    %c0_i32_0 = arith.constant 0 : i32
    return %arg0, %arg1, %c0_i32 : i32, i32, i32
  }
}

module attributes {stable_mosaic.version = 11 : i64} {
  func.func @_tail_kernel(%arg0: i32, %arg1: memref<1x8x8x128xbf16, #tpu.memory_space<vmem>>, %arg2: memref<2048x128xbf16, #tpu.memory_space<vmem>>, %arg3: memref<1x128xf32, #tpu.memory_space<vmem>>, %arg4: memref<2048x8xbf16, #tpu.memory_space<vmem>>, %arg5: memref<1x8xf32, #tpu.memory_space<vmem>>, %arg6: memref<1x4x8xf32, #tpu.memory_space<vmem>>) attributes {dimension_semantics = [#tpu.dimension_semantics<parallel>], iteration_bounds = array<i64: 2>, scalar_prefetch = 0 : i64, scratch_operands = 0 : i64, tpu.core_type = #tpu.core_type<tc>, window_params = [{transform_indices = @transform_0, window_bounds = array<i64: 1, 8, 8, 128>}, {pipeline_mode = #tpu.pipeline_mode<synchronous>, transform_indices = @transform_1, window_bounds = array<i64: 2048, 128>}, {pipeline_mode = #tpu.pipeline_mode<synchronous>, transform_indices = @transform_2, window_bounds = array<i64: 1, 128>}, {pipeline_mode = #tpu.pipeline_mode<synchronous>, transform_indices = @transform_3, window_bounds = array<i64: 2048, 8>}, {pipeline_mode = #tpu.pipeline_mode<synchronous>, transform_indices = @transform_4, window_bounds = array<i64: 1, 8>}, {transform_indices = @transform_5, window_bounds = array<i64: 1, 4, 8>}]} {
    %c0 = arith.constant 0 : index
    %c0_0 = arith.constant 0 : index
    %c0_1 = arith.constant 0 : index
    %c0_2 = arith.constant 0 : index
    %0 = vector.load %arg1[%c0, %c0_0, %c0_1, %c0_2] : memref<1x8x8x128xbf16, #tpu.memory_space<vmem>>, vector<1x8x8x128xbf16>
    %1 = vector.shape_cast %0 : vector<1x8x8x128xbf16> to vector<8x8x128xbf16>
    %2 = vector.extract_strided_slice %1 {offsets = [0, 0, 0], sizes = [5, 5, 128], strides = [1, 1, 1]} : vector<8x8x128xbf16> to vector<5x5x128xbf16>
    %3 = vector.shape_cast %2 : vector<5x5x128xbf16> to vector<25x128xbf16>
    %c0_3 = arith.constant 0 : index
    %c0_4 = arith.constant 0 : index
    %4 = vector.load %arg2[%c0_3, %c0_4] : memref<2048x128xbf16, #tpu.memory_space<vmem>>, vector<128x128xbf16>
    %cst = arith.constant dense<0.000000e+00> : vector<25x128xf32>
    %5 = tpu.matmul %3, %4, %cst {dimension_numbers = #tpu.dot_dimension_numbers<[1], [0], [0], [1], [0, 0, 1, 1], [], []>} : vector<25x128xbf16>, vector<128x128xbf16>, vector<25x128xf32> -> vector<25x128xf32>
    %6 = vector.extract_strided_slice %1 {offsets = [0, 1, 0], sizes = [5, 5, 128], strides = [1, 1, 1]} : vector<8x8x128xbf16> to vector<5x5x128xbf16>
    %7 = vector.shape_cast %6 : vector<5x5x128xbf16> to vector<25x128xbf16>
    %c128 = arith.constant 128 : index
    %c0_5 = arith.constant 0 : index
    %8 = vector.load %arg2[%c128, %c0_5] : memref<2048x128xbf16, #tpu.memory_space<vmem>>, vector<128x128xbf16>
    %cst_6 = arith.constant dense<0.000000e+00> : vector<25x128xf32>
    %9 = tpu.matmul %7, %8, %cst_6 {dimension_numbers = #tpu.dot_dimension_numbers<[1], [0], [0], [1], [0, 0, 1, 1], [], []>} : vector<25x128xbf16>, vector<128x128xbf16>, vector<25x128xf32> -> vector<25x128xf32>
    %10 = arith.addf %5, %9 : vector<25x128xf32>
    %11 = vector.extract_strided_slice %1 {offsets = [0, 2, 0], sizes = [5, 5, 128], strides = [1, 1, 1]} : vector<8x8x128xbf16> to vector<5x5x128xbf16>
    %12 = vector.shape_cast %11 : vector<5x5x128xbf16> to vector<25x128xbf16>
    %c256 = arith.constant 256 : index
    %c0_7 = arith.constant 0 : index
    %13 = vector.load %arg2[%c256, %c0_7] : memref<2048x128xbf16, #tpu.memory_space<vmem>>, vector<128x128xbf16>
    %cst_8 = arith.constant dense<0.000000e+00> : vector<25x128xf32>
    %14 = tpu.matmul %12, %13, %cst_8 {dimension_numbers = #tpu.dot_dimension_numbers<[1], [0], [0], [1], [0, 0, 1, 1], [], []>} : vector<25x128xbf16>, vector<128x128xbf16>, vector<25x128xf32> -> vector<25x128xf32>
    %15 = arith.addf %10, %14 : vector<25x128xf32>
    %16 = vector.extract_strided_slice %1 {offsets = [0, 3, 0], sizes = [5, 5, 128], strides = [1, 1, 1]} : vector<8x8x128xbf16> to vector<5x5x128xbf16>
    %17 = vector.shape_cast %16 : vector<5x5x128xbf16> to vector<25x128xbf16>
    %c384 = arith.constant 384 : index
    %c0_9 = arith.constant 0 : index
    %18 = vector.load %arg2[%c384, %c0_9] : memref<2048x128xbf16, #tpu.memory_space<vmem>>, vector<128x128xbf16>
    %cst_10 = arith.constant dense<0.000000e+00> : vector<25x128xf32>
    %19 = tpu.matmul %17, %18, %cst_10 {dimension_numbers = #tpu.dot_dimension_numbers<[1], [0], [0], [1], [0, 0, 1, 1], [], []>} : vector<25x128xbf16>, vector<128x128xbf16>, vector<25x128xf32> -> vector<25x128xf32>
    %20 = arith.addf %15, %19 : vector<25x128xf32>
    %21 = vector.extract_strided_slice %1 {offsets = [1, 0, 0], sizes = [5, 5, 128], strides = [1, 1, 1]} : vector<8x8x128xbf16> to vector<5x5x128xbf16>
    %22 = vector.shape_cast %21 : vector<5x5x128xbf16> to vector<25x128xbf16>
    %c512 = arith.constant 512 : index
    %c0_11 = arith.constant 0 : index
    %23 = vector.load %arg2[%c512, %c0_11] : memref<2048x128xbf16, #tpu.memory_space<vmem>>, vector<128x128xbf16>
    %cst_12 = arith.constant dense<0.000000e+00> : vector<25x128xf32>
    %24 = tpu.matmul %22, %23, %cst_12 {dimension_numbers = #tpu.dot_dimension_numbers<[1], [0], [0], [1], [0, 0, 1, 1], [], []>} : vector<25x128xbf16>, vector<128x128xbf16>, vector<25x128xf32> -> vector<25x128xf32>
    %25 = arith.addf %20, %24 : vector<25x128xf32>
    %26 = vector.extract_strided_slice %1 {offsets = [1, 1, 0], sizes = [5, 5, 128], strides = [1, 1, 1]} : vector<8x8x128xbf16> to vector<5x5x128xbf16>
    %27 = vector.shape_cast %26 : vector<5x5x128xbf16> to vector<25x128xbf16>
    %c640 = arith.constant 640 : index
    %c0_13 = arith.constant 0 : index
    %28 = vector.load %arg2[%c640, %c0_13] : memref<2048x128xbf16, #tpu.memory_space<vmem>>, vector<128x128xbf16>
    %cst_14 = arith.constant dense<0.000000e+00> : vector<25x128xf32>
    %29 = tpu.matmul %27, %28, %cst_14 {dimension_numbers = #tpu.dot_dimension_numbers<[1], [0], [0], [1], [0, 0, 1, 1], [], []>} : vector<25x128xbf16>, vector<128x128xbf16>, vector<25x128xf32> -> vector<25x128xf32>
    %30 = arith.addf %25, %29 : vector<25x128xf32>
    %31 = vector.extract_strided_slice %1 {offsets = [1, 2, 0], sizes = [5, 5, 128], strides = [1, 1, 1]} : vector<8x8x128xbf16> to vector<5x5x128xbf16>
    %32 = vector.shape_cast %31 : vector<5x5x128xbf16> to vector<25x128xbf16>
    %c768 = arith.constant 768 : index
    %c0_15 = arith.constant 0 : index
    %33 = vector.load %arg2[%c768, %c0_15] : memref<2048x128xbf16, #tpu.memory_space<vmem>>, vector<128x128xbf16>
    %cst_16 = arith.constant dense<0.000000e+00> : vector<25x128xf32>
    %34 = tpu.matmul %32, %33, %cst_16 {dimension_numbers = #tpu.dot_dimension_numbers<[1], [0], [0], [1], [0, 0, 1, 1], [], []>} : vector<25x128xbf16>, vector<128x128xbf16>, vector<25x128xf32> -> vector<25x128xf32>
    %35 = arith.addf %30, %34 : vector<25x128xf32>
    %36 = vector.extract_strided_slice %1 {offsets = [1, 3, 0], sizes = [5, 5, 128], strides = [1, 1, 1]} : vector<8x8x128xbf16> to vector<5x5x128xbf16>
    %37 = vector.shape_cast %36 : vector<5x5x128xbf16> to vector<25x128xbf16>
    %c896 = arith.constant 896 : index
    %c0_17 = arith.constant 0 : index
    %38 = vector.load %arg2[%c896, %c0_17] : memref<2048x128xbf16, #tpu.memory_space<vmem>>, vector<128x128xbf16>
    %cst_18 = arith.constant dense<0.000000e+00> : vector<25x128xf32>
    %39 = tpu.matmul %37, %38, %cst_18 {dimension_numbers = #tpu.dot_dimension_numbers<[1], [0], [0], [1], [0, 0, 1, 1], [], []>} : vector<25x128xbf16>, vector<128x128xbf16>, vector<25x128xf32> -> vector<25x128xf32>
    %40 = arith.addf %35, %39 : vector<25x128xf32>
    %41 = vector.extract_strided_slice %1 {offsets = [2, 0, 0], sizes = [5, 5, 128], strides = [1, 1, 1]} : vector<8x8x128xbf16> to vector<5x5x128xbf16>
    %42 = vector.shape_cast %41 : vector<5x5x128xbf16> to vector<25x128xbf16>
    %c1024 = arith.constant 1024 : index
    %c0_19 = arith.constant 0 : index
    %43 = vector.load %arg2[%c1024, %c0_19] : memref<2048x128xbf16, #tpu.memory_space<vmem>>, vector<128x128xbf16>
    %cst_20 = arith.constant dense<0.000000e+00> : vector<25x128xf32>
    %44 = tpu.matmul %42, %43, %cst_20 {dimension_numbers = #tpu.dot_dimension_numbers<[1], [0], [0], [1], [0, 0, 1, 1], [], []>} : vector<25x128xbf16>, vector<128x128xbf16>, vector<25x128xf32> -> vector<25x128xf32>
    %45 = arith.addf %40, %44 : vector<25x128xf32>
    %46 = vector.extract_strided_slice %1 {offsets = [2, 1, 0], sizes = [5, 5, 128], strides = [1, 1, 1]} : vector<8x8x128xbf16> to vector<5x5x128xbf16>
    %47 = vector.shape_cast %46 : vector<5x5x128xbf16> to vector<25x128xbf16>
    %c1152 = arith.constant 1152 : index
    %c0_21 = arith.constant 0 : index
    %48 = vector.load %arg2[%c1152, %c0_21] : memref<2048x128xbf16, #tpu.memory_space<vmem>>, vector<128x128xbf16>
    %cst_22 = arith.constant dense<0.000000e+00> : vector<25x128xf32>
    %49 = tpu.matmul %47, %48, %cst_22 {dimension_numbers = #tpu.dot_dimension_numbers<[1], [0], [0], [1], [0, 0, 1, 1], [], []>} : vector<25x128xbf16>, vector<128x128xbf16>, vector<25x128xf32> -> vector<25x128xf32>
    %50 = arith.addf %45, %49 : vector<25x128xf32>
    %51 = vector.extract_strided_slice %1 {offsets = [2, 2, 0], sizes = [5, 5, 128], strides = [1, 1, 1]} : vector<8x8x128xbf16> to vector<5x5x128xbf16>
    %52 = vector.shape_cast %51 : vector<5x5x128xbf16> to vector<25x128xbf16>
    %c1280 = arith.constant 1280 : index
    %c0_23 = arith.constant 0 : index
    %53 = vector.load %arg2[%c1280, %c0_23] : memref<2048x128xbf16, #tpu.memory_space<vmem>>, vector<128x128xbf16>
    %cst_24 = arith.constant dense<0.000000e+00> : vector<25x128xf32>
    %54 = tpu.matmul %52, %53, %cst_24 {dimension_numbers = #tpu.dot_dimension_numbers<[1], [0], [0], [1], [0, 0, 1, 1], [], []>} : vector<25x128xbf16>, vector<128x128xbf16>, vector<25x128xf32> -> vector<25x128xf32>
    %55 = arith.addf %50, %54 : vector<25x128xf32>
    %56 = vector.extract_strided_slice %1 {offsets = [2, 3, 0], sizes = [5, 5, 128], strides = [1, 1, 1]} : vector<8x8x128xbf16> to vector<5x5x128xbf16>
    %57 = vector.shape_cast %56 : vector<5x5x128xbf16> to vector<25x128xbf16>
    %c1408 = arith.constant 1408 : index
    %c0_25 = arith.constant 0 : index
    %58 = vector.load %arg2[%c1408, %c0_25] : memref<2048x128xbf16, #tpu.memory_space<vmem>>, vector<128x128xbf16>
    %cst_26 = arith.constant dense<0.000000e+00> : vector<25x128xf32>
    %59 = tpu.matmul %57, %58, %cst_26 {dimension_numbers = #tpu.dot_dimension_numbers<[1], [0], [0], [1], [0, 0, 1, 1], [], []>} : vector<25x128xbf16>, vector<128x128xbf16>, vector<25x128xf32> -> vector<25x128xf32>
    %60 = arith.addf %55, %59 : vector<25x128xf32>
    %61 = vector.extract_strided_slice %1 {offsets = [3, 0, 0], sizes = [5, 5, 128], strides = [1, 1, 1]} : vector<8x8x128xbf16> to vector<5x5x128xbf16>
    %62 = vector.shape_cast %61 : vector<5x5x128xbf16> to vector<25x128xbf16>
    %c1536 = arith.constant 1536 : index
    %c0_27 = arith.constant 0 : index
    %63 = vector.load %arg2[%c1536, %c0_27] : memref<2048x128xbf16, #tpu.memory_space<vmem>>, vector<128x128xbf16>
    %cst_28 = arith.constant dense<0.000000e+00> : vector<25x128xf32>
    %64 = tpu.matmul %62, %63, %cst_28 {dimension_numbers = #tpu.dot_dimension_numbers<[1], [0], [0], [1], [0, 0, 1, 1], [], []>} : vector<25x128xbf16>, vector<128x128xbf16>, vector<25x128xf32> -> vector<25x128xf32>
    %65 = arith.addf %60, %64 : vector<25x128xf32>
    %66 = vector.extract_strided_slice %1 {offsets = [3, 1, 0], sizes = [5, 5, 128], strides = [1, 1, 1]} : vector<8x8x128xbf16> to vector<5x5x128xbf16>
    %67 = vector.shape_cast %66 : vector<5x5x128xbf16> to vector<25x128xbf16>
    %c1664 = arith.constant 1664 : index
    %c0_29 = arith.constant 0 : index
    %68 = vector.load %arg2[%c1664, %c0_29] : memref<2048x128xbf16, #tpu.memory_space<vmem>>, vector<128x128xbf16>
    %cst_30 = arith.constant dense<0.000000e+00> : vector<25x128xf32>
    %69 = tpu.matmul %67, %68, %cst_30 {dimension_numbers = #tpu.dot_dimension_numbers<[1], [0], [0], [1], [0, 0, 1, 1], [], []>} : vector<25x128xbf16>, vector<128x128xbf16>, vector<25x128xf32> -> vector<25x128xf32>
    %70 = arith.addf %65, %69 : vector<25x128xf32>
    %71 = vector.extract_strided_slice %1 {offsets = [3, 2, 0], sizes = [5, 5, 128], strides = [1, 1, 1]} : vector<8x8x128xbf16> to vector<5x5x128xbf16>
    %72 = vector.shape_cast %71 : vector<5x5x128xbf16> to vector<25x128xbf16>
    %c1792 = arith.constant 1792 : index
    %c0_31 = arith.constant 0 : index
    %73 = vector.load %arg2[%c1792, %c0_31] : memref<2048x128xbf16, #tpu.memory_space<vmem>>, vector<128x128xbf16>
    %cst_32 = arith.constant dense<0.000000e+00> : vector<25x128xf32>
    %74 = tpu.matmul %72, %73, %cst_32 {dimension_numbers = #tpu.dot_dimension_numbers<[1], [0], [0], [1], [0, 0, 1, 1], [], []>} : vector<25x128xbf16>, vector<128x128xbf16>, vector<25x128xf32> -> vector<25x128xf32>
    %75 = arith.addf %70, %74 : vector<25x128xf32>
    %76 = vector.extract_strided_slice %1 {offsets = [3, 3, 0], sizes = [5, 5, 128], strides = [1, 1, 1]} : vector<8x8x128xbf16> to vector<5x5x128xbf16>
    %77 = vector.shape_cast %76 : vector<5x5x128xbf16> to vector<25x128xbf16>
    %c1920 = arith.constant 1920 : index
    %c0_33 = arith.constant 0 : index
    %78 = vector.load %arg2[%c1920, %c0_33] : memref<2048x128xbf16, #tpu.memory_space<vmem>>, vector<128x128xbf16>
    %cst_34 = arith.constant dense<0.000000e+00> : vector<25x128xf32>
    %79 = tpu.matmul %77, %78, %cst_34 {dimension_numbers = #tpu.dot_dimension_numbers<[1], [0], [0], [1], [0, 0, 1, 1], [], []>} : vector<25x128xbf16>, vector<128x128xbf16>, vector<25x128xf32> -> vector<25x128xf32>
    %80 = arith.addf %75, %79 : vector<25x128xf32>
    %c0_35 = arith.constant 0 : index
    %c0_36 = arith.constant 0 : index
    %81 = vector.load %arg3[%c0_35, %c0_36] : memref<1x128xf32, #tpu.memory_space<vmem>>, vector<1x128xf32>
    %82 = vector.broadcast %81 : vector<1x128xf32> to vector<25x128xf32>
    %83 = arith.addf %80, %82 : vector<25x128xf32>
    %cst_37 = arith.constant 0.000000e+00 : f32
    %84 = vector.broadcast %cst_37 : f32 to vector<25x128xf32>
    %85 = arith.cmpf oge, %83, %84 : vector<25x128xf32>
    %cst_38 = arith.constant 2.000000e-01 : f32
    %86 = vector.broadcast %cst_38 : f32 to vector<25x128xf32>
    %87 = arith.mulf %83, %86 : vector<25x128xf32>
    %88 = arith.select %85, %83, %87 : vector<25x128xi1>, vector<25x128xf32>
    %89 = arith.truncf %88 : vector<25x128xf32> to vector<25x128xbf16>
    %90 = vector.shape_cast %89 : vector<25x128xbf16> to vector<5x5x128xbf16>
    %91 = vector.extract_strided_slice %90 {offsets = [0, 0, 0], sizes = [2, 2, 128], strides = [1, 1, 1]} : vector<5x5x128xbf16> to vector<2x2x128xbf16>
    %92 = vector.shape_cast %91 : vector<2x2x128xbf16> to vector<4x128xbf16>
    %c0_39 = arith.constant 0 : index
    %c0_40 = arith.constant 0 : index
    %93 = vector.load %arg4[%c0_39, %c0_40] : memref<2048x8xbf16, #tpu.memory_space<vmem>>, vector<128x8xbf16>
    %cst_41 = arith.constant dense<0.000000e+00> : vector<4x8xf32>
    %94 = tpu.matmul %92, %93, %cst_41 {dimension_numbers = #tpu.dot_dimension_numbers<[1], [0], [0], [1], [0, 0, 1, 1], [], []>} : vector<4x128xbf16>, vector<128x8xbf16>, vector<4x8xf32> -> vector<4x8xf32>
    %95 = vector.extract_strided_slice %90 {offsets = [0, 1, 0], sizes = [2, 2, 128], strides = [1, 1, 1]} : vector<5x5x128xbf16> to vector<2x2x128xbf16>
    %96 = vector.shape_cast %95 : vector<2x2x128xbf16> to vector<4x128xbf16>
    %c128_42 = arith.constant 128 : index
    %c0_43 = arith.constant 0 : index
    %97 = vector.load %arg4[%c128_42, %c0_43] : memref<2048x8xbf16, #tpu.memory_space<vmem>>, vector<128x8xbf16>
    %cst_44 = arith.constant dense<0.000000e+00> : vector<4x8xf32>
    %98 = tpu.matmul %96, %97, %cst_44 {dimension_numbers = #tpu.dot_dimension_numbers<[1], [0], [0], [1], [0, 0, 1, 1], [], []>} : vector<4x128xbf16>, vector<128x8xbf16>, vector<4x8xf32> -> vector<4x8xf32>
    %99 = arith.addf %94, %98 : vector<4x8xf32>
    %100 = vector.extract_strided_slice %90 {offsets = [0, 2, 0], sizes = [2, 2, 128], strides = [1, 1, 1]} : vector<5x5x128xbf16> to vector<2x2x128xbf16>
    %101 = vector.shape_cast %100 : vector<2x2x128xbf16> to vector<4x128xbf16>
    %c256_45 = arith.constant 256 : index
    %c0_46 = arith.constant 0 : index
    %102 = vector.load %arg4[%c256_45, %c0_46] : memref<2048x8xbf16, #tpu.memory_space<vmem>>, vector<128x8xbf16>
    %cst_47 = arith.constant dense<0.000000e+00> : vector<4x8xf32>
    %103 = tpu.matmul %101, %102, %cst_47 {dimension_numbers = #tpu.dot_dimension_numbers<[1], [0], [0], [1], [0, 0, 1, 1], [], []>} : vector<4x128xbf16>, vector<128x8xbf16>, vector<4x8xf32> -> vector<4x8xf32>
    %104 = arith.addf %99, %103 : vector<4x8xf32>
    %105 = vector.extract_strided_slice %90 {offsets = [0, 3, 0], sizes = [2, 2, 128], strides = [1, 1, 1]} : vector<5x5x128xbf16> to vector<2x2x128xbf16>
    %106 = vector.shape_cast %105 : vector<2x2x128xbf16> to vector<4x128xbf16>
    %c384_48 = arith.constant 384 : index
    %c0_49 = arith.constant 0 : index
    %107 = vector.load %arg4[%c384_48, %c0_49] : memref<2048x8xbf16, #tpu.memory_space<vmem>>, vector<128x8xbf16>
    %cst_50 = arith.constant dense<0.000000e+00> : vector<4x8xf32>
    %108 = tpu.matmul %106, %107, %cst_50 {dimension_numbers = #tpu.dot_dimension_numbers<[1], [0], [0], [1], [0, 0, 1, 1], [], []>} : vector<4x128xbf16>, vector<128x8xbf16>, vector<4x8xf32> -> vector<4x8xf32>
    %109 = arith.addf %104, %108 : vector<4x8xf32>
    %110 = vector.extract_strided_slice %90 {offsets = [1, 0, 0], sizes = [2, 2, 128], strides = [1, 1, 1]} : vector<5x5x128xbf16> to vector<2x2x128xbf16>
    %111 = vector.shape_cast %110 : vector<2x2x128xbf16> to vector<4x128xbf16>
    %c512_51 = arith.constant 512 : index
    %c0_52 = arith.constant 0 : index
    %112 = vector.load %arg4[%c512_51, %c0_52] : memref<2048x8xbf16, #tpu.memory_space<vmem>>, vector<128x8xbf16>
    %cst_53 = arith.constant dense<0.000000e+00> : vector<4x8xf32>
    %113 = tpu.matmul %111, %112, %cst_53 {dimension_numbers = #tpu.dot_dimension_numbers<[1], [0], [0], [1], [0, 0, 1, 1], [], []>} : vector<4x128xbf16>, vector<128x8xbf16>, vector<4x8xf32> -> vector<4x8xf32>
    %114 = arith.addf %109, %113 : vector<4x8xf32>
    %115 = vector.extract_strided_slice %90 {offsets = [1, 1, 0], sizes = [2, 2, 128], strides = [1, 1, 1]} : vector<5x5x128xbf16> to vector<2x2x128xbf16>
    %116 = vector.shape_cast %115 : vector<2x2x128xbf16> to vector<4x128xbf16>
    %c640_54 = arith.constant 640 : index
    %c0_55 = arith.constant 0 : index
    %117 = vector.load %arg4[%c640_54, %c0_55] : memref<2048x8xbf16, #tpu.memory_space<vmem>>, vector<128x8xbf16>
    %cst_56 = arith.constant dense<0.000000e+00> : vector<4x8xf32>
    %118 = tpu.matmul %116, %117, %cst_56 {dimension_numbers = #tpu.dot_dimension_numbers<[1], [0], [0], [1], [0, 0, 1, 1], [], []>} : vector<4x128xbf16>, vector<128x8xbf16>, vector<4x8xf32> -> vector<4x8xf32>
    %119 = arith.addf %114, %118 : vector<4x8xf32>
    %120 = vector.extract_strided_slice %90 {offsets = [1, 2, 0], sizes = [2, 2, 128], strides = [1, 1, 1]} : vector<5x5x128xbf16> to vector<2x2x128xbf16>
    %121 = vector.shape_cast %120 : vector<2x2x128xbf16> to vector<4x128xbf16>
    %c768_57 = arith.constant 768 : index
    %c0_58 = arith.constant 0 : index
    %122 = vector.load %arg4[%c768_57, %c0_58] : memref<2048x8xbf16, #tpu.memory_space<vmem>>, vector<128x8xbf16>
    %cst_59 = arith.constant dense<0.000000e+00> : vector<4x8xf32>
    %123 = tpu.matmul %121, %122, %cst_59 {dimension_numbers = #tpu.dot_dimension_numbers<[1], [0], [0], [1], [0, 0, 1, 1], [], []>} : vector<4x128xbf16>, vector<128x8xbf16>, vector<4x8xf32> -> vector<4x8xf32>
    %124 = arith.addf %119, %123 : vector<4x8xf32>
    %125 = vector.extract_strided_slice %90 {offsets = [1, 3, 0], sizes = [2, 2, 128], strides = [1, 1, 1]} : vector<5x5x128xbf16> to vector<2x2x128xbf16>
    %126 = vector.shape_cast %125 : vector<2x2x128xbf16> to vector<4x128xbf16>
    %c896_60 = arith.constant 896 : index
    %c0_61 = arith.constant 0 : index
    %127 = vector.load %arg4[%c896_60, %c0_61] : memref<2048x8xbf16, #tpu.memory_space<vmem>>, vector<128x8xbf16>
    %cst_62 = arith.constant dense<0.000000e+00> : vector<4x8xf32>
    %128 = tpu.matmul %126, %127, %cst_62 {dimension_numbers = #tpu.dot_dimension_numbers<[1], [0], [0], [1], [0, 0, 1, 1], [], []>} : vector<4x128xbf16>, vector<128x8xbf16>, vector<4x8xf32> -> vector<4x8xf32>
    %129 = arith.addf %124, %128 : vector<4x8xf32>
    %130 = vector.extract_strided_slice %90 {offsets = [2, 0, 0], sizes = [2, 2, 128], strides = [1, 1, 1]} : vector<5x5x128xbf16> to vector<2x2x128xbf16>
    %131 = vector.shape_cast %130 : vector<2x2x128xbf16> to vector<4x128xbf16>
    %c1024_63 = arith.constant 1024 : index
    %c0_64 = arith.constant 0 : index
    %132 = vector.load %arg4[%c1024_63, %c0_64] : memref<2048x8xbf16, #tpu.memory_space<vmem>>, vector<128x8xbf16>
    %cst_65 = arith.constant dense<0.000000e+00> : vector<4x8xf32>
    %133 = tpu.matmul %131, %132, %cst_65 {dimension_numbers = #tpu.dot_dimension_numbers<[1], [0], [0], [1], [0, 0, 1, 1], [], []>} : vector<4x128xbf16>, vector<128x8xbf16>, vector<4x8xf32> -> vector<4x8xf32>
    %134 = arith.addf %129, %133 : vector<4x8xf32>
    %135 = vector.extract_strided_slice %90 {offsets = [2, 1, 0], sizes = [2, 2, 128], strides = [1, 1, 1]} : vector<5x5x128xbf16> to vector<2x2x128xbf16>
    %136 = vector.shape_cast %135 : vector<2x2x128xbf16> to vector<4x128xbf16>
    %c1152_66 = arith.constant 1152 : index
    %c0_67 = arith.constant 0 : index
    %137 = vector.load %arg4[%c1152_66, %c0_67] : memref<2048x8xbf16, #tpu.memory_space<vmem>>, vector<128x8xbf16>
    %cst_68 = arith.constant dense<0.000000e+00> : vector<4x8xf32>
    %138 = tpu.matmul %136, %137, %cst_68 {dimension_numbers = #tpu.dot_dimension_numbers<[1], [0], [0], [1], [0, 0, 1, 1], [], []>} : vector<4x128xbf16>, vector<128x8xbf16>, vector<4x8xf32> -> vector<4x8xf32>
    %139 = arith.addf %134, %138 : vector<4x8xf32>
    %140 = vector.extract_strided_slice %90 {offsets = [2, 2, 0], sizes = [2, 2, 128], strides = [1, 1, 1]} : vector<5x5x128xbf16> to vector<2x2x128xbf16>
    %141 = vector.shape_cast %140 : vector<2x2x128xbf16> to vector<4x128xbf16>
    %c1280_69 = arith.constant 1280 : index
    %c0_70 = arith.constant 0 : index
    %142 = vector.load %arg4[%c1280_69, %c0_70] : memref<2048x8xbf16, #tpu.memory_space<vmem>>, vector<128x8xbf16>
    %cst_71 = arith.constant dense<0.000000e+00> : vector<4x8xf32>
    %143 = tpu.matmul %141, %142, %cst_71 {dimension_numbers = #tpu.dot_dimension_numbers<[1], [0], [0], [1], [0, 0, 1, 1], [], []>} : vector<4x128xbf16>, vector<128x8xbf16>, vector<4x8xf32> -> vector<4x8xf32>
    %144 = arith.addf %139, %143 : vector<4x8xf32>
    %145 = vector.extract_strided_slice %90 {offsets = [2, 3, 0], sizes = [2, 2, 128], strides = [1, 1, 1]} : vector<5x5x128xbf16> to vector<2x2x128xbf16>
    %146 = vector.shape_cast %145 : vector<2x2x128xbf16> to vector<4x128xbf16>
    %c1408_72 = arith.constant 1408 : index
    %c0_73 = arith.constant 0 : index
    %147 = vector.load %arg4[%c1408_72, %c0_73] : memref<2048x8xbf16, #tpu.memory_space<vmem>>, vector<128x8xbf16>
    %cst_74 = arith.constant dense<0.000000e+00> : vector<4x8xf32>
    %148 = tpu.matmul %146, %147, %cst_74 {dimension_numbers = #tpu.dot_dimension_numbers<[1], [0], [0], [1], [0, 0, 1, 1], [], []>} : vector<4x128xbf16>, vector<128x8xbf16>, vector<4x8xf32> -> vector<4x8xf32>
    %149 = arith.addf %144, %148 : vector<4x8xf32>
    %150 = vector.extract_strided_slice %90 {offsets = [3, 0, 0], sizes = [2, 2, 128], strides = [1, 1, 1]} : vector<5x5x128xbf16> to vector<2x2x128xbf16>
    %151 = vector.shape_cast %150 : vector<2x2x128xbf16> to vector<4x128xbf16>
    %c1536_75 = arith.constant 1536 : index
    %c0_76 = arith.constant 0 : index
    %152 = vector.load %arg4[%c1536_75, %c0_76] : memref<2048x8xbf16, #tpu.memory_space<vmem>>, vector<128x8xbf16>
    %cst_77 = arith.constant dense<0.000000e+00> : vector<4x8xf32>
    %153 = tpu.matmul %151, %152, %cst_77 {dimension_numbers = #tpu.dot_dimension_numbers<[1], [0], [0], [1], [0, 0, 1, 1], [], []>} : vector<4x128xbf16>, vector<128x8xbf16>, vector<4x8xf32> -> vector<4x8xf32>
    %154 = arith.addf %149, %153 : vector<4x8xf32>
    %155 = vector.extract_strided_slice %90 {offsets = [3, 1, 0], sizes = [2, 2, 128], strides = [1, 1, 1]} : vector<5x5x128xbf16> to vector<2x2x128xbf16>
    %156 = vector.shape_cast %155 : vector<2x2x128xbf16> to vector<4x128xbf16>
    %c1664_78 = arith.constant 1664 : index
    %c0_79 = arith.constant 0 : index
    %157 = vector.load %arg4[%c1664_78, %c0_79] : memref<2048x8xbf16, #tpu.memory_space<vmem>>, vector<128x8xbf16>
    %cst_80 = arith.constant dense<0.000000e+00> : vector<4x8xf32>
    %158 = tpu.matmul %156, %157, %cst_80 {dimension_numbers = #tpu.dot_dimension_numbers<[1], [0], [0], [1], [0, 0, 1, 1], [], []>} : vector<4x128xbf16>, vector<128x8xbf16>, vector<4x8xf32> -> vector<4x8xf32>
    %159 = arith.addf %154, %158 : vector<4x8xf32>
    %160 = vector.extract_strided_slice %90 {offsets = [3, 2, 0], sizes = [2, 2, 128], strides = [1, 1, 1]} : vector<5x5x128xbf16> to vector<2x2x128xbf16>
    %161 = vector.shape_cast %160 : vector<2x2x128xbf16> to vector<4x128xbf16>
    %c1792_81 = arith.constant 1792 : index
    %c0_82 = arith.constant 0 : index
    %162 = vector.load %arg4[%c1792_81, %c0_82] : memref<2048x8xbf16, #tpu.memory_space<vmem>>, vector<128x8xbf16>
    %cst_83 = arith.constant dense<0.000000e+00> : vector<4x8xf32>
    %163 = tpu.matmul %161, %162, %cst_83 {dimension_numbers = #tpu.dot_dimension_numbers<[1], [0], [0], [1], [0, 0, 1, 1], [], []>} : vector<4x128xbf16>, vector<128x8xbf16>, vector<4x8xf32> -> vector<4x8xf32>
    %164 = arith.addf %159, %163 : vector<4x8xf32>
    %165 = vector.extract_strided_slice %90 {offsets = [3, 3, 0], sizes = [2, 2, 128], strides = [1, 1, 1]} : vector<5x5x128xbf16> to vector<2x2x128xbf16>
    %166 = vector.shape_cast %165 : vector<2x2x128xbf16> to vector<4x128xbf16>
    %c1920_84 = arith.constant 1920 : index
    %c0_85 = arith.constant 0 : index
    %167 = vector.load %arg4[%c1920_84, %c0_85] : memref<2048x8xbf16, #tpu.memory_space<vmem>>, vector<128x8xbf16>
    %cst_86 = arith.constant dense<0.000000e+00> : vector<4x8xf32>
    %168 = tpu.matmul %166, %167, %cst_86 {dimension_numbers = #tpu.dot_dimension_numbers<[1], [0], [0], [1], [0, 0, 1, 1], [], []>} : vector<4x128xbf16>, vector<128x8xbf16>, vector<4x8xf32> -> vector<4x8xf32>
    %169 = arith.addf %164, %168 : vector<4x8xf32>
    %c0_87 = arith.constant 0 : index
    %c0_88 = arith.constant 0 : index
    %170 = vector.load %arg5[%c0_87, %c0_88] : memref<1x8xf32, #tpu.memory_space<vmem>>, vector<1x8xf32>
    %171 = vector.broadcast %170 : vector<1x8xf32> to vector<4x8xf32>
    %172 = arith.addf %169, %171 : vector<4x8xf32>
    %c0_89 = arith.constant 0 : index
    %c0_90 = arith.constant 0 : index
    %c0_91 = arith.constant 0 : index
    %173 = vector.load %arg6[%c0_89, %c0_90, %c0_91] : memref<1x4x8xf32, #tpu.memory_space<vmem>>, vector<1x4x8xf32>
    %174 = vector.shape_cast %173 : vector<1x4x8xf32> to vector<4x8xf32>
    %175 = vector.shape_cast %172 : vector<4x8xf32> to vector<1x4x8xf32>
    tpu.vector_store %arg6[%c0_89, %c0_90, %c0_91], %175 {strides = array<i32>} : memref<1x4x8xf32, #tpu.memory_space<vmem>>, vector<1x4x8xf32>,
    return
  }
  func.func @transform_0(%arg0: i32) -> (i32, i32, i32, i32) {
    %c0_i32 = arith.constant 0 : i32
    %c0_i32_0 = arith.constant 0 : i32
    %c0_i32_1 = arith.constant 0 : i32
    %c0_i32_2 = arith.constant 0 : i32
    return %arg0, %c0_i32, %c0_i32_0, %c0_i32_1 : i32, i32, i32, i32
  }
  func.func @transform_1(%arg0: i32) -> (i32, i32) {
    %c0_i32 = arith.constant 0 : i32
    %c0_i32_0 = arith.constant 0 : i32
    %c0_i32_1 = arith.constant 0 : i32
    return %c0_i32, %c0_i32_0 : i32, i32
  }
  func.func @transform_2(%arg0: i32) -> (i32, i32) {
    %c0_i32 = arith.constant 0 : i32
    %c0_i32_0 = arith.constant 0 : i32
    %c0_i32_1 = arith.constant 0 : i32
    return %c0_i32, %c0_i32_0 : i32, i32
  }
  func.func @transform_3(%arg0: i32) -> (i32, i32) {
    %c0_i32 = arith.constant 0 : i32
    %c0_i32_0 = arith.constant 0 : i32
    %c0_i32_1 = arith.constant 0 : i32
    return %c0_i32, %c0_i32_0 : i32, i32
  }
  func.func @transform_4(%arg0: i32) -> (i32, i32) {
    %c0_i32 = arith.constant 0 : i32
    %c0_i32_0 = arith.constant 0 : i32
    %c0_i32_1 = arith.constant 0 : i32
    return %c0_i32, %c0_i32_0 : i32, i32
  }
  func.func @transform_5(%arg0: i32) -> (i32, i32, i32) {
    %c0_i32 = arith.constant 0 : i32
    %c0_i32_0 = arith.constant 0 : i32
    %c0_i32_1 = arith.constant 0 : i32
    return %arg0, %c0_i32, %c0_i32_0 : i32, i32, i32
  }
}

</mosaic_0001>

<bundles_post_ra>
// kernel: _lambda_.4
= control target key start
LH: loop header
LB: loop body
LE: loop exit
PB: predicated region body
PF: predicated region fallthrough
CT: control target
= control target key end

     0   :  { %s2287_s12 = smov 0   ;;  %s2289_s13 = smov 0   ;;  %s3006_s0 = inlined_call_operand.vmem [shape: bf16[2,25,25,32], index: 0, kind: input, shape index: {}]   ;;  %s3007_s1 = inlined_call_operand.vmem [shape: bf16[128,128], index: 1, kind: input, shape index: {}]   ;;  %s3008_s2 = inlined_call_operand.vmem [shape: f32[1,128], index: 2, kind: input, shape index: {}]   ;;  %s3009_s3 = inlined_call_operand.vmem [shape: bf16[2,576,128], index: 3, kind: output, shape index: {}]  }
   0x1   :  { %s2291_s14 = smov 0   ;;  %s2293_s15 = smov 0  }
   0x2   :  { %s2295_s16 = smov 0  }
   0x3 LB: > { %s22_s17 = sadd.s32 1, %s2254_s14  ;;  %s25_s18 = sadd.s32 1, %s2258_s15  ;;  %s2262_s16 = sphi %s2295_s16, %s13_s16   ;;  %s2258_s15 = sphi %s2293_s15, %s3028_s15   ;;  %s2254_s14 = sphi %s2291_s14, %s3027_s14   ;;  %s2250_s13 = sphi %s2289_s13, %s3026_s13   ;;  %s2246_s12 = sphi %s2287_s12, %s3025_s12  }
   0x4   : > { %p23_p0 = scmp.ge.s32.totalorder %s22_s17, 2  ;;  %p1766_p1 = scmp.ge.s32.totalorder %s2262_s16, 1 }
   0x5   : > { %p151_p2 = scmp.lt.s32.totalorder %s2262_s16, 5 }
   0x6   : > { %s3030_s17 = smov (%p23_p0, %s22_s17), 0  ;;  %s3032_s18 = smov (!%p23_p0, %s25_s18), %s2258_s15 }
   0x7   : > { %p152_p3 = pnand %p1766_p1, %p151_p2  ;;  %p27_p4 = scmp.ge.s32.totalorder %s3032_s18, 2 }
   0x9   : > { %s3034_s18 = smov (%p27_p4, %s3032_s18), 0  ;;  %155 = sbr.rel (%p152_p3) target bundleno = 483 (0x1e3), region = 32 }
  0x10   : > { %p179_p5 = scmp.lt.s32.totalorder %s2250_s13, 1  ;;  %v2191_v0 = vld [vmem:[%s3007_s1] sm:$0xff]   ;;  %s1890_s21 = smul.u32 192, %s2246_s12  ;;  %v2192_v1 = vld [vmem:[%s3007_s1 + $0x8] sm:$0xff]   ;;  %v2193_v2 = vld [vmem:[%s3007_s1 + $0x10] sm:$0xff]   ;;  %vm993_vm3 = vcmask 261120  }
  0x11   : > { %2060 = vmatprep.subr.bf16.mxu0 %v2191_v0  ;;  %2112 = vmatprep.subr.bf16.mxu1 %v2191_v0  ;;  %vm251_vm0 = vsmask.f32 3328  ;;  %vm252_vm1 = vsmask.f32 7440  ;;  %v2194_v14 = vld [vmem:[%s3007_s1 + $0x18] sm:$0xff]   ;;  %s2264_s6 = smov 64  }
  0x12   : > { %s3036_s13 = smov (!%p179_p5, %s2250_s13), 1  ;;  %2061 = vmatpush3.bf16.msra.mxu0 %v2191_v0  ;;  %2120 = vmatpush3.bf16.msra.mxu1 %v2191_v0  ;;  %v2195_v25 = vld [vmem:[%s3007_s1 + $0x20] sm:$0xff]   ;;  %v2196_v56 = vld [vmem:[%s3007_s1 + $0x28] sm:$0xff]   ;;  %vm2422_vm2 = vmor %vm251_vm0, %vm252_vm1  ;;  %s2265_s22 = smov 32   ;;  %vm1048_vm4 = vcmask 523264   ;;  %vm1085_vm5 = vcmask 785408  }
  0x13   : > { %s2128_s24 = smul.u32 400, %s3036_s13  ;;  %2062 = vmatprep.subr.bf16.mxu0 %v2192_v1  ;;  %2113 = vmatprep.subr.bf16.mxu1 %v2192_v1  ;;  %s2266_s23 = smov 96  }
  0x14   : > { %s2129_s25 = smul.u32 72, %s3036_s13 }
  0x15   : > { %s183_s27 = scalar_lea.vmem %s3006_s0, %s2128_s24  ;;  %s184_s24 = smul.u32 36, %s2246_s12 }
  0x16   : > { %s2335_s30 = scalar_lea.vmem %s183_s27, %s1890_s21  ;;  %2063 = vmatpush3.bf16.msra.mxu0 %v2192_v1  ;;  %2121 = vmatpush3.bf16.msra.mxu1 %v2192_v1 }
  0x17   : > { %v203_v3 = vld [vmem:[%s2335_s30 + $0x10] sm:$0xf]  ;;  %v2339_v4 = vld [vmem:[%s2335_s30 + $0x14] sm:$0xf]  ;;  %v205_v5 = vld [vmem:[%s2335_s30 + $0x18] sm:$0xf]  ;;  %2064 = vmatprep.subr.bf16.mxu0 %v2193_v2  ;;  %2114 = vmatprep.subr.bf16.mxu1 %v2193_v2 }
  0x18   : > { %v302_v6 = vshrl.u32 %v2339_v4, 16  ;;  %v1807_v7 = vcombine.low %v203_v3, %v2339_v4  ;;  %v289_v8 = vshrl.u32 %v203_v3, 16  ;;  %v2345_v9 = vld [vmem:[%s2335_s30 + $0x20] sm:$0xf]  ;;  %v298_v10 = vshll.u32 %v2339_v4, 16  ;;  %p187_p6 = scmp.lt.s32.totalorder %s184_s24, 71 }
  0x19   : > { %v292_v11 = vshll.u32 %v203_v3, 16  ;;  %v308_v12 = vshll.u32 %v205_v5, 16  ;;  %v2349_v13 = vld [vmem:[%s2335_s30 + $0x24] sm:$0xf]  ;;  %v312_v16 = vshrl.u32 %v205_v5, 16  ;;  %v323_v17 = vshrl.u32 %v2345_v9, 16 }
  0x1a   : > { %900 = vrot.lane.b32.xlu1 %v1807_v7, %s2264_s6  ;;  %v2355_v15 = vrot.slane %v289_v8, 4  ;;  %v1808_v18 = vcombine.low %v205_v5, %v2345_v9  ;;  %v2360_v19 = vld [vmem:[%s2335_s30 + $0x28] sm:$0xf]  ;;  %v2362_v20 = vrot.slane %v302_v6, 4  ;;  %v2368_v24 = vld [vmem:[%s2335_s30 + $0x78] sm:$0xf]  ;;  %2065 = vmatpush3.bf16.msra.mxu0 %v2193_v2 }
  0x1b   : > { %v294_v21 = vrot.slane %v292_v11, 5  ;;  %v346_v22 = vshrl.u32 %v2360_v19, 16  ;;  %v1809_v23 = vcombine.low %v2349_v13, %v2360_v19  ;;  %v326_v26 = vshll.u32 %v2345_v9, 16  ;;  %v2378_v30 = vld [vmem:[%s2335_s30 + $0x80] sm:$0xf]  ;;  %2122 = vmatpush3.bf16.msra.mxu1 %v2193_v2  ;;  %2066 = vmatprep.subr.bf16.mxu0 %v2194_v14  ;;  %v2198_v8 = vld [vmem:[%s3007_s1 + $0x30] sm:$0xff]  }
  0x1c   : > { %v342_v27 = vshll.u32 %v2360_v19, 16  ;;  %v332_v28 = vshll.u32 %v2349_v13, 16  ;;  %v336_v29 = vshrl.u32 %v2349_v13, 16  ;;  %v516_v32 = vshrl.u32 %v2368_v24, 16  ;;  %v2386_v34 = vld [vmem:[%s2335_s30] sm:$0xf]  ;;  %2115 = vmatprep.subr.bf16.mxu1 %v2194_v14 }
  0x1d   : > { %v2380_v31 = vrot.slane %v346_v22, 4  ;;  %904 = vrot.lane.b32.xlu0 %v1809_v23, %s2264_s6  ;;  %v527_v33 = vshrl.u32 %v2378_v30, 16  ;;  %v2388_v35 = vrot.slane %v308_v12, 5  ;;  %v1817_v37 = vcombine.low %v2368_v24, %v2378_v30  ;;  %v2396_v38 = vld [vmem:[%s2335_s30 + $0x4] sm:$0xf]  ;;  %s3038_s24 = smov (!%p187_p6, %s184_s24), 71 }
  0x1e   : > { %902 = vrot.lane.b32.xlu1 %v1808_v18, %s2264_s6  ;;  %v2391_v36 = vrot.slane %v336_v29, 4  ;;  %v2399_v39 = vld [vmem:[%s2335_s30 + $0x8] sm:$0xf]  ;;  %v255_v40 = vshrl.u32 %v2386_v34, 16  ;;  %v295_v41 = vor.u32 %v294_v21, %v2355_v15  ;;  %v258_v42 = vshll.u32 %v2386_v34, 16  ;;  %2067 = vmatpush3.bf16.msra.mxu0 %v2194_v14  ;;  %s190_s28 = sadd.s32 %s2129_s25, %s3038_s24 }
  0x1f   : > { %v264_v43 = vshll.u32 %v2396_v38, 16  ;;  %v268_v44 = vshrl.u32 %v2396_v38, 16  ;;  %v274_v45 = vshll.u32 %v2399_v39, 16  ;;  %v206_v46 = vld [vmem:[%s2335_s30 + $0x1c] sm:$0x1]  ;;  %v314_v48 = vrot.slane %v312_v16, 4  ;;  %2123 = vmatpush3.bf16.msra.mxu1 %v2194_v14  ;;  %2068 = vmatprep.subr.bf16.mxu0 %v2195_v25 }
  0x20   : > { %v257_v47 = vrot.slane %v255_v40, 4  ;;  %v318_v49 = vshll.u32 %v206_v46, 16  ;;  %v325_v50 = vrot.slane %v323_v17, 4  ;;  %v202_v51 = vld [vmem:[%s2335_s30 + $0xc] sm:$0x1]  ;;  %v260_v52 = vrot.slane %v258_v42, 5  ;;  %2116 = vmatprep.subr.bf16.mxu1 %v2195_v25 }
  0x21   : > { %v266_v53 = vrot.slane %v264_v43, 5  ;;  %v270_v54 = vrot.slane %v268_v44, 4  ;;  %v276_v55 = vrot.slane %v274_v45, 5  ;;  %v315_v57 = vor.u32 %v314_v48, %v2388_v35  ;;  %v2418_v1 = vld [vmem:[%s2335_s30 + $0x68] sm:$0xf]  ;;  %v2200_v44 = vld [vmem:[%s3007_s1 + $0x38] sm:$0xff]  }
  0x22   : > { %920 = vrot.lane.b32.xlu1 %v1817_v37, %s2264_s6  ;;  %v320_v58 = vrot.slane %v318_v49, 5  ;;  %v328_v59 = vrot.slane %v326_v26, 5  ;;  %v2414_v60 = vrot.slane %v332_v28, 5  ;;  %v261_v61 = vor.u32 %v260_v52, %v257_v47  ;;  %2069 = vmatpush3.bf16.msra.mxu0 %v2195_v25  ;;  %v226_v14 = vld [vmem:[%s2335_s30 + $0x6c] sm:$0x1]  ;;  %s1768_s12 = sshll.u32 %s190_s28, 2 }
  0x23   : > { %v271_v62 = vor.u32 %v270_v54, %v266_v53  ;;  %v278_v63 = vshrl.u32 %v2399_v39, 16  ;;  %v284_v0 = vshll.u32 %v202_v51, 16  ;;  %v316_v3 = vrot.slane %v315_v57, 4  ;;  %2124 = vmatpush3.bf16.msra.mxu1 %v2195_v25  ;;  %2070 = vmatprep.subr.bf16.mxu0 %v2196_v56  ;;  %v2441_v16 = vld [vmem:[%s2335_s30 + $0x70] sm:$0xf] }
  0x24   : > { %v329_v5 = vor.u32 %v328_v59, %v325_v50  ;;  %v296_v6 = vrot.slane %v295_v41, 4  ;;  %v300_v7 = vrot.slane %v298_v10, 5  ;;  %v262_v9 = vrot.slane %v261_v61, 4  ;;  %2117 = vmatprep.subr.bf16.mxu1 %v2196_v56  ;;  %v2449_v23 = vld [vmem:[%s2335_s30 + $0x74] sm:$0xf] }
  0x25   : > { %v272_v11 = vrot.slane %v271_v62, 4  ;;  %v280_v12 = vrot.slane %v278_v63, 4  ;;  %v286_v13 = vrot.slane %v284_v0, 5  ;;  %v2434_v15 = vsel %vm2422_vm2, %v316_v3, %v320_v58  ;;  %v230_v52 = vld [vmem:[%s2335_s30 + $0x7c] sm:$0x1] }
  0x26   : > { %v330_v4 = vrot.slane %v329_v5, 4  ;;  %v2438_v10 = vsel %vm2422_vm2, %v296_v6, %v300_v7  ;;  %v478_v17 = vshll.u32 %v2418_v1, 16  ;;  %v267_v18 = vsel %vm2422_vm2, %v262_v9, %v266_v53  ;;  %2071 = vmatpush3.bf16.msra.mxu0 %v2196_v56  ;;  %v2477_v58 = vld [vmem:[%s2335_s30 + $0x84] sm:$0xf]  ;;  %v2488_v6 = vld [vmem:[%s2335_s30 + $0x88] sm:$0xf] }
  0x27   : > { %v277_v21 = vsel %vm2422_vm2, %v272_v11, %v276_v55  ;;  %v281_v22 = vor.u32 %v280_v12, %v276_v55  ;;  %v482_v25 = vshrl.u32 %v2418_v1, 16  ;;  %v488_v37 = vshll.u32 %v226_v14, 16  ;;  %2125 = vmatpush3.bf16.msra.mxu1 %v2196_v56  ;;  %2072 = vmatprep.subr.bf16.mxu0 %v2198_v8  ;;  %3015 = vst [vmem:[#allocation2_spill] sm:$0xff] %v2488_v6 }
  0x28   : > { %v1789_v26 = vcombine.low %v267_v18, %v277_v21  ;;  %v2455_v28 = vsel %vm2422_vm2, %v330_v4, %v2414_v60  ;;  %v2457_v29 = vrot.slane %v478_v17, 5  ;;  %v493_v43 = vshrl.u32 %v2441_v16, 16  ;;  %2118 = vmatprep.subr.bf16.mxu1 %v2198_v8  ;;  %v2501_v18 = vld [vmem:[%s2335_s30 + $0x30] sm:$0xf] }
  0x29   : > { %v1826_v40 = vcombine.low %v2434_v15, %v2455_v28  ;;  %v282_v41 = vrot.slane %v281_v22, 4  ;;  %v484_v42 = vrot.slane %v482_v25, 4  ;;  %v490_v45 = vrot.slane %v488_v37, 5  ;;  %3016 = vst [vmem:[#allocation3_spill] sm:$0xff] %v2501_v18 }
  0x2a   : > { %840 = vrot.lane.b32.xlu0 %v1789_v26, %s2265_s22  ;;  %v496_v46 = vshll.u32 %v2441_v16, 16  ;;  %v502_v47 = vshll.u32 %v2449_v23, 16  ;;  %v305_v48 = vor.u32 %v2362_v20, %v300_v7  ;;  %v495_v51 = vrot.slane %v493_v43, 4  ;;  %2073 = vmatpush3.bf16.msra.mxu0 %v2198_v8  ;;  %v2513_v26 = vld [vmem:[%s2335_s30 + $0x34] sm:$0xf] }
  0x2b   : > { %959 = vrot.lane.b32.xlu1 %v1826_v40, %s2266_s23  ;;  %v287_v49 = vsel %vm2422_vm2, %v282_v41, %v286_v13  ;;  %v485_v50 = vor.u32 %v484_v42, %v2457_v29  ;;  %v506_v53 = vshrl.u32 %v2449_v23, 16  ;;  %2126 = vmatpush3.bf16.msra.mxu1 %v2198_v8  ;;  %v512_v61 = vshll.u32 %v2368_v24, 16  ;;  %v234_v41 = vld [vmem:[%s2335_s30 + $0x8c] sm:$0x1] }
  0x2c   : > { %v1790_v54 = vcombine.low %v287_v49, %v2438_v10  ;;  %v498_v55 = vrot.slane %v496_v46, 5  ;;  %v504_v56 = vrot.slane %v502_v47, 5  ;;  %v306_v57 = vrot.slane %v305_v48, 4  ;;  %2074 = vmatprep.subr.bf16.mxu0 %v2200_v44  ;;  %2119 = vmatprep.subr.bf16.mxu1 %v2200_v44  ;;  %v210_v46 = vld [vmem:[%s2335_s30 + $0x2c] sm:$0x1] }
  0x2d   : > { %v486_v20 = vrot.slane %v485_v50, 4  ;;  %v508_v59 = vrot.slane %v506_v53, 4  ;;  %v518_v62 = vrot.slane %v516_v32, 4  ;;  %v530_v63 = vshll.u32 %v2378_v30, 16 }
  0x2e   : > { %842 = vrot.lane.b32.xlu0 %v1790_v54, %s2265_s22  ;;  %v499_v0 = vor.u32 %v498_v55, %v495_v51  ;;  %v311_v3 = vsel %vm2422_vm2, %v306_v57, %v2388_v35  ;;  %v522_v5 = vshll.u32 %v230_v52, 16  ;;  %v514_v9 = vrot.slane %v512_v61, 5  ;;  %2075 = vmatpush3.bf16.msra.mxu0 %v2200_v44 }
  0x2f   : > { %v1825_v7 = vcombine.low %v2438_v10, %v311_v3  ;;  %v509_v8 = vor.u32 %v508_v59, %v504_v56  ;;  %v540_v32 = vshrl.u32 %v2477_v58, 16  ;;  %v2494_v11 = vsel %vm2422_vm2, %v486_v20, %v490_v45  ;;  %2127 = vmatpush3.bf16.msra.mxu1 %v2200_v44  ;;  %v2542_v20 = vld [vmem:[%s2335_s30 + $0x38] sm:$0xf] }
  0x30   : > { %v500_v12 = vrot.slane %v499_v0, 4  ;;  %v524_v13 = vrot.slane %v522_v5, 5  ;;  %v1791_v14 = vcombine.low %v311_v3, %v2434_v15  ;;  %v519_v4 = vor.u32 %v518_v62, %v514_v9  ;;  %v2550_v0 = vld [vmem:[%s2335_s30 + $0x90] sm:$0xf] }
  0x31   : > { %v510_v35 = vrot.slane %v509_v8, 4  ;;  %v550_v17 = vshrl.u32 %v2488_v6, 16  ;;  %v339_v10 = vor.u32 %v2391_v36, %v2414_v60  ;;  %v344_v15 = vrot.slane %v342_v27, 5  ;;  %3017 = vst [vmem:[#allocation4_spill] sm:$0xff] %v2550_v0 }
  0x32   : > { %v2505_v21 = vsel %vm2422_vm2, %v500_v12, %v504_v56  ;;  %957 = vrot.lane.b32.xlu0 %v1825_v7, %s2266_s23  ;;  %v529_v22 = vrot.slane %v527_v33, 4  ;;  %v532_v25 = vrot.slane %v530_v63, 5  ;;  %v520_v37 = vrot.slane %v519_v4, 4  ;;  %v2560_v4 = vld [vmem:[%s2335_s30 + $0x94] sm:$0xf] }
  0x33   : > { %v1799_v36 = vcombine.low %v2494_v11, %v2505_v21  ;;  %v2519_v60 = vsel %vm2422_vm2, %v510_v35, %v514_v9  ;;  %v340_v40 = vrot.slane %v339_v10, 4  ;;  %v1818_v19 = vcombine.low %v2477_v58, %v2488_v6 }
  0x34   : > { %v533_v27 = vor.u32 %v532_v25, %v529_v22  ;;  %v536_v30 = vshll.u32 %v2477_v58, 16  ;;  %v357_v33 = vshrl.u32 %v2501_v18, 16  ;;  %v525_v42 = vsel %vm2422_vm2, %v520_v37, %v524_v13 }
  0x35   : > { %860 = vrot.lane.b32.xlu1 %v1799_v36, %s2265_s22  ;;  %v345_v43 = vsel %vm2422_vm2, %v340_v40, %v344_v15  ;;  %v360_v44 = vshll.u32 %v2501_v18, 16  ;;  %v370_v45 = vshrl.u32 %v2513_v26, 16  ;;  %v1800_v47 = vcombine.low %v2519_v60, %v525_v42 }
  0x36   : > { %844 = vrot.lane.b32.xlu0 %v1791_v14, %s2265_s22  ;;  %v1792_v48 = vcombine.low %v2455_v28, %v345_v43  ;;  %v534_v49 = vrot.slane %v533_v27, 4  ;;  %v538_v50 = vrot.slane %v536_v30, 5  ;;  %v542_v51 = vrot.slane %v540_v32, 4  ;;  %v214_v27 = vld [vmem:[%s2335_s30 + $0x3c] sm:$0x1] }
  0x37   : > { %v546_v52 = vshll.u32 %v2488_v6, 16  ;;  %v552_v53 = vrot.slane %v550_v17, 4  ;;  %v556_v54 = vshll.u32 %v234_v41, 16  ;;  %v1810_v55 = vcombine.low %v2501_v18, %v2513_v26 }
  0x38   : > { %v349_v56 = vor.u32 %v2380_v31, %v344_v15  ;;  %v352_v57 = vshll.u32 %v210_v46, 16  ;;  %v359_v59 = vrot.slane %v357_v33, 4  ;;  %v2547_v28 = vsel %vm2422_vm2, %v534_v49, %v538_v50 }
  0x39   : > { %862 = vrot.lane.b32.xlu1 %v1800_v47, %s2265_s22  ;;  %v543_v61 = vor.u32 %v542_v51, %v538_v50  ;;  %v548_v62 = vrot.slane %v546_v52, 5  ;;  %v558_v63 = vrot.slane %v556_v54, 5  ;;  %v362_v5 = vrot.slane %v360_v44, 5  ;;  %v2585_v51 = vld [vmem:[%s2335_s30 + $0xa0] sm:$0xf] }
  0x3a   : > { %846 = vrot.lane.b32.xlu0 %v1792_v48, %s2265_s22  ;;  %v350_v3 = vrot.slane %v349_v56, 4  ;;  %v354_v31 = vrot.slane %v352_v57, 5  ;;  %v366_v7 = vshll.u32 %v2513_v26, 16  ;;  %v372_v32 = vrot.slane %v370_v45, 4  ;;  %v2579_v48 = vld [vmem:[%s2335_s30 + $0x98] sm:$0xf] }
  0x3b   : > { %v544_v8 = vrot.slane %v543_v61, 4  ;;  %v553_v9 = vor.u32 %v552_v53, %v548_v62  ;;  %v376_v12 = vshll.u32 %v2542_v20, 16  ;;  %v363_v14 = vor.u32 %v362_v5, %v359_v59  ;;  %v2589_v56 = vld [vmem:[%s2335_s30 + $0x40] sm:$0xf]  ;;  %v2598_v5 = vld [vmem:[%s2335_s30 + $0x44] sm:$0xf] }
  0x3c   : > { %v2557_v13 = vsel %vm2422_vm2, %v350_v3, %v354_v31  ;;  %v368_v35 = vrot.slane %v366_v7, 5  ;;  %v561_v17 = vshrl.u32 %v2550_v0, 16  ;;  %v1835_v10 = vcombine.low %v525_v42, %v2547_v28 }
  0x3d   : > { %922 = vrot.lane.b32.xlu1 %v1818_v19, %s2264_s6  ;;  %v549_v15 = vsel %vm2422_vm2, %v544_v8, %v548_v62  ;;  %v554_v22 = vrot.slane %v553_v9, 4  ;;  %v1827_v25 = vcombine.low %v345_v43, %v2557_v13  ;;  %v364_v36 = vrot.slane %v363_v14, 4 }
  0x3e   : > { %906 = vrot.lane.b32.xlu0 %v1810_v55, %s2264_s6  ;;  %v373_v37 = vor.u32 %v372_v32, %v368_v35  ;;  %v378_v40 = vrot.slane %v376_v12, 5  ;;  %v563_v19 = vrot.slane %v561_v17, 4  ;;  %v564_v33 = vshll.u32 %v2550_v0, 16  ;;  %v2613_v17 = vld [vmem:[%s2335_s30 + $0x48] sm:$0xf] }
  0x3f   : > { %v559_v30 = vsel %vm2422_vm2, %v554_v22, %v558_v63  ;;  %v570_v41 = vshll.u32 %v2560_v4, 16  ;;  %v369_v42 = vsel %vm2422_vm2, %v364_v36, %v368_v35  ;;  %v380_v43 = vshrl.u32 %v2542_v20, 16 }
  0x40   : > { %v374_v44 = vrot.slane %v373_v37, 4  ;;  %v1836_v45 = vcombine.low %v549_v15, %v559_v30  ;;  %v566_v46 = vrot.slane %v564_v33, 5  ;;  %v386_v47 = vshll.u32 %v214_v27, 16  ;;  %v2622_v27 = vld [vmem:[%s2335_s30 + $0xa4] sm:$0xf] }
  0x41   : > { %977 = vrot.lane.b32.xlu1 %v1835_v10, %s2266_s23  ;;  %v382_v50 = vrot.slane %v380_v43, 4  ;;  %v1801_v52 = vcombine.low %v2547_v28, %v549_v15  ;;  %v572_v55 = vrot.slane %v570_v41, 5  ;;  %v1793_v57 = vcombine.low %v2557_v13, %v369_v42 }
  0x42   : > { %961 = vrot.lane.b32.xlu0 %v1827_v25, %s2266_s23  ;;  %v379_v49 = vsel %vm2422_vm2, %v374_v44, %v378_v40  ;;  %v567_v54 = vor.u32 %v566_v46, %v563_v19  ;;  %v388_v61 = vrot.slane %v386_v47, 5  ;;  %v584_v62 = vshrl.u32 %v2579_v48, 16  ;;  %v238_v25 = vld [vmem:[%s2335_s30 + $0x9c] sm:$0x1]  ;;  %v218_v46 = vld [vmem:[%s2335_s30 + $0x4c] sm:$0x1] }
  0x43   : > { %v1828_v53 = vcombine.low %v369_v42, %v379_v49  ;;  %v383_v59 = vor.u32 %v382_v50, %v378_v40  ;;  %v595_v3 = vshrl.u32 %v2585_v51, 16  ;;  %v574_v31 = vshrl.u32 %v2560_v4, 16 }
  0x44   : > { %v568_v63 = vrot.slane %v567_v54, 4  ;;  %v580_v28 = vshll.u32 %v2579_v48, 16  ;;  %v598_v8 = vshll.u32 %v2585_v51, 16  ;;  %v391_v9 = vshrl.u32 %v2589_v56, 16 }
  0x45   : > { %979 = vrot.lane.b32.xlu1 %v1836_v45, %s2266_s23  ;;  %v384_v7 = vrot.slane %v383_v59, 4  ;;  %v394_v32 = vshll.u32 %v2589_v56, 16  ;;  %v576_v13 = vrot.slane %v574_v31, 4  ;;  %v404_v10 = vshrl.u32 %v2598_v5, 16  ;;  %v2636_v31 = vld [vmem:[%s2335_s30 + $0x50] sm:$0xf] }
  0x46   : > { %963 = vrot.lane.b32.xlu0 %v1828_v53, %s2266_s23  ;;  %v2606_v12 = vsel %vm2422_vm2, %v568_v63, %v572_v55  ;;  %v582_v35 = vrot.slane %v580_v28, 5  ;;  %v586_v36 = vrot.slane %v584_v62, 4  ;;  %v597_v37 = vrot.slane %v595_v3, 4 }
  0x47   : > { %v2610_v14 = vsel %vm2422_vm2, %v384_v7, %v388_v61  ;;  %v1802_v15 = vcombine.low %v559_v30, %v2606_v12  ;;  %v577_v22 = vor.u32 %v576_v13, %v572_v55  ;;  %v600_v19 = vrot.slane %v598_v8, 5 }
  0x48   : > { %v1794_v40 = vcombine.low %v379_v49, %v2610_v14  ;;  %v393_v33 = vrot.slane %v391_v9, 4  ;;  %v396_v41 = vrot.slane %v394_v32, 5  ;;  %v1819_v42 = vcombine.low %v2550_v0, %v2560_v4 }
  0x49   : > { %864 = vrot.lane.b32.xlu1 %v1801_v52, %s2265_s22  ;;  %v414_v44 = vshrl.u32 %v2613_v17, 16  ;;  %v400_v30 = vshll.u32 %v2598_v5, 16  ;;  %v590_v43 = vshll.u32 %v238_v25, 16  ;;  %v406_v47 = vrot.slane %v404_v10, 4 }
  0x4a   : > { %848 = vrot.lane.b32.xlu0 %v1793_v57, %s2265_s22  ;;  %v397_v45 = vor.u32 %v396_v41, %v393_v33  ;;  %v410_v50 = vshll.u32 %v2613_v17, 16  ;;  %v578_v49 = vrot.slane %v577_v22, 4  ;;  %v587_v52 = vor.u32 %v586_v36, %v582_v35  ;;  %v2651_v41 = vld [vmem:[%s2335_s30 + $0xa8] sm:$0xf] }
  0x4b   : > { %v604_v53 = vshll.u32 %v2622_v27, 16  ;;  %v402_v54 = vrot.slane %v400_v30, 5  ;;  %v1811_v55 = vcombine.low %v2542_v20, %v2589_v56  ;;  %v601_v57 = vor.u32 %v600_v19, %v597_v37 }
  0x4c   : > { %v398_v59 = vrot.slane %v397_v45, 4  ;;  %v412_v61 = vrot.slane %v410_v50, 5  ;;  %v416_v63 = vrot.slane %v414_v44, 4  ;;  %v420_v3 = vshll.u32 %v218_v46, 16 }
  0x4d   : > { %866 = vrot.lane.b32.xlu1 %v1802_v15, %s2265_s22  ;;  %v407_v62 = vor.u32 %v406_v47, %v402_v54  ;;  %v1820_v28 = vcombine.low %v2579_v48, %v2585_v51  ;;  %v1812_v7 = vcombine.low %v2598_v5, %v2613_v17  ;;  %v592_v8 = vrot.slane %v590_v43, 5 }
  0x4e   : > { %850 = vrot.lane.b32.xlu0 %v1794_v40, %s2265_s22  ;;  %v608_v9 = vshrl.u32 %v2622_v27, 16  ;;  %v583_v32 = vsel %vm2422_vm2, %v578_v49, %v582_v35  ;;  %v588_v13 = vrot.slane %v587_v52, 4  ;;  %v606_v10 = vrot.slane %v604_v53, 5  ;;  %v2655_v35 = vld [vmem:[%s2335_s30 + $0x54] sm:$0xf] }
  0x4f   : > { %v417_v15 = vor.u32 %v416_v63, %v412_v61  ;;  %v602_v22 = vrot.slane %v601_v57, 4  ;;  %v403_v25 = vsel %vm2422_vm2, %v398_v59, %v402_v54  ;;  %v425_v37 = vshrl.u32 %v2636_v31, 16  ;;  %v2675_v63 = vld [vmem:[%s2335_s30 + $0xb0] sm:$0xf] }
  0x50   : > { %v610_v36 = vrot.slane %v608_v9, 4  ;;  %v408_v40 = vrot.slane %v407_v62, 4  ;;  %v422_v33 = vrot.slane %v420_v3, 5  ;;  %v1837_v30 = vcombine.low %v2606_v12, %v583_v32 }
  0x51   : > { %924 = vrot.lane.b32.xlu1 %v1819_v42, %s2264_s6  ;;  %v418_v19 = vrot.slane %v417_v15, 4  ;;  %v428_v42 = vshll.u32 %v2636_v31, 16  ;;  %v427_v44 = vrot.slane %v425_v37, 4  ;;  %v593_v43 = vsel %vm2422_vm2, %v588_v13, %v592_v8  ;;  %v2684_v8 = vld [vmem:[%s2335_s30 + $0x60] sm:$0xf] }
  0x52   : > { %908 = vrot.lane.b32.xlu0 %v1811_v55, %s2264_s6  ;;  %v607_v46 = vsel %vm2422_vm2, %v602_v22, %v606_v10  ;;  %v1829_v47 = vcombine.low %v2610_v14, %v403_v25  ;;  %v611_v50 = vor.u32 %v610_v36, %v606_v10  ;;  %v614_v49 = vshll.u32 %v2651_v41, 16  ;;  %v242_v37 = vld [vmem:[%s2335_s30 + $0xac] sm:$0x1] }
  0x53   : > { %v430_v45 = vrot.slane %v428_v42, 5  ;;  %v413_v12 = vsel %vm2422_vm2, %v408_v40, %v412_v61  ;;  %v423_v52 = vsel %vm2422_vm2, %v418_v19, %v422_v33  ;;  %v434_v54 = vshll.u32 %v2655_v35, 16  ;;  %v2678_v61 = vld [vmem:[%s2335_s30 + $0xb4] sm:$0xf] }
  0x54   : > { %v1838_v55 = vcombine.low %v593_v43, %v607_v46  ;;  %v618_v57 = vshrl.u32 %v2651_v41, 16  ;;  %v1830_v14 = vcombine.low %v413_v12, %v423_v52  ;;  %v612_v59 = vrot.slane %v611_v50, 4 }
  0x55   : > { %926 = vrot.lane.b32.xlu1 %v1820_v28, %s2264_s6  ;;  %v431_v53 = vor.u32 %v430_v45, %v427_v44  ;;  %v616_v62 = vrot.slane %v614_v49, 5  ;;  %v436_v28 = vrot.slane %v434_v54, 5  ;;  %v1803_v9 = vcombine.low %v583_v32, %v593_v43  ;;  %v2709_v49 = vld [vmem:[%s2335_s30 + $0xb8] sm:$0xf] }
  0x56   : > { %910 = vrot.lane.b32.xlu0 %v1812_v7, %s2264_s6  ;;  %v2681_v7 = vld [vmem:[%s2335_s30 + $0x58] sm:$0xf]  ;;  %v1795_v13 = vcombine.low %v403_v25, %v413_v12  ;;  %v438_v10 = vshrl.u32 %v2655_v35, 16  ;;  %v629_v15 = vshrl.u32 %v2675_v63, 16  ;;  %v632_v22 = vshll.u32 %v2675_v63, 16 }
  0x57   : > { %v432_v3 = vrot.slane %v431_v53, 4  ;;  %v642_v36 = vshrl.u32 %v2678_v61, 16  ;;  %v620_v40 = vrot.slane %v618_v57, 4  ;;  %v2695_v19 = vsel %vm2422_vm2, %v612_v59, %v616_v62 }
  0x58   : > { %v448_v32 = vshrl.u32 %v2681_v7, 16  ;;  %v459_v25 = vshrl.u32 %v2684_v8, 16  ;;  %v638_v33 = vshll.u32 %v2678_v61, 16  ;;  %v462_v44 = vshll.u32 %v2684_v8, 16 }
  0x59   : > { %981 = vrot.lane.b32.xlu1 %v1837_v30, %s2266_s23  ;;  %v2702_v42 = vsel %vm2422_vm2, %v432_v3, %v436_v28  ;;  %v440_v30 = vrot.slane %v438_v10, 4  ;;  %v444_v43 = vshll.u32 %v2681_v7, 16  ;;  %v624_v45 = vshll.u32 %v242_v37, 16  ;;  %v222_v37 = vld [vmem:[%s2335_s30 + $0x5c] sm:$0x1] }
  0x5a   : > { %965 = vrot.lane.b32.xlu0 %v1829_v47, %s2266_s23  ;;  %v1804_v47 = vcombine.low %v607_v46, %v2695_v19  ;;  %v621_v50 = vor.u32 %v620_v40, %v616_v62  ;;  %v631_v12 = vrot.slane %v629_v15, 4  ;;  %v634_v53 = vrot.slane %v632_v22, 5 }
  0x5b   : > { %v1796_v54 = vcombine.low %v423_v52, %v2702_v42  ;;  %v644_v57 = vrot.slane %v642_v36, 4  ;;  %v450_v59 = vrot.slane %v448_v32, 4  ;;  %v441_v3 = vor.u32 %v440_v30, %v436_v28 }
  0x5c   : > { %v446_v10 = vrot.slane %v444_v43, 5  ;;  %v464_v6 = vrot.slane %v462_v44, 5  ;;  %v1821_v46 = vcombine.low %v2622_v27, %v2651_v41  ;;  %v1813_v62 = vcombine.low %v2636_v31, %v2655_v35 }
  0x5d   : > { %983 = vrot.lane.b32.xlu1 %v1838_v55, %s2266_s23  ;;  %v640_v55 = vrot.slane %v638_v33, 5  ;;  %v635_v52 = vor.u32 %v634_v53, %v631_v12  ;;  %v648_v15 = vshll.u32 %v2709_v49, 16  ;;  %v622_v28 = vrot.slane %v621_v50, 4 }
  0x5e   : > { %967 = vrot.lane.b32.xlu0 %v1830_v14, %s2266_s23  ;;  %v2714_v14 = vld [vmem:[%s2335_s30 + $0x64] sm:$0xf]  ;;  %v454_v40 = vshll.u32 %v222_v37, 16  ;;  %v652_v32 = vshrl.u32 %v2709_v49, 16  ;;  %v451_v33 = vor.u32 %v450_v59, %v446_v10  ;;  %v1822_v43 = vcombine.low %v2675_v63, %v2678_v61  ;;  %v246_v59 = vld [vmem:[%s2335_s30 + $0xbc] sm:$0x1] }
  0x5f   : > { %v468_v22 = vshll.u32 %v2714_v14, 16  ;;  %v645_v36 = vor.u32 %v644_v57, %v640_v55  ;;  %v472_v30 = vshrl.u32 %v2714_v14, 16  ;;  %v650_v50 = vrot.slane %v648_v15, 5 }
  0x60   : > { %v456_v57 = vrot.slane %v454_v40, 5 }
  0x61   : > { %868 = vrot.lane.b32.xlu1 %v1803_v9, %s2265_s22  ;;  %v461_v9 = vrot.slane %v459_v25, 4  ;;  %v442_v25 = vrot.slane %v441_v3, 4  ;;  %v470_v12 = vrot.slane %v468_v22, 5  ;;  %v474_v53 = vrot.slane %v472_v30, 4 }
  0x62   : > { %852 = vrot.lane.b32.xlu0 %v1795_v13, %s2265_s22  ;;  %v626_v13 = vrot.slane %v624_v45, 5  ;;  %v1814_v45 = vcombine.low %v2681_v7, %v2684_v8  ;;  %v654_v3 = vrot.slane %v652_v32, 4 }
  0x63   : > { %v465_v44 = vor.u32 %v464_v6, %v461_v9  ;;  %v447_v37 = vsel %vm2422_vm2, %v442_v25, %v446_v10  ;;  %v452_v9 = vrot.slane %v451_v33, 4  ;;  %v475_v18 = vor.u32 %v474_v53, %v470_v12 }
  0x64   : > { %v627_v6 = vsel %vm2422_vm2, %v622_v28, %v626_v13  ;;  %v658_v13 = vshll.u32 %v246_v59, 16  ;;  %v1831_v28 = vcombine.low %v2702_v42, %v447_v37  ;;  %v1786_v53 = vcombine.low %v2585_v51, %v2622_v27 }
  0x65   : > { %870 = vrot.lane.b32.xlu1 %v1804_v47, %s2265_s22  ;;  %v636_v47 = vrot.slane %v635_v52, 4  ;;  %v466_v0 = vrot.slane %v465_v44, 4  ;;  %v1834_v52 = vcombine.low %v2505_v21, %v2519_v60  ;;  %v476_v15 = vrot.slane %v475_v18, 4 }
  0x66   : > { %854 = vrot.lane.b32.xlu0 %v1796_v54, %s2265_s22  ;;  %v646_v54 = vrot.slane %v645_v36, 4  ;;  %v655_v36 = vor.u32 %v654_v3, %v650_v50  ;;  %v457_v40 = vsel %vm2422_vm2, %v452_v9, %v456_v57  ;;  %v660_v33 = vrot.slane %v658_v13, 5  ;;  %v250_v57 = vld [vmem:[%s2335_s30 + $0xcc] sm:$0x1] }
  0x67   : > { %v641_v22 = vsel %vm2422_vm2, %v636_v47, %v640_v55  ;;  %v2759_v55 = vsel %vm2422_vm2, %v476_v15, %v2457_v29  ;;  %v1776_v29 = vcombine.low %v2513_v26, %v2542_v20 }
  0x68   : > { %v651_v10 = vsel %vm2422_vm2, %v646_v54, %v650_v50  ;;  %v1833_v32 = vcombine.low %v2759_v55, %v2494_v11  ;;  %v1805_v25 = vcombine.low %v627_v6, %v641_v22  ;;  %v656_v30 = vrot.slane %v655_v36, 4  ;;  %v249_v50 = vld [vmem:[%s2335_s30 + $0xc8] sm:$0xf] }
  0x69   : > { %928 = vrot.lane.b32.xlu1 %v1821_v46, %s2264_s6  ;;  %v2739_v46 = vld [vmem:[%s2335_s30 + $0xc0] sm:$0xf]  ;;  %v1840_v42 = vcombine.low %v641_v22, %v651_v10  ;;  %v1778_v54 = vcombine.low %v2613_v17, %v2636_v31  ;;  %v682_v22 = vshll.u32 %v249_v50, 16 }
  0x6a   : > { %912 = vrot.lane.b32.xlu0 %v1813_v62, %s2264_s6  ;;  %v1839_v62 = vcombine.low %v2695_v19, %v627_v6  ;;  %v471_v19 = vsel %vm2422_vm2, %v466_v0, %v470_v12  ;;  %v663_v18 = vshrl.u32 %v2739_v46, 16  ;;  %v1797_v0 = vcombine.low %v447_v37, %v457_v40 }
  0x6b   : > { %v1832_v44 = vcombine.low %v457_v40, %v471_v19  ;;  %v1785_v12 = vcombine.low %v2560_v4, %v2579_v48  ;;  %v1777_v6 = vcombine.low %v2589_v56, %v2598_v5  ;;  %v661_v13 = vsel %vm2422_vm2, %v656_v30, %v660_v33 }
  0x6c   : > { %v665_v47 = vrot.slane %v663_v18, 4  ;;  %v1806_v36 = vcombine.low %v651_v10, %v661_v13  ;;  %v684_v59 = vrot.slane %v682_v22, 5  ;;  %v1823_v33 = vcombine.low %v2709_v49, %v2739_v46 }
  0x6d   : > { %930 = vrot.lane.b32.xlu1 %v1822_v43, %s2264_s6  ;;  %v666_v43 = vshll.u32 %v2739_v46, 16  ;;  %v1771_v22 = vcombine.low %v2386_v34, %v2396_v38 }
  0x6e   : > { %914 = vrot.lane.b32.xlu0 %v1814_v45, %s2264_s6  ;;  %v248_v45 = vld [vmem:[%s2335_s30 + $0xc4] sm:$0xf] }
  0x6f   : > { %v672_v3 = vshll.u32 %v248_v45, 16  ;;  %v676_v37 = vshrl.u32 %v248_v45, 16  ;;  %v668_v15 = vrot.slane %v666_v43, 5  ;;  %v1816_v43 = vcombine.low %v2441_v16, %v2449_v23 }
  0x71   : > { %985 = vrot.lane.b32.xlu1 %v1839_v62, %s2266_s23  ;;  %v674_v40 = vrot.slane %v672_v3, 5  ;;  %v678_v18 = vrot.slane %v676_v37, 4  ;;  %v669_v62 = vor.u32 %v668_v15, %v665_v47 }
  0x72   : > { %969 = vrot.lane.b32.xlu0 %v1831_v28, %s2266_s23  ;;  %v686_v28 = vshrl.u32 %v249_v50, 16 }
  0x73   : > { %v670_v10 = vrot.slane %v669_v62, 4 }
  0x74   : > { %v688_v9 = vrot.slane %v686_v28, 4  ;;  %v2217_v28 = vld [vmem:[%s2335_s30 + $0x10] sm:$0xf] }
  0x75   : > { %987 = vrot.lane.b32.xlu1 %v1840_v42, %s2266_s23  ;;  %v1798_v42 = vcombine.low %v471_v19, %v2759_v55  ;;  %v1824_v19 = vcombine.low %v248_v45, %v249_v50  ;;  %v675_v46 = vsel %vm2422_vm2, %v670_v10, %v674_v40  ;;  %v2218_v10 = vld [vmem:[%s2335_s30 + $0x14] sm:$0xf] }
  0x76   : > { %971 = vrot.lane.b32.xlu0 %v1832_v44, %s2266_s23  ;;  %v1815_v44 = vcombine.low %v2714_v14, %v2418_v1  ;;  %v689_v30 = vor.u32 %v688_v9, %v684_v59  ;;  %v1841_v62 = vcombine.low %v661_v13, %v675_v46 }
  0x78   : > { %v690_v3 = vrot.slane %v689_v30, 4 }
  0x79   : > { %872 = vrot.lane.b32.xlu1 %v1805_v25, %s2265_s22  ;;  %v679_v25 = vor.u32 %v678_v18, %v674_v40 }
  0x7a   : > { %856 = vrot.lane.b32.xlu0 %v1797_v0, %s2265_s22  ;;  %v692_v0 = vshll.u32 %v250_v57, 16 }
  0x7b   : > { %v680_v47 = vrot.slane %v679_v25, 4  ;;  %v2219_v25 = vld [vmem:[%s2335_s30 + $0x18] sm:$0xf] }
  0x7c   : > { %v694_v37 = vrot.slane %v692_v0, 5  ;;  %v1773_v30 = vcombine.low %v2218_v10, %v2219_v25  ;;  %v3020_v10 = vld [vmem:[#allocation2_spill] sm:$0xff] }
  0x7d   : > { %874 = vrot.lane.b32.xlu1 %v1806_v36, %s2265_s22  ;;  %v685_v45 = vsel %vm2422_vm2, %v680_v47, %v684_v59  ;;  %v1772_v36 = vcombine.low %v2399_v39, %v2217_v28 }
  0x7e   : > { %858 = vrot.lane.b32.xlu0 %v1798_v42, %s2265_s22  ;;  %v695_v50 = vsel %vm2422_vm2, %v690_v3, %v694_v37  ;;  %v2220_v3 = vld [vmem:[%s2335_s30 + $0x20] sm:$0xf]  ;;  %v2221_v37 = vld [vmem:[%s2335_s30 + $0x24] sm:$0xf] }
  0x7f   : > { %v1842_v57 = vcombine.low %v685_v45, %v695_v50 }
  0x81   : > { %932 = vrot.lane.b32.xlu1 %v1823_v33, %s2264_s6  ;;  %v1781_v33 = vcombine.low %v2418_v1, %v2441_v16 }
  0x82   : > { %916 = vrot.lane.b32.xlu0 %v1815_v44, %s2264_s6 }
  0x85   : > { %934 = vrot.lane.b32.xlu1 %v1824_v19, %s2264_s6 }
  0x86   : > { %918 = vrot.lane.b32.xlu0 %v1816_v43, %s2264_s6  ;;  %v1782_v43 = vcombine.low %v2449_v23, %v2368_v24 }
  0x89   : > { %989 = vrot.lane.b32.xlu1 %v1841_v62, %s2266_s23  ;;  %v1774_v62 = vcombine.low %v2220_v3, %v2221_v37 }
  0x8a   : > { %973 = vrot.lane.b32.xlu0 %v1833_v32, %s2266_s23 }
  0x8c   : > { %v901_v9 = vpop.permute.xlu1 %900 }
  0x8d   : > { %991 = vrot.lane.b32.xlu1 %v1842_v57, %s2266_s23 }
  0x8e   : > { %975 = vrot.lane.b32.xlu0 %v1834_v52, %s2266_s23 }
  0x8f   : > { %v905_v13 = vpop.permute.xlu0 %904 }
  0x90   : > { %v903_v59 = vpop.permute.xlu1 %902 }
  0x94   : > { %v921_v2 = vpop.permute.xlu1 %920 }
  0x9c   : > { %v841_v15 = vpop.permute.xlu0 %840 }
  0x9d   : > { %v996_v55 = vsel %vm993_vm3, %v1771_v22, %v841_v15  ;;  %v960_v32 = vpop.permute.xlu1 %959 }
  0x9e   : > { %v1050_v40 = vsel %vm1048_vm4, %v996_v55, %v901_v9 }
  0xa0   : > { %v843_v11 = vpop.permute.xlu0 %842 }
  0xa1   : > { %v999_v21 = vsel %vm993_vm3, %v1772_v36, %v843_v11 }
  0xa2   : > { %v1052_v60 = vsel %vm1048_vm4, %v999_v21, %v903_v59 }
  0xa3   : > { %v1090_v38 = vsel %vm1085_vm5, %v1052_v60, %v960_v32 }
  0xa4   : > { %v958_v52 = vpop.permute.xlu0 %957 }
  0xa5   : > { %v1087_v34 = vsel %vm1085_vm5, %v1050_v40, %v958_v52  ;;  %v2222_v52 = vld [vmem:[%s2335_s30 + $0x80] sm:$0xf] }
  0xa6   : > { %2076 = vmatprep.mubr.bf16.mxu0 %v1087_v34  ;;  %v1783_v40 = vcombine.low %v2222_v52, %v2477_v58  ;;  %v2223_v34 = vld [vmem:[%s2335_s30 + $0x28] sm:$0xf]  ;;  %s2935_s30 = scalar_lea.vmem %s3009_s3, %s1768_s12 }
  0xa7   : > { %v861_v39 = vpop.permute.xlu1 %860  ;;  %2077 = vmatmul.mubr.bf16.vlgmr.msra.gmra.mrb[0].mxu0 %v1090_v38  ;;  %v3018_v38 = vld [vmem:[#allocation3_spill] sm:$0xff] }
  0xa8   : > { %v845_v18 = vpop.permute.xlu0 %844  ;;  %v1026_v19 = vsel %vm993_vm3, %v1781_v33, %v861_v39  ;;  %v1775_v39 = vcombine.low %v2223_v34, %v3018_v38  ;;  %v3021_v34 = vcombine.low %v2651_v41, %v2675_v63  ;;  %v3023_v63 = vcombine.low %v2678_v61, %v2709_v49  ;;  %v2926_v61 = vld [vmem:[%s3008_s2] ss:$0 sm:$0xff] }
  0xa9   : > { %v1002_v47 = vsel %vm993_vm3, %v1773_v30, %v845_v18  ;;  %v1070_v50 = vsel %vm1048_vm4, %v1026_v19, %v921_v2 }
  0xaa   : > { %v1054_v9 = vsel %vm1048_vm4, %v1002_v47, %v905_v13 }
  0xab   : > { %v863_v42 = vpop.permute.xlu1 %862 }
  0xac   : > { %v847_v44 = vpop.permute.xlu0 %846  ;;  %v1029_v1 = vsel %vm993_vm3, %v1782_v43, %v863_v42 }
  0xad   : > { %v1005_v23 = vsel %vm993_vm3, %v1774_v62, %v847_v44  ;;  %v3019_v44 = vld [vmem:[#allocation4_spill] sm:$0xff] }
  0xae   : > { %v1784_v25 = vcombine.low %v3020_v10, %v3019_v44 }
  0xaf   : > { %v923_v0 = vpop.permute.xlu1 %922 }
  0xb0   : > { %v907_v46 = vpop.permute.xlu0 %906  ;;  %v1072_v24 = vsel %vm1048_vm4, %v1029_v1, %v923_v0 }
  0xb1   : > { %v1056_v2 = vsel %vm1048_vm4, %v1005_v23, %v907_v46 }
  0xb3   : > { %v978_v45 = vpop.permute.xlu1 %977 }
  0xb4   : > { %v1117_v16 = vsel %vm1085_vm5, %v1070_v50, %v978_v45  ;;  %v962_v57 = vpop.permute.xlu0 %961 }
  0xb5   : > { %2096 = vmatprep.mubr.bf16.mxu1 %v1117_v16  ;;  %v1093_v59 = vsel %vm1085_vm5, %v1054_v9, %v962_v57 }
  0xb6   : > { %2080 = vmatprep.mubr.bf16.mxu0 %v1093_v59 }
  0xb7   : > { %v980_v15 = vpop.permute.xlu1 %979 }
  0xb8   : > { %v1120_v22 = vsel %vm1085_vm5, %v1072_v24, %v980_v15  ;;  %v964_v28 = vpop.permute.xlu0 %963 }
  0xb9   : > { %2097 = vmatmul.mubr.bf16.vlgmr.msra.gmra.mrb[0].mxu1 %v1120_v22  ;;  %v1096_v36 = vsel %vm1085_vm5, %v1056_v2, %v964_v28 }
  0xba   : > { %2081 = vmatmul.mubr.bf16.gmra.mrb[4].mxu0 %v1096_v36 }
  0xbb   : > { %v865_v13 = vpop.permute.xlu1 %864 }
  0xbc   : > { %v849_v11 = vpop.permute.xlu0 %848  ;;  %v1032_v33 = vsel %vm993_vm3, %v1783_v40, %v865_v13 }
  0xbd   : > { %v1008_v30 = vsel %vm993_vm3, %v1775_v39, %v849_v11  ;;  %v3022_v39 = vcombine.low %v2655_v35, %v2681_v7  ;;  %v3024_v7 = vcombine.low %v2684_v8, %v2714_v14 }
  0xbf   : > { %v867_v55 = vpop.permute.xlu1 %866 }
  0xc0   : > { %v851_v32 = vpop.permute.xlu0 %850  ;;  %v1035_v3 = vsel %vm993_vm3, %v1784_v25, %v867_v55 }
  0xc1   : > { %v1011_v37 = vsel %vm993_vm3, %v1776_v29, %v851_v32 }
  0xc3   : > { %v925_v21 = vpop.permute.xlu1 %924 }
  0xc4   : > { %v909_v60 = vpop.permute.xlu0 %908  ;;  %v1074_v0 = vsel %vm1048_vm4, %v1032_v33, %v925_v21 }
  0xc5   : > { %v1058_v43 = vsel %vm1048_vm4, %v1008_v30, %v909_v60 }
  0xc7   : > { %v927_v18 = vpop.permute.xlu1 %926 }
  0xc8   : > { %v911_v42 = vpop.permute.xlu0 %910  ;;  %v1076_v62 = vsel %vm1048_vm4, %v1035_v3, %v927_v18 }
  0xc9   : > { %v1060_v50 = vsel %vm1048_vm4, %v1011_v37, %v911_v42 }
  0xcb   : > { %v982_v19 = vpop.permute.xlu1 %981 }
  0xcc   : > { %v1123_v46 = vsel %vm1085_vm5, %v1074_v0, %v982_v19  ;;  %v966_v58 = vpop.permute.xlu0 %965 }
  0xcd   : > { %2100 = vmatprep.mubr.bf16.mxu1 %v1123_v46  ;;  %v1099_v47 = vsel %vm1085_vm5, %v1058_v43, %v966_v58 }
  0xce   : > { %2084 = vmatprep.mubr.bf16.mxu0 %v1099_v47 }
  0xcf   : > { %v984_v45 = vpop.permute.xlu1 %983 }
  0xd0   : > { %v1126_v1 = vsel %vm1085_vm5, %v1076_v62, %v984_v45  ;;  %v968_v16 = vpop.permute.xlu0 %967 }
  0xd1   : > { %2101 = vmatmul.mubr.bf16.gmra.mrb[4].mxu1 %v1126_v1  ;;  %v1102_v57 = vsel %vm1085_vm5, %v1060_v50, %v968_v16 }
  0xd2   : > { %2085 = vmatmul.mubr.bf16.gmra.mrb[8].mxu0 %v1102_v57 }
  0xd3   : > { %v869_v9 = vpop.permute.xlu1 %868 }
  0xd4   : > { %v853_v59 = vpop.permute.xlu0 %852  ;;  %v1038_v2 = vsel %vm993_vm3, %v1785_v12, %v869_v9 }
  0xd5   : > { %v1014_v22 = vsel %vm993_vm3, %v1777_v6, %v853_v59 }
  0xd7   : > { %v871_v24 = vpop.permute.xlu1 %870 }
  0xd8   : > { %v855_v23 = vpop.permute.xlu0 %854  ;;  %v1041_v4 = vsel %vm993_vm3, %v1786_v53, %v871_v24 }
  0xd9   : > { %v1017_v48 = vsel %vm993_vm3, %v1778_v54, %v855_v23 }
  0xdb   : > { %v929_v15 = vpop.permute.xlu1 %928 }
  0xdc   : > { %v913_v26 = vpop.permute.xlu0 %912  ;;  %v1078_v28 = vsel %vm1048_vm4, %v1038_v2, %v929_v15 }
  0xdd   : > { %v1062_v13 = vsel %vm1048_vm4, %v1014_v22, %v913_v26 }
  0xdf   : > { %v931_v20 = vpop.permute.xlu1 %930 }
  0xe0   : > { %v915_v29 = vpop.permute.xlu0 %914  ;;  %v1080_v56 = vsel %vm1048_vm4, %v1041_v4, %v931_v20 }
  0xe1   : > { %v1064_v12 = vsel %vm1048_vm4, %v1017_v48, %v915_v29 }
  0xe3   : > { %v986_v36 = vpop.permute.xlu1 %985 }
  0xe4   : > { %v1129_v11 = vsel %vm1085_vm5, %v1078_v28, %v986_v36  ;;  %v970_v55 = vpop.permute.xlu0 %969 }
  0xe5   : > { %2104 = vmatprep.mubr.bf16.mxu1 %v1129_v11  ;;  %v1105_v32 = vsel %vm1085_vm5, %v1062_v13, %v970_v55 }
  0xe6   : > { %2088 = vmatprep.mubr.bf16.mxu0 %v1105_v32 }
  0xe7   : > { %v988_v5 = vpop.permute.xlu1 %987 }
  0xe8   : > { %v1132_v6 = vsel %vm1085_vm5, %v1080_v56, %v988_v5  ;;  %v972_v21 = vpop.permute.xlu0 %971 }
  0xe9   : > { %2105 = vmatmul.mubr.bf16.gmra.mrb[8].mxu1 %v1132_v6  ;;  %v1108_v60 = vsel %vm1085_vm5, %v1064_v12, %v972_v21 }
  0xea   : > { %2089 = vmatmul.mubr.bf16.gmra.mrb[12].mxu0 %v1108_v60 }
  0xeb   : > { %v873_v51 = vpop.permute.xlu1 %872 }
  0xec   : > { %v857_v27 = vpop.permute.xlu0 %856  ;;  %v1044_v38 = vsel %vm993_vm3, %v3021_v34, %v873_v51 }
  0xed   : > { %v1020_v18 = vsel %vm993_vm3, %v3022_v39, %v857_v27 }
  0xef   : > { %v875_v53 = vpop.permute.xlu1 %874 }
  0xf0   : > { %v859_v52 = vpop.permute.xlu0 %858  ;;  %v1047_v35 = vsel %vm993_vm3, %v3023_v63, %v875_v53 }
  0xf1   : > { %v1023_v30 = vsel %vm993_vm3, %v3024_v7, %v859_v52 }
  0xf3   : > { %v933_v40 = vpop.permute.xlu1 %932 }
  0xf4   : > { %v917_v17 = vpop.permute.xlu0 %916  ;;  %v1082_v42 = vsel %vm1048_vm4, %v1044_v38, %v933_v40 }
  0xf5   : > { %v1066_v44 = vsel %vm1048_vm4, %v1020_v18, %v917_v17 }
  0xf7   : > { %v935_v31 = vpop.permute.xlu1 %934 }
  0xf8   : > { %v919_v54 = vpop.permute.xlu0 %918  ;;  %v1084_v0 = vsel %vm1048_vm4, %v1047_v35, %v935_v31 }
  0xf9   : > { %v1068_v43 = vsel %vm1048_vm4, %v1023_v30, %v919_v54 }
  0xfb   : > { %v990_v33 = vpop.permute.xlu1 %989 }
  0xfc   : > { %v1135_v10 = vsel %vm1085_vm5, %v1082_v42, %v990_v33  ;;  %v974_v25 = vpop.permute.xlu0 %973 }
  0xfd   : > { %2108 = vmatprep.mubr.bf16.mxu1 %v1135_v10  ;;  %v1111_v41 = vsel %vm1085_vm5, %v1066_v44, %v974_v25 }
  0xfe   : > { %2092 = vmatprep.mubr.bf16.mxu0 %v1111_v41 }
  0xff   : > { %v992_v19 = vpop.permute.xlu1 %991 }
 0x100   : > { %v1138_v46 = vsel %vm1085_vm5, %v1084_v0, %v992_v19  ;;  %v976_v58 = vpop.permute.xlu0 %975 }
 0x101   : > { %2109 = vmatmul.mubr.bf16.gmra.mrb[12].mxu1 %v1138_v46  ;;  %v1114_v47 = vsel %vm1085_vm5, %v1068_v43, %v976_v58 }
 0x102   : > { %2093 = vmatmul.mubr.bf16.gmra.mrb[16].mxu0 %v1114_v47 }
 0x17a   : > { %v2078_v8 = vpop.f32.mrb[0].mxu0 }
 0x17b   : > { %v1254_v49 = vadd.f32 %v2078_v8, %v2926_v61  ;;  %v1245_v14 = vpop.f32.mrb[1].mxu0 }
 0x17c   : > { %v1246_v3 = vadd.f32 %v2926_v61, %v1245_v14  ;;  %v2079_v37 = vpop.f32.mrb[2].mxu0 }
 0x17d   : > { %v1426_v62 = vmul.f32 0.2, %v1254_v49  ;;  %v1257_v45 = vadd.f32 %v2079_v37, %v2926_v61  ;;  %v1248_v50 = vpop.f32.mrb[3].mxu0  ;;  %vm1390_vm6 = vcmp.ge.f32.partialorder %v1254_v49, 0.0 }
 0x17e   : > { %v1424_v1 = vmul.f32 0.2, %v1246_v3  ;;  %v1249_v16 = vadd.f32 %v2926_v61, %v1248_v50  ;;  %vm1388_vm7 = vcmp.ge.f32.partialorder %v1246_v3, 0.0 }
 0x17f   : > { %vm1391_vm8 = vcmp.ge.f32.partialorder %v1257_v45, 0.0  ;;  %v1427_v57 = vmul.f32 0.2, %v1257_v45  ;;  %v1462_v59 = vsel %vm1390_vm6, %v1254_v49, %v1426_v62 }
 0x180   : > { %vm1389_vm9 = vcmp.ge.f32.partialorder %v1249_v16, 0.0  ;;  %v1425_v9 = vmul.f32 0.2, %v1249_v16  ;;  %v1460_v23 = vsel %vm1388_vm7, %v1246_v3, %v1424_v1 }
 0x181   : > { %v1463_v24 = vsel %vm1391_vm8, %v1257_v45, %v1427_v57 }
 0x182   : > { %v1935_v15 = vpack.c.bf16 %v1463_v24, %v1462_v59  ;;  %v1461_v26 = vsel %vm1389_vm9, %v1249_v16, %v1425_v9 }
 0x183   : > { %v1930_v20 = vpack.c.bf16 %v1461_v26, %v1460_v23 }
 0x184   : > { %2017 = vst [vmem:[%s2935_s30 + $0x8] sm:$0xff] %v1935_v15  }
 0x185   : > { %1931 = vst [vmem:[%s2935_s30] sm:$0xff] %v1930_v20  }
 0x18c   : > { %v2098_v29 = vpop.f32.mrb[0].mxu1 }
 0x18d   : > { %v1334_v2 = vadd.f32 %v2098_v29, %v2926_v61  ;;  %v1325_v22 = vpop.f32.mrb[1].mxu1  ;;  %v2082_v28 = vpop.f32.mrb[4].mxu0 }
 0x18e   : > { %v1326_v36 = vadd.f32 %v2926_v61, %v1325_v22  ;;  %v2099_v13 = vpop.f32.mrb[2].mxu1  ;;  %v1270_v11 = vadd.f32 %v2082_v28, %v2926_v61  ;;  %v1261_v55 = vpop.f32.mrb[5].mxu0 }
 0x18f   : > { %vm1410_vm10 = vcmp.ge.f32.partialorder %v1334_v2, 0.0  ;;  %v1446_v32 = vmul.f32 0.2, %v1334_v2  ;;  %v1337_v4 = vadd.f32 %v2099_v13, %v2926_v61  ;;  %v1328_v48 = vpop.f32.mrb[3].mxu1  ;;  %v2083_v56 = vpop.f32.mrb[6].mxu0  ;;  %v1262_v6 = vadd.f32 %v2926_v61, %v1261_v55 }
 0x190   : > { %vm1408_vm11 = vcmp.ge.f32.partialorder %v1326_v36, 0.0  ;;  %v1444_v5 = vmul.f32 0.2, %v1326_v36  ;;  %v1329_v12 = vadd.f32 %v2926_v61, %v1328_v48  ;;  %v1264_v21 = vpop.f32.mrb[7].mxu0  ;;  %vm1394_vm14 = vcmp.ge.f32.partialorder %v1270_v11, 0.0 }
 0x191   : > { %vm1411_vm12 = vcmp.ge.f32.partialorder %v1337_v4, 0.0  ;;  %v1447_v60 = vmul.f32 0.2, %v1337_v4  ;;  %v1482_v51 = vsel %vm1410_vm10, %v1334_v2, %v1446_v32  ;;  %v1430_v40 = vmul.f32 0.2, %v1270_v11 }
 0x192   : > { %vm1409_vm13 = vcmp.ge.f32.partialorder %v1329_v12, 0.0  ;;  %v1445_v27 = vmul.f32 0.2, %v1329_v12  ;;  %v1480_v53 = vsel %vm1408_vm11, %v1326_v36, %v1444_v5  ;;  %v1273_v17 = vadd.f32 %v2083_v56, %v2926_v61 }
 0x193   : > { %v1483_v52 = vsel %vm1411_vm12, %v1337_v4, %v1447_v60  ;;  %v1428_v34 = vmul.f32 0.2, %v1262_v6  ;;  %v1265_v38 = vadd.f32 %v2926_v61, %v1264_v21  ;;  %vm1392_vm15 = vcmp.ge.f32.partialorder %v1262_v6, 0.0 }
 0x194   : > { %v1985_v31 = vpack.c.bf16 %v1483_v52, %v1482_v51  ;;  %v1481_v54 = vsel %vm1409_vm13, %v1329_v12, %v1445_v27  ;;  %vm1395_vm0 = vcmp.ge.f32.partialorder %v1273_v17, 0.0  ;;  %v1431_v18 = vmul.f32 0.2, %v1273_v17 }
 0x195   : > { %v1980_v39 = vpack.c.bf16 %v1481_v54, %v1480_v53  ;;  %vm1393_vm1 = vcmp.ge.f32.partialorder %v1265_v38, 0.0  ;;  %v1429_v42 = vmul.f32 0.2, %v1265_v38  ;;  %v1466_v33 = vsel %vm1394_vm14, %v1270_v11, %v1430_v40 }
 0x196   : > { %2027 = vst [vmem:[%s2935_s30 + $0x58] sm:$0xff] %v1985_v31   ;;  %v1467_v44 = vsel %vm1395_vm0, %v1273_v17, %v1431_v18  ;;  %v1464_v10 = vsel %vm1392_vm15, %v1262_v6, %v1428_v34 }
 0x197   : > { %2026 = vst [vmem:[%s2935_s30 + $0x50] sm:$0xff] %v1980_v39   ;;  %v1945_v25 = vpack.c.bf16 %v1467_v44, %v1466_v33  ;;  %v1465_v41 = vsel %vm1393_vm1, %v1265_v38, %v1429_v42 }
 0x198   : > { %v1940_v63 = vpack.c.bf16 %v1465_v41, %v1464_v10 }
 0x199   : > { %2019 = vst [vmem:[%s2935_s30 + $0x18] sm:$0xff] %v1945_v25  }
 0x19a   : > { %2018 = vst [vmem:[%s2935_s30 + $0x10] sm:$0xff] %v1940_v63  }
 0x1a4   : > { %v2102_v35 = vpop.f32.mrb[4].mxu1 }
 0x1a5   : > { %v1350_v7 = vadd.f32 %v2102_v35, %v2926_v61  ;;  %v1341_v30 = vpop.f32.mrb[5].mxu1  ;;  %v2086_v0 = vpop.f32.mrb[8].mxu0 }
 0x1a6   : > { %v1342_v19 = vadd.f32 %v2926_v61, %v1341_v30  ;;  %v2103_v43 = vpop.f32.mrb[6].mxu1  ;;  %v1286_v46 = vadd.f32 %v2086_v0, %v2926_v61  ;;  %v1277_v58 = vpop.f32.mrb[9].mxu0 }
 0x1a7   : > { %vm1414_vm2 = vcmp.ge.f32.partialorder %v1350_v7, 0.0  ;;  %v1450_v47 = vmul.f32 0.2, %v1350_v7  ;;  %v1353_v8 = vadd.f32 %v2103_v43, %v2926_v61  ;;  %v1344_v49 = vpop.f32.mrb[7].mxu1  ;;  %v2087_v14 = vpop.f32.mrb[10].mxu0  ;;  %v1278_v62 = vadd.f32 %v2926_v61, %v1277_v58 }
 0x1a8   : > { %vm1412_vm3 = vcmp.ge.f32.partialorder %v1342_v19, 0.0  ;;  %v1448_v3 = vmul.f32 0.2, %v1342_v19  ;;  %v1345_v37 = vadd.f32 %v2926_v61, %v1344_v49  ;;  %v1280_v45 = vpop.f32.mrb[11].mxu0  ;;  %vm1398_vm6 = vcmp.ge.f32.partialorder %v1286_v46, 0.0 }
 0x1a9   : > { %vm1415_vm4 = vcmp.ge.f32.partialorder %v1353_v8, 0.0  ;;  %v1451_v50 = vmul.f32 0.2, %v1353_v8  ;;  %v1486_v1 = vsel %vm1414_vm2, %v1350_v7, %v1450_v47  ;;  %v1434_v59 = vmul.f32 0.2, %v1286_v46 }
 0x1aa   : > { %vm1413_vm5 = vcmp.ge.f32.partialorder %v1345_v37, 0.0  ;;  %v1449_v16 = vmul.f32 0.2, %v1345_v37  ;;  %v1484_v57 = vsel %vm1412_vm3, %v1342_v19, %v1448_v3  ;;  %v1289_v24 = vadd.f32 %v2087_v14, %v2926_v61 }
 0x1ab   : > { %v1487_v9 = vsel %vm1415_vm4, %v1353_v8, %v1451_v50  ;;  %v1432_v26 = vmul.f32 0.2, %v1278_v62  ;;  %v1281_v20 = vadd.f32 %v2926_v61, %v1280_v45  ;;  %vm1396_vm7 = vcmp.ge.f32.partialorder %v1278_v62, 0.0 }
 0x1ac   : > { %v1995_v23 = vpack.c.bf16 %v1487_v9, %v1486_v1  ;;  %v1485_v15 = vsel %vm1413_vm5, %v1345_v37, %v1449_v16  ;;  %vm1399_vm8 = vcmp.ge.f32.partialorder %v1289_v24, 0.0  ;;  %v1435_v2 = vmul.f32 0.2, %v1289_v24 }
 0x1ad   : > { %v1990_v29 = vpack.c.bf16 %v1485_v15, %v1484_v57  ;;  %vm1397_vm9 = vcmp.ge.f32.partialorder %v1281_v20, 0.0  ;;  %v1433_v22 = vmul.f32 0.2, %v1281_v20  ;;  %v1470_v28 = vsel %vm1398_vm6, %v1286_v46, %v1434_v59 }
 0x1ae   : > { %2029 = vst [vmem:[%s2935_s30 + $0x68] sm:$0xff] %v1995_v23   ;;  %v1471_v36 = vsel %vm1399_vm8, %v1289_v24, %v1435_v2  ;;  %v1468_v13 = vsel %vm1396_vm7, %v1278_v62, %v1432_v26 }
 0x1af   : > { %2028 = vst [vmem:[%s2935_s30 + $0x60] sm:$0xff] %v1990_v29   ;;  %v1955_v11 = vpack.c.bf16 %v1471_v36, %v1470_v28  ;;  %v1469_v55 = vsel %vm1397_vm9, %v1281_v20, %v1433_v22 }
 0x1b0   : > { %v1950_v32 = vpack.c.bf16 %v1469_v55, %v1468_v13 }
 0x1b1   : > { %2021 = vst [vmem:[%s2935_s30 + $0x28] sm:$0xff] %v1955_v11  }
 0x1b2   : > { %2020 = vst [vmem:[%s2935_s30 + $0x20] sm:$0xff] %v1950_v32  }
 0x1bc   : > { %v2106_v4 = vpop.f32.mrb[8].mxu1 }
 0x1bd   : > { %v1366_v48 = vadd.f32 %v2106_v4, %v2926_v61  ;;  %v1357_v56 = vpop.f32.mrb[9].mxu1  ;;  %v2090_v5 = vpop.f32.mrb[12].mxu0 }
 0x1be   : > { %v1358_v12 = vadd.f32 %v2926_v61, %v1357_v56  ;;  %v2107_v6 = vpop.f32.mrb[10].mxu1  ;;  %v1302_v21 = vadd.f32 %v2090_v5, %v2926_v61  ;;  %v1293_v60 = vpop.f32.mrb[13].mxu0 }
 0x1bf   : > { %vm1418_vm10 = vcmp.ge.f32.partialorder %v1366_v48, 0.0  ;;  %v1454_v51 = vmul.f32 0.2, %v1366_v48  ;;  %v1369_v27 = vadd.f32 %v2107_v6, %v2926_v61  ;;  %v1360_v53 = vpop.f32.mrb[11].mxu1  ;;  %v2091_v52 = vpop.f32.mrb[14].mxu0  ;;  %v1294_v31 = vadd.f32 %v2926_v61, %v1293_v60 }
 0x1c0   : > { %vm1416_vm11 = vcmp.ge.f32.partialorder %v1358_v12, 0.0  ;;  %v1452_v40 = vmul.f32 0.2, %v1358_v12  ;;  %v1361_v17 = vadd.f32 %v2926_v61, %v1360_v53  ;;  %v1296_v54 = vpop.f32.mrb[15].mxu0  ;;  %vm1402_vm14 = vcmp.ge.f32.partialorder %v1302_v21, 0.0 }
 0x1c1   : > { %vm1419_vm12 = vcmp.ge.f32.partialorder %v1369_v27, 0.0  ;;  %v1455_v34 = vmul.f32 0.2, %v1369_v27  ;;  %v1490_v38 = vsel %vm1418_vm10, %v1366_v48, %v1454_v51  ;;  %v1438_v33 = vmul.f32 0.2, %v1302_v21 }
 0x1c2   : > { %vm1417_vm13 = vcmp.ge.f32.partialorder %v1361_v17, 0.0  ;;  %v1453_v39 = vmul.f32 0.2, %v1361_v17  ;;  %v1488_v18 = vsel %vm1416_vm11, %v1358_v12, %v1452_v40  ;;  %v1305_v44 = vadd.f32 %v2091_v52, %v2926_v61 }
 0x1c3   : > { %v1491_v42 = vsel %vm1419_vm12, %v1369_v27, %v1455_v34  ;;  %v1436_v41 = vmul.f32 0.2, %v1294_v31  ;;  %v1297_v63 = vadd.f32 %v2926_v61, %v1296_v54  ;;  %vm1400_vm15 = vcmp.ge.f32.partialorder %v1294_v31, 0.0 }
 0x1c4   : > { %v2005_v10 = vpack.c.bf16 %v1491_v42, %v1490_v38  ;;  %v1489_v25 = vsel %vm1417_vm13, %v1361_v17, %v1453_v39  ;;  %vm1403_vm0 = vcmp.ge.f32.partialorder %v1305_v44, 0.0  ;;  %v1439_v7 = vmul.f32 0.2, %v1305_v44 }
 0x1c5   : > { %v2000_v35 = vpack.c.bf16 %v1489_v25, %v1488_v18  ;;  %vm1401_vm1 = vcmp.ge.f32.partialorder %v1297_v63, 0.0  ;;  %v1437_v30 = vmul.f32 0.2, %v1297_v63  ;;  %v1474_v0 = vsel %vm1402_vm14, %v1302_v21, %v1438_v33 }
 0x1c6   : > { %2031 = vst [vmem:[%s2935_s30 + $0x78] sm:$0xff] %v2005_v10   ;;  %v1475_v19 = vsel %vm1403_vm0, %v1305_v44, %v1439_v7  ;;  %v1472_v43 = vsel %vm1400_vm15, %v1294_v31, %v1436_v41 }
 0x1c7   : > { %2030 = vst [vmem:[%s2935_s30 + $0x70] sm:$0xff] %v2000_v35   ;;  %v1965_v46 = vpack.c.bf16 %v1475_v19, %v1474_v0  ;;  %v1473_v58 = vsel %vm1401_vm1, %v1297_v63, %v1437_v30 }
 0x1c8   : > { %v1960_v47 = vpack.c.bf16 %v1473_v58, %v1472_v43 }
 0x1c9   : > { %2023 = vst [vmem:[%s2935_s30 + $0x38] sm:$0xff] %v1965_v46  }
 0x1ca   : > { %2022 = vst [vmem:[%s2935_s30 + $0x30] sm:$0xff] %v1960_v47  }
 0x1d4   : > { %v2110_v8 = vpop.f32.mrb[12].mxu1 }
 0x1d5   : > { %v1382_v49 = vadd.f32 %v2110_v8, %v2926_v61  ;;  %v1373_v14 = vpop.f32.mrb[13].mxu1  ;;  %v2094_v3 = vpop.f32.mrb[16].mxu0 }
 0x1d6   : > { %v1374_v37 = vadd.f32 %v2926_v61, %v1373_v14  ;;  %v2111_v62 = vpop.f32.mrb[14].mxu1  ;;  %v1318_v45 = vadd.f32 %v2094_v3, %v2926_v61  ;;  %v1309_v50 = vpop.f32.mrb[17].mxu0 }
 0x1d7   : > { %vm1422_vm2 = vcmp.ge.f32.partialorder %v1382_v49, 0.0  ;;  %v1458_v1 = vmul.f32 0.2, %v1382_v49  ;;  %v1385_v16 = vadd.f32 %v2111_v62, %v2926_v61  ;;  %v1376_v57 = vpop.f32.mrb[15].mxu1  ;;  %v2095_v9 = vpop.f32.mrb[18].mxu0  ;;  %v1310_v23 = vadd.f32 %v2926_v61, %v1309_v50 }
 0x1d8   : > { %vm1420_vm3 = vcmp.ge.f32.partialorder %v1374_v37, 0.0  ;;  %v1456_v59 = vmul.f32 0.2, %v1374_v37  ;;  %v1377_v24 = vadd.f32 %v2926_v61, %v1376_v57  ;;  %v1312_v15 = vpop.f32.mrb[19].mxu0  ;;  %vm1406_vm6 = vcmp.ge.f32.partialorder %v1318_v45, 0.0 }
 0x1d9   : > { %vm1423_vm4 = vcmp.ge.f32.partialorder %v1385_v16, 0.0  ;;  %v1459_v26 = vmul.f32 0.2, %v1385_v16  ;;  %v1494_v20 = vsel %vm1422_vm2, %v1382_v49, %v1458_v1  ;;  %v1442_v28 = vmul.f32 0.2, %v1318_v45 }
 0x1da   : > { %vm1421_vm5 = vcmp.ge.f32.partialorder %v1377_v24, 0.0  ;;  %v1457_v29 = vmul.f32 0.2, %v1377_v24  ;;  %v1492_v2 = vsel %vm1420_vm3, %v1374_v37, %v1456_v59  ;;  %v1321_v36 = vadd.f32 %v2095_v9, %v2926_v61 }
 0x1db   : > { %v1495_v22 = vsel %vm1423_vm4, %v1385_v16, %v1459_v26  ;;  %v1440_v55 = vmul.f32 0.2, %v1310_v23  ;;  %v1313_v32 = vadd.f32 %v2926_v61, %v1312_v15  ;;  %vm1404_vm7 = vcmp.ge.f32.partialorder %v1310_v23, 0.0 }
 0x1dc   : > { %v2015_v13 = vpack.c.bf16 %v1495_v22, %v1494_v20  ;;  %v1493_v11 = vsel %vm1421_vm5, %v1377_v24, %v1457_v29  ;;  %vm1407_vm8 = vcmp.ge.f32.partialorder %v1321_v36, 0.0  ;;  %v1443_v48 = vmul.f32 0.2, %v1321_v36 }
 0x1dd   : > { %v2010_v4 = vpack.c.bf16 %v1493_v11, %v1492_v2  ;;  %vm1405_vm9 = vcmp.ge.f32.partialorder %v1313_v32, 0.0  ;;  %v1441_v56 = vmul.f32 0.2, %v1313_v32  ;;  %v1478_v5 = vsel %vm1406_vm6, %v1318_v45, %v1442_v28 }
 0x1de   : > { %2033 = vst [vmem:[%s2935_s30 + $0x88] sm:$0xff] %v2015_v13   ;;  %v1479_v12 = vsel %vm1407_vm8, %v1321_v36, %v1443_v48  ;;  %v1476_v6 = vsel %vm1404_vm7, %v1310_v23, %v1440_v55 }
 0x1df   : > { %2032 = vst [vmem:[%s2935_s30 + $0x80] sm:$0xff] %v2010_v4   ;;  %v1975_v21 = vpack.c.bf16 %v1479_v12, %v1478_v5  ;;  %v1477_v60 = vsel %vm1405_vm9, %v1313_v32, %v1441_v56 }
 0x1e0   : > { %v1970_v51 = vpack.c.bf16 %v1477_v60, %v1476_v6 }
 0x1e1   : > { %2025 = vst [vmem:[%s2935_s30 + $0x48] sm:$0xff] %v1975_v21  }
 0x1e2   : > { %2024 = vst [vmem:[%s2935_s30 + $0x40] sm:$0xff] %v1970_v51  }
 0x1e3 PF: > { %s13_s16 = sadd.s32 1, %s2262_s16   ;;  %s3025_s12 = smov %s2254_s14 }
 0x1e4   : > { %p10_p7 = scmp.ge.s32.totalorder %s13_s16, 6   ;;  %s3026_s13 = smov %s2258_s15 }
 0x1e5   : > { %s3027_s14 = smov %s3030_s17  ;;  %s3028_s15 = smov %s3034_s18 }
 0x1e6   :  { %12 = sbr.rel (!%p10_p7) target bundleno = 3 (0x3), region = 63 }

// kernel: _lambda_.5
= control target key start
LH: loop header
LB: loop body
LE: loop exit
PB: predicated region body
PF: predicated region fallthrough
CT: control target
= control target key end

     0   :  { %s5892_s12 = smov 0   ;;  %s5894_s13 = smov 0   ;;  %s7503_s0 = inlined_call_operand.vmem [shape: bf16[2,13,13,512], index: 0, kind: input, shape index: {}]   ;;  %s7504_s1 = inlined_call_operand.vmem [shape: bf16[2048,128], index: 1, kind: input, shape index: {}]   ;;  %s7505_s2 = inlined_call_operand.vmem [shape: f32[1,128], index: 2, kind: input, shape index: {}]   ;;  %s7506_s3 = inlined_call_operand.vmem [shape: bf16[2,144,128], index: 3, kind: output, shape index: {}]  }
   0x1   :  { %s5896_s14 = smov 0  }
   0x2 LB: > { %s25_s15 = sadd.s32 1, %s5865_s13  ;;  %p4764_p0 = scmp.ge.s32.totalorder %s5869_s14, 1  ;;  %s5869_s14 = sphi %s5896_s14, %s13_s14   ;;  %s5865_s13 = sphi %s5894_s13, %s7656_s13   ;;  %s5861_s12 = sphi %s5892_s12, %s7655_s12  }
   0x3   : > { %p27_p1 = scmp.ge.s32.totalorder %s25_s15, 2  ;;  %p151_p2 = scmp.lt.s32.totalorder %s5869_s14, 3 }
   0x5   : > { %s7658_s15 = smov (%p27_p1, %s25_s15), 0  ;;  %p152_p3 = pnand %p4764_p0, %p151_p2 }
   0x7   : > { %155 = sbr.rel (%p152_p3) target bundleno = 592 (0x250), region = 32 }
   0xe   : > { %v5674_v0 = vld [vmem:[%s7504_s1 + $0x140] sm:$0xff]   ;;  %v5678_v4 = vld [vmem:[%s7504_s1 + $0x148] sm:$0xff]   ;;  %v5682_v8 = vld [vmem:[%s7504_s1 + $0x150] sm:$0xff]   ;;  %p179_p4 = scmp.lt.s32.totalorder %s5861_s12, 1  ;;  %vm747_vm0 = vsmask.f32 1280  ;;  %v1233_v42 = vlaneseq }
   0xf   : > { %v5675_v1 = vld [vmem:[%s7504_s1 + $0x1c0] sm:$0xff]   ;;  %5087 = vmatprep.subr.bf16.mxu0 %v5674_v0  ;;  %v5679_v5 = vld [vmem:[%s7504_s1 + $0x1c8] sm:$0xff]   ;;  %v5683_v9 = vld [vmem:[%s7504_s1 + $0x1d0] sm:$0xff]   ;;  %vm748_vm1 = vsmask.f32 3336 }
  0x10   : > { %v5676_v2 = vld [vmem:[%s7504_s1 + $0x100] sm:$0xff]   ;;  %5157 = vmatprep.subr.bf16.mxu1 %v5675_v1  ;;  %v5680_v6 = vld [vmem:[%s7504_s1 + $0x108] sm:$0xff]   ;;  %v5684_v10 = vld [vmem:[%s7504_s1 + $0x110] sm:$0xff]   ;;  %s7660_s12 = smov (!%p179_p4, %s5861_s12), 1  ;;  %vm750_vm3 = vsmask.f32 5392 }
  0x11   : > { %v5677_v3 = vld [vmem:[%s7504_s1 + $0x180] sm:$0xff]   ;;  %5088 = vmatpush3.bf16.msra.mxu0 %v5676_v2  ;;  %v5681_v7 = vld [vmem:[%s7504_s1 + $0x188] sm:$0xff]   ;;  %v5685_v11 = vld [vmem:[%s7504_s1 + $0x190] sm:$0xff]   ;;  %s5647_s22 = smul.u32 416, %s7660_s12  ;;  %vm752_vm4 = vsmask.f32 7448 }
  0x12   : > { %5158 = vmatpush3.bf16.msra.mxu1 %v5677_v3  ;;  %5089 = vmatprep.subr.bf16.mxu0 %v5678_v4  ;;  %v5686_v12 = vld [vmem:[%s7504_s1 + $0x158] sm:$0xff]   ;;  %v5690_v16 = vld [vmem:[%s7504_s1 + $0x160] sm:$0xff]   ;;  %v5694_v20 = vld [vmem:[%s7504_s1 + $0x168] sm:$0xff]   ;;  %s5648_s5 = smul.u32 72, %s7660_s12 }
  0x13   : > { %5159 = vmatprep.subr.bf16.mxu1 %v5679_v5  ;;  %v5687_v13 = vld [vmem:[%s7504_s1 + $0x1d8] sm:$0xff]   ;;  %v5691_v17 = vld [vmem:[%s7504_s1 + $0x1e0] sm:$0xff]   ;;  %v5695_v21 = vld [vmem:[%s7504_s1 + $0x1e8] sm:$0xff]   ;;  %s6010_s6 = scalar_lea.vmem %s7503_s0, %s5647_s22 }
  0x14   : > { %v5688_v14 = vld [vmem:[%s7504_s1 + $0x118] sm:$0xff]   ;;  %v5692_v18 = vld [vmem:[%s7504_s1 + $0x120] sm:$0xff]   ;;  %v5696_v22 = vld [vmem:[%s7504_s1 + $0x128] sm:$0xff]   ;;  %s7451_s9 = scalar_lea.vmem %s7506_s3, %s5648_s5 }
  0x15   : > { %5090 = vmatpush3.bf16.msra.mxu0 %v5680_v6  ;;  %v5689_v15 = vld [vmem:[%s7504_s1 + $0x198] sm:$0xff]   ;;  %v5693_v19 = vld [vmem:[%s7504_s1 + $0x1a0] sm:$0xff]   ;;  %v5697_v23 = vld [vmem:[%s7504_s1 + $0x1a8] sm:$0xff]  }
  0x16   : > { %5160 = vmatpush3.bf16.msra.mxu1 %v5681_v7  ;;  %5091 = vmatprep.subr.bf16.mxu0 %v5682_v8  ;;  %v5698_v24 = vld [vmem:[%s7504_s1 + $0x170] sm:$0xff]   ;;  %v5702_v28 = vld [vmem:[%s7504_s1 + $0x178] sm:$0xff]   ;;  %v4767_v32 = vld.sshfl [vmem:[%s6010_s6] sm:$0xff pattern:$0x76325410] }
  0x17   : > { %5161 = vmatprep.subr.bf16.mxu1 %v5683_v9  ;;  %v5699_v25 = vld [vmem:[%s7504_s1 + $0x1f0] sm:$0xff]   ;;  %v5703_v29 = vld [vmem:[%s7504_s1 + $0x1f8] sm:$0xff]   ;;  %v4768_v33 = vld.sshfl [vmem:[%s6010_s6 + $0x8] sm:$0xff pattern:$0x76325410]  ;;  %v1234_v9 = vshrl.u32 %v1233_v42, 7 }
  0x18   : > { %v5700_v26 = vld [vmem:[%s7504_s1 + $0x130] sm:$0xff]   ;;  %v5704_v30 = vld [vmem:[%s7504_s1 + $0x138] sm:$0xff]   ;;  %v313_v35 = vcombine.low %v4767_v32, %v4768_v33  ;;  %v314_v36 = vcombine.high %v4767_v32, %v4768_v33  ;;  %v6025_v38 = vld.sshfl [vmem:[%s6010_s6 + $0x20] sm:$0xff pattern:$0x76325410] }
  0x19   : > { %5092 = vmatpush3.bf16.msra.mxu0 %v5684_v10  ;;  %v5701_v27 = vld [vmem:[%s7504_s1 + $0x1b0] sm:$0xff]   ;;  %v5705_v31 = vld [vmem:[%s7504_s1 + $0x1b8] sm:$0xff]   ;;  %v4772_v39 = vld.sshfl [vmem:[%s6010_s6 + $0x28] sm:$0xff pattern:$0x76325410] }
  0x1a   : > { %5162 = vmatpush3.bf16.msra.mxu1 %v5685_v11  ;;  %5093 = vmatprep.subr.bf16.mxu0 %v5686_v12  ;;  %v6021_v34 = vld.sshfl [vmem:[%s6010_s6 + $0x10] sm:$0x5f pattern:$0x76325410]  ;;  %v344_v43 = vcombine.low %v6025_v38, %v4772_v39  ;;  %v6032_v44 = vcombine.high %v6025_v38, %v4772_v39  ;;  %vm749_vm2 = vmor %vm747_vm0, %vm748_vm1  ;;  %v755_v45 = vshrl.u32 %v313_v35, 16  ;;  %v758_v46 = vshll.u32 %v313_v35, 16 }
  0x1b   : > { %5163 = vmatprep.subr.bf16.mxu1 %v5687_v13  ;;  %v4770_v37 = vld.sshfl [vmem:[%s6010_s6 + $0x18] sm:$0x5f pattern:$0x76325410]  ;;  %v764_v47 = vshll.u32 %v314_v36, 16  ;;  %v768_v48 = vshrl.u32 %v314_v36, 16  ;;  %vm751_vm5 = vmor %vm749_vm2, %vm750_vm3 }
  0x1c   : > { %v329_v40 = vcombine.low %v6021_v34, %v4770_v37  ;;  %v735_v41 = vcombine.high %v6021_v34, %v4770_v37  ;;  %v789_v52 = vshrl.u32 %v344_v43, 16  ;;  %v5706_v53 = vld [vmem:[%s7504_s1 + $0x40] sm:$0xff]   ;;  %v757_v55 = vrot.slane %v755_v45, 6  ;;  %vm6042_vm6 = vmor %vm751_vm5, %vm752_vm4 }
  0x1d   : > { %5094 = vmatpush3.bf16.msra.mxu0 %v5688_v14  ;;  %v5707_v54 = vld [vmem:[%s7504_s1 + $0xc0] sm:$0xff]   ;;  %v760_v56 = vrot.slane %v758_v46, 7  ;;  %v766_v57 = vrot.slane %v764_v47, 7  ;;  %v770_v58 = vrot.slane %v768_v48, 6  ;;  %v792_v0 = vshll.u32 %v344_v43, 16 }
  0x1e   : > { %5164 = vmatpush3.bf16.msra.mxu1 %v5689_v15  ;;  %5095 = vmatprep.subr.bf16.mxu0 %v5690_v16  ;;  %v774_v49 = vshll.u32 %v329_v40, 16  ;;  %v778_v50 = vshrl.u32 %v329_v40, 16  ;;  %v784_v51 = vshll.u32 %v735_v41, 16  ;;  %v791_v61 = vrot.slane %v789_v52, 6 }
  0x1f   : > { %5165 = vmatprep.subr.bf16.mxu1 %v5691_v17  ;;  %v761_v62 = vor.u32 %v760_v56, %v757_v55  ;;  %v771_v63 = vor.u32 %v770_v58, %v766_v57  ;;  %v798_v1 = vshll.u32 %v6032_v44, 16  ;;  %v802_v5 = vshrl.u32 %v6032_v44, 16  ;;  %v4775_v15 = vld.sshfl [vmem:[%s6010_s6 + $0x40] sm:$0xff pattern:$0x76325410] }
  0x20   : > { %v776_v59 = vrot.slane %v774_v49, 7  ;;  %v780_v60 = vrot.slane %v778_v50, 6  ;;  %v786_v4 = vrot.slane %v784_v51, 7  ;;  %v794_v8 = vrot.slane %v792_v0, 7 }
  0x21   : > { %5096 = vmatpush3.bf16.msra.mxu0 %v5692_v18  ;;  %v762_v6 = vrot.slane %v761_v62, 2  ;;  %v772_v7 = vrot.slane %v771_v63, 2  ;;  %v800_v11 = vrot.slane %v798_v1, 7  ;;  %v804_v12 = vrot.slane %v802_v5, 6 }
  0x22   : > { %5166 = vmatpush3.bf16.msra.mxu1 %v5693_v19  ;;  %5097 = vmatprep.subr.bf16.mxu0 %v5694_v20  ;;  %v781_v3 = vor.u32 %v780_v60, %v776_v59  ;;  %v5871_v13 = vmov 1983009808   ;;  %v795_v18 = vor.u32 %v794_v8, %v791_v61  ;;  %v4773_v19 = vld.sshfl [vmem:[%s6010_s6 + $0x30] sm:$0x5f pattern:$0x76325410] }
  0x23   : > { %5167 = vmatprep.subr.bf16.mxu1 %v5695_v21  ;;  %v1231_v14 = vunpack.c.l.s4 %v5871_v13  ;;  %v767_v16 = vsel %vm6042_vm6, %v762_v6, %v766_v57  ;;  %v777_v17 = vsel %vm6042_vm6, %v772_v7, %v776_v59  ;;  %v805_v21 = vor.u32 %v804_v12, %v800_v11  ;;  %v6062_v32 = vld.sshfl [vmem:[%s6010_s6 + $0x50] sm:$0x5f pattern:$0x76325410]  ;;  %v5710_v61 = vld [vmem:[%s7504_s1 + $0x48] sm:$0xff]  }
  0x24   : > { %v782_v10 = vrot.slane %v781_v3, 2  ;;  %v6071_v37 = vld.sshfl [vmem:[%s6010_s6 + $0x58] sm:$0x5f pattern:$0x76325410]  ;;  %v5712_v12 = vld [vmem:[%s7504_s1 + $0x8] sm:$0xff]  }
  0x25   : > { %5098 = vmatpush3.bf16.msra.mxu0 %v5696_v22  ;;  %v1226_v22 = vcombine.low %v767_v16, %v777_v17  ;;  %v6083_v47 = vcombine.low %v6062_v32, %v6071_v37  ;;  %v4779_v62 = vld.sshfl [vmem:[%s6010_s6 + $0x60] sm:$0xff pattern:$0x76325410]  ;;  %v4780_v5 = vld.sshfl [vmem:[%s6010_s6 + $0x68] sm:$0xff pattern:$0x76325410] }
  0x26   : > { %5168 = vmatpush3.bf16.msra.mxu1 %v5697_v23  ;;  %5099 = vmatprep.subr.bf16.mxu0 %v5698_v24  ;;  %v787_v20 = vsel %vm6042_vm6, %v782_v10, %v786_v4  ;;  %v1232_v23 = vunpack.c.0.s8 %v1231_v14  ;;  %v4774_v24 = vld.sshfl [vmem:[%s6010_s6 + $0x38] sm:$0x5f pattern:$0x76325410]  ;;  %v5711_v4 = vld [vmem:[%s7504_s1 + $0xc8] sm:$0xff]  }
  0x27   : > { %5169 = vmatprep.subr.bf16.mxu1 %v5699_v25  ;;  %v796_v25 = vrot.slane %v795_v18, 2  ;;  %v5713_v13 = vld [vmem:[%s7504_s1 + $0x88] sm:$0xff]   ;;  %v4781_v14 = vld.sshfl [vmem:[%s6010_s6 + $0x70] sm:$0x5f pattern:$0x76325410] }
  0x29   : > { %5100 = vmatpush3.bf16.msra.mxu0 %v5700_v26  ;;  %v1227_v26 = vcombine.high %v767_v16, %v777_v17  ;;  %v6068_v36 = vsel %vm6042_vm6, %v796_v25, %v800_v11  ;;  %v842_v11 = vshll.u32 %v6083_v47, 16  ;;  %v6115_v16 = vcombine.high %v4779_v62, %v4780_v5 }
  0x2a   : > { %5170 = vmatpush3.bf16.msra.mxu1 %v5701_v27  ;;  %5101 = vmatprep.subr.bf16.mxu0 %v5702_v28  ;;  %v4776_v27 = vld.sshfl [vmem:[%s6010_s6 + $0x48] sm:$0xff pattern:$0x76325410]  ;;  %v6057_v28 = vcombine.low %v4773_v19, %v4774_v24  ;;  %7578 = vst [vmem:[#allocation2_spill] sm:$0xff] %v6068_v36  ;;  %v1228_v42 = vcombine.low %v787_v20, %v6068_v36 }
  0x2b   : > { %5171 = vmatprep.subr.bf16.mxu1 %v5703_v29  ;;  %v736_v29 = vcombine.high %v4773_v19, %v4774_v24  ;;  %v375_v33 = vcombine.low %v4775_v15, %v4776_v27  ;;  %v6073_v39 = vcombine.high %v4775_v15, %v4776_v27  ;;  %v1229_v45 = vcombine.high %v787_v20, %v6068_v36  ;;  %v4782_v19 = vld.sshfl [vmem:[%s6010_s6 + $0x78] sm:$0x5f pattern:$0x76325410] }
  0x2c   : > { %v808_v40 = vshll.u32 %v6057_v28, 16  ;;  %v812_v41 = vshrl.u32 %v6057_v28, 16  ;;  %v406_v15 = vcombine.low %v4779_v62, %v4780_v5  ;;  %v737_v20 = vcombine.high %v6062_v32, %v6071_v37 }
  0x2d   : > { %5102 = vmatpush3.bf16.msra.mxu0 %v5704_v30  ;;  %v806_v30 = vrot.slane %v805_v21, 2  ;;  %v818_v50 = vshll.u32 %v736_v29, 16  ;;  %v823_v55 = vshrl.u32 %v375_v33, 16  ;;  %v826_v56 = vshll.u32 %v375_v33, 16 }
  0x2e   : > { %5172 = vmatpush3.bf16.msra.mxu1 %v5705_v31  ;;  %5227 = vmatprep.subr.bf16.mxu0 %v5706_v53  ;;  %v6059_v31 = vsub.s32 %v1232_v23, %v1234_v9  ;;  %v810_v48 = vrot.slane %v808_v40, 7  ;;  %v814_v49 = vrot.slane %v812_v41, 6  ;;  %v5708_v53 = vld [vmem:[%s7504_s1] sm:$0xff]   ;;  %v832_v60 = vshll.u32 %v6073_v39, 16  ;;  %v5715_v23 = vld [vmem:[%s7504_s1 + $0xd0] sm:$0xff]  }
  0x2f   : > { %5297 = vmatprep.subr.bf16.mxu1 %v5707_v54  ;;  %v5709_v54 = vld [vmem:[%s7504_s1 + $0x80] sm:$0xff]   ;;  %v820_v59 = vrot.slane %v818_v50, 7  ;;  %v825_v7 = vrot.slane %v823_v55, 6  ;;  %v828_v8 = vrot.slane %v826_v56, 7  ;;  %v836_v10 = vshrl.u32 %v6073_v39, 16  ;;  %v5717_v50 = vld [vmem:[%s7504_s1 + $0x90] sm:$0xff]  }
  0x30   : > { %v1236_v43 = vrot.slane %v1226_v22, %v6059_v31  ;;  %v1243_v46 = vrot.slane %v1227_v26, %v6059_v31  ;;  %v1250_v51 = vrot.slane %v1228_v42, %v6059_v31  ;;  %v1257_v52 = vrot.slane %v1229_v45, %v6059_v31  ;;  %v5714_v22 = vld [vmem:[%s7504_s1 + $0x50] sm:$0xff]   ;;  %v4783_v56 = vld.sshfl [vmem:[%s6010_s6 + $0x80] sm:$0xff pattern:$0x76325410] }
  0x31   : > { %v6095_v57 = vsel %vm6042_vm6, %v806_v30, %v810_v48  ;;  %v815_v58 = vor.u32 %v814_v49, %v810_v48  ;;  %v834_v9 = vrot.slane %v832_v60, 7  ;;  %v829_v18 = vor.u32 %v828_v8, %v825_v7  ;;  %v5716_v49 = vld [vmem:[%s7504_s1 + $0x10] sm:$0xff]  }
  0x32   : > { %7579 = vst [vmem:[#allocation3_spill] sm:$0xff] %v6095_v57  ;;  %v1259_v63 = vcombine.high %v1236_v43, %v1250_v51  ;;  %v1261_v0 = vcombine.high %v1243_v46, %v1257_v52  ;;  %v1258_v1 = vcombine.low %v1236_v43, %v1250_v51  ;;  %v1260_v3 = vcombine.low %v1243_v46, %v1257_v52  ;;  %v5718_v51 = vld [vmem:[%s7504_s1 + $0x58] sm:$0xff]   ;;  %v6175_v8 = vld.sshfl [vmem:[%s6010_s6 + $0x90] sm:$0x5f pattern:$0x76325410] }
  0x33   : > { %v816_v6 = vrot.slane %v815_v58, 2  ;;  %v846_v21 = vshrl.u32 %v6083_v47, 16  ;;  %v838_v24 = vrot.slane %v836_v10, 6  ;;  %v844_v25 = vrot.slane %v842_v11, 7 }
  0x34   : > { %1810 = vmatprep.mubr.bf16.mxu0 %v1259_v63  ;;  %1915 = vmatprep.mubr.bf16.mxu1 %v1261_v0  ;;  %v830_v29 = vrot.slane %v829_v18, 2  ;;  %v6135_v30 = vcombine.low %v4781_v14, %v4782_v19  ;;  %v738_v32 = vcombine.high %v4781_v14, %v4782_v19  ;;  %v852_v42 = vshll.u32 %v737_v20, 16  ;;  %v4786_v19 = vld.sshfl [vmem:[%s6010_s6 + $0x98] sm:$0x5f pattern:$0x76325410] }
  0x35   : > { %1811 = vmatmul.mubr.bf16.vlgmr.msra.gmra.mrb[0].mxu0 %v1258_v1  ;;  %1916 = vmatmul.mubr.bf16.vlgmr.msra.gmra.mrb[0].mxu1 %v1260_v3  ;;  %v6119_v17 = vsel %vm6042_vm6, %v816_v6, %v820_v59  ;;  %v848_v33 = vrot.slane %v846_v21, 6  ;;  %v839_v37 = vor.u32 %v838_v24, %v834_v9  ;;  %v857_v46 = vshrl.u32 %v406_v15, 16  ;;  %v4784_v3 = vld.sshfl [vmem:[%s6010_s6 + $0x88] sm:$0xff pattern:$0x76325410]  ;;  %v5719_v21 = vld [vmem:[%s7504_s1 + $0xd8] sm:$0xff]  }
  0x36   : > { %7580 = vst [vmem:[#allocation4_spill] sm:$0xff] %v6119_v17  ;;  %5228 = vmatpush3.bf16.msra.mxu0 %v5708_v53  ;;  %5298 = vmatpush3.bf16.msra.mxu1 %v5709_v54  ;;  %v1262_v26 = vcombine.low %v6095_v57, %v6119_v17  ;;  %v1263_v27 = vcombine.high %v6095_v57, %v6119_v17  ;;  %v860_v48 = vshll.u32 %v406_v15, 16  ;;  %v854_v53 = vrot.slane %v852_v42, 7 }
  0x37   : > { %5229 = vmatprep.subr.bf16.mxu0 %v5710_v61  ;;  %5299 = vmatprep.subr.bf16.mxu1 %v5711_v4  ;;  %v6145_v43 = vsel %vm6042_vm6, %v830_v29, %v834_v9  ;;  %v849_v45 = vor.u32 %v848_v33, %v844_v25  ;;  %v840_v52 = vrot.slane %v839_v37, 2  ;;  %v866_v54 = vshll.u32 %v6115_v16, 16 }
  0x38   : > { %v6138_v40 = vrot.slane %v1262_v26, %v6059_v31  ;;  %v6141_v41 = vrot.slane %v1263_v27, %v6059_v31  ;;  %7581 = vst [vmem:[#allocation5_spill] sm:$0xff] %v6145_v43  ;;  %v870_v55 = vshrl.u32 %v6115_v16, 16  ;;  %v859_v59 = vrot.slane %v857_v46, 6  ;;  %v5720_v27 = vld [vmem:[%s7504_s1 + $0x18] sm:$0xff]  }
  0x39   : > { %v850_v58 = vrot.slane %v849_v45, 2  ;;  %v862_v60 = vrot.slane %v860_v48, 7  ;;  %v876_v61 = vshll.u32 %v6135_v30, 16  ;;  %v6162_v62 = vsel %vm6042_vm6, %v840_v52, %v844_v25  ;;  %v4788_v25 = vld.sshfl [vmem:[%s6010_s6 + $0xa8] sm:$0xff pattern:$0x76325410] }
  0x3a   : > { %5230 = vmatpush3.bf16.msra.mxu0 %v5712_v12  ;;  %5300 = vmatpush3.bf16.msra.mxu1 %v5713_v13  ;;  %7582 = vst [vmem:[#allocation6_spill] sm:$0xff] %v6162_v62  ;;  %v868_v63 = vrot.slane %v866_v54, 7  ;;  %v872_v0 = vrot.slane %v870_v55, 6  ;;  %v880_v1 = vshrl.u32 %v6135_v30, 16  ;;  %v1264_v4 = vcombine.low %v6145_v43, %v6162_v62  ;;  %v5722_v52 = vld [vmem:[%s7504_s1 + $0x60] sm:$0xff]  }
  0x3b   : > { %5231 = vmatprep.subr.bf16.mxu0 %v5714_v22  ;;  %5301 = vmatprep.subr.bf16.mxu1 %v5715_v23  ;;  %v1265_v5 = vcombine.high %v6145_v43, %v6162_v62  ;;  %v6172_v6 = vsel %vm6042_vm6, %v850_v58, %v854_v53  ;;  %v863_v7 = vor.u32 %v862_v60, %v859_v59  ;;  %v878_v10 = vrot.slane %v876_v61, 7  ;;  %v4787_v13 = vld.sshfl [vmem:[%s6010_s6 + $0xa0] sm:$0xff pattern:$0x76325410] }
  0x3c   : > { %7583 = vst [vmem:[#allocation7_spill] sm:$0xff] %v6172_v6  ;;  %v873_v9 = vor.u32 %v872_v0, %v868_v63  ;;  %v882_v11 = vrot.slane %v880_v1, 6  ;;  %v886_v12 = vshll.u32 %v738_v32, 16  ;;  %v1286_v14 = vrot.slane %v1264_v4, %v6059_v31  ;;  %v5723_v58 = vld [vmem:[%s7504_s1 + $0xe0] sm:$0xff]  }
  0x3d   : > { %v1293_v15 = vrot.slane %v1265_v5, %v6059_v31  ;;  %v864_v18 = vrot.slane %v863_v7, 2  ;;  %v437_v20 = vcombine.low %v4783_v56, %v4784_v3  ;;  %v6185_v26 = vcombine.high %v4783_v56, %v4784_v3  ;;  %v6524_v62 = vld.sshfl [vmem:[%s6010_s6 + $0x170] sm:$0x5f pattern:$0x76325410] }
  0x3e   : > { %5232 = vmatpush3.bf16.msra.mxu0 %v5716_v49  ;;  %5302 = vmatpush3.bf16.msra.mxu1 %v5717_v50  ;;  %v874_v22 = vrot.slane %v873_v9, 2  ;;  %v883_v23 = vor.u32 %v882_v11, %v878_v10  ;;  %v888_v24 = vrot.slane %v886_v12, 7  ;;  %v1295_v29 = vcombine.high %v6138_v40, %v1286_v14  ;;  %v4790_v11 = vld.sshfl [vmem:[%s6010_s6 + $0xb8] sm:$0x5f pattern:$0x76325410] }
  0x3f   : > { %5233 = vmatprep.subr.bf16.mxu0 %v5718_v51  ;;  %v1297_v32 = vcombine.high %v6141_v41, %v1293_v15  ;;  %v1294_v33 = vcombine.low %v6138_v40, %v1286_v14  ;;  %v1296_v37 = vcombine.low %v6141_v41, %v1293_v15  ;;  %5303 = vmatprep.subr.bf16.mxu1 %v5719_v21  ;;  %v5721_v40 = vld [vmem:[%s7504_s1 + $0x98] sm:$0xff]   ;;  %v891_v51 = vshrl.u32 %v437_v20, 16 }
  0x40   : > { %v6196_v42 = vsel %vm6042_vm6, %v864_v18, %v868_v63  ;;  %v6200_v45 = vsel %vm6042_vm6, %v874_v22, %v878_v10  ;;  %v884_v46 = vrot.slane %v883_v23, 2  ;;  %v6203_v48 = vcombine.low %v6175_v8, %v4786_v19  ;;  %1818 = vmatprep.mubr.bf16.mxu0 %v1295_v29  ;;  %v4789_v10 = vld.sshfl [vmem:[%s6010_s6 + $0xb0] sm:$0x5f pattern:$0x76325410] }
  0x41   : > { %7584 = vst [vmem:[#allocation8_spill] sm:$0xff] %v6196_v42  ;;  %7585 = vst [vmem:[#allocation9_spill] sm:$0xff] %v6200_v45  ;;  %1923 = vmatprep.mubr.bf16.mxu1 %v1297_v32  ;;  %v1298_v41 = vcombine.low %v6172_v6, %v6196_v42  ;;  %v1299_v49 = vcombine.high %v6172_v6, %v6196_v42  ;;  %v468_v50 = vcombine.low %v4787_v13, %v4788_v25  ;;  %v4791_v18 = vld.sshfl [vmem:[%s6010_s6 + $0xc0] sm:$0xff pattern:$0x76325410] }
  0x42   : > { %5234 = vmatpush3.bf16.msra.mxu0 %v5720_v27  ;;  %1924 = vmatmul.mubr.bf16.gmra.mrb[4].mxu1 %v1296_v37  ;;  %v6217_v53 = vsel %vm6042_vm6, %v884_v46, %v888_v24  ;;  %v6219_v54 = vcombine.high %v4787_v13, %v4788_v25  ;;  %v739_v55 = vcombine.high %v6175_v8, %v4786_v19  ;;  %v894_v56 = vshll.u32 %v437_v20, 16  ;;  %v4792_v19 = vld.sshfl [vmem:[%s6010_s6 + $0xc8] sm:$0xff pattern:$0x76325410]  ;;  %v5724_v20 = vld [vmem:[%s7504_s1 + $0x20] sm:$0xff]  }
  0x43   : > { %1819 = vmatmul.mubr.bf16.gmra.mrb[4].mxu0 %v1294_v33  ;;  %7586 = vst [vmem:[#allocation10_spill] sm:$0xff] %v6217_v53  ;;  %v1300_v59 = vcombine.low %v6200_v45, %v6217_v53  ;;  %v1308_v60 = vrot.slane %v1298_v41, %v6059_v31  ;;  %v1301_v61 = vcombine.high %v6200_v45, %v6217_v53  ;;  %v893_v0 = vrot.slane %v891_v51, 6  ;;  %v6245_v25 = vld.sshfl [vmem:[%s6010_s6 + $0xd0] sm:$0x5f pattern:$0x76325410] }
  0x44   : > { %v1315_v63 = vrot.slane %v1299_v49, %v6059_v31  ;;  %5304 = vmatpush3.bf16.msra.mxu1 %v5721_v40  ;;  %v896_v1 = vrot.slane %v894_v56, 7  ;;  %v900_v3 = vshll.u32 %v6185_v26, 16  ;;  %v904_v4 = vshrl.u32 %v6185_v26, 16  ;;  %5235 = vmatprep.subr.bf16.mxu0 %v5722_v52  ;;  %v5725_v46 = vld [vmem:[%s7504_s1 + $0xa0] sm:$0xff]  }
  0x45   : > { %5305 = vmatprep.subr.bf16.mxu1 %v5723_v58  ;;  %v1322_v5 = vrot.slane %v1300_v59, %v6059_v31  ;;  %v1329_v7 = vrot.slane %v1301_v61, %v6059_v31  ;;  %v910_v8 = vshll.u32 %v6203_v48, 16  ;;  %v914_v9 = vshrl.u32 %v6203_v48, 16  ;;  %v6248_v27 = vld.sshfl [vmem:[%s6010_s6 + $0xd8] sm:$0x5f pattern:$0x76325410] }
  0x46   : > { %v897_v12 = vor.u32 %v896_v1, %v893_v0  ;;  %v902_v13 = vrot.slane %v900_v3, 7  ;;  %v906_v14 = vrot.slane %v904_v4, 6  ;;  %v920_v15 = vshll.u32 %v739_v55, 16  ;;  %5236 = vmatpush3.bf16.msra.mxu0 %v5724_v20  ;;  %v5726_v59 = vld [vmem:[%s7504_s1 + $0x68] sm:$0xff]  }
  0x47   : > { %v1331_v21 = vcombine.high %v1308_v60, %v1322_v5  ;;  %v1333_v22 = vcombine.high %v1315_v63, %v1329_v7  ;;  %v1330_v23 = vcombine.low %v1308_v60, %v1322_v5  ;;  %v1332_v24 = vcombine.low %v1315_v63, %v1329_v7  ;;  %v5727_v0 = vld [vmem:[%s7504_s1 + $0xe8] sm:$0xff]   ;;  %5237 = vmatprep.subr.bf16.mxu0 %v5726_v59  ;;  %v4814_v6 = vld.sshfl [vmem:[%s6010_s6 + $0x178] sm:$0x5f pattern:$0x76325410] }
  0x48   : > { %v898_v29 = vrot.slane %v897_v12, 2  ;;  %v907_v32 = vor.u32 %v906_v14, %v902_v13  ;;  %v912_v33 = vrot.slane %v910_v8, 7  ;;  %v916_v37 = vrot.slane %v914_v9, 6  ;;  %5306 = vmatpush3.bf16.msra.mxu1 %v5725_v46 }
  0x49   : > { %1826 = vmatprep.mubr.bf16.mxu0 %v1331_v21  ;;  %1931 = vmatprep.mubr.bf16.mxu1 %v1333_v22  ;;  %v922_v40 = vrot.slane %v920_v15, 7  ;;  %v925_v41 = vshrl.u32 %v468_v50, 16  ;;  %v928_v49 = vshll.u32 %v468_v50, 16  ;;  %v934_v51 = vshll.u32 %v6219_v54, 16 }
  0x4a   : > { %1932 = vmatmul.mubr.bf16.gmra.mrb[8].mxu1 %v1332_v24  ;;  %v6256_v52 = vsel %vm6042_vm6, %v898_v29, %v902_v13  ;;  %v908_v55 = vrot.slane %v907_v32, 2  ;;  %v917_v56 = vor.u32 %v916_v37, %v912_v33  ;;  %v6258_v58 = vcombine.low %v4789_v10, %v4790_v11  ;;  %5307 = vmatprep.subr.bf16.mxu1 %v5727_v0  ;;  %v5728_v13 = vld [vmem:[%s7504_s1 + $0x28] sm:$0xff]  }
  0x4b   : > { %1827 = vmatmul.mubr.bf16.gmra.mrb[8].mxu0 %v1330_v23  ;;  %7587 = vst [vmem:[#allocation11_spill] sm:$0xff] %v6256_v52  ;;  %v927_v60 = vrot.slane %v925_v41, 6  ;;  %v930_v61 = vrot.slane %v928_v49, 7  ;;  %v936_v63 = vrot.slane %v934_v51, 7  ;;  %v499_v50 = vcombine.low %v4791_v18, %v4792_v19  ;;  %v5730_v49 = vld [vmem:[%s7504_s1 + $0x70] sm:$0xff]  }
  0x4c   : > { %v6268_v1 = vsel %vm6042_vm6, %v908_v55, %v912_v33  ;;  %v918_v3 = vrot.slane %v917_v56, 2  ;;  %v6270_v4 = vcombine.high %v4791_v18, %v4792_v19  ;;  %v6274_v5 = vcombine.low %v6245_v25, %v6248_v27  ;;  %5238 = vmatpush3.bf16.msra.mxu0 %v5728_v13  ;;  %v4795_v33 = vld.sshfl [vmem:[%s6010_s6 + $0xe0] sm:$0xff pattern:$0x76325410] }
  0x4d   : > { %7588 = vst [vmem:[#allocation12_spill] sm:$0xff] %v6268_v1  ;;  %v931_v7 = vor.u32 %v930_v61, %v927_v60  ;;  %v1334_v8 = vcombine.low %v6256_v52, %v6268_v1  ;;  %v1335_v9 = vcombine.high %v6256_v52, %v6268_v1  ;;  %v740_v12 = vcombine.high %v4789_v10, %v4790_v11  ;;  %v5729_v10 = vld [vmem:[%s7504_s1 + $0xa8] sm:$0xff]   ;;  %v6313_v13 = vld.sshfl [vmem:[%s6010_s6 + $0xf0] sm:$0x5f pattern:$0x76325410] }
  0x4e   : > { %7589 = vst [vmem:[#allocation13_spill] sm:$0xff] %v6274_v5  ;;  %v6285_v14 = vsel %vm6042_vm6, %v918_v3, %v922_v40  ;;  %v938_v15 = vshrl.u32 %v6219_v54, 16  ;;  %v944_v18 = vshll.u32 %v6258_v58, 16  ;;  %v948_v19 = vshrl.u32 %v6258_v58, 16  ;;  %5308 = vmatpush3.bf16.msra.mxu1 %v5729_v10  ;;  %5239 = vmatprep.subr.bf16.mxu0 %v5730_v49  ;;  %v5731_v10 = vld [vmem:[%s7504_s1 + $0xf0] sm:$0xff]  }
  0x4f   : > { %7590 = vst [vmem:[#allocation14_spill] sm:$0xff] %v6285_v14  ;;  %v932_v11 = vrot.slane %v931_v7, 2  ;;  %v1344_v20 = vrot.slane %v1334_v8, %v6059_v31  ;;  %v1351_v21 = vrot.slane %v1335_v9, %v6059_v31  ;;  %v954_v22 = vshll.u32 %v740_v12, 16  ;;  %v4796_v60 = vld.sshfl [vmem:[%s6010_s6 + $0xe8] sm:$0xff pattern:$0x76325410]  ;;  %5309 = vmatprep.subr.bf16.mxu1 %v5731_v10 }
  0x50   : > { %v940_v23 = vrot.slane %v938_v15, 6  ;;  %v946_v24 = vrot.slane %v944_v18, 7  ;;  %v950_v29 = vrot.slane %v948_v19, 6  ;;  %v959_v32 = vshrl.u32 %v499_v50, 16 }
  0x51   : > { %v6298_v37 = vsel %vm6042_vm6, %v932_v11, %v936_v63  ;;  %v956_v46 = vrot.slane %v954_v22, 7  ;;  %v962_v40 = vshll.u32 %v499_v50, 16  ;;  %v968_v41 = vshll.u32 %v6270_v4, 16 }
  0x52   : > { %7591 = vst [vmem:[#allocation15_spill] sm:$0xff] %v6298_v37  ;;  %v1336_v51 = vcombine.low %v6285_v14, %v6298_v37  ;;  %v1337_v55 = vcombine.high %v6285_v14, %v6298_v37  ;;  %v941_v56 = vor.u32 %v940_v23, %v936_v63  ;;  %v951_v59 = vor.u32 %v950_v29, %v946_v24 }
  0x53   : > { %v961_v61 = vrot.slane %v959_v32, 6  ;;  %v964_v0 = vrot.slane %v962_v40, 7  ;;  %v970_v3 = vrot.slane %v968_v41, 7  ;;  %v972_v50 = vshrl.u32 %v6270_v4, 16 }
  0x54   : > { %v1358_v7 = vrot.slane %v1336_v51, %v6059_v31  ;;  %v1365_v8 = vrot.slane %v1337_v55, %v6059_v31  ;;  %v942_v9 = vrot.slane %v941_v56, 2  ;;  %v952_v12 = vrot.slane %v951_v59, 2  ;;  %v6320_v32 = vld.sshfl [vmem:[%s6010_s6 + $0xf8] sm:$0x5f pattern:$0x76325410] }
  0x55   : > { %v965_v15 = vor.u32 %v964_v0, %v961_v61  ;;  %v974_v18 = vrot.slane %v972_v50, 6  ;;  %v978_v63 = vshll.u32 %v6274_v5, 16  ;;  %v530_v19 = vcombine.low %v4795_v33, %v4796_v60  ;;  %v5732_v55 = vld [vmem:[%s7504_s1 + $0x30] sm:$0xff]  }
  0x56   : > { %v1367_v11 = vcombine.high %v1344_v20, %v1358_v7  ;;  %v1369_v22 = vcombine.high %v1351_v21, %v1365_v8  ;;  %v1366_v23 = vcombine.low %v1344_v20, %v1358_v7  ;;  %v1368_v29 = vcombine.low %v1351_v21, %v1365_v8  ;;  %5240 = vmatpush3.bf16.msra.mxu0 %v5732_v55  ;;  %v6374_v55 = vld.sshfl [vmem:[%s6010_s6 + $0x110] sm:$0x5f pattern:$0x76325410] }
  0x57   : > { %v6324_v40 = vsel %vm6042_vm6, %v942_v9, %v946_v24  ;;  %v6328_v41 = vsel %vm6042_vm6, %v952_v12, %v956_v46  ;;  %v966_v49 = vrot.slane %v965_v15, 2  ;;  %v975_v51 = vor.u32 %v974_v18, %v970_v3  ;;  %v5733_v46 = vld [vmem:[%s7504_s1 + $0xb0] sm:$0xff]  }
  0x58   : > { %7592 = vst [vmem:[#allocation16_spill] sm:$0xff] %v6324_v40  ;;  %7593 = vst [vmem:[#allocation17_spill] sm:$0xff] %v6328_v41  ;;  %1834 = vmatprep.mubr.bf16.mxu0 %v1367_v11  ;;  %1939 = vmatprep.mubr.bf16.mxu1 %v1369_v22  ;;  %v980_v20 = vrot.slane %v978_v63, 7  ;;  %v1370_v21 = vcombine.low %v6324_v40, %v6328_v41  ;;  %v1371_v24 = vcombine.high %v6324_v40, %v6328_v41 }
  0x59   : > { %v6337_v56 = vcombine.high %v4795_v33, %v4796_v60  ;;  %1835 = vmatmul.mubr.bf16.gmra.mrb[12].mxu0 %v1366_v23  ;;  %1940 = vmatmul.mubr.bf16.gmra.mrb[12].mxu1 %v1368_v29  ;;  %v6344_v59 = vsel %vm6042_vm6, %v966_v49, %v970_v3  ;;  %v976_v61 = vrot.slane %v975_v51, 2  ;;  %v6348_v0 = vcombine.low %v6313_v13, %v6320_v32  ;;  %v5734_v3 = vld [vmem:[%s7504_s1 + $0x78] sm:$0xff]   ;;  %v4799_v29 = vld.sshfl [vmem:[%s6010_s6 + $0x100] sm:$0xff pattern:$0x76325410] }
  0x5a   : > { %7594 = vst [vmem:[#allocation18_spill] sm:$0xff] %v6344_v59  ;;  %v741_v50 = vcombine.high %v6245_v25, %v6248_v27  ;;  %v1380_v33 = vrot.slane %v1370_v21, %v6059_v31  ;;  %v1387_v60 = vrot.slane %v1371_v24, %v6059_v31  ;;  %v742_v7 = vcombine.high %v6313_v13, %v6320_v32  ;;  %v5735_v21 = vld [vmem:[%s7504_s1 + $0xf8] sm:$0xff]  }
  0x5b   : > { %v982_v8 = vshrl.u32 %v6274_v5, 16  ;;  %5310 = vmatpush3.bf16.msra.mxu1 %v5733_v46  ;;  %v6362_v9 = vsel %vm6042_vm6, %v976_v61, %v980_v20  ;;  %v993_v27 = vshrl.u32 %v530_v19, 16  ;;  %v996_v12 = vshll.u32 %v530_v19, 16  ;;  %5241 = vmatprep.subr.bf16.mxu0 %v5734_v3  ;;  %v6831_v5 = vld.sshfl [vmem:[%s6010_s6 + $0xe8] sm:$0xff pattern:$0x76325410] }
  0x5c   : > { %7595 = vst [vmem:[#allocation19_spill] sm:$0xff] %v6362_v9  ;;  %v988_v25 = vshll.u32 %v741_v50, 16  ;;  %v1372_v13 = vcombine.low %v6344_v59, %v6362_v9  ;;  %v1373_v15 = vcombine.high %v6344_v59, %v6362_v9  ;;  %v1002_v63 = vshll.u32 %v6337_v56, 16  ;;  %5311 = vmatprep.subr.bf16.mxu1 %v5735_v21  ;;  %v6392_v9 = vld.sshfl [vmem:[%s6010_s6 + $0x128] sm:$0xff pattern:$0x76325410] }
  0x5d   : > { %v984_v18 = vrot.slane %v982_v8, 6  ;;  %v995_v11 = vrot.slane %v993_v27, 6  ;;  %v998_v22 = vrot.slane %v996_v12, 7  ;;  %v1006_v23 = vshrl.u32 %v6337_v56, 16 }
  0x5e   : > { %v990_v10 = vrot.slane %v988_v25, 7  ;;  %v1394_v19 = vrot.slane %v1372_v13, %v6059_v31  ;;  %v1401_v32 = vrot.slane %v1373_v15, %v6059_v31  ;;  %v1004_v51 = vrot.slane %v1002_v63, 7  ;;  %v4800_v8 = vld.sshfl [vmem:[%s6010_s6 + $0x108] sm:$0xff pattern:$0x76325410] }
  0x5f   : > { %v985_v49 = vor.u32 %v984_v18, %v980_v20  ;;  %v999_v24 = vor.u32 %v998_v22, %v995_v11  ;;  %v1008_v46 = vrot.slane %v1006_v23, 6  ;;  %v1012_v61 = vshll.u32 %v6348_v0, 16  ;;  %v6383_v20 = vld.sshfl [vmem:[%s6010_s6 + $0x118] sm:$0x5f pattern:$0x76325410] }
  0x60   : > { %v1016_v50 = vshrl.u32 %v6348_v0, 16  ;;  %v1403_v3 = vcombine.high %v1380_v33, %v1394_v19  ;;  %v1405_v25 = vcombine.high %v1387_v60, %v1401_v32  ;;  %v1402_v27 = vcombine.low %v1380_v33, %v1394_v19  ;;  %v6386_v13 = vld.sshfl [vmem:[%s6010_s6 + $0x120] sm:$0xff pattern:$0x76325410]  ;;  %v5736_v22 = vld [vmem:[%s7504_s1 + $0x38] sm:$0xff]  }
  0x61   : > { %v1404_v12 = vcombine.low %v1387_v60, %v1401_v32  ;;  %v986_v15 = vrot.slane %v985_v49, 2  ;;  %v1000_v18 = vrot.slane %v999_v24, 2  ;;  %v1009_v63 = vor.u32 %v1008_v46, %v1004_v51  ;;  %5242 = vmatpush3.bf16.msra.mxu0 %v5736_v22  ;;  %v4806_v41 = vld.sshfl [vmem:[%s6010_s6 + $0x138] sm:$0x5f pattern:$0x76325410] }
  0x62   : > { %v1014_v11 = vrot.slane %v1012_v61, 7  ;;  %1842 = vmatprep.mubr.bf16.mxu0 %v1403_v3  ;;  %1947 = vmatprep.mubr.bf16.mxu1 %v1405_v25  ;;  %v1018_v23 = vrot.slane %v1016_v50, 6  ;;  %v1022_v35 = vshll.u32 %v742_v7, 16  ;;  %v561_v33 = vcombine.low %v4799_v29, %v4800_v8  ;;  %v6449_v59 = vld.sshfl [vmem:[%s6010_s6 + $0x148] sm:$0xff pattern:$0x76325410] }
  0x63   : > { %v6394_v60 = vcombine.high %v4799_v29, %v4800_v8  ;;  %1843 = vmatmul.mubr.bf16.gmra.mrb[16].mxu0 %v1402_v27  ;;  %1948 = vmatmul.mubr.bf16.gmra.mrb[16].mxu1 %v1404_v12  ;;  %v6398_v19 = vsel %vm6042_vm6, %v986_v15, %v990_v10  ;;  %v6402_v32 = vsel %vm6042_vm6, %v1000_v18, %v1004_v51  ;;  %v1010_v49 = vrot.slane %v1009_v63, 2 }
  0x64   : > { %7597 = vst [vmem:[#allocation21_spill] sm:$0xff] %v6398_v19  ;;  %7598 = vst [vmem:[#allocation22_spill] sm:$0xff] %v6402_v32  ;;  %v6406_v21 = vcombine.low %v6374_v55, %v6383_v20  ;;  %v1019_v7 = vor.u32 %v1018_v23, %v1014_v11  ;;  %v1024_v24 = vrot.slane %v1022_v35, 7  ;;  %v1406_v29 = vcombine.low %v6398_v19, %v6402_v32 }
  0x65   : > { %7596 = vst [vmem:[#allocation20_spill] sm:$0xff] %v6394_v60  ;;  %v1407_v46 = vcombine.high %v6398_v19, %v6402_v32  ;;  %v6414_v10 = vsel %vm6042_vm6, %v1010_v49, %v1014_v11  ;;  %v592_v51 = vcombine.low %v6386_v13, %v6392_v9  ;;  %v6420_v61 = vcombine.high %v6386_v13, %v6392_v9 }
  0x66   : > { %7599 = vst [vmem:[#allocation23_spill] sm:$0xff] %v6406_v21  ;;  %7600 = vst [vmem:[#allocation24_spill] sm:$0xff] %v6414_v10  ;;  %v743_v35 = vcombine.high %v6374_v55, %v6383_v20  ;;  %v1020_v50 = vrot.slane %v1019_v7, 2  ;;  %v1416_v8 = vrot.slane %v1406_v29, %v6059_v31  ;;  %v1027_v25 = vshrl.u32 %v561_v33, 16 }
  0x67   : > { %v1423_v3 = vrot.slane %v1407_v46, %v6059_v31  ;;  %v1030_v27 = vshll.u32 %v561_v33, 16  ;;  %v1036_v12 = vshll.u32 %v6394_v60, 16  ;;  %v1040_v15 = vshrl.u32 %v6394_v60, 16  ;;  %v5737_v33 = vld [vmem:[%s7504_s1 + $0xb8] sm:$0xff]  }
  0x68   : > { %v1046_v18 = vshll.u32 %v6406_v21, 16  ;;  %v6431_v63 = vsel %vm6042_vm6, %v1020_v50, %v1024_v24  ;;  %v1029_v11 = vrot.slane %v1027_v25, 6  ;;  %v1050_v22 = vshrl.u32 %v6406_v21, 16  ;;  %5312 = vmatpush3.bf16.msra.mxu1 %v5737_v33 }
  0x69   : > { %7601 = vst [vmem:[#allocation25_spill] sm:$0xff] %v6431_v63  ;;  %v1056_v23 = vshll.u32 %v743_v35, 16  ;;  %v1408_v49 = vcombine.low %v6414_v10, %v6431_v63  ;;  %v1409_v7 = vcombine.high %v6414_v10, %v6431_v63  ;;  %v1032_v29 = vrot.slane %v1030_v27, 7  ;;  %v6446_v35 = vld.sshfl [vmem:[%s6010_s6 + $0x140] sm:$0xff pattern:$0x76325410] }
  0x6a   : > { %v1038_v46 = vrot.slane %v1036_v12, 7  ;;  %v1042_v32 = vrot.slane %v1040_v15, 6  ;;  %v1048_v24 = vrot.slane %v1046_v18, 7  ;;  %v1052_v50 = vrot.slane %v1050_v22, 6  ;;  %v5738_v15 = vld [vmem:[%s7504_s1 + $0x240] sm:$0xff]  }
  0x6b   : > { %v1058_v19 = vrot.slane %v1056_v23, 7  ;;  %v6442_v25 = vld.sshfl [vmem:[%s6010_s6 + $0x130] sm:$0x5f pattern:$0x76325410]  ;;  %v1430_v37 = vrot.slane %v1408_v49, %v6059_v31  ;;  %v1437_v63 = vrot.slane %v1409_v7, %v6059_v31  ;;  %v1033_v27 = vor.u32 %v1032_v29, %v1029_v11  ;;  %5367 = vmatprep.subr.bf16.mxu0 %v5738_v15  ;;  %v5739_v11 = vld [vmem:[%s7504_s1 + $0x2c0] sm:$0xff]  }
  0x6c   : > { %v1061_v12 = vshrl.u32 %v592_v51, 16  ;;  %v1043_v18 = vor.u32 %v1042_v32, %v1038_v46  ;;  %v1053_v22 = vor.u32 %v1052_v50, %v1048_v24  ;;  %v1064_v23 = vshll.u32 %v592_v51, 16  ;;  %v6458_v33 = vld.sshfl [vmem:[%s6010_s6 + $0x150] sm:$0x5f pattern:$0x76325410]  ;;  %5437 = vmatprep.subr.bf16.mxu1 %v5739_v11 }
  0x6d   : > { %v1070_v10 = vshll.u32 %v6420_v61, 16  ;;  %v1439_v40 = vcombine.high %v1416_v8, %v1430_v37  ;;  %v1441_v1 = vcombine.high %v1423_v3, %v1437_v63  ;;  %v1438_v14 = vcombine.low %v1416_v8, %v1430_v37  ;;  %v6461_v49 = vld.sshfl [vmem:[%s6010_s6 + $0x158] sm:$0x5f pattern:$0x76325410] }
  0x6e   : > { %v1440_v53 = vcombine.low %v1423_v3, %v1437_v63  ;;  %v1034_v7 = vrot.slane %v1033_v27, 2  ;;  %v1044_v29 = vrot.slane %v1043_v18, 2  ;;  %v1054_v32 = vrot.slane %v1053_v22, 2 }
  0x6f   : > { %v1063_v50 = vrot.slane %v1061_v12, 6  ;;  %1850 = vmatprep.mubr.bf16.mxu0 %v1439_v40  ;;  %1955 = vmatprep.mubr.bf16.mxu1 %v1441_v1  ;;  %v1066_v51 = vrot.slane %v1064_v23, 7  ;;  %v1072_v52 = vrot.slane %v1070_v10, 7  ;;  %v6467_v37 = vcombine.low %v6442_v25, %v4806_v41 }
  0x70   : > { %v623_v8 = vcombine.low %v6446_v35, %v6449_v59  ;;  %1851 = vmatmul.mubr.bf16.gmra.mrb[20].mxu0 %v1438_v14  ;;  %1956 = vmatmul.mubr.bf16.gmra.mrb[20].mxu1 %v1440_v53  ;;  %v6473_v3 = vsel %vm6042_vm6, %v1034_v7, %v1038_v46  ;;  %v6477_v63 = vsel %vm6042_vm6, %v1044_v29, %v1048_v24  ;;  %v1074_v40 = vshrl.u32 %v6420_v61, 16  ;;  %v5802_v21 = vld.sshfl [vmem:[%s6010_s6 + $0x18] sm:$0x5f pattern:$0x76325410] }
  0x71   : > { %7602 = vst [vmem:[#allocation26_spill] sm:$0xff] %v6473_v3  ;;  %7603 = vst [vmem:[#allocation27_spill] sm:$0xff] %v6477_v63  ;;  %v6481_v1 = vsel %vm6042_vm6, %v1054_v32, %v1058_v19  ;;  %v1067_v10 = vor.u32 %v1066_v51, %v1063_v50  ;;  %v1442_v27 = vcombine.low %v6473_v3, %v6477_v63  ;;  %v1080_v12 = vshll.u32 %v6467_v37, 16  ;;  %v6502_v50 = vld.sshfl [vmem:[%s6010_s6 + $0x160] sm:$0xff pattern:$0x76325410] }
  0x72   : > { %7604 = vst [vmem:[#allocation28_spill] sm:$0xff] %v6481_v1  ;;  %v1443_v53 = vcombine.high %v6473_v3, %v6477_v63  ;;  %v6490_v14 = vcombine.high %v6446_v35, %v6449_v59  ;;  %v6494_v19 = vcombine.low %v6458_v33, %v6461_v49  ;;  %v744_v46 = vcombine.high %v6442_v25, %v4806_v41  ;;  %v6505_v51 = vld.sshfl [vmem:[%s6010_s6 + $0x168] sm:$0xff pattern:$0x76325410] }
  0x73   : > { %v1076_v24 = vrot.slane %v1074_v40, 6  ;;  %v1068_v15 = vrot.slane %v1067_v10, 2  ;;  %v1452_v18 = vrot.slane %v1442_v27, %v6059_v31  ;;  %v1084_v23 = vshrl.u32 %v6467_v37, 16 }
  0x74   : > { %7605 = vst [vmem:[#allocation29_spill] sm:$0xff] %v6490_v14  ;;  %7606 = vst [vmem:[#allocation30_spill] sm:$0xff] %v6494_v19  ;;  %v1459_v22 = vrot.slane %v1443_v53, %v6059_v31  ;;  %v1082_v29 = vrot.slane %v1080_v12, 7  ;;  %v1090_v32 = vshll.u32 %v744_v46, 16  ;;  %v1095_v11 = vshrl.u32 %v623_v8, 16 }
  0x75   : > { %v1077_v7 = vor.u32 %v1076_v24, %v1072_v52  ;;  %v6509_v41 = vsel %vm6042_vm6, %v1068_v15, %v1072_v52  ;;  %v1086_v40 = vrot.slane %v1084_v23, 6  ;;  %v1098_v10 = vshll.u32 %v623_v8, 16  ;;  %v5826_v60 = vld.sshfl [vmem:[%s6010_s6 + $0xd8] sm:$0x5f pattern:$0x76325410] }
  0x76   : > { %7607 = vst [vmem:[#allocation31_spill] sm:$0xff] %v6509_v41  ;;  %v1104_v27 = vshll.u32 %v6490_v14, 16  ;;  %v1444_v53 = vcombine.low %v6481_v1, %v6509_v41  ;;  %v1445_v46 = vcombine.high %v6481_v1, %v6509_v41  ;;  %v1092_v12 = vrot.slane %v1090_v32, 7 }
  0x77   : > { %v1078_v24 = vrot.slane %v1077_v7, 2  ;;  %v1087_v63 = vor.u32 %v1086_v40, %v1082_v29  ;;  %v1097_v3 = vrot.slane %v1095_v11, 6  ;;  %v1100_v42 = vrot.slane %v1098_v10, 7 }
  0x78   : > { %v1106_v45 = vrot.slane %v1104_v27, 7  ;;  %v1466_v52 = vrot.slane %v1444_v53, %v6059_v31  ;;  %v1473_v15 = vrot.slane %v1445_v46, %v6059_v31  ;;  %v1108_v23 = vshrl.u32 %v6490_v14, 16 }
  0x79   : > { %v6520_v8 = vsel %vm6042_vm6, %v1078_v24, %v1082_v29  ;;  %v1088_v41 = vrot.slane %v1087_v63, 2  ;;  %v1101_v7 = vor.u32 %v1100_v42, %v1097_v3  ;;  %v1114_v32 = vshll.u32 %v6494_v19, 16 }
  0x7a   : > { %7608 = vst [vmem:[#allocation32_spill] sm:$0xff] %v6520_v8  ;;  %v654_v11 = vcombine.low %v6502_v50, %v6505_v51  ;;  %v1475_v40 = vcombine.high %v1452_v18, %v1466_v52  ;;  %v1477_v10 = vcombine.high %v1459_v22, %v1473_v15  ;;  %v1474_v27 = vcombine.low %v1452_v18, %v1466_v52 }
  0x7b   : > { %v1476_v53 = vcombine.low %v1459_v22, %v1473_v15  ;;  %v6532_v29 = vsel %vm6042_vm6, %v1088_v41, %v1092_v12  ;;  %v1102_v46 = vrot.slane %v1101_v7, 2  ;;  %v1110_v24 = vrot.slane %v1108_v23, 6 }
  0x7c   : > { %7609 = vst [vmem:[#allocation33_spill] sm:$0xff] %v6532_v29  ;;  %v1116_v1 = vrot.slane %v1114_v32, 7  ;;  %1858 = vmatprep.mubr.bf16.mxu0 %v1475_v40  ;;  %1963 = vmatprep.mubr.bf16.mxu1 %v1477_v10  ;;  %v1478_v42 = vcombine.low %v6520_v8, %v6532_v29  ;;  %v1479_v3 = vcombine.high %v6520_v8, %v6532_v29  ;;  %v1118_v18 = vshrl.u32 %v6494_v19, 16 }
  0x7d   : > { %v6540_v63 = vcombine.high %v6502_v50, %v6505_v51  ;;  %1859 = vmatmul.mubr.bf16.gmra.mrb[24].mxu0 %v1474_v27  ;;  %1964 = vmatmul.mubr.bf16.gmra.mrb[24].mxu1 %v1476_v53  ;;  %v6545_v22 = vsel %vm6042_vm6, %v1102_v46, %v1106_v45  ;;  %v1111_v41 = vor.u32 %v1110_v24, %v1106_v45  ;;  %v1129_v52 = vshrl.u32 %v654_v11, 16 }
  0x7e   : > { %7610 = vst [vmem:[#allocation34_spill] sm:$0xff] %v6545_v22  ;;  %v6548_v12 = vcombine.low %v6524_v62, %v4814_v6  ;;  %v1488_v15 = vrot.slane %v1478_v42, %v6059_v31  ;;  %v1495_v23 = vrot.slane %v1479_v3, %v6059_v31  ;;  %v745_v7 = vcombine.high %v6458_v33, %v6461_v49 }
  0x7f   : > { %v746_v32 = vcombine.high %v6524_v62, %v4814_v6  ;;  %v1112_v40 = vrot.slane %v1111_v41, 2  ;;  %v1120_v10 = vrot.slane %v1118_v18, 6  ;;  %v1131_v27 = vrot.slane %v1129_v52, 6 }
  0x80   : > { %v1132_v53 = vshll.u32 %v654_v11, 16  ;;  %v1124_v46 = vshll.u32 %v745_v7, 16  ;;  %v1138_v45 = vshll.u32 %v6540_v63, 16  ;;  %v1142_v24 = vshrl.u32 %v6540_v63, 16 }
  0x81   : > { %v1148_v29 = vshll.u32 %v6548_v12, 16  ;;  %v6560_v42 = vsel %vm6042_vm6, %v1112_v40, %v1116_v1  ;;  %v1121_v3 = vor.u32 %v1120_v10, %v1116_v1  ;;  %v1152_v17 = vshrl.u32 %v6548_v12, 16 }
  0x82   : > { %7611 = vst [vmem:[#allocation35_spill] sm:$0xff] %v6560_v42  ;;  %v1134_v8 = vrot.slane %v1132_v53, 7  ;;  %v1480_v6 = vcombine.low %v6545_v22, %v6560_v42  ;;  %v1481_v11 = vcombine.high %v6545_v22, %v6560_v42  ;;  %v1126_v18 = vrot.slane %v1124_v46, 7  ;;  %v6575_v42 = vld.sshfl [vmem:[%s6010_s6 + $0x28] sm:$0xff pattern:$0x76325410] }
  0x83   : > { %v1140_v41 = vrot.slane %v1138_v45, 7  ;;  %v1122_v52 = vrot.slane %v1121_v3, 2  ;;  %v1144_v43 = vrot.slane %v1142_v24, 6  ;;  %v1150_v36 = vrot.slane %v1148_v29, 7 }
  0x84   : > { %v1135_v7 = vor.u32 %v1134_v8, %v1131_v27  ;;  %v1502_v40 = vrot.slane %v1480_v6, %v6059_v31  ;;  %v1509_v1 = vrot.slane %v1481_v11, %v6059_v31  ;;  %v1154_v10 = vrot.slane %v1152_v17, 6 }
  0x85   : > { %v1158_v53 = vshll.u32 %v746_v32, 16  ;;  %v6571_v57 = vsel %vm6042_vm6, %v1122_v52, %v1126_v18  ;;  %v1145_v14 = vor.u32 %v1144_v43, %v1140_v41  ;;  %v4848_v46 = vcombine.low %v5802_v21, %v6575_v42 }
  0x86   : > { %7612 = vst [vmem:[#allocation36_spill] sm:$0xff] %v6571_v57  ;;  %v1136_v19 = vrot.slane %v1135_v7, 2  ;;  %v1511_v8 = vcombine.high %v1488_v15, %v1502_v40  ;;  %v1513_v29 = vcombine.high %v1495_v23, %v1509_v1  ;;  %v1510_v27 = vcombine.low %v1488_v15, %v1502_v40 }
  0x87   : > { %v1512_v45 = vcombine.low %v1495_v23, %v1509_v1  ;;  %v1146_v32 = vrot.slane %v1145_v14, 2  ;;  %v1155_v24 = vor.u32 %v1154_v10, %v1150_v36  ;;  %v1160_v3 = vrot.slane %v1158_v53, 7  ;;  %v5804_v23 = vld.sshfl [vmem:[%s6010_s6] sm:$0xff pattern:$0x76325410] }
  0x88   : > { %v6580_v17 = vsel %vm6042_vm6, %v1136_v19, %v1140_v41  ;;  %1866 = vmatprep.mubr.bf16.mxu0 %v1511_v8  ;;  %1971 = vmatprep.mubr.bf16.mxu1 %v1513_v29  ;;  %v1998_v14 = vrot.slane %v5804_v23, %v6059_v31  ;;  %v7615_v11 = vcombine.low %v6021_v34, %v6025_v38  ;;  %v5805_v41 = vld.sshfl [vmem:[%s6010_s6 + $0x8] sm:$0xff pattern:$0x76325410] }
  0x89   : > { %7613 = vst [vmem:[#allocation37_spill] sm:$0xff] %v6580_v17  ;;  %v1514_v43 = vcombine.low %v6571_v57, %v6580_v17  ;;  %v1515_v21 = vcombine.high %v6571_v57, %v6580_v17  ;;  %1867 = vmatmul.mubr.bf16.gmra.mrb[28].mxu0 %v1510_v27  ;;  %1972 = vmatmul.mubr.bf16.gmra.mrb[28].mxu1 %v1512_v45  ;;  %v1156_v19 = vrot.slane %v1155_v24, 2 }
  0x8a   : > { %v6588_v15 = vsel %vm6042_vm6, %v1146_v32, %v1150_v36  ;;  %v2012_v18 = vrot.slane %v7615_v11, %v6059_v31  ;;  %v2005_v52 = vrot.slane %v5805_v41, %v6059_v31  ;;  %v2019_v36 = vrot.slane %v4848_v46, %v6059_v31  ;;  %v6612_v32 = vld.sshfl [vmem:[%s6010_s6 + $0x30] sm:$0x5f pattern:$0x76325410]  ;;  %v5740_v11 = vld [vmem:[%s7504_s1 + $0x200] sm:$0xff]  }
  0x8b   : > { %7614 = vst [vmem:[#allocation38_spill] sm:$0xff] %v6588_v15  ;;  %v6594_v6 = vsel %vm6042_vm6, %v1156_v19, %v1160_v3  ;;  %v1524_v40 = vrot.slane %v1514_v43, %v6059_v31  ;;  %v1531_v10 = vrot.slane %v1515_v21, %v6059_v31  ;;  %v4849_v24 = vcombine.low %v6032_v44, %v6612_v32  ;;  %v6620_v21 = vld.sshfl [vmem:[%s6010_s6 + $0x40] sm:$0xff pattern:$0x76325410] }
  0x8c   : > { %v1516_v7 = vcombine.low %v6588_v15, %v6594_v6  ;;  %v1517_v1 = vcombine.high %v6588_v15, %v6594_v6  ;;  %v2021_v38 = vcombine.high %v1998_v14, %v2012_v18  ;;  %v2023_v8 = vcombine.high %v2005_v52, %v2019_v36  ;;  %v6626_v19 = vld.sshfl [vmem:[%s6010_s6 + $0x48] sm:$0xff pattern:$0x76325410]  ;;  %v5753_v15 = vld [vmem:[%s7504_s1 + $0x298] sm:$0xff]  }
  0x8d   : > { %v4850_v3 = vcombine.high %v6575_v42, %v6057_v28  ;;  %v2034_v43 = vrot.slane %v4849_v24, %v6059_v31  ;;  %v2048_v44 = vrot.slane %v6620_v21, %v6059_v31  ;;  %v2055_v23 = vrot.slane %v6626_v19, %v6059_v31 }
  0x8e   : > { %v1538_v53 = vrot.slane %v1516_v7, %v6059_v31  ;;  %v1545_v34 = vrot.slane %v1517_v1, %v6059_v31  ;;  %v2020_v41 = vcombine.low %v1998_v14, %v2012_v18  ;;  %v2022_v7 = vcombine.low %v2005_v52, %v2019_v36  ;;  %v6637_v1 = vld.sshfl [vmem:[%s6010_s6 + $0x50] sm:$0x5f pattern:$0x76325410]  ;;  %v5742_v14 = vld [vmem:[%s7504_s1 + $0x248] sm:$0xff]  }
  0x8f   : > { %v2041_v28 = vrot.slane %v4850_v3, %v6059_v31  ;;  %v5812_v18 = vld.sshfl [vmem:[%s6010_s6 + $0x58] sm:$0x5f pattern:$0x76325410] }
  0x90   : > { %v1547_v29 = vcombine.high %v1524_v40, %v1538_v53  ;;  %v1549_v27 = vcombine.high %v1531_v10, %v1545_v34  ;;  %v1546_v46 = vcombine.low %v1524_v40, %v1538_v53  ;;  %v1548_v45 = vcombine.low %v1531_v10, %v1545_v34  ;;  %v5741_v40 = vld [vmem:[%s7504_s1 + $0x280] sm:$0xff]   ;;  %v6645_v34 = vld.sshfl [vmem:[%s6010_s6 + $0x70] sm:$0x5f pattern:$0x76325410] }
  0x91   : > { %v6640_v10 = vld.sshfl [vmem:[%s6010_s6 + $0x60] sm:$0xff pattern:$0x76325410]  ;;  %v6654_v52 = vld.sshfl [vmem:[%s6010_s6 + $0x68] sm:$0xff pattern:$0x76325410] }
  0x92   : > { %1874 = vmatprep.mubr.bf16.mxu0 %v1547_v29  ;;  %1979 = vmatprep.mubr.bf16.mxu1 %v1549_v27  ;;  %v4851_v53 = vcombine.low %v6637_v1, %v6640_v10  ;;  %v4852_v36 = vcombine.low %v5812_v18, %v6654_v52  ;;  %v2057_v29 = vcombine.high %v2034_v43, %v2048_v44 }
  0x93   : > { %1875 = vmatmul.mubr.bf16.gmra.mrb[32].mxu0 %v1546_v46  ;;  %1980 = vmatmul.mubr.bf16.gmra.mrb[32].mxu1 %v1548_v45  ;;  %v2059_v27 = vcombine.high %v2041_v28, %v2055_v23  ;;  %v5743_v46 = vld [vmem:[%s7504_s1 + $0x2c8] sm:$0xff]  }
  0x94   : > { %2572 = vmatprep.mubr.bf16.mxu0 %v2021_v38  ;;  %2677 = vmatprep.mubr.bf16.mxu1 %v2023_v8  ;;  %v4853_v38 = vcombine.low %v6115_v16, %v6645_v34  ;;  %v4854_v8 = vcombine.high %v6654_v52, %v6135_v30  ;;  %v5744_v16 = vld [vmem:[%s7504_s1 + $0x208] sm:$0xff]   ;;  %v6669_v24 = vrot.slane %v4851_v53, %v6059_v31 }
  0x95   : > { %v5745_v45 = vld [vmem:[%s7504_s1 + $0x288] sm:$0xff]   ;;  %v6675_v3 = vrot.slane %v4852_v36, %v6059_v31 }
  0x96   : > { %v6672_v30 = vrot.slane %v4853_v38, %v6059_v31  ;;  %v6678_v18 = vrot.slane %v4854_v8, %v6059_v31  ;;  %v5748_v38 = vld [vmem:[%s7504_s1 + $0x210] sm:$0xff]   ;;  %v6706_v8 = vld.sshfl [vmem:[%s6010_s6 + $0xa8] sm:$0xff pattern:$0x76325410] }
  0x98   : > { %v2093_v53 = vcombine.high %v6669_v24, %v6672_v30  ;;  %v2095_v36 = vcombine.high %v6675_v3, %v6678_v18 }
  0x9b   : > { %2573 = vmatmul.mubr.bf16.vlgmr.msra.gmra.mrb[36].mxu0 %v2020_v41  ;;  %2678 = vmatmul.mubr.bf16.vlgmr.msra.gmra.mrb[36].mxu1 %v2022_v7  ;;  %v5746_v41 = vld [vmem:[%s7504_s1 + $0x250] sm:$0xff]   ;;  %v2056_v7 = vcombine.low %v2034_v43, %v2048_v44  ;;  %v6700_v44 = vld.sshfl [vmem:[%s6010_s6 + $0xa0] sm:$0xff pattern:$0x76325410] }
  0x9c   : > { %5368 = vmatpush3.bf16.msra.mxu0 %v5740_v11  ;;  %5438 = vmatpush3.bf16.msra.mxu1 %v5741_v40  ;;  %v5747_v11 = vld [vmem:[%s7504_s1 + $0x2d0] sm:$0xff]   ;;  %v2058_v40 = vcombine.low %v2041_v28, %v2055_v23  ;;  %v5816_v23 = vld.sshfl [vmem:[%s6010_s6 + $0x98] sm:$0x5f pattern:$0x76325410] }
  0x9d   : > { %2580 = vmatprep.mubr.bf16.mxu0 %v2057_v29  ;;  %2685 = vmatprep.mubr.bf16.mxu1 %v2059_v27  ;;  %v6697_v43 = vld.sshfl [vmem:[%s6010_s6 + $0x90] sm:$0x5f pattern:$0x76325410]  ;;  %v4856_v29 = vcombine.low %v5816_v23, %v6706_v8  ;;  %v5750_v27 = vld [vmem:[%s7504_s1 + $0x258] sm:$0xff]  }
  0x9e   : > { %5369 = vmatprep.subr.bf16.mxu0 %v5742_v14  ;;  %5439 = vmatprep.subr.bf16.mxu1 %v5743_v46  ;;  %v5749_v14 = vld [vmem:[%s7504_s1 + $0x290] sm:$0xff]   ;;  %v4855_v28 = vcombine.low %v6697_v43, %v6700_v44  ;;  %v4868_v46 = vcombine.low %v6461_v49, %v6505_v51  ;;  %v5752_v49 = vld [vmem:[%s7504_s1 + $0x218] sm:$0xff]  }
  0x9f   : > { %v6740_v17 = vrot.slane %v4856_v29, %v6059_v31 }
  0xa0   : > { %5370 = vmatpush3.bf16.msra.mxu0 %v5744_v16  ;;  %5440 = vmatpush3.bf16.msra.mxu1 %v5745_v45  ;;  %v5751_v16 = vld [vmem:[%s7504_s1 + $0x2d8] sm:$0xff]   ;;  %v6718_v45 = vld.sshfl [vmem:[%s6010_s6 + $0x80] sm:$0xff pattern:$0x76325410]  ;;  %v6746_v57 = vrot.slane %v4868_v46, %v6059_v31 }
  0xa1   : > { %5371 = vmatprep.subr.bf16.mxu0 %v5746_v41  ;;  %5441 = vmatprep.subr.bf16.mxu1 %v5747_v11  ;;  %v6722_v23 = vrot.slane %v6718_v45, %v6059_v31  ;;  %v6725_v41 = vld.sshfl [vmem:[%s6010_s6 + $0x88] sm:$0xff pattern:$0x76325410]  ;;  %v5757_v46 = vld [vmem:[%s7504_s1 + $0x2a0] sm:$0xff]  }
  0xa2   : > { %v6729_v11 = vrot.slane %v6725_v41, %v6059_v31 }
  0xa3   : > { %2581 = vmatmul.mubr.bf16.gmra.mrb[40].mxu0 %v2056_v7  ;;  %2686 = vmatmul.mubr.bf16.gmra.mrb[40].mxu1 %v2058_v40  ;;  %v4870_v7 = vcombine.high %v6505_v51, %v6548_v12  ;;  %v6737_v40 = vrot.slane %v4855_v28, %v6059_v31  ;;  %v5754_v51 = vld [vmem:[%s7504_s1 + $0x260] sm:$0xff]  }
  0xa4   : > { %2588 = vmatprep.mubr.bf16.mxu0 %v2093_v53  ;;  %2693 = vmatprep.mubr.bf16.mxu1 %v2095_v36  ;;  %v5755_v53 = vld [vmem:[%s7504_s1 + $0x2e0] sm:$0xff]   ;;  %v2092_v36 = vcombine.low %v6669_v24, %v6672_v30  ;;  %v2131_v24 = vcombine.high %v6729_v11, %v6740_v17  ;;  %v6773_v30 = vld.sshfl [vmem:[%s6010_s6 + $0xb0] sm:$0x5f pattern:$0x76325410] }
  0xa5   : > { %5372 = vmatpush3.bf16.msra.mxu0 %v5748_v38  ;;  %5442 = vmatpush3.bf16.msra.mxu1 %v5749_v14  ;;  %v6752_v12 = vrot.slane %v4870_v7, %v6059_v31  ;;  %v2094_v38 = vcombine.low %v6675_v3, %v6678_v18  ;;  %v5756_v14 = vld [vmem:[%s7504_s1 + $0x220] sm:$0xff]   ;;  %v4857_v3 = vcombine.low %v6219_v54, %v6773_v30  ;;  %v5759_v54 = vld [vmem:[%s7504_s1 + $0x2e8] sm:$0xff]  }
  0xa6   : > { %5373 = vmatprep.subr.bf16.mxu0 %v5750_v27  ;;  %5443 = vmatprep.subr.bf16.mxu1 %v5751_v16  ;;  %v2129_v27 = vcombine.high %v6722_v23, %v6737_v40  ;;  %v4858_v18 = vcombine.high %v6706_v8, %v6258_v58  ;;  %v5758_v16 = vld [vmem:[%s7504_s1 + $0x268] sm:$0xff]   ;;  %v6789_v58 = vld.sshfl [vmem:[%s6010_s6 + $0xc0] sm:$0xff pattern:$0x76325410] }
  0xa7   : > { %v2156_v7 = vrot.slane %v6789_v58, %v6059_v31 }
  0xa9   : > { %5374 = vmatpush3.bf16.msra.mxu0 %v5752_v49  ;;  %5444 = vmatpush3.bf16.msra.mxu1 %v5753_v15  ;;  %v2142_v15 = vrot.slane %v4857_v3, %v6059_v31  ;;  %v2149_v49 = vrot.slane %v4858_v18, %v6059_v31  ;;  %v2130_v3 = vcombine.low %v6729_v11, %v6740_v17  ;;  %v6817_v18 = vld.sshfl [vmem:[%s6010_s6 + $0xd0] sm:$0x5f pattern:$0x76325410] }
  0xaa   : > { %5375 = vmatprep.subr.bf16.mxu0 %v5754_v51  ;;  %5445 = vmatprep.subr.bf16.mxu1 %v5755_v53  ;;  %v6796_v51 = vld.sshfl [vmem:[%s6010_s6 + $0xc8] sm:$0xff pattern:$0x76325410]  ;;  %v4862_v17 = vcombine.high %v6831_v5, %v6348_v0  ;;  %v5764_v11 = vld [vmem:[%s7504_s1 + $0x230] sm:$0xff]   ;;  %v5767_v0 = vld [vmem:[%s7504_s1 + $0x2f8] sm:$0xff]  }
  0xab   : > { %2589 = vmatmul.mubr.bf16.gmra.mrb[44].mxu0 %v2092_v36  ;;  %2694 = vmatmul.mubr.bf16.gmra.mrb[44].mxu1 %v2094_v38  ;;  %v2163_v53 = vrot.slane %v6796_v51, %v6059_v31  ;;  %v5760_v36 = vld [vmem:[%s7504_s1 + $0x228] sm:$0xff]   ;;  %v2165_v28 = vcombine.high %v2142_v15, %v2156_v7 }
  0xac   : > { %2596 = vmatprep.mubr.bf16.mxu0 %v2129_v27  ;;  %2701 = vmatprep.mubr.bf16.mxu1 %v2131_v24  ;;  %v5761_v38 = vld [vmem:[%s7504_s1 + $0x2a8] sm:$0xff]   ;;  %v5762_v27 = vld [vmem:[%s7504_s1 + $0x270] sm:$0xff]   ;;  %v2128_v24 = vcombine.low %v6722_v23, %v6737_v40  ;;  %v4860_v23 = vcombine.low %v5826_v60, %v6831_v5  ;;  %v5766_v40 = vld [vmem:[%s7504_s1 + $0x278] sm:$0xff]  }
  0xad   : > { %5376 = vmatpush3.bf16.msra.mxu0 %v5756_v14  ;;  %5446 = vmatpush3.bf16.msra.mxu1 %v5757_v46  ;;  %v5763_v14 = vld [vmem:[%s7504_s1 + $0x2f0] sm:$0xff]   ;;  %v6820_v46 = vld.sshfl [vmem:[%s6010_s6 + $0xe0] sm:$0xff pattern:$0x76325410]  ;;  %v2167_v22 = vcombine.high %v2149_v49, %v2163_v53 }
  0xae   : > { %5377 = vmatprep.subr.bf16.mxu0 %v5758_v16  ;;  %5447 = vmatprep.subr.bf16.mxu1 %v5759_v54  ;;  %v4859_v16 = vcombine.low %v6817_v18, %v6820_v46  ;;  %v6825_v54 = vld.sshfl [vmem:[%s6010_s6 + $0xf0] sm:$0x5f pattern:$0x76325410] }
  0xaf   : > { %v4861_v29 = vcombine.low %v6337_v56, %v6825_v54  ;;  %v5765_v56 = vld [vmem:[%s7504_s1 + $0x2b0] sm:$0xff]  }
  0xb0   : > { %v2178_v60 = vrot.slane %v4859_v16, %v6059_v31 }
  0xb1   : > { %5378 = vmatpush3.bf16.msra.mxu0 %v5760_v36  ;;  %5448 = vmatpush3.bf16.msra.mxu1 %v5761_v38  ;;  %v2192_v36 = vrot.slane %v4861_v29, %v6059_v31  ;;  %v2185_v38 = vrot.slane %v4860_v23, %v6059_v31  ;;  %v2164_v29 = vcombine.low %v2142_v15, %v2156_v7 }
  0xb2   : > { %5379 = vmatprep.subr.bf16.mxu0 %v5762_v27  ;;  %5449 = vmatprep.subr.bf16.mxu1 %v5763_v14  ;;  %v2199_v27 = vrot.slane %v4862_v17, %v6059_v31  ;;  %v5768_v14 = vld [vmem:[%s7504_s1 + $0x238] sm:$0xff]   ;;  %v4863_v17 = vcombine.low %v6374_v55, %v6386_v13  ;;  %v6875_v13 = vld.sshfl [vmem:[%s6010_s6 + $0x108] sm:$0xff pattern:$0x76325410] }
  0xb3   : > { %2597 = vmatmul.mubr.bf16.gmra.mrb[48].mxu0 %v2128_v24  ;;  %2702 = vmatmul.mubr.bf16.gmra.mrb[48].mxu1 %v2130_v3  ;;  %v5769_v24 = vld [vmem:[%s7504_s1 + $0x2b8] sm:$0xff]   ;;  %v2166_v3 = vcombine.low %v2149_v49, %v2163_v53  ;;  %v2201_v16 = vcombine.high %v2178_v60, %v2192_v36  ;;  %v6881_v49 = vld.sshfl [vmem:[%s6010_s6 + $0x190] sm:$0x5f pattern:$0x76325410] }
  0xb4   : > { %2604 = vmatprep.mubr.bf16.mxu0 %v2165_v28  ;;  %2709 = vmatprep.mubr.bf16.mxu1 %v2167_v22  ;;  %v5770_v22 = vld [vmem:[%s7504_s1 + $0x340] sm:$0xff]   ;;  %v2203_v23 = vcombine.high %v2185_v38, %v2199_v27  ;;  %v2228_v55 = vrot.slane %v4863_v17, %v6059_v31  ;;  %v6884_v53 = vld.sshfl [vmem:[%s6010_s6 + $0x198] sm:$0x5f pattern:$0x76325410] }
  0xb5   : > { %5380 = vmatpush3.bf16.msra.mxu0 %v5764_v11  ;;  %5450 = vmatpush3.bf16.msra.mxu1 %v5765_v56  ;;  %v5771_v28 = vld [vmem:[%s7504_s1 + $0x3c0] sm:$0xff]   ;;  %v4864_v11 = vcombine.low %v6383_v20, %v6392_v9  ;;  %v2221_v20 = vrot.slane %v6875_v13, %v6059_v31 }
  0xb6   : > { %5381 = vmatprep.subr.bf16.mxu0 %v5766_v40  ;;  %5451 = vmatprep.subr.bf16.mxu1 %v5767_v0  ;;  %v6869_v56 = vld.sshfl [vmem:[%s6010_s6 + $0x100] sm:$0xff pattern:$0x76325410]  ;;  %v2200_v40 = vcombine.low %v2178_v60, %v2192_v36  ;;  %v2202_v0 = vcombine.low %v2185_v38, %v2199_v27  ;;  %v2271_v38 = vrot.slane %v6449_v59, %v6059_v31 }
  0xb7   : > { %v2214_v7 = vrot.slane %v6869_v56, %v6059_v31  ;;  %v2235_v15 = vrot.slane %v4864_v11, %v6059_v31 }
  0xb9   : > { %5382 = vmatpush3.bf16.msra.mxu0 %v5768_v14  ;;  %5452 = vmatpush3.bf16.msra.mxu1 %v5769_v24  ;;  %v3629_v14 = vcombine.high %v6881_v49, %v6884_v53  ;;  %v2237_v24 = vcombine.high %v2214_v7, %v2228_v55  ;;  %v2236_v27 = vcombine.low %v2214_v7, %v2228_v55  ;;  %v5830_v55 = vld.sshfl [vmem:[%s6010_s6 + $0x38] sm:$0x5f pattern:$0x76325410] }
  0xba   : > { %5507 = vmatprep.subr.bf16.mxu0 %v5770_v22  ;;  %5577 = vmatprep.subr.bf16.mxu1 %v5771_v28  ;;  %v2239_v22 = vcombine.high %v2221_v20, %v2235_v15  ;;  %v4865_v28 = vcombine.low %v6420_v61, %v6442_v25  ;;  %v2238_v61 = vcombine.low %v2221_v20, %v2235_v15 }
  0xbb   : > { %2605 = vmatmul.mubr.bf16.gmra.mrb[52].mxu0 %v2164_v29  ;;  %2710 = vmatmul.mubr.bf16.gmra.mrb[52].mxu1 %v2166_v3  ;;  %v4866_v29 = vcombine.high %v6392_v9, %v6467_v37  ;;  %v2264_v3 = vrot.slane %v6446_v35, %v6059_v31  ;;  %v4867_v37 = vcombine.low %v6458_v33, %v6502_v50  ;;  %v6909_v50 = vld.sshfl [vmem:[%s6010_s6 + $0x180] sm:$0xff pattern:$0x76325410] }
  0xbc   : > { %2612 = vmatprep.mubr.bf16.mxu0 %v2201_v16  ;;  %2717 = vmatprep.mubr.bf16.mxu1 %v2203_v23  ;;  %v2250_v60 = vrot.slane %v4865_v28, %v6059_v31  ;;  %v4869_v35 = vcombine.low %v6540_v63, %v6524_v62  ;;  %v4907_v7 = vcombine.low %v6612_v32, %v6620_v21  ;;  %v6912_v62 = vld.sshfl [vmem:[%s6010_s6 + $0x188] sm:$0xff pattern:$0x76325410]  ;;  %v5831_v63 = vld.sshfl [vmem:[%s6010_s6 + $0x20] sm:$0xff pattern:$0x76325410] }
  0xbd   : > { %v2257_v36 = vrot.slane %v4866_v29, %v6059_v31  ;;  %v2286_v59 = vrot.slane %v4867_v37, %v6059_v31  ;;  %v4908_v33 = vcombine.low %v5830_v55, %v6626_v19  ;;  %v2859_v20 = vrot.slane %v5831_v63, %v6059_v31 }
  0xbe   : > { %v2273_v25 = vcombine.high %v2250_v60, %v2264_v3  ;;  %v2300_v16 = vrot.slane %v4869_v35, %v6059_v31  ;;  %v2272_v23 = vcombine.low %v2250_v60, %v2264_v3  ;;  %v2768_v15 = vcombine.low %v6909_v50, %v6912_v62 }
  0xbf   : > { %v2275_v9 = vcombine.high %v2257_v36, %v2271_v38  ;;  %v2274_v17 = vcombine.low %v2257_v36, %v2271_v38  ;;  %v2873_v32 = vrot.slane %v4907_v7, %v6059_v31  ;;  %v2866_v21 = vrot.slane %v6575_v42, %v6059_v31 }
  0xc0   : > { %v2309_v11 = vcombine.high %v2286_v59, %v2300_v16  ;;  %v3634_v28 = vshll.u32 %v2768_v15, 16  ;;  %v4909_v60 = vcombine.low %v6073_v39, %v6637_v1  ;;  %v4910_v36 = vcombine.high %v6626_v19, %v6083_v47 }
  0xc1   : > { %v2882_v29 = vcombine.high %v2859_v20, %v2873_v32  ;;  %v6931_v38 = vcombine.high %v6909_v50, %v6912_v62  ;;  %v6935_v42 = vrot.slane %v6640_v10, %v6059_v31  ;;  %v6942_v39 = vcombine.low %v6881_v49, %v6884_v53 }
  0xc2   : > { %v6946_v19 = vrot.slane %v4909_v60, %v6059_v31  ;;  %v6950_v1 = vrot.slane %v6654_v52, %v6059_v31  ;;  %v6956_v37 = vrot.slane %v4910_v36, %v6059_v31  ;;  %v3660_v52 = vshll.u32 %v3629_v14, 16 }
  0xc3   : > { %2613 = vmatmul.mubr.bf16.gmra.mrb[56].mxu0 %v2200_v40  ;;  %2718 = vmatmul.mubr.bf16.gmra.mrb[56].mxu1 %v2202_v0  ;;  %v7616_v40 = vcombine.high %v6746_v57, %v6752_v12  ;;  %v2880_v0 = vrot.slane %v4908_v33, %v6059_v31  ;;  %v3640_v47 = vshll.u32 %v6931_v38, 16  ;;  %v3644_v10 = vshrl.u32 %v6931_v38, 16  ;;  %v5772_v33 = vld [vmem:[%s7504_s1 + $0x300] sm:$0xff]  }
  0xc4   : > { %2620 = vmatprep.mubr.bf16.mxu0 %v2237_v24  ;;  %2725 = vmatprep.mubr.bf16.mxu1 %v2239_v22  ;;  %v2308_v24 = vcombine.low %v2286_v59, %v2300_v16  ;;  %v3631_v22 = vshrl.u32 %v2768_v15, 16  ;;  %v3650_v59 = vshll.u32 %v6942_v39, 16  ;;  %v4913_v16 = vcombine.low %v6185_v26, %v6697_v43  ;;  %v5773_v26 = vld [vmem:[%s7504_s1 + $0x380] sm:$0xff]   ;;  %v5775_v15 = vld [vmem:[%s7504_s1 + $0x3c8] sm:$0xff]  }
  0xc5   : > { %v2884_v3 = vcombine.high %v2866_v21, %v2880_v0  ;;  %v3642_v35 = vrot.slane %v3640_v47, 7  ;;  %v2918_v14 = vcombine.high %v6946_v19, %v6935_v42  ;;  %v2920_v63 = vcombine.high %v6956_v37, %v6950_v1  ;;  %v5779_v47 = vld [vmem:[%s7504_s1 + $0x3d0] sm:$0xff]  }
  0xc6   : > { %v3652_v55 = vrot.slane %v3650_v59, 7  ;;  %v5781_v59 = vld [vmem:[%s7504_s1 + $0x390] sm:$0xff]  }
  0xcb   : > { %2621 = vmatmul.mubr.bf16.gmra.mrb[60].mxu0 %v2236_v27  ;;  %2726 = vmatmul.mubr.bf16.gmra.mrb[60].mxu1 %v2238_v61  ;;  %v2881_v27 = vcombine.low %v2859_v20, %v2873_v32  ;;  %v7617_v61 = vcombine.low %v6746_v57, %v6752_v12  ;;  %v4911_v57 = vcombine.low %v6645_v34, %v6718_v45  ;;  %v5832_v34 = vld.sshfl [vmem:[%s6010_s6 + $0x78] sm:$0x5f pattern:$0x76325410]  ;;  %v5774_v20 = vld [vmem:[%s7504_s1 + $0x348] sm:$0xff]  }
  0xcc   : > { %2628 = vmatprep.mubr.bf16.mxu0 %v2273_v25  ;;  %2733 = vmatprep.mubr.bf16.mxu1 %v2275_v9  ;;  %v3633_v25 = vrot.slane %v3631_v22, 6  ;;  %v3636_v9 = vrot.slane %v3634_v28, 7  ;;  %v2883_v12 = vcombine.low %v2866_v21, %v2880_v0  ;;  %v4912_v45 = vcombine.low %v5832_v34, %v6725_v41  ;;  %v5782_v34 = vld [vmem:[%s7504_s1 + $0x358] sm:$0xff]  }
  0xcd   : > { %v3662_v0 = vrot.slane %v3660_v52, 7 }
  0xce   : > { %v3637_v7 = vor.u32 %v3636_v9, %v3633_v25  ;;  %v2917_v25 = vcombine.low %v6946_v19, %v6935_v42  ;;  %v5778_v9 = vld [vmem:[%s7504_s1 + $0x350] sm:$0xff]  }
  0xd3   : > { %2629 = vmatmul.mubr.bf16.gmra.mrb[64].mxu0 %v2272_v23  ;;  %2734 = vmatmul.mubr.bf16.gmra.mrb[64].mxu1 %v2274_v17  ;;  %v3646_v23 = vrot.slane %v3644_v10, 6  ;;  %v3654_v17 = vshrl.u32 %v6942_v39, 16 }
  0xd4   : > { %2636 = vmatprep.mubr.bf16.mxu0 %v2309_v11  ;;  %2741 = vmatprep.mubr.bf16.mxu1 %v7616_v40  ;;  %v4914_v11 = vcombine.high %v6725_v41, %v6203_v48  ;;  %v6980_v48 = vrot.slane %v4911_v57, %v6059_v31  ;;  %v3638_v41 = vrot.slane %v3637_v7, 2  ;;  %v6989_v40 = vrot.slane %v4913_v16, %v6059_v31 }
  0xd5   : > { %v3647_v43 = vor.u32 %v3646_v23, %v3642_v35  ;;  %v3656_v53 = vrot.slane %v3654_v17, 6  ;;  %v2919_v57 = vcombine.low %v6956_v37, %v6950_v1  ;;  %v7049_v23 = vrot.slane %v6700_v44, %v6059_v31 }
  0xd6   : > { %v6995_v22 = vrot.slane %v4914_v11, %v6059_v31  ;;  %v3643_v28 = vsel %vm6042_vm6, %v3638_v41, %v3642_v35  ;;  %v2954_v1 = vcombine.high %v6980_v48, %v6989_v40 }
  0xd7   : > { %v3648_v32 = vrot.slane %v3647_v43, 2  ;;  %v3657_v21 = vor.u32 %v3656_v53, %v3652_v55  ;;  %v5784_v43 = vld [vmem:[%s7504_s1 + $0x318] sm:$0xff]  }
  0xd8   : > { %v5785_v53 = vld [vmem:[%s7504_s1 + $0x398] sm:$0xff]  }
  0xd9   : > { %v3653_v60 = vsel %vm6042_vm6, %v3648_v32, %v3652_v55  ;;  %v3658_v36 = vrot.slane %v3657_v21, 2  ;;  %v2974_v55 = vrot.slane %v6706_v8, %v6059_v31  ;;  %v5786_v8 = vld [vmem:[%s7504_s1 + $0x360] sm:$0xff]   ;;  %v4917_v32 = vcombine.low %v6270_v4, %v6817_v18  ;;  %v7618_v21 = vld [vmem:[#allocation13_spill] sm:$0xff]  ;;  %v5791_v4 = vld [vmem:[%s7504_s1 + $0x3e8] sm:$0xff]  }
  0xdb   : > { %2637 = vmatmul.mubr.bf16.gmra.mrb[68].mxu0 %v2308_v24  ;;  %2742 = vmatmul.mubr.bf16.gmra.mrb[68].mxu1 %v7617_v61  ;;  %v6992_v24 = vrot.slane %v4912_v45, %v6059_v31  ;;  %v4017_v61 = vcombine.high %v6594_v6, %v3643_v28  ;;  %v3663_v42 = vsel %vm6042_vm6, %v3658_v36, %v3662_v0  ;;  %v5783_v45 = vld [vmem:[%s7504_s1 + $0x3d8] sm:$0xff]  }
  0xdc   : > { %3433 = vmatprep.mubr.bf16.mxu0 %v2882_v29  ;;  %3538 = vmatprep.mubr.bf16.mxu1 %v2884_v3  ;;  %v5776_v29 = vld [vmem:[%s7504_s1 + $0x308] sm:$0xff]   ;;  %v4018_v19 = vcombine.low %v3653_v60, %v3663_v42  ;;  %v4918_v0 = vcombine.high %v6796_v51, %v7618_v21  ;;  %v3003_v18 = vrot.slane %v4917_v32, %v6059_v31 }
  0xdd   : > { %v5777_v3 = vld [vmem:[%s7504_s1 + $0x388] sm:$0xff]   ;;  %v7027_v35 = vrot.slane %v4017_v61, %v6059_v31  ;;  %v2956_v37 = vcombine.high %v6992_v24, %v6995_v22  ;;  %v2955_v41 = vcombine.low %v6992_v24, %v6995_v22  ;;  %v3024_v22 = vrot.slane %v6831_v5, %v6059_v31  ;;  %v5795_v5 = vld [vmem:[%s7504_s1 + $0x3f0] sm:$0xff]  }
  0xde   : > { %v7042_v16 = vrot.slane %v4018_v19, %v6059_v31  ;;  %v3010_v24 = vrot.slane %v4918_v0, %v6059_v31  ;;  %v5834_v61 = vld.sshfl [vmem:[%s6010_s6 + $0x110] sm:$0x5f pattern:$0x76325410]  ;;  %v7620_v19 = vld [vmem:[#allocation23_spill] sm:$0xff] }
  0xdf   : > { %v5841_v32 = vld.sshfl [vmem:[%s6010_s6 + $0x128] sm:$0xff pattern:$0x76325410] }
  0xe0   : > { %v3082_v21 = vrot.slane %v5841_v32, %v6059_v31 }
  0xe3   : > { %3434 = vmatmul.mubr.bf16.vlgmr.msra.gmra.mrb[72].mxu0 %v2881_v27  ;;  %3539 = vmatmul.mubr.bf16.vlgmr.msra.gmra.mrb[72].mxu1 %v2883_v12  ;;  %v4016_v27 = vcombine.low %v6594_v6, %v3643_v28  ;;  %v4915_v6 = vcombine.low %v6773_v30, %v6789_v58  ;;  %v4019_v12 = vcombine.high %v3653_v60, %v3663_v42  ;;  %v5833_v30 = vld.sshfl [vmem:[%s6010_s6 + $0xb8] sm:$0x5f pattern:$0x76325410]  ;;  %v5780_v58 = vld [vmem:[%s7504_s1 + $0x310] sm:$0xff]   ;;  %v5788_v28 = vld [vmem:[%s7504_s1 + $0x320] sm:$0xff]  }
  0xe4   : > { %5508 = vmatpush3.bf16.msra.mxu0 %v5772_v33  ;;  %5578 = vmatpush3.bf16.msra.mxu1 %v5773_v26  ;;  %v4916_v2 = vcombine.low %v5833_v30, %v6796_v51  ;;  %v3017_v51 = vrot.slane %v6820_v46, %v6059_v31  ;;  %v5793_v46 = vld [vmem:[%s7504_s1 + $0x3a8] sm:$0xff]  }
  0xe5   : > { %3441 = vmatprep.mubr.bf16.mxu0 %v2918_v14  ;;  %3546 = vmatprep.mubr.bf16.mxu1 %v2920_v63  ;;  %v7024_v10 = vrot.slane %v4016_v27, %v6059_v31  ;;  %v7045_v52 = vrot.slane %v4019_v12, %v6059_v31  ;;  %v7052_v17 = vrot.slane %v4915_v6, %v6059_v31  ;;  %v5787_v14 = vld [vmem:[%s7504_s1 + $0x3e0] sm:$0xff]   ;;  %v5835_v6 = vld.sshfl [vmem:[%s6010_s6 + $0xf8] sm:$0x5f pattern:$0x76325410] }
  0xe6   : > { %5509 = vmatprep.subr.bf16.mxu0 %v5774_v20  ;;  %5579 = vmatprep.subr.bf16.mxu1 %v5775_v15  ;;  %v2988_v33 = vrot.slane %v4916_v2, %v6059_v31  ;;  %v2953_v63 = vcombine.low %v6980_v48, %v6989_v40  ;;  %v5789_v48 = vld [vmem:[%s7504_s1 + $0x3a0] sm:$0xff]   ;;  %v5790_v40 = vld [vmem:[%s7504_s1 + $0x368] sm:$0xff]   ;;  %v4919_v27 = vcombine.low %v6825_v54, %v6869_v56  ;;  %v5797_v54 = vld [vmem:[%s7504_s1 + $0x3b0] sm:$0xff]  }
  0xe7   : > { %v4049_v11 = vcombine.high %v7024_v10, %v7042_v16  ;;  %v4051_v44 = vcombine.high %v7027_v35, %v7045_v52  ;;  %v4048_v7 = vcombine.low %v7024_v10, %v7042_v16  ;;  %v4050_v26 = vcombine.low %v7027_v35, %v7045_v52  ;;  %v5798_v56 = vld [vmem:[%s7504_s1 + $0x378] sm:$0xff]  }
  0xe8   : > { %5510 = vmatpush3.bf16.msra.mxu0 %v5776_v29  ;;  %5580 = vmatpush3.bf16.msra.mxu1 %v5777_v3  ;;  %v2990_v20 = vcombine.high %v7049_v23, %v7052_v17  ;;  %v2992_v15 = vcombine.high %v2974_v55, %v2988_v33  ;;  %v5792_v29 = vld [vmem:[%s7504_s1 + $0x328] sm:$0xff]   ;;  %v5794_v3 = vld [vmem:[%s7504_s1 + $0x370] sm:$0xff]   ;;  %v2989_v60 = vcombine.low %v7049_v23, %v7052_v17  ;;  %v5801_v23 = vld [vmem:[%s7504_s1 + $0x3b8] sm:$0xff]  }
  0xe9   : > { %5511 = vmatprep.subr.bf16.mxu0 %v5778_v9  ;;  %5581 = vmatprep.subr.bf16.mxu1 %v5779_v47  ;;  %v2991_v36 = vcombine.low %v2974_v55, %v2988_v33  ;;  %v3026_v47 = vcombine.high %v3003_v18, %v3017_v51  ;;  %v4920_v42 = vcombine.low %v5835_v6, %v6875_v13  ;;  %v5837_v55 = vld.sshfl [vmem:[%s6010_s6 + $0x140] sm:$0xff pattern:$0x76325410] }
  0xea   : > { %v4922_v12 = vcombine.high %v6875_v13, %v7620_v19  ;;  %v5799_v13 = vld [vmem:[%s7504_s1 + $0x3f8] sm:$0xff]   ;;  %v3025_v17 = vcombine.low %v3003_v18, %v3017_v51  ;;  %v5842_v18 = vld.sshfl [vmem:[%s6010_s6 + $0x150] sm:$0x5f pattern:$0x76325410] }
  0xeb   : > { %3442 = vmatmul.mubr.bf16.gmra.mrb[76].mxu0 %v2917_v25  ;;  %3547 = vmatmul.mubr.bf16.gmra.mrb[76].mxu1 %v2919_v57  ;;  %v7619_v25 = vld [vmem:[#allocation20_spill] sm:$0xff]  ;;  %v3028_v57 = vcombine.high %v3010_v24, %v3024_v22  ;;  %v3046_v2 = vrot.slane %v4920_v42, %v6059_v31 }
  0xec   : > { %3449 = vmatprep.mubr.bf16.mxu0 %v2954_v1  ;;  %3554 = vmatprep.mubr.bf16.mxu1 %v2956_v37  ;;  %v4921_v9 = vcombine.low %v7619_v25, %v5834_v61  ;;  %v5796_v1 = vld [vmem:[%s7504_s1 + $0x330] sm:$0xff]   ;;  %v3039_v37 = vrot.slane %v4919_v27, %v6059_v31 }
  0xed   : > { %5512 = vmatpush3.bf16.msra.mxu0 %v5780_v58  ;;  %5582 = vmatpush3.bf16.msra.mxu1 %v5781_v59  ;;  %v3060_v58 = vrot.slane %v4922_v12, %v6059_v31  ;;  %v5800_v59 = vld [vmem:[%s7504_s1 + $0x338] sm:$0xff]   ;;  %v5843_v12 = vld.sshfl [vmem:[%s6010_s6 + $0x160] sm:$0xff pattern:$0x76325410] }
  0xee   : > { %5513 = vmatprep.subr.bf16.mxu0 %v5782_v34  ;;  %5583 = vmatprep.subr.bf16.mxu1 %v5783_v45  ;;  %v3053_v30 = vrot.slane %v4921_v9, %v6059_v31  ;;  %v3027_v34 = vcombine.low %v3010_v24, %v3024_v22  ;;  %v5836_v45 = vld.sshfl [vmem:[%s6010_s6 + $0x130] sm:$0x5f pattern:$0x76325410]  ;;  %v7621_v24 = vld [vmem:[#allocation29_spill] sm:$0xff] }
  0xef   : > { %v4923_v33 = vcombine.low %v5836_v45, %v5837_v55  ;;  %v4925_v22 = vcombine.low %v7621_v24, %v5842_v18  ;;  %v5846_v45 = vld.sshfl [vmem:[%s6010_s6 + $0x178] sm:$0x5f pattern:$0x76325410] }
  0xf0   : > { %v4928_v55 = vcombine.low %v5846_v45, %v6912_v62 }
  0xf1   : > { %5514 = vmatpush3.bf16.msra.mxu0 %v5784_v43  ;;  %5584 = vmatpush3.bf16.msra.mxu1 %v5785_v53  ;;  %v3062_v43 = vcombine.high %v3039_v37, %v3053_v30  ;;  %v3064_v53 = vcombine.high %v3046_v2, %v3060_v58  ;;  %v3111_v19 = vrot.slane %v4925_v22, %v6059_v31 }
  0xf2   : > { %5515 = vmatprep.subr.bf16.mxu0 %v5786_v8  ;;  %5585 = vmatprep.subr.bf16.mxu1 %v5787_v14  ;;  %v5838_v8 = vld.sshfl [vmem:[%s6010_s6 + $0x138] sm:$0x5f pattern:$0x76325410] }
  0xf3   : > { %3450 = vmatmul.mubr.bf16.gmra.mrb[80].mxu0 %v2953_v63  ;;  %3555 = vmatmul.mubr.bf16.gmra.mrb[80].mxu1 %v2955_v41  ;;  %v5839_v14 = vld.sshfl [vmem:[%s6010_s6 + $0x148] sm:$0xff pattern:$0x76325410]  ;;  %v5840_v41 = vld.sshfl [vmem:[%s6010_s6 + $0x120] sm:$0xff pattern:$0x76325410] }
  0xf4   : > { %3457 = vmatprep.mubr.bf16.mxu0 %v2990_v20  ;;  %3562 = vmatprep.mubr.bf16.mxu1 %v2992_v15  ;;  %v4924_v63 = vcombine.low %v5838_v8, %v5839_v14  ;;  %v3075_v20 = vrot.slane %v5840_v41, %v6059_v31  ;;  %v3089_v15 = vrot.slane %v4923_v33, %v6059_v31 }
  0xf5   : > { %5516 = vmatpush3.bf16.msra.mxu0 %v5788_v28  ;;  %5586 = vmatpush3.bf16.msra.mxu1 %v5789_v48  ;;  %v4930_v33 = vcombine.high %v6912_v62, %v6942_v39  ;;  %v7623_v62 = vld [vmem:[#allocation3_spill] sm:$0xff]  ;;  %v7624_v39 = vld [vmem:[#allocation2_spill] sm:$0xff] }
  0xf6   : > { %5517 = vmatprep.subr.bf16.mxu0 %v5790_v40  ;;  %5587 = vmatprep.subr.bf16.mxu1 %v5791_v4  ;;  %v3096_v0 = vrot.slane %v4924_v63, %v6059_v31  ;;  %v3061_v40 = vcombine.low %v3039_v37, %v3053_v30  ;;  %v3063_v4 = vcombine.low %v3046_v2, %v3060_v58  ;;  %v5845_v58 = vld.sshfl [vmem:[%s6010_s6 + $0x170] sm:$0x5f pattern:$0x76325410] }
  0xf7   : > { %v3098_v51 = vcombine.high %v3075_v20, %v3089_v15  ;;  %v3097_v30 = vcombine.low %v3075_v20, %v3089_v15  ;;  %v3728_v32 = vcombine.low %v7624_v39, %v7623_v62  ;;  %v3729_v24 = vcombine.high %v7624_v39, %v7623_v62 }
  0xf8   : > { %v3099_v2 = vcombine.low %v3082_v21, %v3096_v0 }
  0xf9   : > { %5518 = vmatpush3.bf16.msra.mxu0 %v5792_v29  ;;  %5588 = vmatpush3.bf16.msra.mxu1 %v5793_v46 }
  0xfa   : > { %5519 = vmatprep.subr.bf16.mxu0 %v5794_v3  ;;  %5589 = vmatprep.subr.bf16.mxu1 %v5795_v5  ;;  %v3100_v3 = vcombine.high %v3082_v21, %v3096_v0  ;;  %v7622_v5 = vld [vmem:[#allocation30_spill] sm:$0xff] }
  0xfb   : > { %3458 = vmatmul.mubr.bf16.gmra.mrb[84].mxu0 %v2989_v60  ;;  %3563 = vmatmul.mubr.bf16.gmra.mrb[84].mxu1 %v2991_v36  ;;  %v4926_v60 = vcombine.high %v5839_v14, %v7622_v5 }
  0xfc   : > { %3465 = vmatprep.mubr.bf16.mxu0 %v3026_v47  ;;  %3570 = vmatprep.mubr.bf16.mxu1 %v3028_v57 }
  0xfd   : > { %5520 = vmatpush3.bf16.msra.mxu0 %v5796_v1  ;;  %5590 = vmatpush3.bf16.msra.mxu1 %v5797_v54  ;;  %v3125_v1 = vrot.slane %v5843_v12, %v6059_v31  ;;  %v3118_v54 = vrot.slane %v4926_v60, %v6059_v31  ;;  %v7628_v12 = vld [vmem:[#allocation6_spill] sm:$0xff] }
  0xfe   : > { %5521 = vmatprep.subr.bf16.mxu0 %v5798_v56  ;;  %5591 = vmatprep.subr.bf16.mxu1 %v5799_v13  ;;  %v5844_v56 = vld.sshfl [vmem:[%s6010_s6 + $0x168] sm:$0xff pattern:$0x76325410] }
  0xff   : > { %v3132_v13 = vrot.slane %v5844_v56, %v6059_v31  ;;  %v3133_v14 = vcombine.low %v3111_v19, %v3125_v1 }
 0x101   : > { %5522 = vmatpush3.bf16.msra.mxu0 %v5800_v59  ;;  %5592 = vmatpush3.bf16.msra.mxu1 %v5801_v23  ;;  %v4927_v59 = vcombine.low %v5845_v58, %v6909_v50  ;;  %v4929_v23 = vcombine.low %v6931_v38, %v6881_v49  ;;  %v3154_v50 = vrot.slane %v4928_v55, %v6059_v31 }
 0x102   : > { %v3168_v49 = vrot.slane %v4930_v33, %v6059_v31  ;;  %v3135_v63 = vcombine.low %v3118_v54, %v3132_v13 }
 0x103   : > { %3466 = vmatmul.mubr.bf16.gmra.mrb[88].mxu0 %v3025_v17  ;;  %3571 = vmatmul.mubr.bf16.gmra.mrb[88].mxu1 %v3027_v34  ;;  %v3134_v17 = vcombine.high %v3111_v19, %v3125_v1  ;;  %v3136_v34 = vcombine.high %v3118_v54, %v3132_v13  ;;  %v7627_v19 = vld [vmem:[#allocation7_spill] sm:$0xff] }
 0x104   : > { %3473 = vmatprep.mubr.bf16.mxu0 %v3062_v43  ;;  %3578 = vmatprep.mubr.bf16.mxu1 %v3064_v53  ;;  %v3147_v43 = vrot.slane %v4927_v59, %v6059_v31  ;;  %v3161_v53 = vrot.slane %v4929_v23, %v6059_v31  ;;  %v3764_v1 = vcombine.low %v7628_v12, %v7627_v19 }
 0x105   : > { %v3171_v13 = vcombine.low %v3154_v50, %v3168_v49  ;;  %v3765_v33 = vcombine.high %v7628_v12, %v7627_v19 }
 0x106   : > { %v3170_v15 = vcombine.high %v3147_v43, %v3161_v53 }
 0x108   : > { %v5103_v28 = vpop.f32.mrb[0].mxu0  ;;  %v5173_v48 = vpop.f32.mrb[0].mxu1 }
 0x109   : > { %v5104_v29 = vpop.f32.mrb[1].mxu0  ;;  %v5174_v46 = vpop.f32.mrb[1].mxu1 }
 0x10a   : > { %v5105_v36 = vadd.f32 %v5104_v29, %v5103_v28  ;;  %v5175_v27 = vadd.f32 %v5174_v46, %v5173_v48  ;;  %v5106_v61 = vpop.f32.mrb[2].mxu0  ;;  %v5176_v25 = vpop.f32.mrb[2].mxu1 }
 0x10b   : > { %v5107_v9 = vpop.f32.mrb[3].mxu0  ;;  %v5177_v47 = vpop.f32.mrb[3].mxu1  ;;  %3474 = vmatmul.mubr.bf16.gmra.mrb[92].mxu0 %v3061_v40  ;;  %3579 = vmatmul.mubr.bf16.gmra.mrb[92].mxu1 %v3063_v4  ;;  %v3172_v40 = vcombine.high %v3154_v50, %v3168_v49  ;;  %v7625_v4 = vld [vmem:[#allocation5_spill] sm:$0xff] }
 0x10c   : > { %v7168_v57 = vadd.f32 %v5175_v27, %v5105_v36  ;;  %v5108_v6 = vadd.f32 %v5107_v9, %v5106_v61  ;;  %v5178_v42 = vadd.f32 %v5177_v47, %v5176_v25  ;;  %3481 = vmatprep.mubr.bf16.mxu0 %v3098_v51  ;;  %3586 = vmatprep.mubr.bf16.mxu1 %v3100_v3  ;;  %v7626_v51 = vld [vmem:[#allocation4_spill] sm:$0xff] }
 0x10d   : > { %v3730_v18 = vcombine.low %v7626_v51, %v7625_v4  ;;  %v3731_v22 = vcombine.high %v7626_v51, %v7625_v4  ;;  %v3738_v36 = vrot.slane %v3728_v32, %v6059_v31  ;;  %v3745_v25 = vrot.slane %v3729_v24, %v6059_v31  ;;  %v7631_v32 = vld [vmem:[#allocation11_spill] sm:$0xff] }
 0x10e   : > { %v7176_v37 = vadd.f32 %v5178_v42, %v5108_v6  ;;  %v3169_v42 = vcombine.low %v3147_v43, %v3161_v53 }
 0x10f   : > { %v3752_v61 = vrot.slane %v3730_v18, %v6059_v31  ;;  %v3759_v9 = vrot.slane %v3731_v22, %v6059_v31 }
 0x111   : > { %v3761_v45 = vcombine.high %v3738_v36, %v3752_v61  ;;  %v3763_v55 = vcombine.high %v3745_v25, %v3759_v9  ;;  %v3760_v62 = vcombine.low %v3738_v36, %v3752_v61  ;;  %v3762_v39 = vcombine.low %v3745_v25, %v3759_v9 }
 0x113   : > { %3482 = vmatmul.mubr.bf16.gmra.mrb[96].mxu0 %v3097_v30  ;;  %3587 = vmatmul.mubr.bf16.gmra.mrb[96].mxu1 %v3099_v2  ;;  %v7629_v30 = vld [vmem:[#allocation9_spill] sm:$0xff]  ;;  %v7630_v2 = vld [vmem:[#allocation8_spill] sm:$0xff] }
 0x114   : > { %3489 = vmatprep.mubr.bf16.mxu0 %v3134_v17  ;;  %3594 = vmatprep.mubr.bf16.mxu1 %v3136_v34  ;;  %v3766_v58 = vcombine.low %v7630_v2, %v7629_v30  ;;  %v3767_v43 = vcombine.high %v7630_v2, %v7629_v30 }
 0x115   : > { %v5179_v8 = vpop.f32.mrb[4].mxu1 }
 0x116   : > { %v5109_v38 = vpop.f32.mrb[4].mxu0  ;;  %v5180_v20 = vpop.f32.mrb[5].mxu1 }
 0x117   : > { %v5110_v41 = vpop.f32.mrb[5].mxu0  ;;  %v5181_v0 = vadd.f32 %v5180_v20, %v5179_v8  ;;  %v5182_v48 = vpop.f32.mrb[6].mxu1  ;;  %v3781_v20 = vrot.slane %v3765_v33, %v6059_v31 }
 0x118   : > { %v5111_v21 = vadd.f32 %v5110_v41, %v5109_v38  ;;  %v5112_v28 = vpop.f32.mrb[6].mxu0  ;;  %v5183_v46 = vpop.f32.mrb[7].mxu1  ;;  %v3788_v41 = vrot.slane %v3766_v58, %v6059_v31  ;;  %v7637_v58 = vld [vmem:[#allocation18_spill] sm:$0xff] }
 0x119   : > { %v5113_v29 = vpop.f32.mrb[7].mxu0  ;;  %v5184_v60 = vadd.f32 %v5183_v46, %v5182_v48  ;;  %v7634_v48 = vld [vmem:[#allocation12_spill] sm:$0xff] }
 0x11a   : > { %v7198_v3 = vadd.f32 %v5181_v0, %v5111_v21  ;;  %v5114_v5 = vadd.f32 %v5113_v29, %v5112_v28  ;;  %v7632_v21 = vld [vmem:[#allocation10_spill] sm:$0xff] }
 0x11b   : > { %3490 = vmatmul.mubr.bf16.gmra.mrb[100].mxu0 %v3133_v14  ;;  %3595 = vmatmul.mubr.bf16.gmra.mrb[100].mxu1 %v3135_v63  ;;  %v3774_v14 = vrot.slane %v3764_v1, %v6059_v31  ;;  %v3800_v0 = vcombine.low %v7632_v21, %v7631_v32  ;;  %v7633_v28 = vld [vmem:[#allocation14_spill] sm:$0xff]  ;;  %v3801_v18 = vcombine.high %v7632_v21, %v7631_v32  ;;  %v7635_v1 = vld [vmem:[#allocation16_spill] sm:$0xff] }
 0x11c   : > { %v7201_v27 = vadd.f32 %v5184_v60, %v5114_v5  ;;  %3497 = vmatprep.mubr.bf16.mxu0 %v3170_v15  ;;  %3602 = vmatprep.mubr.bf16.mxu1 %v3172_v40  ;;  %v3795_v15 = vrot.slane %v3767_v43, %v6059_v31  ;;  %v3802_v40 = vcombine.low %v7634_v48, %v7633_v28 }
 0x11d   : > { %v5185_v6 = vpop.f32.mrb[8].mxu1  ;;  %v3797_v4 = vcombine.high %v3774_v14, %v3788_v41  ;;  %v3803_v24 = vcombine.high %v7634_v48, %v7633_v28  ;;  %v3810_v22 = vrot.slane %v3800_v0, %v6059_v31  ;;  %v3817_v46 = vrot.slane %v3801_v18, %v6059_v31  ;;  %v7641_v48 = vld [vmem:[#allocation24_spill] sm:$0xff] }
 0x11e   : > { %v5115_v47 = vpop.f32.mrb[8].mxu0  ;;  %v5186_v56 = vpop.f32.mrb[9].mxu1  ;;  %v3799_v51 = vcombine.high %v3781_v20, %v3795_v15  ;;  %v3824_v29 = vrot.slane %v3802_v40, %v6059_v31  ;;  %v3796_v61 = vcombine.low %v3774_v14, %v3788_v41  ;;  %v7642_v40 = vld [vmem:[#allocation22_spill] sm:$0xff] }
 0x11f   : > { %v5116_v54 = vpop.f32.mrb[9].mxu0  ;;  %v5187_v23 = vadd.f32 %v5186_v56, %v5185_v6  ;;  %v5188_v34 = vpop.f32.mrb[10].mxu1  ;;  %v3831_v5 = vrot.slane %v3803_v24, %v6059_v31  ;;  %v3875_v18 = vcombine.high %v7642_v40, %v7641_v48 }
 0x120   : > { %v5117_v59 = vadd.f32 %v5116_v54, %v5115_v47  ;;  %v5118_v17 = vpop.f32.mrb[10].mxu0  ;;  %v5189_v38 = vpop.f32.mrb[11].mxu1  ;;  %v3798_v47 = vcombine.low %v3781_v20, %v3795_v15  ;;  %v7636_v54 = vld [vmem:[#allocation15_spill] sm:$0xff]  ;;  %v3832_v41 = vcombine.low %v3810_v22, %v3824_v29 }
 0x121   : > { %v5119_v53 = vpop.f32.mrb[11].mxu0  ;;  %v5190_v49 = vadd.f32 %v5189_v38, %v5188_v34  ;;  %v3836_v56 = vcombine.low %v7636_v54, %v7635_v1  ;;  %v3834_v21 = vcombine.low %v3817_v46, %v3831_v5 }
 0x122   : > { %v7214_v8 = vadd.f32 %v5187_v23, %v5117_v59  ;;  %v5120_v50 = vadd.f32 %v5119_v53, %v5118_v17  ;;  %v7638_v59 = vld [vmem:[#allocation17_spill] sm:$0xff]  ;;  %v3837_v17 = vcombine.high %v7636_v54, %v7635_v1  ;;  %v3903_v1 = vrot.slane %v3875_v18, %v6059_v31 }
 0x123   : > { %3498 = vmatmul.mubr.bf16.gmra.mrb[104].mxu0 %v3169_v42  ;;  %3603 = vmatmul.mubr.bf16.gmra.mrb[104].mxu1 %v3171_v13  ;;  %v3833_v13 = vcombine.high %v3810_v22, %v3824_v29  ;;  %v3838_v23 = vcombine.low %v7638_v59, %v7637_v58  ;;  %v3839_v34 = vcombine.high %v7638_v59, %v7637_v58  ;;  %v7645_v58 = vld [vmem:[#allocation28_spill] sm:$0xff]  ;;  %v7646_v59 = vld [vmem:[#allocation27_spill] sm:$0xff] }
 0x124   : > { %v7217_v63 = vadd.f32 %v5190_v49, %v5120_v50  ;;  %4312 = vmatprep.mubr.bf16.mxu0 %v3761_v45  ;;  %4417 = vmatprep.mubr.bf16.mxu1 %v3763_v55  ;;  %v3835_v45 = vcombine.high %v3817_v46, %v3831_v5  ;;  %v3846_v38 = vrot.slane %v3836_v56, %v6059_v31 }
 0x125   : > { %v3860_v50 = vrot.slane %v3838_v23, %v6059_v31  ;;  %v3853_v49 = vrot.slane %v3837_v17, %v6059_v31  ;;  %v3867_v14 = vrot.slane %v3839_v34, %v6059_v31  ;;  %v3910_v23 = vcombine.low %v7646_v59, %v7645_v58 }
 0x127   : > { %v3869_v24 = vcombine.high %v3846_v38, %v3860_v50  ;;  %v3868_v54 = vcombine.low %v3846_v38, %v3860_v50  ;;  %v3870_v56 = vcombine.low %v3853_v49, %v3867_v14 }
 0x12b   : > { %4313 = vmatmul.mubr.bf16.vlgmr.msra.gmra.mrb[108].mxu0 %v3760_v62  ;;  %4418 = vmatmul.mubr.bf16.vlgmr.msra.gmra.mrb[108].mxu1 %v3762_v39  ;;  %v7639_v62 = vld [vmem:[#allocation21_spill] sm:$0xff]  ;;  %v7640_v39 = vld [vmem:[#allocation19_spill] sm:$0xff] }
 0x12c   : > { %4320 = vmatprep.mubr.bf16.mxu0 %v3797_v4  ;;  %4425 = vmatprep.mubr.bf16.mxu1 %v3799_v51  ;;  %v5121_v60 = vpop.f32.mrb[12].mxu0  ;;  %v5191_v36 = vpop.f32.mrb[12].mxu1  ;;  %v3872_v32 = vcombine.low %v7640_v39, %v7639_v62  ;;  %v3874_v4 = vcombine.low %v7642_v40, %v7641_v48  ;;  %v3873_v51 = vcombine.high %v7640_v39, %v7639_v62 }
 0x12d   : > { %v5122_v25 = vpop.f32.mrb[13].mxu0  ;;  %v5192_v9 = vpop.f32.mrb[13].mxu1 }
 0x12e   : > { %v5123_v6 = vadd.f32 %v5122_v25, %v5121_v60  ;;  %v5193_v42 = vadd.f32 %v5192_v9, %v5191_v36  ;;  %v5124_v19 = vpop.f32.mrb[14].mxu0  ;;  %v5194_v12 = vpop.f32.mrb[14].mxu1  ;;  %v3871_v60 = vcombine.high %v3853_v49, %v3867_v14  ;;  %v3932_v14 = vrot.slane %v3910_v23, %v6059_v31  ;;  %v7654_v23 = vld [vmem:[#allocation37_spill] sm:$0xff] }
 0x12f   : > { %v5125_v30 = vpop.f32.mrb[15].mxu0  ;;  %v5195_v2 = vpop.f32.mrb[15].mxu1 }
 0x130   : > { %v7242_v55 = vadd.f32 %v5193_v42, %v5123_v6  ;;  %v5126_v33 = vadd.f32 %v5125_v30, %v5124_v19  ;;  %v5196_v43 = vadd.f32 %v5195_v2, %v5194_v12  ;;  %v3882_v6 = vrot.slane %v3872_v32, %v6059_v31  ;;  %v7644_v30 = vld [vmem:[#allocation25_spill] sm:$0xff] }
 0x131   : > { %v3896_v42 = vrot.slane %v3874_v4, %v6059_v31  ;;  %v3889_v12 = vrot.slane %v3873_v51, %v6059_v31  ;;  %v7647_v4 = vld [vmem:[#allocation32_spill] sm:$0xff]  ;;  %v7648_v51 = vld [vmem:[#allocation31_spill] sm:$0xff] }
 0x132   : > { %v7244_v53 = vadd.f32 %v5196_v43, %v5126_v33  ;;  %v3911_v33 = vcombine.high %v7646_v59, %v7645_v58  ;;  %v3944_v18 = vcombine.low %v7648_v51, %v7647_v4  ;;  %v7653_v59 = vld [vmem:[#allocation38_spill] sm:$0xff] }
 0x133   : > { %4321 = vmatmul.mubr.bf16.gmra.mrb[112].mxu0 %v3796_v61  ;;  %4426 = vmatmul.mubr.bf16.gmra.mrb[112].mxu1 %v3798_v47  ;;  %v3905_v17 = vcombine.high %v3882_v6, %v3896_v42  ;;  %v3907_v34 = vcombine.high %v3889_v12, %v3903_v1 }
 0x134   : > { %4328 = vmatprep.mubr.bf16.mxu0 %v3833_v13  ;;  %4433 = vmatprep.mubr.bf16.mxu1 %v3835_v45  ;;  %v7643_v13 = vld [vmem:[#allocation26_spill] sm:$0xff] }
 0x135   : > { %v3908_v2 = vcombine.low %v7644_v30, %v7643_v13  ;;  %v3909_v45 = vcombine.high %v7644_v30, %v7643_v13  ;;  %v7651_v13 = vld [vmem:[#allocation36_spill] sm:$0xff]  ;;  %v7652_v30 = vld [vmem:[#allocation35_spill] sm:$0xff] }
 0x136   : > { %v5127_v20 = vpop.f32.mrb[16].mxu0  ;;  %v5197_v15 = vpop.f32.mrb[16].mxu1 }
 0x137   : > { %v5128_v0 = vpop.f32.mrb[17].mxu0  ;;  %v5198_v28 = vpop.f32.mrb[17].mxu1  ;;  %v3918_v38 = vrot.slane %v3908_v2, %v6059_v31  ;;  %v3980_v2 = vcombine.low %v7652_v30, %v7651_v13 }
 0x138   : > { %v5129_v22 = vadd.f32 %v5128_v0, %v5127_v20  ;;  %v5199_v29 = vadd.f32 %v5198_v28, %v5197_v15  ;;  %v5130_v36 = vpop.f32.mrb[18].mxu0  ;;  %v5200_v61 = vpop.f32.mrb[18].mxu1  ;;  %v3925_v20 = vrot.slane %v3909_v45, %v6059_v31  ;;  %v3939_v15 = vrot.slane %v3911_v33, %v6059_v31 }
 0x139   : > { %v5131_v25 = vpop.f32.mrb[19].mxu0  ;;  %v5201_v9 = vpop.f32.mrb[19].mxu1  ;;  %v3904_v0 = vcombine.low %v3882_v6, %v3896_v42  ;;  %v3906_v28 = vcombine.low %v3889_v12, %v3903_v1  ;;  %v3954_v42 = vrot.slane %v3944_v18, %v6059_v31  ;;  %v3983_v45 = vcombine.high %v7654_v23, %v7653_v59 }
 0x13a   : > { %v7258_v46 = vadd.f32 %v5199_v29, %v5129_v22  ;;  %v5132_v5 = vadd.f32 %v5131_v25, %v5130_v36  ;;  %v5202_v47 = vadd.f32 %v5201_v9, %v5200_v61  ;;  %v7649_v29 = vld [vmem:[#allocation34_spill] sm:$0xff]  ;;  %v7650_v36 = vld [vmem:[#allocation33_spill] sm:$0xff]  ;;  %v3941_v25 = vcombine.high %v3918_v38, %v3932_v14 }
 0x13b   : > { %4329 = vmatmul.mubr.bf16.gmra.mrb[116].mxu0 %v3832_v41  ;;  %4434 = vmatmul.mubr.bf16.gmra.mrb[116].mxu1 %v3834_v21  ;;  %v3946_v61 = vcombine.low %v7650_v36, %v7649_v29  ;;  %v3943_v9 = vcombine.high %v3925_v20, %v3939_v15  ;;  %v3942_v58 = vcombine.low %v3925_v20, %v3939_v15 }
 0x13c   : > { %4336 = vmatprep.mubr.bf16.mxu0 %v3869_v24  ;;  %4441 = vmatprep.mubr.bf16.mxu1 %v3871_v60  ;;  %v7262_v19 = vadd.f32 %v5202_v47, %v5132_v5  ;;  %v3945_v5 = vcombine.high %v7648_v51, %v7647_v4  ;;  %v3947_v47 = vcombine.high %v7650_v36, %v7649_v29 }
 0x13d   : > { %v3968_v12 = vrot.slane %v3946_v61, %v6059_v31  ;;  %v3990_v20 = vrot.slane %v3980_v2, %v6059_v31 }
 0x13e   : > { %v3961_v1 = vrot.slane %v3945_v5, %v6059_v31 }
 0x143   : > { %4337 = vmatmul.mubr.bf16.gmra.mrb[120].mxu0 %v3868_v54  ;;  %4442 = vmatmul.mubr.bf16.gmra.mrb[120].mxu1 %v3870_v56  ;;  %v5133_v43 = vpop.f32.mrb[20].mxu0  ;;  %v5203_v41 = vpop.f32.mrb[20].mxu1  ;;  %v3975_v54 = vrot.slane %v3947_v47, %v6059_v31  ;;  %v3940_v56 = vcombine.low %v3918_v38, %v3932_v14 }
 0x144   : > { %4344 = vmatprep.mubr.bf16.mxu0 %v3905_v17  ;;  %4449 = vmatprep.mubr.bf16.mxu1 %v3907_v34  ;;  %v5134_v50 = vpop.f32.mrb[21].mxu0  ;;  %v5204_v49 = vpop.f32.mrb[21].mxu1  ;;  %v3982_v17 = vcombine.low %v7654_v23, %v7653_v59  ;;  %v3981_v34 = vcombine.high %v7652_v30, %v7651_v13 }
 0x145   : > { %v5135_v62 = vadd.f32 %v5134_v50, %v5133_v43  ;;  %v5205_v39 = vadd.f32 %v5204_v49, %v5203_v41  ;;  %v5136_v32 = vpop.f32.mrb[22].mxu0  ;;  %v5206_v21 = vpop.f32.mrb[22].mxu1  ;;  %v3977_v41 = vcombine.high %v3954_v42, %v3968_v12  ;;  %v3979_v50 = vcombine.high %v3961_v1, %v3975_v54 }
 0x146   : > { %v5137_v48 = vpop.f32.mrb[23].mxu0  ;;  %v5207_v40 = vpop.f32.mrb[23].mxu1 }
 0x147   : > { %v7280_v24 = vadd.f32 %v5205_v39, %v5135_v62  ;;  %v5138_v60 = vadd.f32 %v5137_v48, %v5136_v32  ;;  %v5208_v22 = vadd.f32 %v5207_v40, %v5206_v21  ;;  %v4011_v48 = vrot.slane %v3983_v45, %v6059_v31 }
 0x149   : > { %v7288_v6 = vadd.f32 %v5208_v22, %v5138_v60  ;;  %v3976_v60 = vcombine.low %v3954_v42, %v3968_v12  ;;  %v3978_v22 = vcombine.low %v3961_v1, %v3975_v54 }
 0x14b   : > { %4345 = vmatmul.mubr.bf16.gmra.mrb[124].mxu0 %v3904_v0  ;;  %4450 = vmatmul.mubr.bf16.gmra.mrb[124].mxu1 %v3906_v28  ;;  %v4004_v0 = vrot.slane %v3982_v17, %v6059_v31  ;;  %v3997_v28 = vrot.slane %v3981_v34, %v6059_v31 }
 0x14c   : > { %4352 = vmatprep.mubr.bf16.mxu0 %v3941_v25  ;;  %4457 = vmatprep.mubr.bf16.mxu1 %v3943_v9 }
 0x14d   : > { %v4013_v29 = vcombine.high %v3990_v20, %v4004_v0  ;;  %v4015_v36 = vcombine.high %v3997_v28, %v4011_v48  ;;  %v4014_v59 = vcombine.low %v3997_v28, %v4011_v48 }
 0x150   : > { %v5139_v33 = vpop.f32.mrb[24].mxu0  ;;  %v5209_v43 = vpop.f32.mrb[24].mxu1 }
 0x151   : > { %v5140_v49 = vpop.f32.mrb[25].mxu0  ;;  %v5210_v62 = vpop.f32.mrb[25].mxu1 }
 0x152   : > { %v5141_v38 = vadd.f32 %v5140_v49, %v5139_v33  ;;  %v5211_v14 = vadd.f32 %v5210_v62, %v5209_v43  ;;  %v5142_v39 = vpop.f32.mrb[26].mxu0  ;;  %v5212_v32 = vpop.f32.mrb[26].mxu1 }
 0x153   : > { %4353 = vmatmul.mubr.bf16.gmra.mrb[128].mxu0 %v3940_v56  ;;  %4458 = vmatmul.mubr.bf16.gmra.mrb[128].mxu1 %v3942_v58  ;;  %v5143_v15 = vpop.f32.mrb[27].mxu0  ;;  %v5213_v21 = vpop.f32.mrb[27].mxu1  ;;  %v4012_v58 = vcombine.low %v3990_v20, %v4004_v0 }
 0x154   : > { %v7306_v40 = vadd.f32 %v5211_v14, %v5141_v38  ;;  %v5144_v4 = vadd.f32 %v5143_v15, %v5142_v39  ;;  %v5214_v51 = vadd.f32 %v5213_v21, %v5212_v32  ;;  %4360 = vmatprep.mubr.bf16.mxu0 %v3977_v41  ;;  %4465 = vmatprep.mubr.bf16.mxu1 %v3979_v50 }
 0x156   : > { %v7308_v18 = vadd.f32 %v5214_v51, %v5144_v4 }
 0x15b   : > { %4361 = vmatmul.mubr.bf16.gmra.mrb[132].mxu0 %v3976_v60  ;;  %4466 = vmatmul.mubr.bf16.gmra.mrb[132].mxu1 %v3978_v22 }
 0x15c   : > { %v5145_v61 = vpop.f32.mrb[28].mxu0  ;;  %v5215_v25 = vpop.f32.mrb[28].mxu1  ;;  %4368 = vmatprep.mubr.bf16.mxu0 %v4013_v29  ;;  %4473 = vmatprep.mubr.bf16.mxu1 %v4015_v36 }
 0x15d   : > { %v5146_v9 = vpop.f32.mrb[29].mxu0  ;;  %v5216_v31 = vpop.f32.mrb[29].mxu1 }
 0x15e   : > { %v5147_v5 = vadd.f32 %v5146_v9, %v5145_v61  ;;  %v5217_v47 = vadd.f32 %v5216_v31, %v5215_v25  ;;  %v5148_v56 = vpop.f32.mrb[30].mxu0  ;;  %v5218_v13 = vpop.f32.mrb[30].mxu1 }
 0x15f   : > { %v5149_v30 = vpop.f32.mrb[31].mxu0  ;;  %v5219_v2 = vpop.f32.mrb[31].mxu1 }
 0x160   : > { %v7310_v42 = vadd.f32 %v5217_v47, %v5147_v5  ;;  %v5150_v12 = vadd.f32 %v5149_v30, %v5148_v56  ;;  %v5220_v1 = vadd.f32 %v5219_v2, %v5218_v13 }
 0x162   : > { %v7312_v54 = vadd.f32 %v5220_v1, %v5150_v12 }
 0x163   : > { %4369 = vmatmul.mubr.bf16.gmra.mrb[136].mxu0 %v4012_v58  ;;  %4474 = vmatmul.mubr.bf16.gmra.mrb[136].mxu1 %v4014_v59 }
 0x164   : > { %4376 = vmatprep.mubr.bf16.mxu0 %v4049_v11  ;;  %4481 = vmatprep.mubr.bf16.mxu1 %v4051_v44 }
 0x166   : > { %v5151_v23 = vpop.f32.mrb[32].mxu0  ;;  %v5221_v17 = vpop.f32.mrb[32].mxu1 }
 0x167   : > { %v5152_v34 = vpop.f32.mrb[33].mxu0  ;;  %v5222_v45 = vpop.f32.mrb[33].mxu1 }
 0x168   : > { %v5153_v33 = vadd.f32 %v5152_v34, %v5151_v23  ;;  %v5223_v43 = vadd.f32 %v5222_v45, %v5221_v17  ;;  %v5154_v41 = vpop.f32.mrb[34].mxu0  ;;  %v5224_v50 = vpop.f32.mrb[34].mxu1 }
 0x169   : > { %v5155_v49 = vpop.f32.mrb[35].mxu0  ;;  %v5225_v62 = vpop.f32.mrb[35].mxu1 }
 0x16a   : > { %v7320_v38 = vadd.f32 %v5223_v43, %v5153_v33  ;;  %v5156_v14 = vadd.f32 %v5155_v49, %v5154_v41  ;;  %v5226_v39 = vadd.f32 %v5225_v62, %v5224_v50 }
 0x16b   : > { %4377 = vmatmul.mubr.bf16.gmra.mrb[140].mxu0 %v4048_v7  ;;  %4482 = vmatmul.mubr.bf16.gmra.mrb[140].mxu1 %v4050_v26 }
 0x16c   : > { %v7328_v11 = vadd.f32 %v5226_v39, %v5156_v14 }
 0x16e   : > { %v5243_v44 = vpop.f32.mrb[36].mxu0  ;;  %v5313_v32 = vpop.f32.mrb[36].mxu1 }
 0x16f   : > { %v5244_v20 = vpop.f32.mrb[37].mxu0  ;;  %v5314_v15 = vpop.f32.mrb[37].mxu1 }
 0x170   : > { %v5245_v21 = vadd.f32 %v5244_v20, %v5243_v44  ;;  %v5315_v0 = vadd.f32 %v5314_v15, %v5313_v32  ;;  %v5246_v28 = vpop.f32.mrb[38].mxu0  ;;  %v5316_v48 = vpop.f32.mrb[38].mxu1 }
 0x171   : > { %v5247_v4 = vpop.f32.mrb[39].mxu0  ;;  %v5317_v51 = vpop.f32.mrb[39].mxu1 }
 0x172   : > { %v2575_v60 = vadd.f32 %v5245_v21, %v7168_v57  ;;  %v5248_v10 = vadd.f32 %v5247_v4, %v5246_v28  ;;  %v5318_v16 = vadd.f32 %v5317_v51, %v5316_v48 }
 0x174   : > { %v7331_v7 = vadd.f32 %v5315_v0, %v2575_v60  ;;  %v2578_v35 = vadd.f32 %v5248_v10, %v7176_v37 }
 0x176   : > { %v7334_v52 = vadd.f32 %v5318_v16, %v2578_v35  ;;  %v5249_v26 = vpop.f32.mrb[40].mxu0  ;;  %v5319_v22 = vpop.f32.mrb[40].mxu1 }
 0x177   : > { %v5250_v29 = vpop.f32.mrb[41].mxu0  ;;  %v5320_v36 = vpop.f32.mrb[41].mxu1 }
 0x178   : > { %v5251_v61 = vadd.f32 %v5250_v29, %v5249_v26  ;;  %v5321_v25 = vadd.f32 %v5320_v36, %v5319_v22  ;;  %v5252_v9 = vpop.f32.mrb[42].mxu0  ;;  %v5322_v31 = vpop.f32.mrb[42].mxu1 }
 0x179   : > { %v5253_v5 = vpop.f32.mrb[43].mxu0  ;;  %v5323_v47 = vpop.f32.mrb[43].mxu1 }
 0x17a   : > { %v2583_v57 = vadd.f32 %v5251_v61, %v7198_v3  ;;  %v5254_v56 = vadd.f32 %v5253_v5, %v5252_v9  ;;  %v5324_v13 = vadd.f32 %v5323_v47, %v5322_v31 }
 0x17c   : > { %v7337_v30 = vadd.f32 %v5321_v25, %v2583_v57  ;;  %v2586_v37 = vadd.f32 %v5254_v56, %v7201_v27 }
 0x17e   : > { %v7340_v2 = vadd.f32 %v5324_v13, %v2586_v37  ;;  %v5255_v58 = vpop.f32.mrb[44].mxu0  ;;  %v5325_v59 = vpop.f32.mrb[44].mxu1 }
 0x17f   : > { %v5256_v12 = vpop.f32.mrb[45].mxu0  ;;  %v5326_v1 = vpop.f32.mrb[45].mxu1 }
 0x180   : > { %v5257_v23 = vadd.f32 %v5256_v12, %v5255_v58  ;;  %v5327_v17 = vadd.f32 %v5326_v1, %v5325_v59  ;;  %v5258_v34 = vpop.f32.mrb[46].mxu0  ;;  %v5328_v45 = vpop.f32.mrb[46].mxu1 }
 0x181   : > { %v5259_v33 = vpop.f32.mrb[47].mxu0  ;;  %v5329_v43 = vpop.f32.mrb[47].mxu1 }
 0x182   : > { %v2591_v3 = vadd.f32 %v5257_v23, %v7214_v8  ;;  %v5260_v41 = vadd.f32 %v5259_v33, %v5258_v34  ;;  %v5330_v50 = vadd.f32 %v5329_v43, %v5328_v45 }
 0x184   : > { %v7343_v49 = vadd.f32 %v5327_v17, %v2591_v3  ;;  %v2594_v27 = vadd.f32 %v5260_v41, %v7217_v63 }
 0x186   : > { %v7346_v62 = vadd.f32 %v5330_v50, %v2594_v27  ;;  %v5261_v14 = vpop.f32.mrb[48].mxu0  ;;  %v5331_v39 = vpop.f32.mrb[48].mxu1 }
 0x187   : > { %v5262_v44 = vpop.f32.mrb[49].mxu0  ;;  %v5332_v32 = vpop.f32.mrb[49].mxu1 }
 0x188   : > { %v5263_v20 = vadd.f32 %v5262_v44, %v5261_v14  ;;  %v5333_v15 = vadd.f32 %v5332_v32, %v5331_v39  ;;  %v5264_v21 = vpop.f32.mrb[50].mxu0  ;;  %v5334_v0 = vpop.f32.mrb[50].mxu1 }
 0x189   : > { %v5265_v28 = vpop.f32.mrb[51].mxu0  ;;  %v5335_v48 = vpop.f32.mrb[51].mxu1 }
 0x18a   : > { %v2599_v8 = vadd.f32 %v5263_v20, %v7242_v55  ;;  %v5266_v4 = vadd.f32 %v5265_v28, %v5264_v21  ;;  %v5336_v51 = vadd.f32 %v5335_v48, %v5334_v0 }
 0x18c   : > { %v7349_v60 = vadd.f32 %v5333_v15, %v2599_v8  ;;  %v2602_v63 = vadd.f32 %v5266_v4, %v7244_v53 }
 0x18e   : > { %v7352_v10 = vadd.f32 %v5336_v51, %v2602_v63  ;;  %v5267_v16 = vpop.f32.mrb[52].mxu0  ;;  %v5337_v35 = vpop.f32.mrb[52].mxu1 }
 0x18f   : > { %v5268_v26 = vpop.f32.mrb[53].mxu0  ;;  %v5338_v22 = vpop.f32.mrb[53].mxu1 }
 0x190   : > { %v5269_v29 = vadd.f32 %v5268_v26, %v5267_v16  ;;  %v5339_v36 = vadd.f32 %v5338_v22, %v5337_v35  ;;  %v5270_v61 = vpop.f32.mrb[54].mxu0  ;;  %v5340_v25 = vpop.f32.mrb[54].mxu1 }
 0x191   : > { %v5271_v9 = vpop.f32.mrb[55].mxu0  ;;  %v5341_v31 = vpop.f32.mrb[55].mxu1 }
 0x192   : > { %v2607_v55 = vadd.f32 %v5269_v29, %v7258_v46  ;;  %v5272_v5 = vadd.f32 %v5271_v9, %v5270_v61  ;;  %v5342_v47 = vadd.f32 %v5341_v31, %v5340_v25 }
 0x194   : > { %v7355_v57 = vadd.f32 %v5339_v36, %v2607_v55  ;;  %v2610_v53 = vadd.f32 %v5272_v5, %v7262_v19 }
 0x196   : > { %v7358_v56 = vadd.f32 %v5342_v47, %v2610_v53  ;;  %v5273_v13 = vpop.f32.mrb[56].mxu0  ;;  %v5343_v37 = vpop.f32.mrb[56].mxu1 }
 0x197   : > { %v5274_v58 = vpop.f32.mrb[57].mxu0  ;;  %v5344_v59 = vpop.f32.mrb[57].mxu1 }
 0x198   : > { %v5275_v12 = vadd.f32 %v5274_v58, %v5273_v13  ;;  %v5345_v1 = vadd.f32 %v5344_v59, %v5343_v37  ;;  %v5276_v23 = vpop.f32.mrb[58].mxu0  ;;  %v5346_v17 = vpop.f32.mrb[58].mxu1 }
 0x199   : > { %v5277_v34 = vpop.f32.mrb[59].mxu0  ;;  %v5347_v45 = vpop.f32.mrb[59].mxu1 }
 0x19a   : > { %v2615_v46 = vadd.f32 %v5275_v12, %v7280_v24  ;;  %v5278_v33 = vadd.f32 %v5277_v34, %v5276_v23  ;;  %v5348_v43 = vadd.f32 %v5347_v45, %v5346_v17 }
 0x19c   : > { %v7361_v3 = vadd.f32 %v5345_v1, %v2615_v46  ;;  %v2618_v19 = vadd.f32 %v5278_v33, %v7288_v6 }
 0x19e   : > { %v7364_v41 = vadd.f32 %v5348_v43, %v2618_v19  ;;  %v5279_v50 = vpop.f32.mrb[60].mxu0  ;;  %v5349_v27 = vpop.f32.mrb[60].mxu1 }
 0x19f   : > { %v5280_v14 = vpop.f32.mrb[61].mxu0  ;;  %v5350_v39 = vpop.f32.mrb[61].mxu1 }
 0x1a0   : > { %v5281_v44 = vadd.f32 %v5280_v14, %v5279_v50  ;;  %v5351_v32 = vadd.f32 %v5350_v39, %v5349_v27  ;;  %v5282_v20 = vpop.f32.mrb[62].mxu0  ;;  %v5352_v15 = vpop.f32.mrb[62].mxu1 }
 0x1a1   : > { %v5283_v21 = vpop.f32.mrb[63].mxu0  ;;  %v5353_v0 = vpop.f32.mrb[63].mxu1 }
 0x1a2   : > { %v2623_v24 = vadd.f32 %v5281_v44, %v7306_v40  ;;  %v5284_v28 = vadd.f32 %v5283_v21, %v5282_v20  ;;  %v5354_v48 = vadd.f32 %v5353_v0, %v5352_v15 }
 0x1a4   : > { %v7367_v8 = vadd.f32 %v5351_v32, %v2623_v24  ;;  %v2626_v6 = vadd.f32 %v5284_v28, %v7308_v18 }
 0x1a6   : > { %v7370_v4 = vadd.f32 %v5354_v48, %v2626_v6  ;;  %v5285_v51 = vpop.f32.mrb[64].mxu0  ;;  %v5355_v63 = vpop.f32.mrb[64].mxu1 }
 0x1a7   : > { %v5286_v16 = vpop.f32.mrb[65].mxu0  ;;  %v5356_v35 = vpop.f32.mrb[65].mxu1 }
 0x1a8   : > { %v5287_v26 = vadd.f32 %v5286_v16, %v5285_v51  ;;  %v5357_v22 = vadd.f32 %v5356_v35, %v5355_v63  ;;  %v5288_v29 = vpop.f32.mrb[66].mxu0  ;;  %v5358_v36 = vpop.f32.mrb[66].mxu1 }
 0x1a9   : > { %v5289_v61 = vpop.f32.mrb[67].mxu0  ;;  %v5359_v25 = vpop.f32.mrb[67].mxu1 }
 0x1aa   : > { %v2631_v40 = vadd.f32 %v5287_v26, %v7310_v42  ;;  %v5290_v9 = vadd.f32 %v5289_v61, %v5288_v29  ;;  %v5360_v31 = vadd.f32 %v5359_v25, %v5358_v36 }
 0x1ac   : > { %v7373_v55 = vadd.f32 %v5357_v22, %v2631_v40  ;;  %v2634_v18 = vadd.f32 %v5290_v9, %v7312_v54 }
 0x1ae   : > { %v7376_v5 = vadd.f32 %v5360_v31, %v2634_v18  ;;  %v5291_v47 = vpop.f32.mrb[68].mxu0  ;;  %v5361_v53 = vpop.f32.mrb[68].mxu1 }
 0x1af   : > { %v5292_v13 = vpop.f32.mrb[69].mxu0  ;;  %v5362_v37 = vpop.f32.mrb[69].mxu1 }
 0x1b0   : > { %v5293_v58 = vadd.f32 %v5292_v13, %v5291_v47  ;;  %v5363_v59 = vadd.f32 %v5362_v37, %v5361_v53  ;;  %v5294_v12 = vpop.f32.mrb[70].mxu0  ;;  %v5364_v1 = vpop.f32.mrb[70].mxu1 }
 0x1b1   : > { %v5295_v23 = vpop.f32.mrb[71].mxu0  ;;  %v5365_v17 = vpop.f32.mrb[71].mxu1 }
 0x1b2   : > { %v2639_v42 = vadd.f32 %v5293_v58, %v7320_v38  ;;  %v5296_v34 = vadd.f32 %v5295_v23, %v5294_v12  ;;  %v5366_v45 = vadd.f32 %v5365_v17, %v5364_v1 }
 0x1b4   : > { %v7379_v46 = vadd.f32 %v5363_v59, %v2639_v42  ;;  %v2642_v54 = vadd.f32 %v5296_v34, %v7328_v11 }
 0x1b6   : > { %v7382_v33 = vadd.f32 %v5366_v45, %v2642_v54  ;;  %v5383_v43 = vpop.f32.mrb[72].mxu0  ;;  %v5453_v19 = vpop.f32.mrb[72].mxu1 }
 0x1b7   : > { %v5384_v50 = vpop.f32.mrb[73].mxu0  ;;  %v5454_v27 = vpop.f32.mrb[73].mxu1 }
 0x1b8   : > { %v5385_v14 = vadd.f32 %v5384_v50, %v5383_v43  ;;  %v5455_v39 = vadd.f32 %v5454_v27, %v5453_v19  ;;  %v5386_v44 = vpop.f32.mrb[74].mxu0  ;;  %v5456_v32 = vpop.f32.mrb[74].mxu1 }
 0x1b9   : > { %v5387_v20 = vpop.f32.mrb[75].mxu0  ;;  %v5457_v15 = vpop.f32.mrb[75].mxu1 }
 0x1ba   : > { %v3541_v21 = vadd.f32 %v5455_v39, %v5385_v14  ;;  %v5388_v38 = vadd.f32 %v5387_v20, %v5386_v44  ;;  %v5458_v0 = vadd.f32 %v5457_v15, %v5456_v32 }
 0x1bc   : > { %v7385_v24 = vadd.f32 %v3541_v21, %v7331_v7  ;;  %v3544_v28 = vadd.f32 %v5458_v0, %v5388_v38 }
 0x1be   : > { %v7388_v11 = vadd.f32 %v3544_v28, %v7334_v52  ;;  %v5389_v48 = vpop.f32.mrb[76].mxu0  ;;  %v5459_v6 = vpop.f32.mrb[76].mxu1 }
 0x1bf   : > { %v5390_v51 = vpop.f32.mrb[77].mxu0  ;;  %v5460_v63 = vpop.f32.mrb[77].mxu1 }
 0x1c0   : > { %v5391_v16 = vadd.f32 %v5390_v51, %v5389_v48  ;;  %v5461_v35 = vadd.f32 %v5460_v63, %v5459_v6  ;;  %v5392_v26 = vpop.f32.mrb[78].mxu0  ;;  %v5462_v22 = vpop.f32.mrb[78].mxu1 }
 0x1c1   : > { %v5393_v29 = vpop.f32.mrb[79].mxu0  ;;  %v5463_v36 = vpop.f32.mrb[79].mxu1 }
 0x1c2   : > { %v3549_v61 = vadd.f32 %v5461_v35, %v5391_v16  ;;  %v5394_v25 = vadd.f32 %v5393_v29, %v5392_v26  ;;  %v5464_v40 = vadd.f32 %v5463_v36, %v5462_v22 }
 0x1c4   : > { %v7391_v7 = vadd.f32 %v3549_v61, %v7337_v30  ;;  %v3552_v9 = vadd.f32 %v5464_v40, %v5394_v25 }
 0x1c6   : > { %v7394_v52 = vadd.f32 %v3552_v9, %v7340_v2  ;;  %v5395_v31 = vpop.f32.mrb[80].mxu0  ;;  %v5465_v18 = vpop.f32.mrb[80].mxu1 }
 0x1c7   : > { %v5396_v47 = vpop.f32.mrb[81].mxu0  ;;  %v5466_v53 = vpop.f32.mrb[81].mxu1 }
 0x1c8   : > { %v5397_v13 = vadd.f32 %v5396_v47, %v5395_v31  ;;  %v5467_v37 = vadd.f32 %v5466_v53, %v5465_v18  ;;  %v5398_v58 = vpop.f32.mrb[82].mxu0  ;;  %v5468_v59 = vpop.f32.mrb[82].mxu1 }
 0x1c9   : > { %v5399_v12 = vpop.f32.mrb[83].mxu0  ;;  %v5469_v1 = vpop.f32.mrb[83].mxu1 }
 0x1ca   : > { %v3557_v23 = vadd.f32 %v5467_v37, %v5397_v13  ;;  %v5400_v17 = vadd.f32 %v5399_v12, %v5398_v58  ;;  %v5470_v42 = vadd.f32 %v5469_v1, %v5468_v59 }
 0x1cc   : > { %v7397_v30 = vadd.f32 %v3557_v23, %v7343_v49  ;;  %v3560_v34 = vadd.f32 %v5470_v42, %v5400_v17 }
 0x1ce   : > { %v7400_v2 = vadd.f32 %v3560_v34, %v7346_v62  ;;  %v5401_v45 = vpop.f32.mrb[84].mxu0  ;;  %v5471_v54 = vpop.f32.mrb[84].mxu1 }
 0x1cf   : > { %v5402_v43 = vpop.f32.mrb[85].mxu0  ;;  %v5472_v19 = vpop.f32.mrb[85].mxu1 }
 0x1d0   : > { %v5403_v50 = vadd.f32 %v5402_v43, %v5401_v45  ;;  %v5473_v27 = vadd.f32 %v5472_v19, %v5471_v54  ;;  %v5404_v14 = vpop.f32.mrb[86].mxu0  ;;  %v5474_v39 = vpop.f32.mrb[86].mxu1 }
 0x1d1   : > { %v5405_v44 = vpop.f32.mrb[87].mxu0  ;;  %v5475_v32 = vpop.f32.mrb[87].mxu1 }
 0x1d2   : > { %v3565_v20 = vadd.f32 %v5473_v27, %v5403_v50  ;;  %v5406_v15 = vadd.f32 %v5405_v44, %v5404_v14  ;;  %v5476_v21 = vadd.f32 %v5475_v32, %v5474_v39 }
 0x1d4   : > { %v7403_v49 = vadd.f32 %v3565_v20, %v7349_v60  ;;  %v3568_v38 = vadd.f32 %v5476_v21, %v5406_v15 }
 0x1d6   : > { %v7406_v62 = vadd.f32 %v3568_v38, %v7352_v10  ;;  %v5407_v0 = vpop.f32.mrb[88].mxu0  ;;  %v5477_v28 = vpop.f32.mrb[88].mxu1 }
 0x1d7   : > { %v5408_v48 = vpop.f32.mrb[89].mxu0  ;;  %v5478_v6 = vpop.f32.mrb[89].mxu1 }
 0x1d8   : > { %v5409_v51 = vadd.f32 %v5408_v48, %v5407_v0  ;;  %v5479_v63 = vadd.f32 %v5478_v6, %v5477_v28  ;;  %v5410_v16 = vpop.f32.mrb[90].mxu0  ;;  %v5480_v35 = vpop.f32.mrb[90].mxu1 }
 0x1d9   : > { %v5411_v26 = vpop.f32.mrb[91].mxu0  ;;  %v5481_v22 = vpop.f32.mrb[91].mxu1 }
 0x1da   : > { %v3573_v29 = vadd.f32 %v5479_v63, %v5409_v51  ;;  %v5412_v36 = vadd.f32 %v5411_v26, %v5410_v16  ;;  %v5482_v61 = vadd.f32 %v5481_v22, %v5480_v35 }
 0x1dc   : > { %v7409_v60 = vadd.f32 %v3573_v29, %v7355_v57  ;;  %v3576_v25 = vadd.f32 %v5482_v61, %v5412_v36 }
 0x1de   : > { %v7412_v10 = vadd.f32 %v3576_v25, %v7358_v56  ;;  %v5413_v40 = vpop.f32.mrb[92].mxu0  ;;  %v5483_v9 = vpop.f32.mrb[92].mxu1 }
 0x1df   : > { %v5414_v31 = vpop.f32.mrb[93].mxu0  ;;  %v5484_v18 = vpop.f32.mrb[93].mxu1 }
 0x1e0   : > { %v5415_v47 = vadd.f32 %v5414_v31, %v5413_v40  ;;  %v5485_v53 = vadd.f32 %v5484_v18, %v5483_v9  ;;  %v5416_v13 = vpop.f32.mrb[94].mxu0  ;;  %v5486_v37 = vpop.f32.mrb[94].mxu1 }
 0x1e1   : > { %v5417_v58 = vpop.f32.mrb[95].mxu0  ;;  %v5487_v59 = vpop.f32.mrb[95].mxu1 }
 0x1e2   : > { %v3581_v12 = vadd.f32 %v5485_v53, %v5415_v47  ;;  %v5418_v1 = vadd.f32 %v5417_v58, %v5416_v13  ;;  %v5488_v23 = vadd.f32 %v5487_v59, %v5486_v37 }
 0x1e4   : > { %v7415_v57 = vadd.f32 %v3581_v12, %v7361_v3  ;;  %v3584_v17 = vadd.f32 %v5488_v23, %v5418_v1 }
 0x1e6   : > { %v7418_v56 = vadd.f32 %v3584_v17, %v7364_v41  ;;  %v5419_v42 = vpop.f32.mrb[96].mxu0  ;;  %v5489_v34 = vpop.f32.mrb[96].mxu1 }
 0x1e7   : > { %v5420_v45 = vpop.f32.mrb[97].mxu0  ;;  %v5490_v54 = vpop.f32.mrb[97].mxu1 }
 0x1e8   : > { %v5421_v43 = vadd.f32 %v5420_v45, %v5419_v42  ;;  %v5491_v19 = vadd.f32 %v5490_v54, %v5489_v34  ;;  %v5422_v50 = vpop.f32.mrb[98].mxu0  ;;  %v5492_v27 = vpop.f32.mrb[98].mxu1 }
 0x1e9   : > { %v5423_v14 = vpop.f32.mrb[99].mxu0  ;;  %v5493_v39 = vpop.f32.mrb[99].mxu1 }
 0x1ea   : > { %v3589_v44 = vadd.f32 %v5491_v19, %v5421_v43  ;;  %v5424_v32 = vadd.f32 %v5423_v14, %v5422_v50  ;;  %v5494_v20 = vadd.f32 %v5493_v39, %v5492_v27 }
 0x1ec   : > { %v7421_v3 = vadd.f32 %v3589_v44, %v7367_v8  ;;  %v3592_v15 = vadd.f32 %v5494_v20, %v5424_v32 }
 0x1ee   : > { %v7424_v41 = vadd.f32 %v3592_v15, %v7370_v4  ;;  %v5425_v21 = vpop.f32.mrb[100].mxu0  ;;  %v5495_v38 = vpop.f32.mrb[100].mxu1 }
 0x1ef   : > { %v5426_v0 = vpop.f32.mrb[101].mxu0  ;;  %v5496_v28 = vpop.f32.mrb[101].mxu1 }
 0x1f0   : > { %v5427_v48 = vadd.f32 %v5426_v0, %v5425_v21  ;;  %v5497_v6 = vadd.f32 %v5496_v28, %v5495_v38  ;;  %v5428_v51 = vpop.f32.mrb[102].mxu0  ;;  %v5498_v63 = vpop.f32.mrb[102].mxu1 }
 0x1f1   : > { %v5429_v16 = vpop.f32.mrb[103].mxu0  ;;  %v5499_v35 = vpop.f32.mrb[103].mxu1 }
 0x1f2   : > { %v3597_v26 = vadd.f32 %v5497_v6, %v5427_v48  ;;  %v5430_v22 = vadd.f32 %v5429_v16, %v5428_v51  ;;  %v5500_v29 = vadd.f32 %v5499_v35, %v5498_v63 }
 0x1f4   : > { %v7427_v8 = vadd.f32 %v3597_v26, %v7373_v55  ;;  %v3600_v36 = vadd.f32 %v5500_v29, %v5430_v22 }
 0x1f6   : > { %v7430_v4 = vadd.f32 %v3600_v36, %v7376_v5  ;;  %v5431_v61 = vpop.f32.mrb[104].mxu0  ;;  %v5501_v25 = vpop.f32.mrb[104].mxu1 }
 0x1f7   : > { %v5432_v40 = vpop.f32.mrb[105].mxu0  ;;  %v5502_v9 = vpop.f32.mrb[105].mxu1 }
 0x1f8   : > { %v5433_v31 = vadd.f32 %v5432_v40, %v5431_v61  ;;  %v5503_v18 = vadd.f32 %v5502_v9, %v5501_v25  ;;  %v5434_v47 = vpop.f32.mrb[106].mxu0  ;;  %v5504_v53 = vpop.f32.mrb[106].mxu1 }
 0x1f9   : > { %v5435_v13 = vpop.f32.mrb[107].mxu0  ;;  %v5505_v37 = vpop.f32.mrb[107].mxu1 }
 0x1fa   : > { %v3605_v58 = vadd.f32 %v5503_v18, %v5433_v31  ;;  %v5436_v59 = vadd.f32 %v5435_v13, %v5434_v47  ;;  %v5506_v12 = vadd.f32 %v5505_v37, %v5504_v53 }
 0x1fc   : > { %v7433_v55 = vadd.f32 %v3605_v58, %v7379_v46  ;;  %v3608_v1 = vadd.f32 %v5506_v12, %v5436_v59  ;;  %v7441_v46 = vld [vmem:[%s7505_s2] ss:$0 sm:$0xff] }
 0x1fe   : > { %v7436_v5 = vadd.f32 %v3608_v1, %v7382_v33  ;;  %v5523_v23 = vpop.f32.mrb[108].mxu0  ;;  %v5593_v17 = vpop.f32.mrb[108].mxu1 }
 0x1ff   : > { %v5524_v42 = vpop.f32.mrb[109].mxu0  ;;  %v5594_v34 = vpop.f32.mrb[109].mxu1 }
 0x200   : > { %v5525_v45 = vadd.f32 %v5524_v42, %v5523_v23  ;;  %v5595_v54 = vadd.f32 %v5594_v34, %v5593_v17  ;;  %v5526_v43 = vpop.f32.mrb[110].mxu0  ;;  %v5596_v19 = vpop.f32.mrb[110].mxu1 }
 0x201   : > { %v5527_v50 = vpop.f32.mrb[111].mxu0  ;;  %v5597_v27 = vpop.f32.mrb[111].mxu1 }
 0x202   : > { %v4420_v14 = vadd.f32 %v5595_v54, %v5525_v45  ;;  %v5528_v39 = vadd.f32 %v5527_v50, %v5526_v43  ;;  %v5598_v44 = vadd.f32 %v5597_v27, %v5596_v19 }
 0x204   : > { %v4490_v33 = vadd.f32 %v4420_v14, %v7385_v24  ;;  %v4423_v32 = vadd.f32 %v5598_v44, %v5528_v39 }
 0x206   : > { %v4515_v20 = vadd.f32 %v7441_v46, %v4490_v33  ;;  %v4491_v15 = vadd.f32 %v4423_v32, %v7388_v11  ;;  %v5529_v21 = vpop.f32.mrb[112].mxu0  ;;  %v5599_v38 = vpop.f32.mrb[112].mxu1 }
 0x207   : > { %v5530_v0 = vpop.f32.mrb[113].mxu0  ;;  %v5600_v28 = vpop.f32.mrb[113].mxu1 }
 0x208   : > { %v4551_v48 = vmul.f32 0.2, %v4515_v20  ;;  %v4516_v6 = vadd.f32 %v7441_v46, %v4491_v15  ;;  %v5531_v51 = vadd.f32 %v5530_v0, %v5529_v21  ;;  %v5532_v63 = vpop.f32.mrb[114].mxu0  ;;  %v5602_v16 = vpop.f32.mrb[114].mxu1  ;;  %vm4533_vm7 = vcmp.ge.f32.partialorder %v4515_v20, 0.0 }
 0x209   : > { %v5601_v35 = vadd.f32 %v5600_v28, %v5599_v38  ;;  %v5533_v26 = vpop.f32.mrb[115].mxu0  ;;  %v5603_v24 = vpop.f32.mrb[115].mxu1 }
 0x20a   : > { %vm4534_vm8 = vcmp.ge.f32.partialorder %v4516_v6, 0.0  ;;  %v4552_v22 = vmul.f32 0.2, %v4516_v6  ;;  %v5534_v29 = vadd.f32 %v5533_v26, %v5532_v63  ;;  %v5604_v11 = vadd.f32 %v5603_v24, %v5602_v16 }
 0x20b   : > { %v4428_v36 = vadd.f32 %v5601_v35, %v5531_v51  ;;  %v4569_v61 = vsel %vm4533_vm7, %v4515_v20, %v4551_v48 }
 0x20c   : > { %v4570_v25 = vsel %vm4534_vm8, %v4516_v6, %v4552_v22  ;;  %v4431_v31 = vadd.f32 %v5604_v11, %v5534_v29 }
 0x20d   : > { %v5037_v40 = vpack.c.bf16 %v4570_v25, %v4569_v61  ;;  %v4492_v9 = vadd.f32 %v4428_v36, %v7391_v7 }
 0x20e   : > { %v5535_v18 = vpop.f32.mrb[116].mxu0  ;;  %v5605_v47 = vpop.f32.mrb[116].mxu1  ;;  %v4493_v13 = vadd.f32 %v4431_v31, %v7394_v52 }
 0x20f   : > { %5038 = vst [vmem:[%s7451_s9] sm:$0xff] %v5037_v40   ;;  %v4517_v53 = vadd.f32 %v7441_v46, %v4492_v9  ;;  %v5536_v37 = vpop.f32.mrb[117].mxu0  ;;  %v5606_v58 = vpop.f32.mrb[117].mxu1 }
 0x210   : > { %v5537_v59 = vadd.f32 %v5536_v37, %v5535_v18  ;;  %v5607_v12 = vadd.f32 %v5606_v58, %v5605_v47  ;;  %v5538_v1 = vpop.f32.mrb[118].mxu0  ;;  %v5608_v23 = vpop.f32.mrb[118].mxu1  ;;  %v4518_v42 = vadd.f32 %v7441_v46, %v4493_v13 }
 0x211   : > { %v4553_v17 = vmul.f32 0.2, %v4517_v53  ;;  %v5539_v34 = vpop.f32.mrb[119].mxu0  ;;  %v5609_v45 = vpop.f32.mrb[119].mxu1  ;;  %vm4535_vm9 = vcmp.ge.f32.partialorder %v4517_v53, 0.0 }
 0x212   : > { %v4436_v7 = vadd.f32 %v5607_v12, %v5537_v59  ;;  %v5540_v54 = vadd.f32 %v5539_v34, %v5538_v1  ;;  %v5610_v43 = vadd.f32 %v5609_v45, %v5608_v23  ;;  %vm4536_vm10 = vcmp.ge.f32.partialorder %v4518_v42, 0.0 }
 0x213   : > { %v4554_v19 = vmul.f32 0.2, %v4518_v42  ;;  %v4571_v27 = vsel %vm4535_vm9, %v4517_v53, %v4553_v17 }
 0x214   : > { %v4494_v52 = vadd.f32 %v4436_v7, %v7397_v30  ;;  %v4439_v50 = vadd.f32 %v5610_v43, %v5540_v54 }
 0x215   : > { %v4572_v14 = vsel %vm4536_vm10, %v4518_v42, %v4554_v19 }
 0x216   : > { %v5042_v39 = vpack.c.bf16 %v4572_v14, %v4571_v27  ;;  %v4519_v44 = vadd.f32 %v7441_v46, %v4494_v52  ;;  %v4495_v33 = vadd.f32 %v4439_v50, %v7400_v2  ;;  %v5541_v32 = vpop.f32.mrb[120].mxu0  ;;  %v5611_v20 = vpop.f32.mrb[120].mxu1 }
 0x217   : > { %v5542_v15 = vpop.f32.mrb[121].mxu0  ;;  %v5612_v21 = vpop.f32.mrb[121].mxu1 }
 0x218   : > { %5079 = vst [vmem:[%s7451_s9 + $0x8] sm:$0xff] %v5042_v39   ;;  %v4555_v38 = vmul.f32 0.2, %v4519_v44  ;;  %v4520_v0 = vadd.f32 %v7441_v46, %v4495_v33  ;;  %v5543_v28 = vadd.f32 %v5542_v15, %v5541_v32  ;;  %v5544_v48 = vpop.f32.mrb[122].mxu0  ;;  %v5614_v6 = vpop.f32.mrb[122].mxu1  ;;  %vm4537_vm11 = vcmp.ge.f32.partialorder %v4519_v44, 0.0 }
 0x219   : > { %v5613_v30 = vadd.f32 %v5612_v21, %v5611_v20  ;;  %v5545_v51 = vpop.f32.mrb[123].mxu0  ;;  %v5615_v63 = vpop.f32.mrb[123].mxu1 }
 0x21a   : > { %vm4538_vm12 = vcmp.ge.f32.partialorder %v4520_v0, 0.0  ;;  %v4556_v16 = vmul.f32 0.2, %v4520_v0  ;;  %v5546_v35 = vadd.f32 %v5545_v51, %v5544_v48  ;;  %v5616_v26 = vadd.f32 %v5615_v63, %v5614_v6 }
 0x21b   : > { %v4444_v2 = vadd.f32 %v5613_v30, %v5543_v28  ;;  %v4573_v24 = vsel %vm4537_vm11, %v4519_v44, %v4555_v38 }
 0x21c   : > { %v4574_v22 = vsel %vm4538_vm12, %v4520_v0, %v4556_v16  ;;  %v4447_v11 = vadd.f32 %v5616_v26, %v5546_v35 }
 0x21d   : > { %v5047_v29 = vpack.c.bf16 %v4574_v22, %v4573_v24  ;;  %v4496_v36 = vadd.f32 %v4444_v2, %v7403_v49 }
 0x21e   : > { %v5547_v61 = vpop.f32.mrb[124].mxu0  ;;  %v5617_v25 = vpop.f32.mrb[124].mxu1  ;;  %v4497_v9 = vadd.f32 %v4447_v11, %v7406_v62 }
 0x21f   : > { %5080 = vst [vmem:[%s7451_s9 + $0x10] sm:$0xff] %v5047_v29   ;;  %v4521_v40 = vadd.f32 %v7441_v46, %v4496_v36  ;;  %v5548_v31 = vpop.f32.mrb[125].mxu0  ;;  %v5618_v18 = vpop.f32.mrb[125].mxu1 }
 0x220   : > { %v5549_v47 = vadd.f32 %v5548_v31, %v5547_v61  ;;  %v5619_v53 = vadd.f32 %v5618_v18, %v5617_v25  ;;  %v5550_v13 = vpop.f32.mrb[126].mxu0  ;;  %v5620_v37 = vpop.f32.mrb[126].mxu1  ;;  %v4522_v59 = vadd.f32 %v7441_v46, %v4497_v9 }
 0x221   : > { %v4557_v58 = vmul.f32 0.2, %v4521_v40  ;;  %v5551_v12 = vpop.f32.mrb[127].mxu0  ;;  %v5621_v1 = vpop.f32.mrb[127].mxu1  ;;  %vm4539_vm13 = vcmp.ge.f32.partialorder %v4521_v40, 0.0 }
 0x222   : > { %v4452_v49 = vadd.f32 %v5619_v53, %v5549_v47  ;;  %v5552_v23 = vadd.f32 %v5551_v12, %v5550_v13  ;;  %v5622_v17 = vadd.f32 %v5621_v1, %v5620_v37  ;;  %vm4540_vm14 = vcmp.ge.f32.partialorder %v4522_v59, 0.0 }
 0x223   : > { %v4558_v42 = vmul.f32 0.2, %v4522_v59  ;;  %v4575_v45 = vsel %vm4539_vm13, %v4521_v40, %v4557_v58 }
 0x224   : > { %v4498_v62 = vadd.f32 %v4452_v49, %v7409_v60  ;;  %v4455_v34 = vadd.f32 %v5622_v17, %v5552_v23 }
 0x225   : > { %v4576_v7 = vsel %vm4540_vm14, %v4522_v59, %v4558_v42 }
 0x226   : > { %v5052_v54 = vpack.c.bf16 %v4576_v7, %v4575_v45  ;;  %v4523_v43 = vadd.f32 %v7441_v46, %v4498_v62  ;;  %v4499_v19 = vadd.f32 %v4455_v34, %v7412_v10  ;;  %v5553_v52 = vpop.f32.mrb[128].mxu0  ;;  %v5623_v50 = vpop.f32.mrb[128].mxu1 }
 0x227   : > { %v5554_v27 = vpop.f32.mrb[129].mxu0  ;;  %v5624_v14 = vpop.f32.mrb[129].mxu1 }
 0x228   : > { %5081 = vst [vmem:[%s7451_s9 + $0x18] sm:$0xff] %v5052_v54   ;;  %v4559_v39 = vmul.f32 0.2, %v4523_v43  ;;  %v4524_v44 = vadd.f32 %v7441_v46, %v4499_v19  ;;  %v5555_v33 = vadd.f32 %v5554_v27, %v5553_v52  ;;  %v5556_v32 = vpop.f32.mrb[130].mxu0  ;;  %v5626_v20 = vpop.f32.mrb[130].mxu1  ;;  %vm4541_vm15 = vcmp.ge.f32.partialorder %v4523_v43, 0.0 }
 0x229   : > { %v5625_v60 = vadd.f32 %v5624_v14, %v5623_v50  ;;  %v5557_v15 = vpop.f32.mrb[131].mxu0  ;;  %v5627_v21 = vpop.f32.mrb[131].mxu1 }
 0x22a   : > { %vm4542_vm0 = vcmp.ge.f32.partialorder %v4524_v44, 0.0  ;;  %v4560_v38 = vmul.f32 0.2, %v4524_v44  ;;  %v5558_v0 = vadd.f32 %v5557_v15, %v5556_v32  ;;  %v5628_v28 = vadd.f32 %v5627_v21, %v5626_v20 }
 0x22b   : > { %v4460_v10 = vadd.f32 %v5625_v60, %v5555_v33  ;;  %v4577_v48 = vsel %vm4541_vm15, %v4523_v43, %v4559_v39 }
 0x22c   : > { %v4578_v6 = vsel %vm4542_vm0, %v4524_v44, %v4560_v38  ;;  %v4463_v63 = vadd.f32 %v5628_v28, %v5558_v0 }
 0x22d   : > { %v5057_v30 = vpack.c.bf16 %v4578_v6, %v4577_v48  ;;  %v4500_v51 = vadd.f32 %v4460_v10, %v7415_v57 }
 0x22e   : > { %v5559_v16 = vpop.f32.mrb[132].mxu0  ;;  %v5629_v35 = vpop.f32.mrb[132].mxu1  ;;  %v4501_v26 = vadd.f32 %v4463_v63, %v7418_v56 }
 0x22f   : > { %5082 = vst [vmem:[%s7451_s9 + $0x20] sm:$0xff] %v5057_v30   ;;  %v4525_v2 = vadd.f32 %v7441_v46, %v4500_v51  ;;  %v5560_v24 = vpop.f32.mrb[133].mxu0  ;;  %v5630_v22 = vpop.f32.mrb[133].mxu1 }
 0x230   : > { %v5561_v29 = vadd.f32 %v5560_v24, %v5559_v16  ;;  %v5631_v36 = vadd.f32 %v5630_v22, %v5629_v35  ;;  %v5562_v11 = vpop.f32.mrb[134].mxu0  ;;  %v5632_v61 = vpop.f32.mrb[134].mxu1  ;;  %v4526_v40 = vadd.f32 %v7441_v46, %v4501_v26 }
 0x231   : > { %v4561_v25 = vmul.f32 0.2, %v4525_v2  ;;  %v5563_v9 = vpop.f32.mrb[135].mxu0  ;;  %v5633_v31 = vpop.f32.mrb[135].mxu1  ;;  %vm4543_vm1 = vcmp.ge.f32.partialorder %v4525_v2, 0.0 }
 0x232   : > { %v4468_v57 = vadd.f32 %v5631_v36, %v5561_v29  ;;  %v5564_v18 = vadd.f32 %v5563_v9, %v5562_v11  ;;  %v5634_v47 = vadd.f32 %v5633_v31, %v5632_v61  ;;  %vm4544_vm2 = vcmp.ge.f32.partialorder %v4526_v40, 0.0 }
 0x233   : > { %v4562_v53 = vmul.f32 0.2, %v4526_v40  ;;  %v4579_v37 = vsel %vm4543_vm1, %v4525_v2, %v4561_v25 }
 0x234   : > { %v4502_v56 = vadd.f32 %v4468_v57, %v7421_v3  ;;  %v4471_v13 = vadd.f32 %v5634_v47, %v5564_v18 }
 0x235   : > { %v4580_v58 = vsel %vm4544_vm2, %v4526_v40, %v4562_v53 }
 0x236   : > { %v5062_v59 = vpack.c.bf16 %v4580_v58, %v4579_v37  ;;  %v4527_v12 = vadd.f32 %v7441_v46, %v4502_v56  ;;  %v4503_v1 = vadd.f32 %v4471_v13, %v7424_v41  ;;  %v5565_v49 = vpop.f32.mrb[136].mxu0  ;;  %v5635_v23 = vpop.f32.mrb[136].mxu1 }
 0x237   : > { %v5566_v17 = vpop.f32.mrb[137].mxu0  ;;  %v5636_v42 = vpop.f32.mrb[137].mxu1 }
 0x238   : > { %5083 = vst [vmem:[%s7451_s9 + $0x28] sm:$0xff] %v5062_v59   ;;  %v4563_v62 = vmul.f32 0.2, %v4527_v12  ;;  %v4528_v34 = vadd.f32 %v7441_v46, %v4503_v1  ;;  %v5567_v45 = vadd.f32 %v5566_v17, %v5565_v49  ;;  %v5568_v7 = vpop.f32.mrb[138].mxu0  ;;  %v5638_v54 = vpop.f32.mrb[138].mxu1  ;;  %vm4545_vm3 = vcmp.ge.f32.partialorder %v4527_v12, 0.0 }
 0x239   : > { %v5637_v3 = vadd.f32 %v5636_v42, %v5635_v23  ;;  %v5569_v43 = vpop.f32.mrb[139].mxu0  ;;  %v5639_v19 = vpop.f32.mrb[139].mxu1 }
 0x23a   : > { %vm4546_vm4 = vcmp.ge.f32.partialorder %v4528_v34, 0.0  ;;  %v4564_v52 = vmul.f32 0.2, %v4528_v34  ;;  %v5570_v50 = vadd.f32 %v5569_v43, %v5568_v7  ;;  %v5640_v27 = vadd.f32 %v5639_v19, %v5638_v54 }
 0x23b   : > { %v4476_v41 = vadd.f32 %v5637_v3, %v5567_v45  ;;  %v4581_v14 = vsel %vm4545_vm3, %v4527_v12, %v4563_v62 }
 0x23c   : > { %v4582_v39 = vsel %vm4546_vm4, %v4528_v34, %v4564_v52  ;;  %v4479_v32 = vadd.f32 %v5640_v27, %v5570_v50 }
 0x23d   : > { %v5067_v44 = vpack.c.bf16 %v4582_v39, %v4581_v14  ;;  %v4504_v33 = vadd.f32 %v4476_v41, %v7427_v8 }
 0x23e   : > { %v5571_v20 = vpop.f32.mrb[140].mxu0  ;;  %v5641_v60 = vpop.f32.mrb[140].mxu1  ;;  %v4505_v21 = vadd.f32 %v4479_v32, %v7430_v4 }
 0x23f   : > { %5084 = vst [vmem:[%s7451_s9 + $0x30] sm:$0xff] %v5067_v44   ;;  %v4529_v15 = vadd.f32 %v7441_v46, %v4504_v33  ;;  %v5572_v38 = vpop.f32.mrb[141].mxu0  ;;  %v5642_v0 = vpop.f32.mrb[141].mxu1 }
 0x240   : > { %v5573_v10 = vadd.f32 %v5572_v38, %v5571_v20  ;;  %v5643_v28 = vadd.f32 %v5642_v0, %v5641_v60  ;;  %v5574_v48 = vpop.f32.mrb[142].mxu0  ;;  %v5644_v6 = vpop.f32.mrb[142].mxu1  ;;  %v4530_v51 = vadd.f32 %v7441_v46, %v4505_v21 }
 0x241   : > { %v4565_v30 = vmul.f32 0.2, %v4529_v15  ;;  %v5575_v63 = vpop.f32.mrb[143].mxu0  ;;  %v5645_v8 = vpop.f32.mrb[143].mxu1  ;;  %vm4547_vm5 = vcmp.ge.f32.partialorder %v4529_v15, 0.0 }
 0x242   : > { %v4484_v16 = vadd.f32 %v5643_v28, %v5573_v10  ;;  %v5576_v35 = vadd.f32 %v5575_v63, %v5574_v48  ;;  %v5646_v2 = vadd.f32 %v5645_v8, %v5644_v6  ;;  %vm4548_vm6 = vcmp.ge.f32.partialorder %v4530_v51, 0.0 }
 0x243   : > { %v4566_v26 = vmul.f32 0.2, %v4530_v51  ;;  %v4583_v22 = vsel %vm4547_vm5, %v4529_v15, %v4565_v30 }
 0x244   : > { %v4506_v4 = vadd.f32 %v4484_v16, %v7433_v55  ;;  %v4487_v24 = vadd.f32 %v5646_v2, %v5576_v35 }
 0x245   : > { %v4584_v29 = vsel %vm4548_vm6, %v4530_v51, %v4566_v26 }
 0x246   : > { %v5072_v36 = vpack.c.bf16 %v4584_v29, %v4583_v22  ;;  %v4531_v11 = vadd.f32 %v7441_v46, %v4506_v4  ;;  %v4507_v61 = vadd.f32 %v4487_v24, %v7436_v5 }
 0x248   : > { %5085 = vst [vmem:[%s7451_s9 + $0x38] sm:$0xff] %v5072_v36   ;;  %v4567_v25 = vmul.f32 0.2, %v4531_v11  ;;  %v4532_v40 = vadd.f32 %v7441_v46, %v4507_v61  ;;  %vm4549_vm7 = vcmp.ge.f32.partialorder %v4531_v11, 0.0 }
 0x24a   : > { %vm4550_vm8 = vcmp.ge.f32.partialorder %v4532_v40, 0.0  ;;  %v4568_v9 = vmul.f32 0.2, %v4532_v40  ;;  %v4585_v31 = vsel %vm4549_vm7, %v4531_v11, %v4567_v25 }
 0x24c   : > { %v4586_v57 = vsel %vm4550_vm8, %v4532_v40, %v4568_v9 }
 0x24d   : > { %v5077_v18 = vpack.c.bf16 %v4586_v57, %v4585_v31 }
 0x24f   : > { %5086 = vst [vmem:[%s7451_s9 + $0x40] sm:$0xff] %v5077_v18  }
 0x250 PF: > { %s13_s14 = sadd.s32 1, %s5869_s14   ;;  %s7655_s12 = smov %s5865_s13 }
 0x251   : > { %p10_p5 = scmp.ge.s32.totalorder %s13_s14, 4   ;;  %s7656_s13 = smov %s7658_s15 }
 0x253   :  { %12 = sbr.rel (!%p10_p5) target bundleno = 2 (0x2), region = 63 }

// kernel: _lambda_.6
= control target key start
LH: loop header
LB: loop body
LE: loop exit
PB: predicated region body
PF: predicated region fallthrough
CT: control target
= control target key end

     0   :  { %s3617_s12 = smov 0   ;;  %s3619_s13 = smov 0   ;;  %s4524_s0 = inlined_call_operand.vmem [shape: bf16[2,7,7,512], index: 0, kind: input, shape index: {}]   ;;  %s4525_s1 = inlined_call_operand.vmem [shape: bf16[2048,128], index: 1, kind: input, shape index: {}]   ;;  %s4526_s2 = inlined_call_operand.vmem [shape: f32[1,128], index: 2, kind: input, shape index: {}]   ;;  %s4527_s3 = inlined_call_operand.vmem [shape: bf16[2,36,128], index: 3, kind: output, shape index: {}]  }
   0x1   :  { %s3621_s14 = smov 0  }
   0x2 LB: > { %s25_s15 = sadd.s32 1, %s3590_s13  ;;  %p2955_p0 = scmp.ge.s32.totalorder %s3594_s14, 1  ;;  %s3594_s14 = sphi %s3621_s14, %s13_s14   ;;  %s3590_s13 = sphi %s3619_s13, %s4531_s13   ;;  %s3586_s12 = sphi %s3617_s12, %s4530_s12  }
   0x3   : > { %p27_p1 = scmp.ge.s32.totalorder %s25_s15, 2  ;;  %p151_p2 = scmp.lt.s32.totalorder %s3594_s14, 3 }
   0x5   : > { %s4533_s15 = smov (%p27_p1, %s25_s15), 0  ;;  %p152_p3 = pnand %p2955_p0, %p151_p2 }
   0x6   : > { %v3444_v0 = vld [vmem:[%s4525_s1 + $0x140] sm:$0xff] (!%p152_p3)   ;;  %v3448_v4 = vld [vmem:[%s4525_s1 + $0x148] sm:$0xff] (!%p152_p3)   ;;  %v3452_v8 = vld [vmem:[%s4525_s1 + $0x150] sm:$0xff] (!%p152_p3)   ;;  %p179_p4 = scmp.lt.s32.totalorder (!%p152_p3), %s3586_s12, 1  ;;  %v244_v28 = vlaneseq (!%p152_p3)  ;;  %vm481_vm0 = vsmask.f32 (!%p152_p3), 256 }
   0x7   : > { %155 = sbr.rel (%p152_p3) target bundleno = 388 (0x184), region = 32  ;;  %v3445_v1 = vld [vmem:[%s4525_s1 + $0x1c0] sm:$0xff] (!%p152_p3)   ;;  %3145 = vmatprep.subr.bf16.mxu0 (!%p152_p3), %v3444_v0  ;;  %v3449_v5 = vld [vmem:[%s4525_s1 + $0x1c8] sm:$0xff] (!%p152_p3)   ;;  %v3453_v9 = vld [vmem:[%s4525_s1 + $0x1d0] sm:$0xff] (!%p152_p3)   ;;  %v3596_v40 = vmov (!%p152_p3), 1966171168  }
   0x8   : > { %v3446_v2 = vld [vmem:[%s4525_s1 + $0x100] sm:$0xff] (!%p152_p3)   ;;  %3179 = vmatprep.subr.bf16.mxu1 (!%p152_p3), %v3445_v1  ;;  %v3450_v6 = vld [vmem:[%s4525_s1 + $0x108] sm:$0xff] (!%p152_p3)   ;;  %v3454_v10 = vld [vmem:[%s4525_s1 + $0x110] sm:$0xff] (!%p152_p3)   ;;  %v245_v33 = vshrl.u32 (!%p152_p3), %v244_v28, 7  ;;  %v242_v41 = vunpack.c.l.s4 (!%p152_p3), %v3596_v40  ;;  %vm482_vm1 = vsmask.f32 (!%p152_p3), 1284 }
   0x9   : > { %v3447_v3 = vld [vmem:[%s4525_s1 + $0x180] sm:$0xff] (!%p152_p3)   ;;  %3146 = vmatpush3.bf16.msra.mxu0 (!%p152_p3), %v3446_v2  ;;  %v3451_v7 = vld [vmem:[%s4525_s1 + $0x188] sm:$0xff] (!%p152_p3)   ;;  %v3455_v11 = vld [vmem:[%s4525_s1 + $0x190] sm:$0xff] (!%p152_p3)   ;;  %vm484_vm2 = vsmask.f32 (!%p152_p3), 2312 }
   0xa   : > { %3180 = vmatpush3.bf16.msra.mxu1 (!%p152_p3), %v3447_v3  ;;  %3147 = vmatprep.subr.bf16.mxu0 (!%p152_p3), %v3448_v4  ;;  %v3456_v12 = vld [vmem:[%s4525_s1 + $0x158] sm:$0xff] (!%p152_p3)   ;;  %v3460_v16 = vld [vmem:[%s4525_s1 + $0x160] sm:$0xff] (!%p152_p3)   ;;  %v3464_v20 = vld [vmem:[%s4525_s1 + $0x168] sm:$0xff] (!%p152_p3)   ;;  %vm486_vm3 = vsmask.f32 (!%p152_p3), 3340  ;;  %v243_v44 = vunpack.c.0.s8 (!%p152_p3), %v242_v41 }
   0xb   : > { %3181 = vmatprep.subr.bf16.mxu1 (!%p152_p3), %v3449_v5  ;;  %v3457_v13 = vld [vmem:[%s4525_s1 + $0x1d8] sm:$0xff] (!%p152_p3)   ;;  %v3461_v17 = vld [vmem:[%s4525_s1 + $0x1e0] sm:$0xff] (!%p152_p3)   ;;  %v3465_v21 = vld [vmem:[%s4525_s1 + $0x1e8] sm:$0xff] (!%p152_p3)   ;;  %vm488_vm5 = vsmask.f32 (!%p152_p3), 4368 }
   0xc   : > { %v3458_v14 = vld [vmem:[%s4525_s1 + $0x118] sm:$0xff] (!%p152_p3)   ;;  %v3462_v18 = vld [vmem:[%s4525_s1 + $0x120] sm:$0xff] (!%p152_p3)   ;;  %v3466_v22 = vld [vmem:[%s4525_s1 + $0x128] sm:$0xff] (!%p152_p3)   ;;  %vm490_vm7 = vsmask.f32 (!%p152_p3), 5396  ;;  %v3752_v50 = vsub.s32 (!%p152_p3), %v243_v44, %v245_v33 }
   0xd   : > { %3148 = vmatpush3.bf16.msra.mxu0 (!%p152_p3), %v3450_v6  ;;  %v3459_v15 = vld [vmem:[%s4525_s1 + $0x198] sm:$0xff] (!%p152_p3)   ;;  %v3463_v19 = vld [vmem:[%s4525_s1 + $0x1a0] sm:$0xff] (!%p152_p3)   ;;  %v3467_v23 = vld [vmem:[%s4525_s1 + $0x1a8] sm:$0xff] (!%p152_p3)   ;;  %vm492_vm9 = vsmask.f32 (!%p152_p3), 6424 }
   0xe   : > { %3182 = vmatpush3.bf16.msra.mxu1 %v3451_v7  ;;  %3149 = vmatprep.subr.bf16.mxu0 %v3452_v8  ;;  %s4535_s12 = smov (!%p179_p4, %s3586_s12), 1  ;;  %v3468_v24 = vld [vmem:[%s4525_s1 + $0x170] sm:$0xff]   ;;  %v3472_v29 = vld [vmem:[%s4525_s1 + $0x178] sm:$0xff]   ;;  %vm483_vm4 = vmor %vm481_vm0, %vm482_vm1  ;;  %vm494_vm12 = vsmask.f32 7452 }
   0xf   : > { %3183 = vmatprep.subr.bf16.mxu1 %v3453_v9  ;;  %v3469_v25 = vld [vmem:[%s4525_s1 + $0x1f0] sm:$0xff]   ;;  %s3417_s22 = smul.u32 112, %s4535_s12  ;;  %v3473_v30 = vld [vmem:[%s4525_s1 + $0x1f8] sm:$0xff]   ;;  %vm485_vm6 = vmor %vm483_vm4, %vm484_vm2 }
  0x10   : > { %v3470_v26 = vld [vmem:[%s4525_s1 + $0x130] sm:$0xff]   ;;  %v3474_v31 = vld [vmem:[%s4525_s1 + $0x138] sm:$0xff]   ;;  %v3476_v47 = vld [vmem:[%s4525_s1 + $0x40] sm:$0xff]   ;;  %s3418_s30 = smul.u32 20, %s4535_s12 }
  0x11   : > { %3150 = vmatpush3.bf16.msra.mxu0 %v3454_v10  ;;  %v3471_v27 = vld [vmem:[%s4525_s1 + $0x1b0] sm:$0xff]   ;;  %s3735_s6 = scalar_lea.vmem %s4524_s0, %s3417_s22  ;;  %v3475_v32 = vld [vmem:[%s4525_s1 + $0x1b8] sm:$0xff]   ;;  %vm487_vm8 = vmor %vm485_vm6, %vm486_vm3 }
  0x12   : > { %3184 = vmatpush3.bf16.msra.mxu1 %v3455_v11  ;;  %3151 = vmatprep.subr.bf16.mxu0 %v3456_v12  ;;  %v2958_v34 = vld.sshfl [vmem:[%s3735_s6] sm:$0xff pattern:$0x75316420]  ;;  %v2959_v35 = vld.sshfl [vmem:[%s3735_s6 + $0x8] sm:$0xff pattern:$0x75316420]  ;;  %vm489_vm10 = vmor %vm487_vm8, %vm488_vm5 }
  0x13   : > { %3185 = vmatprep.subr.bf16.mxu1 %v3457_v13  ;;  %v2960_v36 = vld.sshfl [vmem:[%s3735_s6 + $0x10] sm:$0xff pattern:$0x75316420]  ;;  %v2961_v37 = vld.sshfl [vmem:[%s3735_s6 + $0x18] sm:$0xff pattern:$0x75316420]  ;;  %v239_v42 = vcombine.low %v2958_v34, %v2959_v35  ;;  %v240_v43 = vcombine.high %v2958_v34, %v2959_v35  ;;  %vm491_vm11 = vmor %vm489_vm10, %vm490_vm7 }
  0x14   : > { %v2962_v38 = vld.sshfl [vmem:[%s3735_s6 + $0x20] sm:$0xff pattern:$0x75316420]  ;;  %v2963_v39 = vld.sshfl [vmem:[%s3735_s6 + $0x28] sm:$0xff pattern:$0x75316420]  ;;  %v270_v45 = vcombine.low %v2960_v36, %v2961_v37  ;;  %v271_v46 = vcombine.high %v2960_v36, %v2961_v37  ;;  %vm493_vm13 = vmor %vm491_vm11, %vm492_vm9 }
  0x15   : > { %3152 = vmatpush3.bf16.msra.mxu0 %v3458_v14  ;;  %v301_v48 = vcombine.low %v2962_v38, %v2963_v39  ;;  %v302_v49 = vcombine.high %v2962_v38, %v2963_v39  ;;  %v3477_v51 = vld [vmem:[%s4525_s1 + $0xc0] sm:$0xff]   ;;  %v3758_v52 = vrot.slane %v239_v42, %v3752_v50  ;;  %v3761_v53 = vrot.slane %v240_v43, %v3752_v50  ;;  %vm3787_vm14 = vmor %vm493_vm13, %vm494_vm12  ;;  %v2964_v39 = vld.sshfl [vmem:[%s3735_s6 + $0x30] sm:$0xff pattern:$0x75316420] }
  0x16   : > { %3186 = vmatpush3.bf16.msra.mxu1 %v3459_v15  ;;  %3153 = vmatprep.subr.bf16.mxu0 %v3460_v16  ;;  %v3764_v54 = vrot.slane %v270_v45, %v3752_v50  ;;  %v3767_v55 = vrot.slane %v271_v46, %v3752_v50  ;;  %v2965_v44 = vld.sshfl [vmem:[%s3735_s6 + $0x38] sm:$0xff pattern:$0x75316420]  ;;  %v2966_v45 = vld.sshfl [vmem:[%s3735_s6 + $0x40] sm:$0xff pattern:$0x75316420] }
  0x17   : > { %3187 = vmatprep.subr.bf16.mxu1 %v3461_v17  ;;  %v3770_v56 = vrot.slane %v301_v48, %v3752_v50  ;;  %v3773_v57 = vrot.slane %v302_v49, %v3752_v50  ;;  %v3777_v58 = vcombine.high %v3758_v52, %v3758_v52  ;;  %v475_v60 = vcombine.high %v3761_v53, %v3761_v53 }
  0x18   : > { %v3781_v59 = vcombine.high %v3764_v54, %v3764_v54  ;;  %v476_v61 = vcombine.high %v3767_v55, %v3767_v55  ;;  %v497_v1 = vshrl.u32 %v3758_v52, 16  ;;  %v502_v2 = vshll.u32 %v3761_v53, 16 }
  0x19   : > { %3154 = vmatpush3.bf16.msra.mxu0 %v3462_v18  ;;  %v3793_v63 = vcombine.high %v3770_v56, %v3770_v56  ;;  %v477_v0 = vcombine.high %v3773_v57, %v3773_v57  ;;  %v505_v3 = vshrl.u32 %v3761_v53, 16  ;;  %v510_v4 = vshll.u32 %v3777_v58, 16 }
  0x1a   : > { %3188 = vmatpush3.bf16.msra.mxu1 %v3463_v19  ;;  %3155 = vmatprep.subr.bf16.mxu0 %v3464_v20  ;;  %v513_v5 = vshrl.u32 %v3777_v58, 16  ;;  %v518_v6 = vshll.u32 %v475_v60, 16  ;;  %v504_v7 = vsel %vm3787_vm14, %v497_v1, %v502_v2  ;;  %v522_v8 = vshrl.u32 %v3764_v54, 16  ;;  %v2968_v60 = vld.sshfl [vmem:[%s3735_s6 + $0x50] sm:$0xff pattern:$0x75316420] }
  0x1b   : > { %3189 = vmatprep.subr.bf16.mxu1 %v3465_v21  ;;  %v527_v9 = vshll.u32 %v3767_v55, 16  ;;  %v530_v10 = vshrl.u32 %v3767_v55, 16  ;;  %v512_v11 = vsel %vm3787_vm14, %v505_v3, %v510_v4  ;;  %v535_v13 = vshll.u32 %v3781_v59, 16  ;;  %v2969_v3 = vld.sshfl [vmem:[%s3735_s6 + $0x58] sm:$0xff pattern:$0x75316420] }
  0x1c   : > { %v520_v12 = vsel %vm3787_vm14, %v513_v5, %v518_v6  ;;  %v538_v14 = vshrl.u32 %v3781_v59, 16  ;;  %v543_v16 = vshll.u32 %v476_v61, 16  ;;  %v547_v17 = vshrl.u32 %v3770_v56, 16 }
  0x1d   : > { %3156 = vmatpush3.bf16.msra.mxu0 %v3466_v22  ;;  %v3815_v15 = vsel %vm3787_vm14, %v522_v8, %v527_v9  ;;  %v552_v18 = vshll.u32 %v3773_v57, 16  ;;  %v3821_v19 = vsel %vm3787_vm14, %v530_v10, %v535_v13  ;;  %v555_v20 = vshrl.u32 %v3773_v57, 16  ;;  %v3478_v8 = vld [vmem:[%s4525_s1] sm:$0xff]  }
  0x1e   : > { %3190 = vmatpush3.bf16.msra.mxu1 %v3467_v23  ;;  %3157 = vmatprep.subr.bf16.mxu0 %v3468_v24  ;;  %v560_v21 = vshll.u32 %v3793_v63, 16  ;;  %v563_v22 = vshrl.u32 %v3793_v63, 16  ;;  %v3828_v23 = vsel %vm3787_vm14, %v538_v14, %v543_v16  ;;  %v711_v28 = vcombine.low %v520_v12, %v3815_v15 }
  0x1f   : > { %3191 = vmatprep.subr.bf16.mxu1 %v3469_v25  ;;  %v3832_v24 = vsel %vm3787_vm14, %v547_v17, %v552_v18  ;;  %v568_v25 = vshll.u32 %v477_v0, 16  ;;  %v1187_v40 = vcombine.low %v3758_v52, %v3761_v53  ;;  %v1188_v41 = vcombine.low %v3777_v58, %v3764_v54  ;;  %v3493_v53 = vld [vmem:[%s4525_s1 + $0xe0] sm:$0xff]  }
  0x20   : > { %v2334_v34 = vcombine.low %v3828_v23, %v3832_v24  ;;  %v727_v35 = vrot.slane %v711_v28, %v3752_v50  ;;  %v1189_v46 = vcombine.low %v3767_v55, %v3781_v59  ;;  %v332_v61 = vcombine.low %v2964_v39, %v2965_v44 }
  0x21   : > { %3158 = vmatpush3.bf16.msra.mxu0 %v3470_v26  ;;  %v710_v26 = vcombine.low %v504_v7, %v512_v11  ;;  %v333_v0 = vcombine.high %v2964_v39, %v2965_v44  ;;  %v3479_v11 = vld [vmem:[%s4525_s1 + $0x80] sm:$0xff]   ;;  %v394_v14 = vcombine.low %v2968_v60, %v2969_v3  ;;  %v395_v16 = vcombine.high %v2968_v60, %v2969_v3 }
  0x22   : > { %3192 = vmatpush3.bf16.msra.mxu1 %v3471_v27  ;;  %3159 = vmatprep.subr.bf16.mxu0 %v3472_v29  ;;  %v3836_v27 = vsel %vm3787_vm14, %v555_v20, %v560_v21  ;;  %v712_v29 = vcombine.low %v3821_v19, %v3828_v23  ;;  %v3879_v9 = vrot.slane %v332_v61, %v3752_v50 }
  0x23   : > { %3193 = vmatprep.subr.bf16.mxu1 %v3473_v30  ;;  %v2333_v30 = vcombine.low %v3815_v15, %v3821_v19  ;;  %v720_v33 = vrot.slane %v710_v26, %v3752_v50  ;;  %v3882_v10 = vrot.slane %v333_v0, %v3752_v50  ;;  %v3517_v15 = vld [vmem:[%s4525_s1 + $0x2d0] sm:$0xff]  }
  0x24   : > { %v734_v36 = vrot.slane %v712_v29, %v3752_v50  ;;  %v3901_v26 = vcombine.high %v3879_v9, %v3879_v9  ;;  %v3908_v29 = vrot.slane %v394_v14, %v3752_v50  ;;  %v572_v39 = vshrl.u32 %v3879_v9, 16 }
  0x25   : > { %3160 = vmatpush3.bf16.msra.mxu0 %v3474_v31  ;;  %v3845_v31 = vsel %vm3787_vm14, %v563_v22, %v568_v25  ;;  %v743_v42 = vcombine.high %v720_v33, %v727_v35  ;;  %v742_v43 = vcombine.low %v720_v33, %v727_v35  ;;  %v3480_v22 = vld [vmem:[%s4525_s1 + $0x48] sm:$0xff]  }
  0x26   : > { %3194 = vmatpush3.bf16.msra.mxu1 %v3475_v32  ;;  %3213 = vmatprep.subr.bf16.mxu0 %v3476_v47  ;;  %v713_v32 = vcombine.low %v3832_v24, %v3836_v27  ;;  %v2335_v37 = vcombine.low %v3836_v27, %v3845_v31  ;;  %v1190_v47 = vcombine.low %v3770_v56, %v3773_v57  ;;  %v3481_v25 = vld [vmem:[%s4525_s1 + $0xc8] sm:$0xff]   ;;  %v585_v44 = vshll.u32 %v3901_v26, 16  ;;  %v3518_v24 = vld [vmem:[%s4525_s1 + $0x210] sm:$0xff]   ;;  %v3520_v27 = vld [vmem:[%s4525_s1 + $0x258] sm:$0xff]  }
  0x27   : > { %3247 = vmatprep.subr.bf16.mxu1 %v3477_v51  ;;  %v2967_v51 = vld.sshfl [vmem:[%s3735_s6 + $0x48] sm:$0xff pattern:$0x75316420]  ;;  %v759_v1 = vrot.slane %v743_v42, %v3752_v50  ;;  %v752_v2 = vrot.slane %v742_v43, %v3752_v50  ;;  %v577_v42 = vshll.u32 %v3882_v10, 16  ;;  %v580_v43 = vshrl.u32 %v3882_v10, 16 }
  0x28   : > { %v741_v38 = vrot.slane %v713_v32, %v3752_v50  ;;  %v363_v4 = vcombine.low %v2966_v45, %v2967_v51  ;;  %v364_v5 = vcombine.high %v2966_v45, %v2967_v51  ;;  %v3911_v32 = vrot.slane %v395_v16, %v3752_v50  ;;  %v3482_v33 = vld [vmem:[%s4525_s1 + $0x8] sm:$0xff]   ;;  %v3487_v16 = vld [vmem:[%s4525_s1 + $0x90] sm:$0xff]  }
  0x29   : > { %v3483_v35 = vld [vmem:[%s4525_s1 + $0x88] sm:$0xff]   ;;  %v588_v45 = vshrl.u32 %v3901_v26, 16  ;;  %v3934_v51 = vsel %vm3787_vm14, %v572_v39, %v577_v42 }
  0x2a   : > { %v745_v48 = vcombine.high %v734_v36, %v741_v38  ;;  %v744_v49 = vcombine.low %v734_v36, %v741_v38  ;;  %v3888_v12 = vrot.slane %v363_v4, %v3752_v50  ;;  %v3891_v13 = vrot.slane %v364_v5, %v3752_v50 }
  0x2b   : > { %v478_v36 = vcombine.high %v3882_v10, %v3882_v10  ;;  %v627_v14 = vshll.u32 %v3911_v32, 16  ;;  %v630_v39 = vshrl.u32 %v3911_v32, 16 }
  0x2c   : > { %v773_v6 = vrot.slane %v745_v48, %v3752_v50  ;;  %v766_v7 = vrot.slane %v744_v49, %v3752_v50  ;;  %v3905_v28 = vcombine.high %v3888_v12, %v3888_v12  ;;  %v479_v38 = vcombine.high %v3891_v13, %v3891_v13  ;;  %v3484_v49 = vld [vmem:[%s4525_s1 + $0x50] sm:$0xff]  }
  0x2d   : > { %v597_v48 = vshrl.u32 %v3888_v12, 16  ;;  %v593_v60 = vshll.u32 %v478_v36, 16  ;;  %v602_v61 = vshll.u32 %v3891_v13, 16  ;;  %v605_v0 = vshrl.u32 %v3891_v13, 16 }
  0x2e   : > { %v776_v17 = vcombine.low %v759_v1, %v773_v6  ;;  %v777_v18 = vcombine.high %v759_v1, %v773_v6  ;;  %v774_v20 = vcombine.low %v752_v2, %v766_v7  ;;  %v775_v21 = vcombine.high %v752_v2, %v766_v7  ;;  %v3485_v1 = vld [vmem:[%s4525_s1 + $0xd0] sm:$0xff]  }
  0x2f   : > { %v3943_v2 = vsel %vm3787_vm14, %v580_v43, %v585_v44  ;;  %v610_v3 = vshll.u32 %v3905_v28, 16  ;;  %v613_v4 = vshrl.u32 %v3905_v28, 16  ;;  %v618_v5 = vshll.u32 %v479_v38, 16  ;;  %v3486_v6 = vld [vmem:[%s4525_s1 + $0x10] sm:$0xff]  }
  0x30   : > { %1107 = vmatprep.mubr.bf16.mxu0 %v776_v17  ;;  %1163 = vmatprep.mubr.bf16.mxu1 %v777_v18  ;;  %v3952_v7 = vsel %vm3787_vm14, %v588_v45, %v593_v60  ;;  %v3986_v38 = vcombine.high %v3908_v29, %v3908_v29  ;;  %v480_v45 = vcombine.high %v3911_v32, %v3911_v32 }
  0x31   : > { %1108 = vmatmul.mubr.bf16.vlgmr.msra.gmra.mrb[0].mxu0 %v774_v20  ;;  %1164 = vmatmul.mubr.bf16.vlgmr.msra.gmra.mrb[0].mxu1 %v775_v21  ;;  %v3965_v17 = vsel %vm3787_vm14, %v605_v0, %v610_v3  ;;  %v3969_v18 = vsel %vm3787_vm14, %v613_v4, %v618_v5  ;;  %v778_v20 = vcombine.low %v3845_v31, %v3934_v51  ;;  %v3490_v0 = vld [vmem:[%s4525_s1 + $0x18] sm:$0xff]  }
  0x32   : > { %3214 = vmatpush3.bf16.msra.mxu0 %v3478_v8  ;;  %3248 = vmatpush3.bf16.msra.mxu1 %v3479_v11  ;;  %v3956_v8 = vsel %vm3787_vm14, %v597_v48, %v602_v61  ;;  %v622_v11 = vshrl.u32 %v3908_v29, 16  ;;  %v779_v21 = vcombine.low %v3943_v2, %v3952_v7  ;;  %v635_v48 = vshll.u32 %v3986_v38, 16  ;;  %v3491_v3 = vld [vmem:[%s4525_s1 + $0x98] sm:$0xff]  }
  0x33   : > { %3215 = vmatprep.subr.bf16.mxu0 %v3480_v22  ;;  %3249 = vmatprep.subr.bf16.mxu1 %v3481_v25  ;;  %v3488_v22 = vld [vmem:[%s4525_s1 + $0x58] sm:$0xff]   ;;  %v780_v36 = vcombine.low %v3956_v8, %v3965_v17  ;;  %v788_v42 = vrot.slane %v778_v20, %v3752_v50  ;;  %v643_v5 = vshll.u32 %v480_v45, 16  ;;  %v3497_v45 = vld [vmem:[%s4525_s1 + $0xe8] sm:$0xff]  }
  0x34   : > { %v3980_v25 = vsel %vm3787_vm14, %v622_v11, %v627_v14  ;;  %v795_v43 = vrot.slane %v779_v21, %v3752_v50  ;;  %v4010_v4 = vsel %vm3787_vm14, %v630_v39, %v635_v48  ;;  %v4016_v11 = vrot.slane %v1187_v40, %v3752_v50  ;;  %v3492_v21 = vld [vmem:[%s4525_s1 + $0x60] sm:$0xff]  }
  0x35   : > { %v802_v44 = vrot.slane %v780_v36, %v3752_v50  ;;  %v4040_v40 = vrot.slane %v1189_v46, %v3752_v50  ;;  %v3494_v39 = vld [vmem:[%s4525_s1 + $0x20] sm:$0xff]  }
  0x36   : > { %3216 = vmatpush3.bf16.msra.mxu0 %v3482_v33  ;;  %3250 = vmatpush3.bf16.msra.mxu1 %v3483_v35  ;;  %v3489_v33 = vld [vmem:[%s4525_s1 + $0xd8] sm:$0xff]   ;;  %v781_v35 = vcombine.low %v3969_v18, %v3980_v25  ;;  %v811_v61 = vcombine.high %v788_v42, %v795_v43  ;;  %v3495_v46 = vld [vmem:[%s4525_s1 + $0xa0] sm:$0xff]  }
  0x37   : > { %3217 = vmatprep.subr.bf16.mxu0 %v3484_v49  ;;  %3251 = vmatprep.subr.bf16.mxu1 %v3485_v1  ;;  %v638_v49 = vshrl.u32 %v3986_v38, 16  ;;  %v810_v1 = vcombine.low %v788_v42, %v795_v43 }
  0x38   : > { %v809_v60 = vrot.slane %v781_v35, %v3752_v50 }
  0x39   : > { %v820_v52 = vrot.slane %v810_v1, %v3752_v50  ;;  %v4034_v58 = vsel %vm3787_vm14, %v638_v49, %v643_v5  ;;  %v1256_v1 = vcombine.low %v3882_v10, %v3901_v26  ;;  %v1258_v5 = vcombine.low %v3905_v28, %v3908_v29 }
  0x3a   : > { %3218 = vmatpush3.bf16.msra.mxu0 %v3486_v6  ;;  %3252 = vmatpush3.bf16.msra.mxu1 %v3487_v16  ;;  %v4022_v6 = vrot.slane %v1188_v41, %v3752_v50  ;;  %v813_v14 = vcombine.high %v802_v44, %v809_v60  ;;  %v827_v16 = vrot.slane %v811_v61, %v3752_v50 }
  0x3b   : > { %3219 = vmatprep.subr.bf16.mxu0 %v3488_v22  ;;  %3253 = vmatprep.subr.bf16.mxu1 %v3489_v33  ;;  %v812_v20 = vcombine.low %v802_v44, %v809_v60  ;;  %v4046_v41 = vrot.slane %v1190_v47, %v3752_v50  ;;  %v846_v33 = vcombine.low %v4010_v4, %v4034_v58  ;;  %v3496_v44 = vld [vmem:[%s4525_s1 + $0x68] sm:$0xff]  }
  0x3c   : > { %v841_v22 = vrot.slane %v813_v14, %v3752_v50  ;;  %v1220_v49 = vcombine.high %v4016_v11, %v4022_v6  ;;  %v1255_v61 = vcombine.low %v3793_v63, %v3879_v9 }
  0x3d   : > { %v834_v36 = vrot.slane %v812_v20, %v3752_v50  ;;  %v853_v48 = vrot.slane %v846_v33, %v3752_v50  ;;  %v1222_v60 = vcombine.high %v4040_v40, %v4046_v41  ;;  %v3502_v33 = vld [vmem:[%s4525_s1 + $0x30] sm:$0xff]  }
  0x3e   : > { %3220 = vmatpush3.bf16.msra.mxu0 %v3490_v0  ;;  %3254 = vmatpush3.bf16.msra.mxu1 %v3491_v3  ;;  %v844_v35 = vcombine.low %v827_v16, %v841_v22  ;;  %v845_v47 = vcombine.high %v827_v16, %v841_v22  ;;  %v3498_v0 = vld [vmem:[%s4525_s1 + $0x28] sm:$0xff]   ;;  %v1257_v3 = vcombine.low %v3888_v12, %v3891_v13  ;;  %v3501_v22 = vld [vmem:[%s4525_s1 + $0xf0] sm:$0xff]  }
  0x3f   : > { %v842_v42 = vcombine.low %v820_v52, %v834_v36  ;;  %v843_v43 = vcombine.high %v820_v52, %v834_v36  ;;  %3221 = vmatprep.subr.bf16.mxu0 %v3492_v21  ;;  %3255 = vmatprep.subr.bf16.mxu1 %v3493_v53  ;;  %v854_v14 = vcombine.high %v853_v48, %v853_v48  ;;  %v3499_v16 = vld [vmem:[%s4525_s1 + $0xa8] sm:$0xff]   ;;  %v3500_v21 = vld [vmem:[%s4525_s1 + $0x70] sm:$0xff]  }
  0x40   : > { %1115 = vmatprep.mubr.bf16.mxu0 %v844_v35  ;;  %1171 = vmatprep.mubr.bf16.mxu1 %v845_v47  ;;  %v861_v20 = vrot.slane %v853_v48, %v3752_v50  ;;  %v1219_v52 = vcombine.low %v4016_v11, %v4022_v6  ;;  %v1236_v36 = vrot.slane %v1220_v49, %v3752_v50  ;;  %v3504_v48 = vld [vmem:[%s4525_s1 + $0x78] sm:$0xff]  }
  0x41   : > { %1116 = vmatmul.mubr.bf16.gmra.mrb[4].mxu0 %v842_v42  ;;  %1172 = vmatmul.mubr.bf16.gmra.mrb[4].mxu1 %v843_v43  ;;  %v868_v53 = vrot.slane %v854_v14, %v3752_v50  ;;  %v1272_v11 = vrot.slane %v1256_v1, %v3752_v50  ;;  %v1279_v6 = vrot.slane %v1257_v3, %v3752_v50  ;;  %v3503_v43 = vld [vmem:[%s4525_s1 + $0xb0] sm:$0xff]   ;;  %v3505_v49 = vld [vmem:[%s4525_s1 + $0xf8] sm:$0xff]  }
  0x42   : > { %3222 = vmatpush3.bf16.msra.mxu0 %v3494_v39  ;;  %3256 = vmatpush3.bf16.msra.mxu1 %v3495_v46  ;;  %v1250_v39 = vrot.slane %v1222_v60, %v3752_v50  ;;  %v1265_v46 = vrot.slane %v1255_v61, %v3752_v50  ;;  %v1286_v35 = vrot.slane %v1258_v5, %v3752_v50  ;;  %v3507_v1 = vld [vmem:[%s4525_s1 + $0xb8] sm:$0xff]  }
  0x43   : > { %3223 = vmatprep.subr.bf16.mxu0 %v3496_v44  ;;  %3257 = vmatprep.subr.bf16.mxu1 %v3497_v45  ;;  %v870_v47 = vcombine.high %v868_v53, %v868_v53  ;;  %v869_v42 = vcombine.high %v861_v20, %v861_v20  ;;  %v1221_v44 = vcombine.low %v4040_v40, %v4046_v41  ;;  %v3506_v40 = vld [vmem:[%s4525_s1 + $0x38] sm:$0xff]  }
  0x44   : > { %1123 = vmatprep.mubr.bf16.mxu0 %v868_v53  ;;  %v1323_v45 = vcombine.low %v3911_v32, %v3986_v38  ;;  %v1253_v41 = vcombine.low %v1236_v36, %v1250_v39  ;;  %v1254_v60 = vcombine.high %v1236_v36, %v1250_v39  ;;  %v1288_v61 = vcombine.high %v1265_v46, %v1272_v11 }
  0x45   : > { %1179 = vmatprep.mubr.bf16.mxu1 %v870_v47  ;;  %v1229_v3 = vrot.slane %v1219_v52, %v3752_v50  ;;  %v1243_v5 = vrot.slane %v1221_v44, %v3752_v50  ;;  %v1289_v53 = vcombine.low %v1279_v6, %v1286_v35  ;;  %v1761_v52 = vcombine.low %v3764_v54, %v3767_v55  ;;  %v3512_v55 = vld [vmem:[%s4525_s1 + $0x248] sm:$0xff]  }
  0x46   : > { %3224 = vmatpush3.bf16.msra.mxu0 %v3498_v0  ;;  %3258 = vmatpush3.bf16.msra.mxu1 %v3499_v16  ;;  %v1290_v0 = vcombine.high %v1279_v6, %v1286_v35  ;;  %v4124_v14 = vrot.slane %v1323_v45, %v3752_v50  ;;  %v3508_v16 = vld [vmem:[%s4525_s1 + $0x240] sm:$0xff]   ;;  %v1304_v36 = vrot.slane %v1288_v61, %v3752_v50  ;;  %v3515_v45 = vld [vmem:[%s4525_s1 + $0x288] sm:$0xff]   ;;  %v3519_v61 = vld [vmem:[%s4525_s1 + $0x290] sm:$0xff]  }
  0x47   : > { %3225 = vmatprep.subr.bf16.mxu0 %v3500_v21  ;;  %3259 = vmatprep.subr.bf16.mxu1 %v3501_v22  ;;  %v1287_v21 = vcombine.low %v1265_v46, %v1272_v11  ;;  %v3510_v22 = vld [vmem:[%s4525_s1 + $0x200] sm:$0xff]   ;;  %v1251_v47 = vcombine.low %v1229_v3, %v1243_v5  ;;  %v1763_v11 = vcombine.low %v3773_v57, %v3793_v63  ;;  %v3514_v57 = vld [vmem:[%s4525_s1 + $0x208] sm:$0xff]  }
  0x48   : > { %v1318_v39 = vrot.slane %v1290_v0, %v3752_v50  ;;  %v3511_v46 = vld [vmem:[%s4525_s1 + $0x280] sm:$0xff]   ;;  %v1331_v54 = vcombine.high %v4124_v14, %v4124_v14  ;;  %v1311_v35 = vrot.slane %v1289_v53, %v3752_v50  ;;  %v3522_v53 = vld [vmem:[%s4525_s1 + $0x218] sm:$0xff]  }
  0x49   : > { %1124 = vmatmul.mubr.bf16.gmra.mrb[8].mxu0 %v861_v20  ;;  %1180 = vmatmul.mubr.bf16.gmra.mrb[8].mxu1 %v869_v42  ;;  %v3509_v20 = vld [vmem:[%s4525_s1 + $0x2c0] sm:$0xff]   ;;  %v1252_v42 = vcombine.high %v1229_v3, %v1243_v5  ;;  %v1297_v6 = vrot.slane %v1287_v21, %v3752_v50  ;;  %v2401_v5 = vcombine.low %v3952_v7, %v3956_v8 }
  0x4a   : > { %3226 = vmatpush3.bf16.msra.mxu0 %v3502_v33  ;;  %3260 = vmatpush3.bf16.msra.mxu1 %v3503_v43  ;;  %v1762_v33 = vcombine.low %v3781_v59, %v3770_v56  ;;  %v1764_v56 = vcombine.low %v3879_v9, %v3882_v10  ;;  %v3513_v59 = vld [vmem:[%s4525_s1 + $0x2c8] sm:$0xff]   ;;  %v4159_v43 = vrot.slane %v1761_v52, %v3752_v50 }
  0x4b   : > { %3227 = vmatprep.subr.bf16.mxu0 %v3504_v48  ;;  %3261 = vmatprep.subr.bf16.mxu1 %v3505_v49  ;;  %v1321_v63 = vcombine.low %v1304_v36, %v1318_v39  ;;  %v1322_v44 = vcombine.high %v1304_v36, %v1318_v39  ;;  %v2336_v10 = vcombine.low %v3934_v51, %v3943_v2  ;;  %v3516_v51 = vld [vmem:[%s4525_s1 + $0x250] sm:$0xff]  }
  0x4c   : > { %1584 = vmatprep.mubr.bf16.mxu0 %v1253_v41  ;;  %1640 = vmatprep.mubr.bf16.mxu1 %v1254_v60  ;;  %v4165_v9 = vrot.slane %v1762_v33, %v3752_v50  ;;  %v1345_v48 = vrot.slane %v1331_v54, %v3752_v50  ;;  %v2343_v49 = vrot.slane %v2333_v30, %v3752_v50 }
  0x4d   : > { %v4185_v2 = vrot.slane %v1763_v11, %v3752_v50  ;;  %v1319_v41 = vcombine.low %v1297_v6, %v1311_v35  ;;  %v1320_v19 = vcombine.high %v1297_v6, %v1311_v35  ;;  %v4191_v23 = vrot.slane %v1764_v56, %v3752_v50 }
  0x4e   : > { %3228 = vmatpush3.bf16.msra.mxu0 %v3506_v40  ;;  %3262 = vmatpush3.bf16.msra.mxu1 %v3507_v1  ;;  %v2350_v40 = vrot.slane %v2334_v34, %v3752_v50  ;;  %v2357_v30 = vrot.slane %v2335_v37, %v3752_v50  ;;  %v2364_v34 = vrot.slane %v2336_v10, %v3752_v50  ;;  %v3529_v10 = vld [vmem:[%s4525_s1 + $0x2e8] sm:$0xff]  }
  0x4f   : > { %3281 = vmatprep.subr.bf16.mxu0 %v3508_v16  ;;  %3315 = vmatprep.subr.bf16.mxu1 %v3509_v20  ;;  %v1347_v0 = vcombine.high %v1345_v48, %v1345_v48  ;;  %v1794_v1 = vcombine.high %v4159_v43, %v4165_v9  ;;  %v3521_v20 = vld [vmem:[%s4525_s1 + $0x2d8] sm:$0xff]   ;;  %v2402_v7 = vcombine.low %v3965_v17, %v3969_v18 }
  0x50   : > { %v2365_v60 = vcombine.low %v2343_v49, %v2350_v40  ;;  %v2366_v3 = vcombine.high %v2343_v49, %v2350_v40  ;;  %v2367_v31 = vcombine.low %v2357_v30, %v2364_v34  ;;  %v2368_v37 = vcombine.high %v2357_v30, %v2364_v34  ;;  %v3523_v17 = vld [vmem:[%s4525_s1 + $0x298] sm:$0xff]   ;;  %v3531_v40 = vld [vmem:[%s4525_s1 + $0x2a8] sm:$0xff]   ;;  %v3535_v30 = vld [vmem:[%s4525_s1 + $0x2b0] sm:$0xff]  }
  0x51   : > { %1585 = vmatmul.mubr.bf16.vlgmr.msra.gmra.mrb[12].mxu0 %v1251_v47  ;;  %1641 = vmatmul.mubr.bf16.vlgmr.msra.gmra.mrb[12].mxu1 %v1252_v42  ;;  %v2403_v8 = vcombine.low %v3980_v25, %v4010_v4  ;;  %v1796_v52 = vcombine.high %v4185_v2, %v4191_v23  ;;  %v4236_v39 = vrot.slane %v2401_v5, %v3752_v50  ;;  %v3524_v47 = vld [vmem:[%s4525_s1 + $0x260] sm:$0xff]  }
  0x52   : > { %3282 = vmatpush3.bf16.msra.mxu0 %v3510_v22  ;;  %3316 = vmatpush3.bf16.msra.mxu1 %v3511_v46  ;;  %v4212_v16 = vrot.slane %v2365_v60, %v3752_v50  ;;  %v4218_v21 = vrot.slane %v2366_v3, %v3752_v50  ;;  %v4230_v22 = vrot.slane %v2368_v37, %v3752_v50 }
  0x53   : > { %3283 = vmatprep.subr.bf16.mxu0 %v3512_v55  ;;  %3317 = vmatprep.subr.bf16.mxu1 %v3513_v59  ;;  %v4233_v36 = vrot.slane %v2367_v31, %v3752_v50  ;;  %v1338_v18 = vrot.slane %v4124_v14, %v3752_v50  ;;  %v4244_v33 = vrot.slane %v2402_v7, %v3752_v50  ;;  %v3525_v14 = vld [vmem:[%s4525_s1 + $0x2e0] sm:$0xff]  }
  0x54   : > { %1592 = vmatprep.mubr.bf16.mxu0 %v1321_v63  ;;  %1648 = vmatprep.mubr.bf16.mxu1 %v1322_v44  ;;  %v2399_v42 = vcombine.low %v4218_v21, %v4230_v22  ;;  %v2400_v46 = vcombine.high %v4218_v21, %v4230_v22  ;;  %v3526_v59 = vld [vmem:[%s4525_s1 + $0x220] sm:$0xff]   ;;  %v1810_v6 = vrot.slane %v1794_v1, %v3752_v50  ;;  %v3528_v44 = vld [vmem:[%s4525_s1 + $0x268] sm:$0xff]   ;;  %v3539_v1 = vld [vmem:[%s4525_s1 + $0x2b8] sm:$0xff]  }
  0x55   : > { %v2397_v54 = vcombine.low %v4212_v16, %v4233_v36  ;;  %v2398_v55 = vcombine.high %v4212_v16, %v4233_v36  ;;  %v2434_v11 = vcombine.high %v4236_v39, %v4244_v33  ;;  %v2433_v56 = vcombine.low %v4236_v39, %v4244_v33  ;;  %v3542_v7 = vld [vmem:[%s4525_s1 + $0x300] sm:$0xff]   ;;  %v3553_v39 = vld [vmem:[%s4525_s1 + $0x3d8] sm:$0xff]  }
  0x56   : > { %3284 = vmatpush3.bf16.msra.mxu0 %v3514_v57  ;;  %3318 = vmatpush3.bf16.msra.mxu1 %v3515_v45  ;;  %v1824_v35 = vrot.slane %v1796_v52, %v3752_v50  ;;  %v3527_v57 = vld [vmem:[%s4525_s1 + $0x2a0] sm:$0xff]   ;;  %v1346_v63 = vcombine.high %v1338_v18, %v1338_v18  ;;  %v3530_v45 = vld [vmem:[%s4525_s1 + $0x228] sm:$0xff]   ;;  %v1793_v34 = vcombine.low %v4159_v43, %v4165_v9  ;;  %v3538_v9 = vld [vmem:[%s4525_s1 + $0x238] sm:$0xff]  }
  0x57   : > { %3285 = vmatprep.subr.bf16.mxu0 %v3516_v51  ;;  %3319 = vmatprep.subr.bf16.mxu1 %v3517_v15  ;;  %v3532_v51 = vld [vmem:[%s4525_s1 + $0x270] sm:$0xff]   ;;  %v1829_v15 = vcombine.low %v3901_v26, %v3888_v12  ;;  %v1795_v60 = vcombine.low %v4185_v2, %v4191_v23  ;;  %v3536_v12 = vld [vmem:[%s4525_s1 + $0x278] sm:$0xff]   ;;  %v1831_v23 = vcombine.low %v3908_v29, %v3911_v32  ;;  %v3541_v29 = vld [vmem:[%s4525_s1 + $0x3c0] sm:$0xff]  }
  0x58   : > { %v1828_v49 = vcombine.high %v1810_v6, %v1824_v35  ;;  %v3537_v26 = vld [vmem:[%s4525_s1 + $0x2f8] sm:$0xff]   ;;  %v1803_v3 = vrot.slane %v1793_v34, %v3752_v50  ;;  %v4383_v4 = vrot.slane %v2434_v11, %v3752_v50 }
  0x59   : > { %1593 = vmatmul.mubr.bf16.gmra.mrb[16].mxu0 %v1319_v41  ;;  %1649 = vmatmul.mubr.bf16.gmra.mrb[16].mxu1 %v1320_v19  ;;  %v3533_v41 = vld [vmem:[%s4525_s1 + $0x2f0] sm:$0xff]   ;;  %v1830_v19 = vcombine.low %v3891_v13, %v3905_v28  ;;  %v3052_v13 = vld.sshfl [vmem:[%s3735_s6 + $0x60] sm:$0xff pattern:$0x75316420]  ;;  %v1817_v5 = vrot.slane %v1795_v60, %v3752_v50  ;;  %v1853_v52 = vrot.slane %v1831_v23, %v3752_v50  ;;  %v3552_v23 = vld [vmem:[%s4525_s1 + $0x358] sm:$0xff]  }
  0x5a   : > { %3286 = vmatpush3.bf16.msra.mxu0 %v3518_v24  ;;  %3320 = vmatpush3.bf16.msra.mxu1 %v3519_v61  ;;  %v3534_v24 = vld [vmem:[%s4525_s1 + $0x230] sm:$0xff]   ;;  %v3053_v28 = vld.sshfl [vmem:[%s3735_s6 + $0x68] sm:$0xff pattern:$0x75316420]  ;;  %v1839_v61 = vrot.slane %v1829_v15, %v3752_v50  ;;  %v3569_v21 = vld [vmem:[%s4525_s1 + $0x3f8] sm:$0xff]   ;;  %s4509_s6 = scalar_lea.vmem %s4527_s3, %s3418_s30 }
  0x5b   : > { %3287 = vmatprep.subr.bf16.mxu0 %v3520_v27  ;;  %3321 = vmatprep.subr.bf16.mxu1 %v3521_v20  ;;  %v1846_v43 = vrot.slane %v1830_v19, %v3752_v50  ;;  %v1680_v2 = vcombine.low %v3052_v13, %v3053_v28  ;;  %v3540_v27 = vld [vmem:[%s4525_s1 + $0x340] sm:$0xff]   ;;  %v3547_v15 = vld [vmem:[%s4525_s1 + $0x388] sm:$0xff]   ;;  %v2425_v19 = vrot.slane %v2403_v8, %v3752_v50  ;;  %v3549_v60 = vld [vmem:[%s4525_s1 + $0x3d0] sm:$0xff]  }
  0x5c   : > { %1600 = vmatprep.mubr.bf16.mxu0 %v1345_v48  ;;  %1656 = vmatprep.mubr.bf16.mxu1 %v1347_v0  ;;  %v1827_v48 = vcombine.low %v1810_v6, %v1824_v35  ;;  %v1681_v0 = vcombine.high %v3052_v13, %v3053_v28  ;;  %v3544_v35 = vld [vmem:[%s4525_s1 + $0x348] sm:$0xff]   ;;  %v4392_v28 = vrot.slane %v2433_v56, %v3752_v50  ;;  %v3570_v22 = vld [vmem:[%s4525_s1 + $0x338] sm:$0xff]  }
  0x5d   : > { %v1688_v31 = vrot.slane %v1680_v2, %v3752_v50  ;;  %v1862_v32 = vcombine.high %v1839_v61, %v1846_v43  ;;  %v1861_v20 = vcombine.low %v1839_v61, %v1846_v43  ;;  %v3551_v43 = vld [vmem:[%s4525_s1 + $0x390] sm:$0xff]  }
  0x5e   : > { %3288 = vmatpush3.bf16.msra.mxu0 %v3522_v53  ;;  %3322 = vmatpush3.bf16.msra.mxu1 %v3523_v17  ;;  %v4329_v37 = vrot.slane %v1681_v0, %v3752_v50  ;;  %v3554_v0 = vld [vmem:[%s4525_s1 + $0x318] sm:$0xff]  }
  0x5f   : > { %3289 = vmatprep.subr.bf16.mxu0 %v3524_v47  ;;  %3323 = vmatprep.subr.bf16.mxu1 %v3525_v14  ;;  %v1832_v53 = vcombine.low %v3986_v38, %v1688_v31  ;;  %v4339_v17 = vcombine.high %v1688_v31, %v1688_v31  ;;  %v1825_v47 = vcombine.low %v1803_v3, %v1817_v5 }
  0x60   : > { %v1826_v14 = vcombine.high %v1803_v3, %v1817_v5  ;;  %v2250_v6 = vshll.u32 %v4329_v37, 16  ;;  %v3555_v5 = vld [vmem:[%s4525_s1 + $0x398] sm:$0xff]  }
  0x61   : > { %1601 = vmatmul.mubr.bf16.gmra.mrb[20].mxu0 %v1338_v18  ;;  %1657 = vmatmul.mubr.bf16.gmra.mrb[20].mxu1 %v1346_v63  ;;  %v2245_v18 = vshrl.u32 %v1688_v31, 16  ;;  %v1860_v38 = vrot.slane %v1832_v53, %v3752_v50  ;;  %v3545_v63 = vld [vmem:[%s4525_s1 + $0x3c8] sm:$0xff]   ;;  %v2243_v53 = vcombine.high %v4329_v37, %v4329_v37 }
  0x62   : > { %3290 = vmatpush3.bf16.msra.mxu0 %v3526_v59  ;;  %3324 = vmatpush3.bf16.msra.mxu1 %v3527_v57  ;;  %v3543_v59 = vld [vmem:[%s4525_s1 + $0x380] sm:$0xff]   ;;  %v1897_v57 = vcombine.low %v4329_v37, %v4339_v17 }
  0x63   : > { %3291 = vmatprep.subr.bf16.mxu0 %v3528_v44  ;;  %3325 = vmatprep.subr.bf16.mxu1 %v3529_v10  ;;  %v1878_v44 = vrot.slane %v1862_v32, %v3752_v50  ;;  %v1871_v10 = vrot.slane %v1861_v20, %v3752_v50  ;;  %v3556_v32 = vld [vmem:[%s4525_s1 + $0x360] sm:$0xff]  }
  0x64   : > { %2158 = vmatprep.mubr.bf16.mxu0 %v1827_v48  ;;  %2214 = vmatprep.mubr.bf16.mxu1 %v1828_v49  ;;  %v3546_v48 = vld [vmem:[%s4525_s1 + $0x308] sm:$0xff]   ;;  %v1864_v49 = vcombine.high %v1853_v52, %v1860_v38 }
  0x66   : > { %3292 = vmatpush3.bf16.msra.mxu0 %v3530_v45  ;;  %3326 = vmatpush3.bf16.msra.mxu1 %v3531_v40  ;;  %v2252_v45 = vsel %vm3787_vm14, %v2245_v18, %v2250_v6  ;;  %v1863_v40 = vcombine.low %v1853_v52, %v1860_v38  ;;  %v3558_v18 = vld [vmem:[%s4525_s1 + $0x320] sm:$0xff]   ;;  %v2253_v6 = vshrl.u32 %v4329_v37, 16  ;;  %v2261_v38 = vshrl.u32 %v4339_v17, 16  ;;  %v3564_v37 = vld [vmem:[%s4525_s1 + $0x370] sm:$0xff]  }
  0x67   : > { %3293 = vmatprep.subr.bf16.mxu0 %v3532_v51  ;;  %3327 = vmatprep.subr.bf16.mxu1 %v3533_v41  ;;  %v1904_v51 = vrot.slane %v1897_v57, %v3752_v50  ;;  %v2404_v41 = vcombine.low %v4034_v58, %v2252_v45  ;;  %v3548_v58 = vld [vmem:[%s4525_s1 + $0x350] sm:$0xff]   ;;  %v2266_v57 = vshll.u32 %v2243_v53, 16 }
  0x69   : > { %v1905_v34 = vcombine.high %v1904_v51, %v1904_v51  ;;  %v2432_v25 = vrot.slane %v2404_v41, %v3752_v50  ;;  %v1912_v3 = vrot.slane %v1904_v51, %v3752_v50  ;;  %v2268_v45 = vsel %vm3787_vm14, %v2261_v38, %v2266_v57 }
  0x6a   : > { %3294 = vmatpush3.bf16.msra.mxu0 %v3534_v24  ;;  %3328 = vmatpush3.bf16.msra.mxu1 %v3535_v30  ;;  %v1892_v24 = vrot.slane %v1864_v49, %v3752_v50  ;;  %v1885_v30 = vrot.slane %v1863_v40, %v3752_v50  ;;  %v3567_v49 = vld [vmem:[%s4525_s1 + $0x3b0] sm:$0xff]  }
  0x6b   : > { %3295 = vmatprep.subr.bf16.mxu0 %v3536_v12  ;;  %3329 = vmatprep.subr.bf16.mxu1 %v3537_v26  ;;  %v3550_v26 = vld [vmem:[%s4525_s1 + $0x310] sm:$0xff]   ;;  %v1919_v11 = vrot.slane %v1905_v34, %v3752_v50  ;;  %v2435_v2 = vcombine.low %v2425_v19, %v2432_v25  ;;  %v1920_v52 = vcombine.high %v1912_v3, %v1912_v3 }
  0x6c   : > { %v1895_v8 = vcombine.low %v1878_v44, %v1892_v24  ;;  %v1896_v12 = vcombine.high %v1878_v44, %v1892_v24  ;;  %v1893_v13 = vcombine.low %v1871_v10, %v1885_v30  ;;  %v1894_v61 = vcombine.high %v1871_v10, %v1885_v30  ;;  %v3563_v44 = vld [vmem:[%s4525_s1 + $0x3a8] sm:$0xff]  }
  0x6d   : > { %v4408_v56 = vrot.slane %v2435_v2, %v3752_v50 }
  0x6e   : > { %3296 = vmatpush3.bf16.msra.mxu0 %v3538_v9  ;;  %3330 = vmatpush3.bf16.msra.mxu1 %v3539_v1  ;;  %v2436_v9 = vcombine.high %v2425_v19, %v2432_v25  ;;  %v1921_v1 = vcombine.high %v1919_v11, %v1919_v11 }
  0x6f   : > { %3349 = vmatprep.subr.bf16.mxu0 %v3540_v27  ;;  %3383 = vmatprep.subr.bf16.mxu1 %v3541_v29  ;;  %v2465_v29 = vcombine.low %v4392_v28, %v4408_v56  ;;  %v2466_v20 = vcombine.high %v4392_v28, %v4408_v56 }
  0x70   : > { %v4405_v33 = vrot.slane %v2436_v9, %v3752_v50 }
  0x71   : > { %2159 = vmatmul.mubr.bf16.vlgmr.msra.gmra.mrb[24].mxu0 %v1825_v47  ;;  %2215 = vmatmul.mubr.bf16.vlgmr.msra.gmra.mrb[24].mxu1 %v1826_v14  ;;  %v3559_v47 = vld [vmem:[%s4525_s1 + $0x3a0] sm:$0xff]   ;;  %v3560_v14 = vld [vmem:[%s4525_s1 + $0x368] sm:$0xff]  }
  0x72   : > { %3350 = vmatpush3.bf16.msra.mxu0 %v3542_v7  ;;  %3384 = vmatpush3.bf16.msra.mxu1 %v3543_v59  ;;  %v2467_v27 = vcombine.low %v4383_v4, %v4405_v33  ;;  %v2468_v31 = vcombine.high %v4383_v4, %v4405_v33  ;;  %v3557_v7 = vld [vmem:[%s4525_s1 + $0x3e0] sm:$0xff]   ;;  %v3561_v59 = vld [vmem:[%s4525_s1 + $0x3e8] sm:$0xff]  }
  0x73   : > { %3351 = vmatprep.subr.bf16.mxu0 %v3544_v35  ;;  %3385 = vmatprep.subr.bf16.mxu1 %v3545_v63  ;;  %v2258_v35 = vshll.u32 %v4339_v17, 16  ;;  %v3562_v63 = vld [vmem:[%s4525_s1 + $0x328] sm:$0xff]   ;;  %v3565_v17 = vld [vmem:[%s4525_s1 + $0x3f0] sm:$0xff]  }
  0x74   : > { %2166 = vmatprep.mubr.bf16.mxu0 %v1895_v8  ;;  %2222 = vmatprep.mubr.bf16.mxu1 %v1896_v12 }
  0x75   : > { %v2260_v10 = vsel %vm3787_vm14, %v2253_v6, %v2258_v35 }
  0x76   : > { %3352 = vmatpush3.bf16.msra.mxu0 %v3546_v48  ;;  %3386 = vmatpush3.bf16.msra.mxu1 %v3547_v15  ;;  %v3566_v48 = vld [vmem:[%s4525_s1 + $0x330] sm:$0xff]   ;;  %v2469_v62 = vcombine.low %v2260_v10, %v2268_v45 }
  0x77   : > { %3353 = vmatprep.subr.bf16.mxu0 %v3548_v58  ;;  %3387 = vmatprep.subr.bf16.mxu1 %v3549_v60 }
  0x78   : > { %v2476_v40 = vrot.slane %v2469_v62, %v3752_v50 }
  0x79   : > { %2167 = vmatmul.mubr.bf16.gmra.mrb[28].mxu0 %v1893_v13  ;;  %2223 = vmatmul.mubr.bf16.gmra.mrb[28].mxu1 %v1894_v61 }
  0x7a   : > { %3354 = vmatpush3.bf16.msra.mxu0 %v3550_v26  ;;  %3388 = vmatpush3.bf16.msra.mxu1 %v3551_v43  ;;  %v2477_v51 = vcombine.high %v2476_v40, %v2476_v40  ;;  %v2484_v19 = vrot.slane %v2476_v40, %v3752_v50 }
  0x7b   : > { %3355 = vmatprep.subr.bf16.mxu0 %v3552_v23  ;;  %3389 = vmatprep.subr.bf16.mxu1 %v3553_v39 }
  0x7c   : > { %2174 = vmatprep.mubr.bf16.mxu0 %v1919_v11  ;;  %2230 = vmatprep.mubr.bf16.mxu1 %v1921_v1  ;;  %v2491_v41 = vrot.slane %v2477_v51, %v3752_v50  ;;  %v2492_v24 = vcombine.high %v2484_v19, %v2484_v19 }
  0x7e   : > { %3356 = vmatpush3.bf16.msra.mxu0 %v3554_v0  ;;  %3390 = vmatpush3.bf16.msra.mxu1 %v3555_v5  ;;  %v2493_v15 = vcombine.high %v2491_v41, %v2491_v41 }
  0x7f   : > { %3357 = vmatprep.subr.bf16.mxu0 %v3556_v32  ;;  %3391 = vmatprep.subr.bf16.mxu1 %v3557_v7 }
  0x81   : > { %2175 = vmatmul.mubr.bf16.gmra.mrb[32].mxu0 %v1912_v3  ;;  %2231 = vmatmul.mubr.bf16.gmra.mrb[32].mxu1 %v1920_v52 }
  0x82   : > { %3358 = vmatpush3.bf16.msra.mxu0 %v3558_v18  ;;  %3392 = vmatpush3.bf16.msra.mxu1 %v3559_v47 }
  0x83   : > { %3359 = vmatprep.subr.bf16.mxu0 %v3560_v14  ;;  %3393 = vmatprep.subr.bf16.mxu1 %v3561_v59 }
  0x84   : > { %2730 = vmatprep.mubr.bf16.mxu0 %v2399_v42  ;;  %2786 = vmatprep.mubr.bf16.mxu1 %v2400_v46  ;;  %v3568_v42 = vld [vmem:[%s4525_s1 + $0x378] sm:$0xff]  }
  0x85   : > { %v3571_v46 = vld [vmem:[%s4525_s1 + $0x3b8] sm:$0xff]  }
  0x86   : > { %3360 = vmatpush3.bf16.msra.mxu0 %v3562_v63  ;;  %3394 = vmatpush3.bf16.msra.mxu1 %v3563_v44 }
  0x87   : > { %3361 = vmatprep.subr.bf16.mxu0 %v3564_v37  ;;  %3395 = vmatprep.subr.bf16.mxu1 %v3565_v17 }
  0x8a   : > { %3362 = vmatpush3.bf16.msra.mxu0 %v3566_v48  ;;  %3396 = vmatpush3.bf16.msra.mxu1 %v3567_v49 }
  0x8b   : > { %3363 = vmatprep.subr.bf16.mxu0 %v3568_v42  ;;  %3397 = vmatprep.subr.bf16.mxu1 %v3569_v21 }
  0x8e   : > { %3364 = vmatpush3.bf16.msra.mxu0 %v3570_v22  ;;  %3398 = vmatpush3.bf16.msra.mxu1 %v3571_v46 }
  0x91   : > { %2731 = vmatmul.mubr.bf16.vlgmr.msra.gmra.mrb[36].mxu0 %v2397_v54  ;;  %2787 = vmatmul.mubr.bf16.vlgmr.msra.gmra.mrb[36].mxu1 %v2398_v55 }
  0x92   : > { %2738 = vmatprep.mubr.bf16.mxu0 %v2467_v27  ;;  %2794 = vmatprep.mubr.bf16.mxu1 %v2468_v31 }
  0x99   : > { %2739 = vmatmul.mubr.bf16.gmra.mrb[40].mxu0 %v2465_v29  ;;  %2795 = vmatmul.mubr.bf16.gmra.mrb[40].mxu1 %v2466_v20 }
  0x9a   : > { %2746 = vmatprep.mubr.bf16.mxu0 %v2491_v41  ;;  %2802 = vmatprep.mubr.bf16.mxu1 %v2493_v15 }
  0xa1   : > { %2747 = vmatmul.mubr.bf16.gmra.mrb[44].mxu0 %v2484_v19  ;;  %2803 = vmatmul.mubr.bf16.gmra.mrb[44].mxu1 %v2492_v24 }
 0x104   : > { %v3161_v54 = vpop.f32.mrb[0].mxu0  ;;  %v3195_v16 = vpop.f32.mrb[0].mxu1 }
 0x105   : > { %v3162_v36 = vpop.f32.mrb[1].mxu0  ;;  %v3196_v55 = vpop.f32.mrb[1].mxu1 }
 0x106   : > { %v3163_v30 = vadd.f32 %v3162_v36, %v3161_v54  ;;  %v3197_v58 = vadd.f32 %v3196_v55, %v3195_v16  ;;  %v3164_v34 = vpop.f32.mrb[2].mxu0  ;;  %v3198_v60 = vpop.f32.mrb[2].mxu1 }
 0x107   : > { %v3165_v25 = vpop.f32.mrb[3].mxu0  ;;  %v3199_v4 = vpop.f32.mrb[3].mxu1 }
 0x108   : > { %v1166_v8 = vadd.f32 %v3197_v58, %v3163_v30  ;;  %v3166_v12 = vadd.f32 %v3165_v25, %v3164_v34  ;;  %v3200_v13 = vadd.f32 %v3199_v4, %v3198_v60 }
 0x10a   : > { %v1169_v26 = vadd.f32 %v3200_v13, %v3166_v12 }
 0x114   : > { %v3167_v50 = vpop.f32.mrb[4].mxu0  ;;  %v3201_v28 = vpop.f32.mrb[4].mxu1 }
 0x115   : > { %v3168_v61 = vpop.f32.mrb[5].mxu0  ;;  %v3202_v43 = vpop.f32.mrb[5].mxu1 }
 0x116   : > { %v3169_v11 = vadd.f32 %v3168_v61, %v3167_v50  ;;  %v3203_v9 = vadd.f32 %v3202_v43, %v3201_v28  ;;  %v3170_v2 = vpop.f32.mrb[6].mxu0  ;;  %v3204_v23 = vpop.f32.mrb[6].mxu1 }
 0x117   : > { %v3171_v39 = vpop.f32.mrb[7].mxu0  ;;  %v3205_v33 = vpop.f32.mrb[7].mxu1 }
 0x118   : > { %v1174_v56 = vadd.f32 %v3203_v9, %v3169_v11  ;;  %v3172_v0 = vadd.f32 %v3171_v39, %v3170_v2  ;;  %v3206_v1 = vadd.f32 %v3205_v33, %v3204_v23 }
 0x11a   : > { %v1177_v3 = vadd.f32 %v3206_v1, %v3172_v0 }
 0x11c   : > { %v3173_v5 = vpop.f32.mrb[8].mxu0  ;;  %v3207_v27 = vpop.f32.mrb[8].mxu1 }
 0x11d   : > { %v3174_v31 = vpop.f32.mrb[9].mxu0  ;;  %v3208_v29 = vpop.f32.mrb[9].mxu1 }
 0x11e   : > { %v3175_v32 = vadd.f32 %v3174_v31, %v3173_v5  ;;  %v3209_v20 = vadd.f32 %v3208_v29, %v3207_v27  ;;  %v3176_v7 = vpop.f32.mrb[10].mxu0  ;;  %v3210_v53 = vpop.f32.mrb[10].mxu1 }
 0x11f   : > { %v3177_v52 = vpop.f32.mrb[11].mxu0  ;;  %v3211_v18 = vpop.f32.mrb[11].mxu1 }
 0x120   : > { %v1182_v47 = vadd.f32 %v3209_v20, %v3175_v32 }
 0x124   : > { %v3229_v14 = vpop.f32.mrb[12].mxu0  ;;  %v3263_v59 = vpop.f32.mrb[12].mxu1 }
 0x125   : > { %v3230_v6 = vpop.f32.mrb[13].mxu0  ;;  %v3264_v35 = vpop.f32.mrb[13].mxu1 }
 0x126   : > { %v3231_v38 = vadd.f32 %v3230_v6, %v3229_v14  ;;  %v3265_v57 = vadd.f32 %v3264_v35, %v3263_v59  ;;  %v3232_v63 = vpop.f32.mrb[14].mxu0  ;;  %v3266_v44 = vpop.f32.mrb[14].mxu1 }
 0x127   : > { %v3233_v37 = vpop.f32.mrb[15].mxu0  ;;  %v3267_v17 = vpop.f32.mrb[15].mxu1 }
 0x128   : > { %v1587_v10 = vadd.f32 %v3231_v38, %v1166_v8  ;;  %v3234_v45 = vadd.f32 %v3233_v37, %v3232_v63  ;;  %v3268_v48 = vadd.f32 %v3267_v17, %v3266_v44 }
 0x12a   : > { %v1643_v49 = vadd.f32 %v3265_v57, %v1587_v10  ;;  %v1590_v62 = vadd.f32 %v3234_v45, %v1169_v26 }
 0x12c   : > { %v1646_v42 = vadd.f32 %v3268_v48, %v1590_v62  ;;  %v3235_v21 = vpop.f32.mrb[16].mxu0  ;;  %v3269_v22 = vpop.f32.mrb[16].mxu1 }
 0x12d   : > { %v3236_v46 = vpop.f32.mrb[17].mxu0  ;;  %v3270_v40 = vpop.f32.mrb[17].mxu1 }
 0x12e   : > { %v3237_v51 = vadd.f32 %v3236_v46, %v3235_v21  ;;  %v3238_v41 = vpop.f32.mrb[18].mxu0  ;;  %v3271_v15 = vadd.f32 %v3270_v40, %v3269_v22  ;;  %v3272_v19 = vpop.f32.mrb[18].mxu1 }
 0x12f   : > { %v3239_v24 = vpop.f32.mrb[19].mxu0  ;;  %v3273_v54 = vpop.f32.mrb[19].mxu1 }
 0x130   : > { %v1595_v16 = vadd.f32 %v3237_v51, %v1174_v56  ;;  %v3240_v36 = vadd.f32 %v3239_v24, %v3238_v41  ;;  %v3274_v55 = vadd.f32 %v3273_v54, %v3272_v19 }
 0x132   : > { %v1598_v30 = vadd.f32 %v3240_v36, %v1177_v3  ;;  %v1651_v58 = vadd.f32 %v3271_v15, %v1595_v16 }
 0x134   : > { %v1654_v34 = vadd.f32 %v3274_v55, %v1598_v30  ;;  %v3241_v60 = vpop.f32.mrb[20].mxu0  ;;  %v3275_v25 = vpop.f32.mrb[20].mxu1 }
 0x135   : > { %v3242_v4 = vpop.f32.mrb[21].mxu0  ;;  %v3276_v8 = vpop.f32.mrb[21].mxu1 }
 0x136   : > { %v3243_v12 = vadd.f32 %v3242_v4, %v3241_v60  ;;  %v3277_v13 = vadd.f32 %v3276_v8, %v3275_v25  ;;  %v3244_v26 = vpop.f32.mrb[22].mxu0  ;;  %v3278_v50 = vpop.f32.mrb[22].mxu1 }
 0x137   : > { %v3245_v28 = vpop.f32.mrb[23].mxu0  ;;  %v3279_v61 = vpop.f32.mrb[23].mxu1 }
 0x138   : > { %v1603_v43 = vadd.f32 %v3243_v12, %v1182_v47 }
 0x13a   : > { %v1659_v11 = vadd.f32 %v3277_v13, %v1603_v43  ;;  %v3121_v13 = vld [vmem:[%s4526_s2] ss:$0 sm:$0xff] }
 0x144   : > { %v3297_v9 = vpop.f32.mrb[24].mxu0  ;;  %v3331_v2 = vpop.f32.mrb[24].mxu1 }
 0x145   : > { %v3298_v23 = vpop.f32.mrb[25].mxu0  ;;  %v3332_v39 = vpop.f32.mrb[25].mxu1 }
 0x146   : > { %v3299_v33 = vadd.f32 %v3298_v23, %v3297_v9  ;;  %v3333_v56 = vadd.f32 %v3332_v39, %v3331_v2  ;;  %v3300_v0 = vpop.f32.mrb[26].mxu0  ;;  %v3334_v1 = vpop.f32.mrb[26].mxu1 }
 0x147   : > { %v3301_v3 = vpop.f32.mrb[27].mxu0  ;;  %v3335_v5 = vpop.f32.mrb[27].mxu1 }
 0x148   : > { %v2217_v27 = vadd.f32 %v3333_v56, %v3299_v33  ;;  %v3302_v31 = vadd.f32 %v3301_v3, %v3300_v0  ;;  %v3336_v29 = vadd.f32 %v3335_v5, %v3334_v1 }
 0x14a   : > { %v2238_v32 = vadd.f32 %v2217_v27, %v1643_v49  ;;  %v2220_v20 = vadd.f32 %v3336_v29, %v3302_v31 }
 0x14c   : > { %v2239_v7 = vadd.f32 %v2220_v20, %v1646_v42  ;;  %v3303_v53 = vpop.f32.mrb[28].mxu0  ;;  %v3337_v52 = vpop.f32.mrb[28].mxu1 }
 0x14d   : > { %v3304_v18 = vpop.f32.mrb[29].mxu0  ;;  %v3338_v47 = vpop.f32.mrb[29].mxu1 }
 0x14e   : > { %v3305_v14 = vadd.f32 %v3304_v18, %v3303_v53  ;;  %v3339_v59 = vadd.f32 %v3338_v47, %v3337_v52  ;;  %v3306_v6 = vpop.f32.mrb[30].mxu0  ;;  %v3340_v35 = vpop.f32.mrb[30].mxu1 }
 0x14f   : > { %v3307_v38 = vpop.f32.mrb[31].mxu0  ;;  %v3341_v57 = vpop.f32.mrb[31].mxu1 }
 0x150   : > { %v2225_v63 = vadd.f32 %v3339_v59, %v3305_v14  ;;  %v3308_v44 = vadd.f32 %v3307_v38, %v3306_v6  ;;  %v3342_v37 = vadd.f32 %v3341_v57, %v3340_v35 }
 0x152   : > { %v2240_v17 = vadd.f32 %v2225_v63, %v1651_v58  ;;  %v2228_v10 = vadd.f32 %v3342_v37, %v3308_v44 }
 0x154   : > { %v2241_v45 = vadd.f32 %v2228_v10, %v1654_v34  ;;  %v3309_v48 = vpop.f32.mrb[32].mxu0  ;;  %v3343_v49 = vpop.f32.mrb[32].mxu1 }
 0x155   : > { %v3310_v62 = vpop.f32.mrb[33].mxu0  ;;  %v3344_v42 = vpop.f32.mrb[33].mxu1 }
 0x156   : > { %v3311_v21 = vadd.f32 %v3310_v62, %v3309_v48  ;;  %v3345_v22 = vadd.f32 %v3344_v42, %v3343_v49  ;;  %v3312_v46 = vpop.f32.mrb[34].mxu0  ;;  %v3346_v40 = vpop.f32.mrb[34].mxu1 }
 0x157   : > { %v3313_v51 = vpop.f32.mrb[35].mxu0  ;;  %v3347_v41 = vpop.f32.mrb[35].mxu1 }
 0x158   : > { %v2233_v15 = vadd.f32 %v3345_v22, %v3311_v21 }
 0x15a   : > { %v4500_v19 = vadd.f32 %v2233_v15, %v1659_v11 }
 0x164   : > { %v3365_v24 = vpop.f32.mrb[36].mxu0  ;;  %v3399_v54 = vpop.f32.mrb[36].mxu1 }
 0x165   : > { %v3366_v16 = vpop.f32.mrb[37].mxu0  ;;  %v3400_v36 = vpop.f32.mrb[37].mxu1 }
 0x166   : > { %v3367_v55 = vadd.f32 %v3366_v16, %v3365_v24  ;;  %v3401_v30 = vadd.f32 %v3400_v36, %v3399_v54  ;;  %v3368_v58 = vpop.f32.mrb[38].mxu0  ;;  %v3402_v34 = vpop.f32.mrb[38].mxu1 }
 0x167   : > { %v3369_v60 = vpop.f32.mrb[39].mxu0  ;;  %v3403_v25 = vpop.f32.mrb[39].mxu1 }
 0x168   : > { %v2789_v4 = vadd.f32 %v3401_v30, %v3367_v55  ;;  %v3370_v8 = vadd.f32 %v3369_v60, %v3368_v58  ;;  %v3404_v12 = vadd.f32 %v3403_v25, %v3402_v34 }
 0x16a   : > { %v2810_v26 = vadd.f32 %v2789_v4, %v2238_v32  ;;  %v2792_v50 = vadd.f32 %v3404_v12, %v3370_v8 }
 0x16c   : > { %v2822_v28 = vadd.f32 %v3121_v13, %v2810_v26  ;;  %v2811_v61 = vadd.f32 %v2792_v50, %v2239_v7  ;;  %v3371_v43 = vpop.f32.mrb[40].mxu0  ;;  %v3405_v11 = vpop.f32.mrb[40].mxu1 }
 0x16d   : > { %v3372_v9 = vpop.f32.mrb[41].mxu0  ;;  %v3406_v2 = vpop.f32.mrb[41].mxu1 }
 0x16e   : > { %v2832_v23 = vmul.f32 0.2, %v2822_v28  ;;  %v2823_v39 = vadd.f32 %v3121_v13, %v2811_v61  ;;  %v3373_v33 = vadd.f32 %v3372_v9, %v3371_v43  ;;  %v3374_v56 = vpop.f32.mrb[42].mxu0  ;;  %v3408_v0 = vpop.f32.mrb[42].mxu1  ;;  %vm2827_vm15 = vcmp.ge.f32.partialorder %v2822_v28, 0.0 }
 0x16f   : > { %v3407_v1 = vadd.f32 %v3406_v2, %v3405_v11  ;;  %v3375_v3 = vpop.f32.mrb[43].mxu0  ;;  %v3409_v5 = vpop.f32.mrb[43].mxu1 }
 0x170   : > { %vm2828_vm0 = vcmp.ge.f32.partialorder %v2823_v39, 0.0  ;;  %v2833_v27 = vmul.f32 0.2, %v2823_v39  ;;  %v3376_v31 = vadd.f32 %v3375_v3, %v3374_v56  ;;  %v3410_v32 = vadd.f32 %v3409_v5, %v3408_v0 }
 0x171   : > { %v2797_v29 = vadd.f32 %v3407_v1, %v3373_v33  ;;  %v2837_v20 = vsel %vm2827_vm15, %v2822_v28, %v2832_v23 }
 0x172   : > { %v2838_v7 = vsel %vm2828_vm0, %v2823_v39, %v2833_v27  ;;  %v2800_v18 = vadd.f32 %v3410_v32, %v3376_v31 }
 0x173   : > { %v3137_v53 = vpack.c.bf16 %v2838_v7, %v2837_v20  ;;  %v2812_v52 = vadd.f32 %v2797_v29, %v2240_v17 }
 0x174   : > { %v3377_v47 = vpop.f32.mrb[44].mxu0  ;;  %v3411_v14 = vpop.f32.mrb[44].mxu1  ;;  %v2813_v6 = vadd.f32 %v2800_v18, %v2241_v45 }
 0x175   : > { %3138 = vst [vmem:[%s4509_s6] sm:$0xff] %v3137_v53   ;;  %v2824_v59 = vadd.f32 %v3121_v13, %v2812_v52  ;;  %v3378_v35 = vpop.f32.mrb[45].mxu0  ;;  %v3412_v38 = vpop.f32.mrb[45].mxu1 }
 0x176   : > { %v3379_v57 = vadd.f32 %v3378_v35, %v3377_v47  ;;  %v3413_v63 = vadd.f32 %v3412_v38, %v3411_v14  ;;  %v3380_v44 = vpop.f32.mrb[46].mxu0  ;;  %v3414_v37 = vpop.f32.mrb[46].mxu1  ;;  %v2825_v48 = vadd.f32 %v3121_v13, %v2813_v6 }
 0x177   : > { %v2834_v10 = vmul.f32 0.2, %v2824_v59  ;;  %v3381_v49 = vpop.f32.mrb[47].mxu0  ;;  %v3415_v62 = vpop.f32.mrb[47].mxu1  ;;  %vm2829_vm1 = vcmp.ge.f32.partialorder %v2824_v59, 0.0 }
 0x178   : > { %v2805_v17 = vadd.f32 %v3413_v63, %v3379_v57  ;;  %vm2830_vm2 = vcmp.ge.f32.partialorder %v2825_v48, 0.0  ;;  %v2835_v42 = vmul.f32 0.2, %v2825_v48 }
 0x179   : > { %v2839_v22 = vsel %vm2829_vm1, %v2824_v59, %v2834_v10 }
 0x17a   : > { %v2814_v21 = vadd.f32 %v2805_v17, %v4500_v19  ;;  %v2840_v45 = vsel %vm2830_vm2, %v2825_v48, %v2835_v42 }
 0x17b   : > { %v3142_v46 = vpack.c.bf16 %v2840_v45, %v2839_v22 }
 0x17c   : > { %v2826_v40 = vadd.f32 %v3121_v13, %v2814_v21 }
 0x17d   : > { %3144 = vst [vmem:[%s4509_s6 + $0x8] sm:$0xff] %v3142_v46  }
 0x17e   : > { %vm2831_vm3 = vcmp.ge.f32.partialorder %v2826_v40, 0.0  ;;  %v2836_v51 = vmul.f32 0.2, %v2826_v40 }
 0x180   : > { %v2841_v41 = vsel %vm2831_vm3, %v2826_v40, %v2836_v51 }
 0x181   : > { %v3133_v15 = vpack.c.bf16 %v2841_v41, %v2841_v41 }
 0x183   : > { %2867 = vst [vmem:[%s4509_s6 + $0x10] sm:$0x3] %v3133_v15 }
 0x184 PF: > { %s13_s14 = sadd.s32 1, %s3594_s14   ;;  %s4530_s12 = smov %s3590_s13 }
 0x185   : > { %p10_p5 = scmp.ge.s32.totalorder %s13_s14, 4   ;;  %s4531_s13 = smov %s4533_s15 }
 0x187   :  { %12 = sbr.rel (!%p10_p5) target bundleno = 2 (0x2), region = 63 }

// kernel: _lambda_.7
= control target key start
LH: loop header
LB: loop body
LE: loop exit
PB: predicated region body
PF: predicated region fallthrough
CT: control target
= control target key end

     0   :  { %s7596_s18 = smov 0   ;;  %s9444_s0 = inlined_call_operand.vmem [shape: bf16[2,8,8,128], index: 0, kind: input, shape index: {}]   ;;  %s9445_s1 = inlined_call_operand.vmem [shape: bf16[2048,128], index: 1, kind: input, shape index: {}]   ;;  %s9446_s2 = inlined_call_operand.vmem [shape: f32[1,128], index: 2, kind: input, shape index: {}]   ;;  %s9447_s3 = inlined_call_operand.vmem [shape: bf16[2048,8], index: 3, kind: input, shape index: {}]   ;;  %s9448_s4 = inlined_call_operand.vmem [shape: f32[1,8], index: 4, kind: input, shape index: {}]   ;;  %s9449_s5 = inlined_call_operand.vmem [shape: f32[2,4,8], index: 5, kind: output, shape index: {}]  }
   0x1 LB: > { %s5955_s19 = sadd.s32 4294967295, %s7561_s18   ;;  %p5959_p0 = scmp.ge.s32.totalorder %s7561_s18, 1  ;;  %s7561_s18 = sphi %s7596_s18, %s15_s18  }
   0x2   : > { %p187_p1 = scmp.lt.s32.totalorder %s7561_s18, 3 }
   0x4   : > { %p188_p2 = pnand %p5959_p0, %p187_p1 }
   0x5   : > { %v7299_v0 = vld [vmem:[%s9445_s1 + $0x40] sm:$0xff] (!%p188_p2)   ;;  %p214_p3 = scmp.lt.s32.totalorder (!%p188_p2), %s5955_s19, 1  ;;  %v7300_v1 = vld [vmem:[%s9445_s1 + $0x48] sm:$0xff] (!%p188_p2)   ;;  %v248_v2 = vlaneseq (!%p188_p2)  ;;  %v7301_v3 = vld [vmem:[%s9445_s1 + $0x50] sm:$0xff] (!%p188_p2)   ;;  %v7563_v8 = vmov (!%p188_p2), 1966171168  }
   0x6   : > { %191 = sbr.rel (%p188_p2) target bundleno = 1455 (0x5af), region = 40  ;;  %6588 = vmatprep.subr.bf16.mxu0 (!%p188_p2), %v7299_v0  ;;  %v7302_v4 = vld [vmem:[%s9445_s1 + $0x58] sm:$0xff] (!%p188_p2)   ;;  %v246_v9 = vunpack.c.l.s4 (!%p188_p2), %v7563_v8  ;;  %v7303_v11 = vld [vmem:[%s9445_s1 + $0x60] sm:$0xff] (!%p188_p2)   ;;  %v7304_v25 = vld [vmem:[%s9445_s1 + $0x68] sm:$0xff] (!%p188_p2)   ;;  %vm7565_vm0 = vmmov (!%p188_p2), 0   ;;  %vm5900_vm5 = vcmask (!%p188_p2), 60416  }
   0x7   : > { %6589 = vmatpush3.bf16.msra.mxu0 (!%p188_p2), %v7299_v0  ;;  %v249_v5 = vshrl.u32 (!%p188_p2), %v248_v2, 7  ;;  %v7305_v42 = vld [vmem:[%s9445_s1 + $0x70] sm:$0xff] (!%p188_p2)   ;;  %v7306_v56 = vld [vmem:[%s9445_s1 + $0x78] sm:$0xff] (!%p188_p2)   ;;  %v7307_v8 = vld [vmem:[%s9445_s1] sm:$0xff] (!%p188_p2)  }
   0x8   : > { %6590 = vmatprep.subr.bf16.mxu0 (!%p188_p2), %v7300_v1  ;;  %v247_v14 = vunpack.c.0.s8 (!%p188_p2), %v246_v9 }
   0xa   : > { %v7632_v19 = vsub.s32 (!%p188_p2), %v247_v14, %v249_v5 }
   0xb   : > { %6591 = vmatpush3.bf16.msra.mxu0 (!%p188_p2), %v7300_v1 }
   0xc   : > { %6592 = vmatprep.subr.bf16.mxu0 (!%p188_p2), %v7301_v3 }
   0xd   : > { %s9453_s19 = smov (!%p214_p3, %s5955_s19), 1 }
   0xe   : > { %s6283_s26 = sshll.u32 %s9453_s19, 5  ;;  %s5962_s14 = sshll.u32 %s9453_s19, 2 }
   0xf   : > { %s7619_s29 = scalar_lea.vmem %s9444_s0, %s6283_s26  ;;  %6593 = vmatpush3.bf16.msra.mxu0 %v7301_v3  ;;  %s222_s21 = scalar_lea.vmem %s9449_s5, %s5962_s14 }
  0x10   : > { %v5963_v6 = vld.sshfl [vmem:[%s7619_s29] sm:$0x33 pattern:$0x75316420]  ;;  %6594 = vmatprep.subr.bf16.mxu0 %v7302_v4 }
  0x11   : > { %v5964_v7 = vld.sshfl [vmem:[%s7619_s29 + $0x4] sm:$0x33 pattern:$0x75316420]  ;;  %v244_v13 = vcombine.high %v5963_v6, %v5963_v6  ;;  %v7635_v21 = vrot.slane %v5963_v6, %v7632_v19 }
  0x12   : > { %v5965_v10 = vld.sshfl [vmem:[%s7619_s29 + $0x8] sm:$0x33 pattern:$0x75316420]  ;;  %v267_v15 = vcombine.high %v5964_v7, %v5964_v7  ;;  %v7641_v23 = vrot.slane %v5964_v7, %v7632_v19 }
  0x13   : > { %v5966_v12 = vld.sshfl [vmem:[%s7619_s29 + $0xc] sm:$0x33 pattern:$0x75316420]  ;;  %v290_v16 = vcombine.high %v5965_v10, %v5965_v10  ;;  %6595 = vmatpush3.bf16.msra.mxu0 %v7302_v4  ;;  %v7638_v22 = vrot.slane %v244_v13, %v7632_v19  ;;  %v7650_v26 = vrot.slane %v5965_v10, %v7632_v19  ;;  %v7663_v30 = vcombine.high %v7635_v21, %v7635_v21 }
  0x14   : > { %v313_v17 = vcombine.high %v5966_v12, %v5966_v12  ;;  %v5967_v18 = vld.sshfl [vmem:[%s7619_s29 + $0x10] sm:$0x33 pattern:$0x75316420]  ;;  %v7644_v24 = vrot.slane %v267_v15, %v7632_v19  ;;  %6596 = vmatprep.subr.bf16.mxu0 %v7303_v11  ;;  %v7656_v28 = vrot.slane %v5966_v12, %v7632_v19  ;;  %v7667_v31 = vcombine.high %v7641_v23, %v7641_v23 }
  0x15   : > { %v336_v20 = vcombine.high %v5967_v18, %v5967_v18  ;;  %v7653_v27 = vrot.slane %v290_v16, %v7632_v19  ;;  %v353_v32 = vunpack.i.h.s16 %v7635_v21  ;;  %v355_v33 = vunpack.i.h.s16 %v7638_v22 }
  0x16   : > { %v7659_v29 = vrot.slane %v313_v17, %v7632_v19  ;;  %v7673_v34 = vcombine.high %v7650_v26, %v7650_v26  ;;  %v358_v35 = vunpack.i.h.s16 %v7641_v23  ;;  %v363_v36 = vunpack.i.h.s16 %v7650_v26 }
  0x17   : > { %v365_v37 = vunpack.i.h.s16 %v7653_v27  ;;  %6597 = vmatpush3.bf16.msra.mxu0 %v7303_v11  ;;  %v368_v38 = vunpack.i.h.s16 %v7656_v28  ;;  %v393_v39 = vunpack.i.h.s16 %v7663_v30  ;;  %v5968_v40 = vpack.i.b16 %v7638_v22, %v353_v32 }
  0x18   : > { %v7682_v41 = vpack.i.b16 %v7663_v30, %v355_v33  ;;  %6598 = vmatprep.subr.bf16.mxu0 %v7304_v25  ;;  %v395_v43 = vunpack.i.h.s16 %v7673_v34  ;;  %v7691_v44 = vpack.i.b16 %v7653_v27, %v363_v36  ;;  %v7703_v48 = vcombine.high %v7656_v28, %v7656_v28 }
  0x19   : > { %v7696_v45 = vpack.i.b16 %v7673_v34, %v365_v37  ;;  %v416_v46 = vpack.i.b16 %v358_v35, %v393_v39  ;;  %v7714_v51 = vrot.slane %v5967_v18, %v7632_v19  ;;  %v7719_v54 = vrot.slane %v336_v20, %v7632_v19 }
  0x1a   : > { %v427_v47 = vcombine.low %v5968_v40, %v7682_v41  ;;  %v7709_v49 = vpack.i.b16 %v368_v38, %v395_v43  ;;  %v429_v50 = vcombine.low %v7667_v31, %v7691_v44  ;;  %v476_v55 = vcombine.low %v7659_v29, %v7703_v48 }
  0x1b   : > { %6599 = vmatpush3.bf16.msra.mxu0 %v7304_v25  ;;  %v428_v52 = vcombine.low %v416_v46, %v7644_v24  ;;  %v7731_v59 = vcombine.high %v7714_v51, %v7714_v51  ;;  %v373_v60 = vunpack.i.h.s16 %v7714_v51  ;;  %v375_v62 = vunpack.i.h.s16 %v7719_v54 }
  0x1c   : > { %v437_v53 = vrot.slane %v427_v47, %v7632_v19  ;;  %6600 = vmatprep.subr.bf16.mxu0 %v7305_v42  ;;  %v430_v57 = vcombine.low %v7696_v45, %v7709_v49  ;;  %v451_v58 = vrot.slane %v429_v50, %v7632_v19  ;;  %v360_v2 = vunpack.i.h.s16 %v7644_v24 }
  0x1d   : > { %v444_v61 = vrot.slane %v428_v52, %v7632_v19  ;;  %v7738_v0 = vunpack.i.h.s16 %v7731_v59  ;;  %v7743_v1 = vpack.i.b16 %v7719_v54, %v373_v60  ;;  %v7749_v4 = vpack.i.b16 %v7731_v59, %v375_v62 }
  0x1e   : > { %v458_v63 = vrot.slane %v430_v57, %v7632_v19  ;;  %v5982_v5 = vpack.i.b16 %v7641_v23, %v7663_v30  ;;  %v7754_v6 = vpack.i.b16 %v7644_v24, %v358_v35  ;;  %v7760_v9 = vrot.slane %v476_v55, %v7632_v19 }
  0x1f   : > { %6601 = vmatpush3.bf16.msra.mxu0 %v7305_v42  ;;  %v459_v3 = vcombine.low %v437_v53, %v444_v61  ;;  %v498_v10 = vrot.slane %v7738_v0, %v7632_v19  ;;  %v7765_v11 = vpack.i.b16 %v7667_v31, %v360_v2  ;;  %v477_v13 = vcombine.low %v7743_v1, %v7749_v4 }
  0x20   : > { %6602 = vmatprep.subr.bf16.mxu0 %v7306_v56  ;;  %v460_v7 = vcombine.low %v451_v58, %v458_v63  ;;  %v7772_v14 = vpack.i.b16 %v7656_v28, %v7673_v34  ;;  %v627_v15 = vcombine.low %v7635_v21, %v7638_v22  ;;  %v628_v17 = vcombine.low %v5982_v5, %v7754_v6  ;;  %v7309_v63 = vld [vmem:[%s9445_s1 + $0x10] sm:$0xff]  }
  0x21   : > { %v467_v12 = vrot.slane %v459_v3, %v7632_v19  ;;  %v629_v18 = vcombine.low %v7765_v11, %v7650_v26  ;;  %v7781_v20 = vrot.slane %v477_v13, %v7632_v19  ;;  %v513_v42 = vrot.slane %v498_v10, %v7632_v19 }
  0x22   : > { %v474_v16 = vrot.slane %v460_v7, %v7632_v19  ;;  %v630_v25 = vcombine.low %v7653_v27, %v7772_v14  ;;  %v637_v32 = vrot.slane %v627_v15, %v7632_v19  ;;  %v644_v21 = vrot.slane %v628_v17, %v7632_v19 }
  0x23   : > { %6603 = vmatpush3.bf16.msra.mxu0 %v7306_v56  ;;  %v651_v35 = vrot.slane %v629_v18, %v7632_v19  ;;  %v499_v40 = vcombine.low %v7760_v9, %v7781_v20  ;;  %v7308_v56 = vld [vmem:[%s9445_s1 + $0x8] sm:$0xff]   ;;  %v814_v61 = vcombine.high %v7638_v22, %v7638_v22  ;;  %v370_v5 = vunpack.i.h.s16 %v7659_v29 }
  0x24   : > { %v475_v33 = vcombine.low %v467_v12, %v474_v16  ;;  %6608 = vmatprep.subr.bf16.mxu0 %v7307_v8  ;;  %v658_v46 = vrot.slane %v630_v25, %v7632_v19  ;;  %v659_v47 = vcombine.low %v637_v32, %v644_v21  ;;  %v7808_v10 = vcombine.high %v7653_v27, %v7653_v27 }
  0x25   : > { %v506_v50 = vrot.slane %v499_v40, %v7632_v19  ;;  %v1039_v3 = vunpack.i.h.s16 %v814_v61  ;;  %v6008_v7 = vpack.i.b16 %v814_v61, %v393_v39  ;;  %v394_v12 = vunpack.i.h.s16 %v7667_v31 }
  0x26   : > { %6604 = vmatprep.mubr.bf16.mxu0 %v475_v33  ;;  %v660_v52 = vcombine.low %v651_v35, %v658_v46  ;;  %v667_v53 = vrot.slane %v659_v47, %v7632_v19  ;;  %v7816_v13 = vcombine.high %v7644_v24, %v7644_v24  ;;  %v7822_v39 = vpack.i.b16 %v7659_v29, %v368_v38 }
  0x27   : > { %v514_v55 = vcombine.low %v506_v50, %v513_v42  ;;  %v1061_v15 = vpack.i.b16 %v360_v2, %v1039_v3  ;;  %v1068_v16 = vcombine.low %v7682_v41, %v6008_v7  ;;  %v7827_v17 = vpack.i.b16 %v7703_v48, %v370_v5  ;;  %v7311_v41 = vld [vmem:[%s9445_s1 + $0x20] sm:$0xff]   ;;  %v7312_v42 = vld [vmem:[%s9445_s1 + $0x28] sm:$0xff]  }
  0x28   : > { %v674_v57 = vrot.slane %v660_v52, %v7632_v19  ;;  %v5996_v2 = vpack.i.b16 %v7644_v24, %v814_v61  ;;  %v7838_v38 = vpack.i.b16 %v7816_v13, %v394_v12  ;;  %v7842_v32 = vpack.i.b16 %v7659_v29, %v7808_v10 }
  0x29   : > { %6605 = vmatmul.mubr.bf16.vlgmr.msra.gmra.mrb[0].mxu0 %v514_v55  ;;  %v1069_v18 = vcombine.low %v1061_v15, %v7667_v31  ;;  %v7831_v25 = vrot.slane %v1068_v16, %v7632_v19  ;;  %v676_v21 = vcombine.low %v7822_v39, %v7827_v17  ;;  %v677_v35 = vcombine.low %v7714_v51, %v7719_v54  ;;  %v7314_v16 = vld [vmem:[%s9445_s1 + $0x38] sm:$0xff]  }
  0x2a   : > { %v675_v58 = vcombine.low %v667_v53, %v674_v57  ;;  %6609 = vmatpush3.bf16.msra.mxu0 %v7307_v8  ;;  %v7310_v8 = vld [vmem:[%s9445_s1 + $0x18] sm:$0xff]   ;;  %v848_v46 = vcombine.low %v7638_v22, %v7663_v30  ;;  %v849_v47 = vcombine.low %v5996_v2, %v7765_v11  ;;  %v850_v50 = vcombine.low %v7838_v38, %v7653_v27  ;;  %v7313_v22 = vld [vmem:[%s9445_s1 + $0x30] sm:$0xff]  }
  0x2b   : > { %6610 = vmatprep.subr.bf16.mxu0 %v7308_v56  ;;  %v7845_v33 = vrot.slane %v1069_v18, %v7632_v19  ;;  %v851_v52 = vcombine.low %v7673_v34, %v7842_v32  ;;  %v376_v53 = vunpack.i.l.s16 %v7731_v59  ;;  %v7865_v55 = vrot.slane %v676_v21, %v7632_v19 }
  0x2c   : > { %6624 = vmatprep.mubr.bf16.mxu0 %v675_v58  ;;  %v858_v30 = vrot.slane %v848_v46, %v7632_v19  ;;  %v865_v57 = vrot.slane %v849_v47, %v7632_v19  ;;  %v872_v58 = vrot.slane %v850_v50, %v7632_v19  ;;  %v1516_v2 = vcombine.low %v7754_v6, %v7765_v11 }
  0x2d   : > { %v1100_v40 = vcombine.low %v7831_v25, %v7845_v33  ;;  %v879_v61 = vrot.slane %v851_v52, %v7632_v19  ;;  %v698_v3 = vrot.slane %v376_v53, %v7632_v19  ;;  %v7316_v52 = vld [vmem:[%s9445_s1 + $0x88] sm:$0xff]   ;;  %v7326_v25 = vld [vmem:[%s9445_s1 + $0xd8] sm:$0xff]  }
  0x2e   : > { %6611 = vmatpush3.bf16.msra.mxu0 %v7308_v56  ;;  %v691_v56 = vrot.slane %v677_v35, %v7632_v19  ;;  %v880_v18 = vcombine.low %v858_v30, %v865_v57  ;;  %v7318_v30 = vld [vmem:[%s9445_s1 + $0x98] sm:$0xff]   ;;  %v1041_v57 = vunpack.i.h.s16 %v7808_v10 }
  0x2f   : > { %6612 = vmatprep.subr.bf16.mxu0 %v7309_v63 }
  0x30   : > { %v699_v7 = vcombine.low %v7865_v55, %v691_v56  ;;  %v888_v46 = vrot.slane %v880_v18, %v7632_v19  ;;  %v7317_v56 = vld [vmem:[%s9445_s1 + $0x90] sm:$0xff]  }
  0x32   : > { %6613 = vmatpush3.bf16.msra.mxu0 %v7309_v63  ;;  %v396_v63 = vunpack.i.h.s16 %v7703_v48  ;;  %v706_v35 = vrot.slane %v699_v7, %v7632_v19  ;;  %v7932_v7 = vpack.i.b16 %v370_v5, %v1041_v57  ;;  %v1070_v5 = vcombine.low %v7816_v13, %v7696_v45 }
  0x33   : > { %6614 = vmatprep.subr.bf16.mxu0 %v7310_v8  ;;  %v1108_v57 = vrot.slane %v1100_v40, %v7632_v19  ;;  %v7327_v40 = vld [vmem:[%s9445_s1 + $0xe0] sm:$0xff]  }
  0x34   : > { %v7882_v15 = vpack.i.b16 %v373_v60, %v396_v63  ;;  %v7893_v60 = vrot.slane %v1516_v2, %v7632_v19 }
  0x36   : > { %6615 = vmatpush3.bf16.msra.mxu0 %v7310_v8  ;;  %v1511_v8 = vpack.i.b16 %v363_v36, %v394_v12  ;;  %v713_v36 = vrot.slane %v698_v3, %v7632_v19  ;;  %v7319_v3 = vld [vmem:[%s9445_s1 + $0xa0] sm:$0xff]  }
  0x37   : > { %6616 = vmatprep.subr.bf16.mxu0 %v7311_v41 }
  0x38   : > { %v1517_v21 = vcombine.low %v1511_v8, %v7653_v27  ;;  %v714_v50 = vcombine.low %v706_v35, %v713_v36  ;;  %v7936_v8 = vcombine.high %v7719_v54, %v7719_v54  ;;  %v7321_v35 = vld [vmem:[%s9445_s1 + $0xb0] sm:$0xff]   ;;  %v1092_v36 = vrot.slane %v1070_v5, %v7632_v19 }
  0x39   : > { %v7325_v5 = vld [vmem:[%s9445_s1 + $0xd0] sm:$0xff]  }
  0x3a   : > { %6617 = vmatpush3.bf16.msra.mxu0 %v7311_v41  ;;  %v881_v41 = vcombine.low %v872_v58, %v879_v61  ;;  %v7896_v12 = vrot.slane %v1517_v21, %v7632_v19  ;;  %v7925_v61 = vpack.i.b16 %v7808_v10, %v395_v43  ;;  %v898_v43 = vcombine.low %v7719_v54, %v7731_v59 }
  0x3b   : > { %6618 = vmatprep.subr.bf16.mxu0 %v7312_v42  ;;  %v7988_v33 = vpack.i.b16 %v7936_v8, %v7738_v0 }
  0x3c   : > { %v895_v6 = vrot.slane %v881_v41, %v7632_v19  ;;  %v1548_v47 = vcombine.low %v7893_v60, %v7896_v12  ;;  %v1071_v18 = vcombine.low %v7925_v61, %v7932_v7  ;;  %v823_v41 = vunpack.i.l.s16 %v7936_v8 }
  0x3d   : > { %v7954_v21 = vrot.slane %v898_v43, %v7632_v19  ;;  %v7324_v43 = vld [vmem:[%s9445_s1 + $0xc8] sm:$0xff]  }
  0x3e   : > { %6619 = vmatpush3.bf16.msra.mxu0 %v7312_v42  ;;  %v7315_v42 = vld [vmem:[%s9445_s1 + $0x80] sm:$0xff]   ;;  %v896_v53 = vcombine.low %v888_v46, %v895_v6  ;;  %v919_v46 = vrot.slane %v823_v41, %v7632_v19  ;;  %v7997_v41 = vpack.i.b16 %v7714_v51, %v7703_v48 }
  0x3f   : > { %6620 = vmatprep.subr.bf16.mxu0 %v7313_v22 }
  0x42   : > { %6621 = vmatpush3.bf16.msra.mxu0 %v7313_v22  ;;  %v7913_v22 = vcombine.high %v7659_v29, %v7659_v29 }
  0x43   : > { %6622 = vmatprep.subr.bf16.mxu0 %v7314_v16 }
  0x44   : > { %v7920_v58 = vpack.i.b16 %v7913_v22, %v396_v63 }
  0x46   : > { %6623 = vmatpush3.bf16.msra.mxu0 %v7314_v16  ;;  %v897_v63 = vcombine.low %v7827_v17, %v7920_v58  ;;  %v7320_v16 = vld [vmem:[%s9445_s1 + $0xa8] sm:$0xff]  }
  0x47   : > { %6628 = vmatprep.subr.bf16.mxu0 %v7315_v42 }
  0x48   : > { %v7951_v2 = vrot.slane %v897_v63, %v7632_v19 }
  0x49   : > { %6625 = vmatmul.mubr.bf16.vlgmr.msra.gmra.mrb[0].mxu0 %v714_v50  ;;  %v7322_v50 = vld [vmem:[%s9445_s1 + $0xb8] sm:$0xff]  }
  0x4a   : > { %6629 = vmatpush3.bf16.msra.mxu0 %v7315_v42  ;;  %6644 = vmatprep.mubr.bf16.mxu0 %v896_v53  ;;  %v1099_v42 = vrot.slane %v1071_v18, %v7632_v19  ;;  %v920_v6 = vcombine.low %v7951_v2, %v7954_v21  ;;  %v6021_v18 = vpack.i.b16 %v7650_v26, %v7667_v31 }
  0x4b   : > { %6630 = vmatprep.subr.bf16.mxu0 %v7316_v52 }
  0x4c   : > { %v927_v53 = vrot.slane %v920_v6, %v7632_v19  ;;  %v1312_v6 = vcombine.low %v6021_v18, %v7691_v44 }
  0x4e   : > { %6631 = vmatpush3.bf16.msra.mxu0 %v7316_v52  ;;  %v1101_v52 = vcombine.low %v1092_v36, %v1099_v42  ;;  %v1118_v36 = vcombine.low %v7749_v4, %v7988_v33  ;;  %v7328_v42 = vld [vmem:[%s9445_s1 + $0xe8] sm:$0xff]  }
  0x4f   : > { %6632 = vmatprep.subr.bf16.mxu0 %v7317_v56 }
  0x52   : > { %6633 = vmatpush3.bf16.msra.mxu0 %v7317_v56  ;;  %v934_v56 = vrot.slane %v919_v46, %v7632_v19  ;;  %v1311_v46 = vcombine.low %v7641_v23, %v7644_v24  ;;  %v7329_v23 = vld [vmem:[%s9445_s1 + $0xf0] sm:$0xff]  }
  0x53   : > { %6634 = vmatprep.subr.bf16.mxu0 %v7318_v30 }
  0x54   : > { %v935_v63 = vcombine.low %v927_v53, %v934_v56  ;;  %v1043_v53 = vunpack.i.h.s16 %v7936_v8 }
  0x56   : > { %6635 = vmatpush3.bf16.msra.mxu0 %v7318_v30  ;;  %v7323_v30 = vld [vmem:[%s9445_s1 + $0xc0] sm:$0xff]  }
  0x57   : > { %6636 = vmatprep.subr.bf16.mxu0 %v7319_v3 }
  0x5a   : > { %6637 = vmatpush3.bf16.msra.mxu0 %v7319_v3  ;;  %v1115_v3 = vrot.slane %v1101_v52, %v7632_v19  ;;  %v1314_v52 = vcombine.low %v7659_v29, %v7997_v41 }
  0x5b   : > { %6638 = vmatprep.subr.bf16.mxu0 %v7320_v16 }
  0x5e   : > { %6639 = vmatpush3.bf16.msra.mxu0 %v7320_v16  ;;  %v1116_v16 = vcombine.low %v1108_v57, %v1115_v3  ;;  %v1321_v57 = vrot.slane %v1311_v46, %v7632_v19  ;;  %v1328_v3 = vrot.slane %v1312_v6, %v7632_v19  ;;  %v7331_v46 = vld [vmem:[%s9445_s1 + $0x100] sm:$0xff]  }
  0x5f   : > { %6640 = vmatprep.subr.bf16.mxu0 %v7321_v35 }
  0x62   : > { %6641 = vmatpush3.bf16.msra.mxu0 %v7321_v35  ;;  %v6011_v35 = vcombine.high %v7656_v28, %v7659_v29 }
  0x63   : > { %6642 = vmatprep.subr.bf16.mxu0 %v7322_v50 }
  0x64   : > { %v1125_v56 = vrot.slane %v6011_v35, %v7632_v19 }
  0x66   : > { %6643 = vmatpush3.bf16.msra.mxu0 %v7322_v50  ;;  %v1313_v50 = vcombine.low %v7696_v45, %v7656_v28 }
  0x67   : > { %6648 = vmatprep.subr.bf16.mxu0 %v7323_v30 }
  0x69   : > { %6645 = vmatmul.mubr.bf16.vlgmr.msra.gmra.mrb[0].mxu0 %v935_v63  ;;  %v1335_v63 = vrot.slane %v1313_v50, %v7632_v19 }
  0x6a   : > { %6649 = vmatpush3.bf16.msra.mxu0 %v7323_v30  ;;  %6664 = vmatprep.mubr.bf16.mxu0 %v1116_v16  ;;  %v8016_v30 = vrot.slane %v1118_v36, %v7632_v19  ;;  %v1139_v16 = vrot.slane %v1043_v53, %v7632_v19 }
  0x6b   : > { %6650 = vmatprep.subr.bf16.mxu0 %v7324_v43 }
  0x6c   : > { %v1154_v36 = vrot.slane %v1139_v16, %v7632_v19 }
  0x6e   : > { %6651 = vmatpush3.bf16.msra.mxu0 %v7324_v43  ;;  %v1342_v43 = vrot.slane %v1314_v52, %v7632_v19  ;;  %v7332_v52 = vld [vmem:[%s9445_s1 + $0x108] sm:$0xff]  }
  0x6f   : > { %6652 = vmatprep.subr.bf16.mxu0 %v7325_v5 }
  0x70   : > { %v1344_v18 = vcombine.low %v1335_v63, %v1342_v43  ;;  %v7334_v63 = vld [vmem:[%s9445_s1 + $0x118] sm:$0xff]  }
  0x72   : > { %6653 = vmatpush3.bf16.msra.mxu0 %v7325_v5  ;;  %v1140_v5 = vcombine.low %v1125_v56, %v8016_v30 }
  0x73   : > { %6654 = vmatprep.subr.bf16.mxu0 %v7326_v25 }
  0x74   : > { %v1147_v35 = vrot.slane %v1140_v5, %v7632_v19  ;;  %v7335_v5 = vld [vmem:[%s9445_s1 + $0x120] sm:$0xff]  }
  0x76   : > { %6655 = vmatpush3.bf16.msra.mxu0 %v7326_v25  ;;  %v7330_v25 = vld [vmem:[%s9445_s1 + $0xf8] sm:$0xff]   ;;  %v1155_v50 = vcombine.low %v1147_v35, %v1154_v36  ;;  %v1518_v35 = vcombine.low %v7673_v34, %v7822_v39  ;;  %v1519_v36 = vcombine.low %v7827_v17, %v7882_v15 }
  0x77   : > { %6656 = vmatprep.subr.bf16.mxu0 %v7327_v40 }
  0x7a   : > { %6657 = vmatpush3.bf16.msra.mxu0 %v7327_v40  ;;  %v1343_v40 = vcombine.low %v1321_v57, %v1328_v3  ;;  %v6020_v57 = vld.sshfl [vmem:[%s7619_s29 + $0x14] sm:$0x33 pattern:$0x75316420] }
  0x7b   : > { %6658 = vmatprep.subr.bf16.mxu0 %v7328_v42  ;;  %v1267_v3 = vcombine.high %v6020_v57, %v6020_v57  ;;  %v8050_v43 = vrot.slane %v6020_v57, %v7632_v19 }
  0x7c   : > { %v1351_v6 = vrot.slane %v1343_v40, %v7632_v19 }
  0x7d   : > { %v8053_v16 = vrot.slane %v1267_v3, %v7632_v19  ;;  %v1284_v60 = vunpack.i.h.s16 %v8050_v43 }
  0x7e   : > { %6659 = vmatpush3.bf16.msra.mxu0 %v7328_v42  ;;  %v1358_v42 = vrot.slane %v1344_v18, %v7632_v19  ;;  %v7336_v18 = vld [vmem:[%s9445_s1 + $0x128] sm:$0xff]  }
  0x7f   : > { %6660 = vmatprep.subr.bf16.mxu0 %v7329_v23  ;;  %v1360_v40 = vcombine.low %v8050_v43, %v8053_v16  ;;  %v9450_v12 = vunpack.i.h.s16 %v8053_v16 }
  0x80   : > { %v1359_v56 = vcombine.low %v1351_v6, %v1358_v42  ;;  %v1540_v42 = vrot.slane %v1518_v35, %v7632_v19 }
  0x81   : > { %v1367_v6 = vrot.slane %v1360_v40, %v7632_v19  ;;  %v7339_v40 = vld [vmem:[%s9445_s1 + $0x140] sm:$0xff]  }
  0x82   : > { %6661 = vmatpush3.bf16.msra.mxu0 %v7329_v23  ;;  %v7333_v23 = vld [vmem:[%s9445_s1 + $0x110] sm:$0xff]  }
  0x83   : > { %6662 = vmatprep.subr.bf16.mxu0 %v7330_v25  ;;  %v1375_v57 = vcombine.low %v7781_v20, %v1367_v6  ;;  %v1556_v20 = vrot.slane %v1548_v47, %v7632_v19  ;;  %v7341_v6 = vld [vmem:[%s9445_s1 + $0x150] sm:$0xff]   ;;  %v7342_v47 = vld [vmem:[%s9445_s1 + $0x158] sm:$0xff]  }
  0x86   : > { %6663 = vmatpush3.bf16.msra.mxu0 %v7330_v25  ;;  %v8060_v25 = vcombine.high %v8050_v43, %v8050_v43 }
  0x87   : > { %6668 = vmatprep.subr.bf16.mxu0 %v7331_v46 }
  0x89   : > { %6665 = vmatmul.mubr.bf16.vlgmr.msra.gmra.mrb[0].mxu0 %v1155_v50  ;;  %v1547_v50 = vrot.slane %v1519_v36, %v7632_v19  ;;  %v7340_v36 = vld [vmem:[%s9445_s1 + $0x148] sm:$0xff]  }
  0x8a   : > { %6669 = vmatpush3.bf16.msra.mxu0 %v7331_v46  ;;  %6684 = vmatprep.mubr.bf16.mxu0 %v1359_v56  ;;  %v1287_v46 = vunpack.i.l.s16 %v8060_v25 }
  0x8b   : > { %6670 = vmatprep.subr.bf16.mxu0 %v7332_v52  ;;  %v1549_v3 = vcombine.low %v1540_v42, %v1547_v50  ;;  %v8107_v42 = vpack.i.b16 %v8053_v16, %v1284_v60  ;;  %v8112_v50 = vpack.i.b16 %v8060_v25, %v9450_v12 }
  0x8c   : > { %v1374_v56 = vrot.slane %v1287_v46, %v7632_v19 }
  0x8e   : > { %6671 = vmatpush3.bf16.msra.mxu0 %v7332_v52  ;;  %v7337_v52 = vld [vmem:[%s9445_s1 + $0x130] sm:$0xff]  }
  0x8f   : > { %6672 = vmatprep.subr.bf16.mxu0 %v7333_v23 }
  0x92   : > { %6673 = vmatpush3.bf16.msra.mxu0 %v7333_v23  ;;  %v7338_v23 = vld [vmem:[%s9445_s1 + $0x138] sm:$0xff]  }
  0x93   : > { %6674 = vmatprep.subr.bf16.mxu0 %v7334_v63 }
  0x96   : > { %6675 = vmatpush3.bf16.msra.mxu0 %v7334_v63  ;;  %v1382_v63 = vrot.slane %v1375_v57, %v7632_v19  ;;  %v8121_v57 = vpack.i.b16 %v7719_v54, %v7913_v22 }
  0x97   : > { %6676 = vmatprep.subr.bf16.mxu0 %v7335_v5 }
  0x9a   : > { %6677 = vmatpush3.bf16.msra.mxu0 %v7335_v5  ;;  %v1389_v5 = vrot.slane %v1374_v56, %v7632_v19  ;;  %v6041_v56 = vpack.i.b16 %v7653_v27, %v7816_v13 }
  0x9b   : > { %6678 = vmatprep.subr.bf16.mxu0 %v7336_v18 }
  0x9c   : > { %v1390_v35 = vcombine.low %v1382_v63, %v1389_v5  ;;  %v1721_v63 = vcombine.low %v7644_v24, %v7667_v31  ;;  %v1722_v5 = vcombine.low %v6041_v56, %v7696_v45  ;;  %v7345_v24 = vld [vmem:[%s9445_s1 + $0x170] sm:$0xff]  }
  0x9e   : > { %6679 = vmatpush3.bf16.msra.mxu0 %v7336_v18  ;;  %v1563_v18 = vrot.slane %v1549_v3, %v7632_v19  ;;  %v7344_v3 = vld [vmem:[%s9445_s1 + $0x168] sm:$0xff]   ;;  %v1731_v31 = vrot.slane %v1721_v63, %v7632_v19 }
  0x9f   : > { %6680 = vmatprep.subr.bf16.mxu0 %v7337_v52 }
  0xa0   : > { %v1564_v46 = vcombine.low %v1556_v20, %v1563_v18  ;;  %v1724_v20 = vcombine.low %v7703_v48, %v8121_v57  ;;  %v8136_v18 = vunpack.i.h.s16 %v8060_v25 }
  0xa2   : > { %6681 = vmatpush3.bf16.msra.mxu0 %v7337_v52  ;;  %v7343_v52 = vld [vmem:[%s9445_s1 + $0x160] sm:$0xff]  }
  0xa3   : > { %6682 = vmatprep.subr.bf16.mxu0 %v7338_v23 }
  0xa6   : > { %6683 = vmatpush3.bf16.msra.mxu0 %v7338_v23  ;;  %v1565_v23 = vcombine.low %v8107_v42, %v8112_v50 }
  0xa7   : > { %6688 = vmatprep.subr.bf16.mxu0 %v7339_v40 }
  0xa9   : > { %6685 = vmatmul.mubr.bf16.vlgmr.msra.gmra.mrb[0].mxu0 %v1390_v35  ;;  %v8139_v35 = vrot.slane %v1565_v23, %v7632_v19 }
  0xaa   : > { %6689 = vmatpush3.bf16.msra.mxu0 %v7339_v40  ;;  %6704 = vmatprep.mubr.bf16.mxu0 %v1564_v46  ;;  %v1723_v40 = vcombine.low %v7925_v61, %v7659_v29 }
  0xab   : > { %6690 = vmatprep.subr.bf16.mxu0 %v7340_v36  ;;  %v1580_v56 = vcombine.low %v7954_v21, %v8139_v35 }
  0xac   : > { %v1745_v46 = vrot.slane %v1723_v40, %v7632_v19 }
  0xae   : > { %6691 = vmatpush3.bf16.msra.mxu0 %v7340_v36  ;;  %v1738_v36 = vrot.slane %v1722_v5, %v7632_v19  ;;  %v1587_v5 = vrot.slane %v1580_v56, %v7632_v19 }
  0xaf   : > { %6692 = vmatprep.subr.bf16.mxu0 %v7341_v6 }
  0xb0   : > { %v1753_v23 = vcombine.low %v1731_v31, %v1738_v36  ;;  %v7348_v31 = vld [vmem:[%s9445_s1 + $0x188] sm:$0xff]  }
  0xb2   : > { %6693 = vmatpush3.bf16.msra.mxu0 %v7341_v6  ;;  %v1752_v6 = vrot.slane %v1724_v20, %v7632_v19  ;;  %v7347_v20 = vld [vmem:[%s9445_s1 + $0x180] sm:$0xff]   ;;  %v1761_v12 = vrot.slane %v1753_v23, %v7632_v19  ;;  %v1770_v23 = vcombine.low %v8053_v16, %v8060_v25 }
  0xb3   : > { %6694 = vmatprep.subr.bf16.mxu0 %v7342_v47 }
  0xb4   : > { %v1754_v63 = vcombine.low %v1745_v46, %v1752_v6  ;;  %v1040_v46 = vunpack.i.h.s16 %v7816_v13  ;;  %v1042_v6 = vunpack.i.h.s16 %v7913_v22  ;;  %v7351_v13 = vld [vmem:[%s9445_s1 + $0x1a0] sm:$0xff]  }
  0xb6   : > { %6695 = vmatpush3.bf16.msra.mxu0 %v7342_v47  ;;  %v1579_v47 = vrot.slane %v8136_v18, %v7632_v19  ;;  %v1768_v21 = vrot.slane %v1754_v63, %v7632_v19  ;;  %v8177_v56 = vpack.i.b16 %v375_v62, %v1042_v6  ;;  %v1929_v62 = vcombine.low %v7808_v10, %v7827_v17 }
  0xb7   : > { %6696 = vmatprep.subr.bf16.mxu0 %v7343_v52 }
  0xb8   : > { %v1594_v40 = vrot.slane %v1579_v47, %v7632_v19  ;;  %v1769_v36 = vcombine.low %v1761_v12, %v1768_v21  ;;  %v7350_v47 = vld [vmem:[%s9445_s1 + $0x198] sm:$0xff]   ;;  %v1921_v12 = vpack.i.b16 %v365_v37, %v1040_v46  ;;  %v1927_v37 = vcombine.low %v7765_v11, %v7838_v38 }
  0xb9   : > { %v8200_v21 = vrot.slane %v1770_v23, %v7632_v19  ;;  %v1951_v10 = vrot.slane %v1929_v62, %v7632_v19 }
  0xba   : > { %6697 = vmatpush3.bf16.msra.mxu0 %v7343_v52  ;;  %v7346_v52 = vld [vmem:[%s9445_s1 + $0x178] sm:$0xff]   ;;  %v1928_v63 = vcombine.low %v1921_v12, %v7673_v34  ;;  %v1937_v11 = vrot.slane %v1927_v37, %v7632_v19 }
  0xbb   : > { %6698 = vmatprep.subr.bf16.mxu0 %v7344_v3 }
  0xbc   : > { %v1944_v38 = vrot.slane %v1928_v63, %v7632_v19 }
  0xbe   : > { %6699 = vmatpush3.bf16.msra.mxu0 %v7344_v3  ;;  %v1595_v3 = vcombine.low %v1587_v5, %v1594_v40  ;;  %v1930_v5 = vcombine.low %v7920_v58, %v8177_v56  ;;  %v7352_v40 = vld [vmem:[%s9445_s1 + $0x1a8] sm:$0xff]   ;;  %v1959_v46 = vcombine.low %v1937_v11, %v1944_v38  ;;  %v6062_v38 = vpack.i.b16 %v8050_v43, %v7731_v59 }
  0xbf   : > { %6700 = vmatprep.subr.bf16.mxu0 %v7345_v24 }
  0xc0   : > { %v1967_v23 = vrot.slane %v1959_v46, %v7632_v19  ;;  %v2169_v46 = vcombine.low %v7827_v17, %v7714_v51 }
  0xc2   : > { %6701 = vmatpush3.bf16.msra.mxu0 %v7345_v24  ;;  %v7349_v24 = vld [vmem:[%s9445_s1 + $0x190] sm:$0xff]  }
  0xc3   : > { %6702 = vmatprep.subr.bf16.mxu0 %v7346_v52 }
  0xc6   : > { %6703 = vmatpush3.bf16.msra.mxu0 %v7346_v52  ;;  %v8184_v52 = vcombine.high %v8053_v16, %v8053_v16 }
  0xc7   : > { %6708 = vmatprep.subr.bf16.mxu0 %v7347_v20 }
  0xc8   : > { %v8233_v11 = vpack.i.b16 %v8184_v52, %v8136_v18 }
  0xc9   : > { %6705 = vmatmul.mubr.bf16.vlgmr.msra.gmra.mrb[0].mxu0 %v1595_v3  ;;  %v1958_v3 = vrot.slane %v1930_v5, %v7632_v19  ;;  %v7356_v5 = vld [vmem:[%s9445_s1 + $0x1c8] sm:$0xff]  }
  0xca   : > { %6709 = vmatpush3.bf16.msra.mxu0 %v7347_v20  ;;  %6724 = vmatprep.mubr.bf16.mxu0 %v1769_v36  ;;  %v1700_v20 = vunpack.i.l.s16 %v8184_v52 }
  0xcb   : > { %6710 = vmatprep.subr.bf16.mxu0 %v7348_v31  ;;  %v1960_v6 = vcombine.low %v1951_v10, %v1958_v3  ;;  %v7359_v10 = vld [vmem:[%s9445_s1 + $0x1e0] sm:$0xff]   ;;  %v6052_v3 = vcombine.high %v7714_v51, %v7719_v54  ;;  %v2191_v51 = vrot.slane %v2169_v46, %v7632_v19  ;;  %v7364_v46 = vld [vmem:[%s9445_s1 + $0x208] sm:$0xff]  }
  0xcc   : > { %v1784_v36 = vrot.slane %v1700_v20, %v7632_v19  ;;  %v7358_v20 = vld [vmem:[%s9445_s1 + $0x1d8] sm:$0xff]  }
  0xcd   : > { %v1974_v37 = vrot.slane %v1960_v6, %v7632_v19  ;;  %v2170_v6 = vcombine.low %v7719_v54, %v6062_v38 }
  0xce   : > { %6711 = vmatpush3.bf16.msra.mxu0 %v7348_v31  ;;  %v7353_v31 = vld [vmem:[%s9445_s1 + $0x1b0] sm:$0xff]  }
  0xcf   : > { %6712 = vmatprep.subr.bf16.mxu0 %v7349_v24  ;;  %v1975_v62 = vcombine.low %v1967_v23, %v1974_v37  ;;  %v7361_v37 = vld [vmem:[%s9445_s1 + $0x1f0] sm:$0xff]  }
  0xd2   : > { %6713 = vmatpush3.bf16.msra.mxu0 %v7349_v24  ;;  %v1785_v24 = vcombine.low %v8016_v30, %v8200_v21  ;;  %v7355_v30 = vld [vmem:[%s9445_s1 + $0x1c0] sm:$0xff]  }
  0xd3   : > { %6714 = vmatprep.subr.bf16.mxu0 %v7350_v47 }
  0xd4   : > { %v1792_v12 = vrot.slane %v1785_v24, %v7632_v19  ;;  %v2168_v24 = vcombine.low %v7772_v14, %v7822_v39  ;;  %v2198_v39 = vrot.slane %v2170_v6, %v7632_v19  ;;  %v6061_v6 = vld.sshfl [vmem:[%s7619_s29 + $0x18] sm:$0x33 pattern:$0x75316420] }
  0xd6   : > { %6715 = vmatpush3.bf16.msra.mxu0 %v7350_v47  ;;  %v7354_v47 = vld [vmem:[%s9445_s1 + $0x1b8] sm:$0xff]   ;;  %v2184_v14 = vrot.slane %v2168_v24, %v7632_v19 }
  0xd7   : > { %6716 = vmatprep.subr.bf16.mxu0 %v7351_v13 }
  0xda   : > { %6717 = vmatpush3.bf16.msra.mxu0 %v7351_v13  ;;  %v1799_v13 = vrot.slane %v1784_v36, %v7632_v19  ;;  %v2167_v36 = vcombine.low %v7650_v26, %v7653_v27 }
  0xdb   : > { %6718 = vmatprep.subr.bf16.mxu0 %v7352_v40 }
  0xdc   : > { %v1800_v63 = vcombine.low %v1792_v12, %v1799_v13  ;;  %v1904_v12 = vunpack.i.h.s16 %v8184_v52  ;;  %v1984_v13 = vrot.slane %v6052_v3, %v7632_v19  ;;  %v2177_v26 = vrot.slane %v2167_v36, %v7632_v19 }
  0xde   : > { %6719 = vmatpush3.bf16.msra.mxu0 %v7352_v40  ;;  %v7357_v40 = vld [vmem:[%s9445_s1 + $0x1d0] sm:$0xff]  }
  0xdf   : > { %6720 = vmatprep.subr.bf16.mxu0 %v7353_v31 }
  0xe2   : > { %6721 = vmatpush3.bf16.msra.mxu0 %v7353_v31  ;;  %v1977_v31 = vcombine.low %v8112_v50, %v8233_v11 }
  0xe3   : > { %6722 = vmatprep.subr.bf16.mxu0 %v7354_v47 }
  0xe4   : > { %v8257_v23 = vrot.slane %v1977_v31, %v7632_v19  ;;  %v7363_v31 = vld [vmem:[%s9445_s1 + $0x200] sm:$0xff]  }
  0xe6   : > { %6723 = vmatpush3.bf16.msra.mxu0 %v7354_v47  ;;  %v7360_v47 = vld [vmem:[%s9445_s1 + $0x1e8] sm:$0xff]  }
  0xe7   : > { %6728 = vmatprep.subr.bf16.mxu0 %v7355_v30 }
  0xe9   : > { %6725 = vmatmul.mubr.bf16.vlgmr.msra.gmra.mrb[0].mxu0 %v1800_v63  ;;  %v1999_v63 = vcombine.low %v1984_v13, %v8257_v23  ;;  %v2126_v13 = vcombine.high %v6061_v6, %v6061_v6 }
  0xea   : > { %6729 = vmatpush3.bf16.msra.mxu0 %v7355_v30  ;;  %6744 = vmatprep.mubr.bf16.mxu0 %v1975_v62  ;;  %v1998_v30 = vrot.slane %v1904_v12, %v7632_v19  ;;  %v2199_v62 = vcombine.low %v2177_v26, %v2184_v14  ;;  %v7366_v26 = vld [vmem:[%s9445_s1 + $0x218] sm:$0xff]   ;;  %v8291_v14 = vrot.slane %v6061_v6, %v7632_v19 }
  0xeb   : > { %6730 = vmatprep.subr.bf16.mxu0 %v7356_v5 }
  0xec   : > { %v2013_v38 = vrot.slane %v1998_v30, %v7632_v19  ;;  %v8304_v30 = vcombine.high %v8291_v14, %v8291_v14 }
  0xee   : > { %6731 = vmatpush3.bf16.msra.mxu0 %v7356_v5  ;;  %v2200_v5 = vcombine.low %v2191_v51, %v2198_v39  ;;  %v8294_v51 = vrot.slane %v2126_v13, %v7632_v19  ;;  %v2367_v39 = vpack.i.b16 %v1284_v60, %v7738_v0  ;;  %v2373_v0 = vcombine.low %v7703_v48, %v7743_v1 }
  0xef   : > { %6732 = vmatprep.subr.bf16.mxu0 %v7357_v40 }
  0xf0   : > { %v2214_v3 = vrot.slane %v2200_v5, %v7632_v19  ;;  %v2372_v5 = vcombine.low %v7709_v49, %v7659_v29  ;;  %v2374_v60 = vcombine.low %v7749_v4, %v2367_v39  ;;  %v2395_v49 = vrot.slane %v2373_v0, %v7632_v19  ;;  %v7373_v0 = vld [vmem:[%s9445_s1 + $0x250] sm:$0xff]  }
  0xf2   : > { %6733 = vmatpush3.bf16.msra.mxu0 %v7357_v40  ;;  %v7362_v40 = vld [vmem:[%s9445_s1 + $0x1f8] sm:$0xff]  }
  0xf3   : > { %6734 = vmatprep.subr.bf16.mxu0 %v7358_v20 }
  0xf6   : > { %6735 = vmatpush3.bf16.msra.mxu0 %v7358_v20  ;;  %v2006_v20 = vrot.slane %v1999_v63, %v7632_v19  ;;  %v2216_v63 = vcombine.low %v8291_v14, %v8294_v51 }
  0xf7   : > { %6736 = vmatprep.subr.bf16.mxu0 %v7359_v10 }
  0xf8   : > { %v2014_v36 = vcombine.low %v2006_v20, %v2013_v38  ;;  %v2146_v20 = vunpack.i.l.s16 %v8304_v30  ;;  %v2223_v38 = vrot.slane %v2216_v63, %v7632_v19 }
  0xfa   : > { %6737 = vmatpush3.bf16.msra.mxu0 %v7359_v10  ;;  %v2207_v10 = vrot.slane %v2199_v62, %v7632_v19  ;;  %v2371_v62 = vcombine.low %v7691_v44, %v7696_v45 }
  0xfb   : > { %6738 = vmatprep.subr.bf16.mxu0 %v7360_v47 }
  0xfc   : > { %v2215_v24 = vcombine.low %v2207_v10, %v2214_v3  ;;  %v2381_v44 = vrot.slane %v2371_v62, %v7632_v19  ;;  %v2388_v10 = vrot.slane %v2372_v5, %v7632_v19  ;;  %v2402_v3 = vrot.slane %v2374_v60, %v7632_v19  ;;  %v7372_v5 = vld [vmem:[%s9445_s1 + $0x248] sm:$0xff]  }
  0xfd   : > { %v2143_v60 = vunpack.i.h.s16 %v8291_v14 }
  0xfe   : > { %6739 = vmatpush3.bf16.msra.mxu0 %v7360_v47  ;;  %v7365_v47 = vld [vmem:[%s9445_s1 + $0x210] sm:$0xff]   ;;  %v2404_v6 = vcombine.low %v2395_v49, %v2402_v3  ;;  %v7375_v49 = vld [vmem:[%s9445_s1 + $0x260] sm:$0xff]  }
  0xff   : > { %6740 = vmatprep.subr.bf16.mxu0 %v7361_v37 }
 0x102   : > { %6741 = vmatpush3.bf16.msra.mxu0 %v7361_v37  ;;  %v7367_v37 = vld [vmem:[%s9445_s1 + $0x220] sm:$0xff]  }
 0x103   : > { %6742 = vmatprep.subr.bf16.mxu0 %v7362_v40 }
 0x106   : > { %6743 = vmatpush3.bf16.msra.mxu0 %v7362_v40  ;;  %v7368_v40 = vld [vmem:[%s9445_s1 + $0x228] sm:$0xff]  }
 0x107   : > { %6748 = vmatprep.subr.bf16.mxu0 %v7363_v31 }
 0x109   : > { %6745 = vmatmul.mubr.bf16.vlgmr.msra.gmra.mrb[0].mxu0 %v2014_v36  ;;  %v2230_v36 = vrot.slane %v2146_v20, %v7632_v19  ;;  %v7374_v20 = vld [vmem:[%s9445_s1 + $0x258] sm:$0xff]  }
 0x10a   : > { %6749 = vmatpush3.bf16.msra.mxu0 %v7363_v31  ;;  %6764 = vmatprep.mubr.bf16.mxu0 %v2215_v24  ;;  %v7369_v31 = vld [vmem:[%s9445_s1 + $0x230] sm:$0xff]   ;;  %v2231_v24 = vcombine.low %v8139_v35, %v2223_v38  ;;  %v7371_v35 = vld [vmem:[%s9445_s1 + $0x240] sm:$0xff]   ;;  %v6071_v38 = vpack.i.b16 %v8294_v51, %v2143_v60 }
 0x10b   : > { %6750 = vmatprep.subr.bf16.mxu0 %v7364_v46 }
 0x10c   : > { %v2238_v13 = vrot.slane %v2231_v24, %v7632_v19  ;;  %v2577_v24 = vcombine.low %v7920_v58, %v7719_v54  ;;  %v7377_v58 = vld [vmem:[%s9445_s1 + $0x270] sm:$0xff]  }
 0x10e   : > { %6751 = vmatpush3.bf16.msra.mxu0 %v7364_v46  ;;  %v2403_v46 = vcombine.low %v2381_v44, %v2388_v10  ;;  %v6081_v10 = vpack.i.b16 %v8053_v16, %v7936_v8 }
 0x10f   : > { %6752 = vmatprep.subr.bf16.mxu0 %v7365_v47 }
 0x110   : > { %v2411_v39 = vrot.slane %v2403_v46, %v7632_v19  ;;  %v2578_v46 = vcombine.low %v7731_v59, %v6081_v10 }
 0x112   : > { %6753 = vmatpush3.bf16.msra.mxu0 %v7365_v47  ;;  %v7370_v47 = vld [vmem:[%s9445_s1 + $0x238] sm:$0xff]  }
 0x113   : > { %6754 = vmatprep.subr.bf16.mxu0 %v7366_v26 }
 0x116   : > { %6755 = vmatpush3.bf16.msra.mxu0 %v7366_v26  ;;  %v2245_v26 = vrot.slane %v2230_v36, %v7632_v19  ;;  %v2576_v36 = vcombine.low %v7842_v32, %v7827_v17  ;;  %v2599_v17 = vrot.slane %v2577_v24, %v7632_v19  ;;  %v2606_v32 = vrot.slane %v2578_v46, %v7632_v19  ;;  %v7383_v46 = vld [vmem:[%s9445_s1 + $0x2a0] sm:$0xff]  }
 0x117   : > { %6756 = vmatprep.subr.bf16.mxu0 %v7367_v37 }
 0x118   : > { %v2246_v63 = vcombine.low %v2238_v13, %v2245_v26 }
 0x11a   : > { %6757 = vmatpush3.bf16.msra.mxu0 %v7367_v37  ;;  %v2418_v37 = vrot.slane %v2404_v6, %v7632_v19  ;;  %v7376_v6 = vld [vmem:[%s9445_s1 + $0x268] sm:$0xff]  }
 0x11b   : > { %6758 = vmatprep.subr.bf16.mxu0 %v7368_v40 }
 0x11c   : > { %v2419_v62 = vcombine.low %v2411_v39, %v2418_v37 }
 0x11e   : > { %6759 = vmatpush3.bf16.msra.mxu0 %v7368_v40  ;;  %v2145_v40 = vunpack.i.h.s16 %v8294_v51 }
 0x11f   : > { %6760 = vmatprep.subr.bf16.mxu0 %v7369_v31 }
 0x120   : > { %v8356_v44 = vpack.i.b16 %v8304_v30, %v2145_v40 }
 0x122   : > { %6761 = vmatpush3.bf16.msra.mxu0 %v7369_v31  ;;  %v2420_v3 = vcombine.low %v6071_v38, %v8356_v44  ;;  %v2575_v31 = vcombine.low %v7653_v27, %v7673_v34  ;;  %v2592_v34 = vrot.slane %v2576_v36, %v7632_v19  ;;  %v9451_v36 = vunpack.i.h.s16 %v8053_v16 }
 0x123   : > { %6762 = vmatprep.subr.bf16.mxu0 %v7370_v47 }
 0x124   : > { %v8376_v13 = vrot.slane %v2420_v3, %v7632_v19  ;;  %v2585_v27 = vrot.slane %v2575_v31, %v7632_v19  ;;  %v7381_v3 = vld [vmem:[%s9445_s1 + $0x290] sm:$0xff]   ;;  %v7382_v31 = vld [vmem:[%s9445_s1 + $0x298] sm:$0xff]   ;;  %v2775_v24 = vpack.i.b16 %v9451_v36, %v1043_v53  ;;  %v2781_v53 = vcombine.low %v7913_v22, %v7749_v4 }
 0x125   : > { %v7390_v36 = vld [vmem:[%s9445_s1 + $0x2d8] sm:$0xff]  }
 0x126   : > { %6763 = vmatpush3.bf16.msra.mxu0 %v7370_v47  ;;  %v2350_v47 = vunpack.i.h.s16 %v8304_v30  ;;  %v2435_v39 = vcombine.low %v8200_v21, %v8376_v13  ;;  %v2607_v37 = vcombine.low %v2585_v27, %v2592_v34  ;;  %v7379_v21 = vld [vmem:[%s9445_s1 + $0x280] sm:$0xff]   ;;  %v2624_v27 = vcombine.low %v8294_v51, %v8304_v30 }
 0x127   : > { %6768 = vmatprep.subr.bf16.mxu0 %v7371_v35  ;;  %v2779_v34 = vcombine.low %v7696_v45, %v7925_v61  ;;  %v2803_v61 = vrot.slane %v2781_v53, %v7632_v19 }
 0x128   : > { %v2434_v26 = vrot.slane %v2350_v47, %v7632_v19 }
 0x129   : > { %6765 = vmatmul.mubr.bf16.vlgmr.msra.gmra.mrb[0].mxu0 %v2246_v63  ;;  %v7378_v63 = vld [vmem:[%s9445_s1 + $0x278] sm:$0xff]   ;;  %v2789_v45 = vrot.slane %v2779_v34, %v7632_v19  ;;  %v7391_v34 = vld [vmem:[%s9445_s1 + $0x2e0] sm:$0xff]  }
 0x12a   : > { %6769 = vmatpush3.bf16.msra.mxu0 %v7371_v35  ;;  %6784 = vmatprep.mubr.bf16.mxu0 %v2419_v62  ;;  %v2608_v35 = vcombine.low %v2599_v17, %v2606_v32  ;;  %v2442_v62 = vrot.slane %v2435_v39, %v7632_v19  ;;  %v2780_v17 = vcombine.low %v7932_v7, %v7703_v48  ;;  %v7385_v7 = vld [vmem:[%s9445_s1 + $0x2b0] sm:$0xff]  }
 0x12b   : > { %6770 = vmatprep.subr.bf16.mxu0 %v7372_v5  ;;  %v2782_v32 = vcombine.low %v7988_v33, %v2775_v24  ;;  %v8434_v39 = vrot.slane %v2624_v27, %v7632_v19  ;;  %v6101_v27 = vpack.i.b16 %v8291_v14, %v8060_v25 }
 0x12c   : > { %v2796_v48 = vrot.slane %v2780_v17, %v7632_v19 }
 0x12d   : > { %v2810_v22 = vrot.slane %v2782_v32, %v7632_v19  ;;  %v6091_v32 = vcombine.high %v8050_v43, %v8053_v16 }
 0x12e   : > { %6771 = vmatpush3.bf16.msra.mxu0 %v7372_v5  ;;  %v2449_v5 = vrot.slane %v2434_v26, %v7632_v19 }
 0x12f   : > { %6772 = vmatprep.subr.bf16.mxu0 %v7373_v0 }
 0x130   : > { %v2450_v38 = vcombine.low %v2442_v62, %v2449_v5  ;;  %v2812_v62 = vcombine.low %v2803_v61, %v2810_v22  ;;  %v7386_v5 = vld [vmem:[%s9445_s1 + $0x2b8] sm:$0xff]  }
 0x132   : > { %6773 = vmatpush3.bf16.msra.mxu0 %v7373_v0  ;;  %v2615_v0 = vrot.slane %v2607_v37, %v7632_v19 }
 0x133   : > { %6774 = vmatprep.subr.bf16.mxu0 %v7374_v20 }
 0x136   : > { %6775 = vmatpush3.bf16.msra.mxu0 %v7374_v20  ;;  %v2622_v20 = vrot.slane %v2608_v35, %v7632_v19  ;;  %v2639_v35 = vcombine.low %v8257_v23, %v8434_v39  ;;  %v7387_v23 = vld [vmem:[%s9445_s1 + $0x2c0] sm:$0xff]  }
 0x137   : > { %6776 = vmatprep.subr.bf16.mxu0 %v7375_v49 }
 0x138   : > { %v2623_v10 = vcombine.low %v2615_v0, %v2622_v20  ;;  %v2646_v0 = vrot.slane %v2639_v35, %v7632_v19 }
 0x13a   : > { %6777 = vmatpush3.bf16.msra.mxu0 %v7375_v49  ;;  %v7380_v49 = vld [vmem:[%s9445_s1 + $0x288] sm:$0xff]  }
 0x13b   : > { %6778 = vmatprep.subr.bf16.mxu0 %v7376_v6 }
 0x13e   : > { %6779 = vmatpush3.bf16.msra.mxu0 %v7376_v6  ;;  %v8418_v6 = vcombine.high %v8294_v51, %v8294_v51 }
 0x13f   : > { %6780 = vmatprep.subr.bf16.mxu0 %v7377_v58 }
 0x140   : > { %v2555_v26 = vunpack.i.l.s16 %v8418_v6  ;;  %v6090_v24 = vpack.i.b16 %v8418_v6, %v2350_v47  ;;  %v3019_v47 = vcombine.low %v7656_v28, %v7659_v29  ;;  %v2836_v28 = vrot.slane %v6091_v32, %v7632_v19 }
 0x142   : > { %6781 = vmatpush3.bf16.msra.mxu0 %v7377_v58  ;;  %v7384_v58 = vld [vmem:[%s9445_s1 + $0x2a8] sm:$0xff]   ;;  %v2638_v37 = vrot.slane %v2555_v26, %v7632_v19  ;;  %v2829_v30 = vcombine.low %v8356_v44, %v6090_v24  ;;  %v3021_v26 = vcombine.low %v7749_v4, %v8050_v43 }
 0x143   : > { %6782 = vmatprep.subr.bf16.mxu0 %v7378_v63 }
 0x144   : > { %v2653_v20 = vrot.slane %v2638_v37, %v7632_v19  ;;  %v8499_v29 = vrot.slane %v2829_v30, %v7632_v19  ;;  %v3043_v35 = vrot.slane %v3021_v26, %v7632_v19 }
 0x146   : > { %6783 = vmatpush3.bf16.msra.mxu0 %v7378_v63  ;;  %v2811_v63 = vcombine.low %v2789_v45, %v2796_v48  ;;  %v3022_v45 = vcombine.low %v8053_v16, %v6101_v27  ;;  %v7392_v48 = vld [vmem:[%s9445_s1 + $0x2e8] sm:$0xff]  }
 0x147   : > { %6788 = vmatprep.subr.bf16.mxu0 %v7379_v21 }
 0x149   : > { %6785 = vmatmul.mubr.bf16.vlgmr.msra.gmra.mrb[0].mxu0 %v2450_v38  ;;  %v2826_v38 = vrot.slane %v2812_v62, %v7632_v19 }
 0x14a   : > { %6789 = vmatpush3.bf16.msra.mxu0 %v7379_v21  ;;  %6804 = vmatprep.mubr.bf16.mxu0 %v2623_v10  ;;  %v2819_v21 = vrot.slane %v2811_v63, %v7632_v19  ;;  %v2654_v10 = vcombine.low %v2646_v0, %v2653_v20  ;;  %v3050_v63 = vrot.slane %v3022_v45, %v7632_v19 }
 0x14b   : > { %6790 = vmatprep.subr.bf16.mxu0 %v7380_v49 }
 0x14e   : > { %6791 = vmatpush3.bf16.msra.mxu0 %v7380_v49  ;;  %v2827_v49 = vcombine.low %v2819_v21, %v2826_v38  ;;  %v3052_v38 = vcombine.low %v3043_v35, %v3050_v63  ;;  %v7398_v35 = vld [vmem:[%s9445_s1 + $0x318] sm:$0xff]   ;;  %v3219_v63 = vpack.i.b16 %v2143_v60, %v8136_v18  ;;  %v7400_v18 = vld [vmem:[%s9445_s1 + $0x328] sm:$0xff]  }
 0x14f   : > { %6792 = vmatprep.subr.bf16.mxu0 %v7381_v3 }
 0x152   : > { %6793 = vmatpush3.bf16.msra.mxu0 %v7381_v3  ;;  %v7388_v3 = vld [vmem:[%s9445_s1 + $0x2c8] sm:$0xff]  }
 0x153   : > { %6794 = vmatprep.subr.bf16.mxu0 %v7382_v31 }
 0x156   : > { %6795 = vmatpush3.bf16.msra.mxu0 %v7382_v31  ;;  %v7389_v31 = vld [vmem:[%s9445_s1 + $0x2d0] sm:$0xff]  }
 0x157   : > { %6796 = vmatprep.subr.bf16.mxu0 %v7383_v46 }
 0x15a   : > { %6797 = vmatpush3.bf16.msra.mxu0 %v7383_v46  ;;  %v6100_v46 = vld.sshfl [vmem:[%s7619_s29 + $0x1c] sm:$0x33 pattern:$0x75316420] }
 0x15b   : > { %6798 = vmatprep.subr.bf16.mxu0 %v7384_v58  ;;  %v2978_v17 = vcombine.high %v6100_v46, %v6100_v46  ;;  %v8475_v53 = vrot.slane %v6100_v46, %v7632_v19 }
 0x15d   : > { %v8491_v61 = vrot.slane %v2978_v17, %v7632_v19  ;;  %v8495_v44 = vcombine.high %v8475_v53, %v8475_v53  ;;  %v7395_v17 = vld [vmem:[%s9445_s1 + $0x300] sm:$0xff]  }
 0x15e   : > { %6799 = vmatpush3.bf16.msra.mxu0 %v7384_v58  ;;  %v3020_v58 = vcombine.low %v7997_v41, %v7743_v1  ;;  %v2758_v1 = vunpack.i.h.s16 %v8418_v6  ;;  %v7393_v6 = vld [vmem:[%s9445_s1 + $0x2f0] sm:$0xff]  }
 0x15f   : > { %6800 = vmatprep.subr.bf16.mxu0 %v7385_v7  ;;  %v2997_v41 = vunpack.i.h.s16 %v8491_v61  ;;  %v3202_v43 = vunpack.i.h.s16 %v8495_v44  ;;  %v8506_v22 = vcombine.high %v8491_v61, %v8491_v61 }
 0x160   : > { %v3036_v37 = vrot.slane %v3020_v58, %v7632_v19  ;;  %v2850_v0 = vrot.slane %v2758_v1, %v7632_v19  ;;  %v7427_v1 = vld [vmem:[%s9447_s3 + $0x40] sm:$0xff]  }
 0x161   : > { %v6129_v62 = vpack.i.b16 %v8506_v22, %v3202_v43  ;;  %v8521_v20 = vpack.i.b16 %v8495_v44, %v2997_v41  ;;  %v7397_v41 = vld [vmem:[%s9445_s1 + $0x310] sm:$0xff]  }
 0x162   : > { %6801 = vmatpush3.bf16.msra.mxu0 %v7385_v7  ;;  %v3029_v7 = vrot.slane %v3019_v47, %v7632_v19 }
 0x163   : > { %6802 = vmatprep.subr.bf16.mxu0 %v7386_v5 }
 0x164   : > { %v3051_v21 = vcombine.low %v3029_v7, %v3036_v37  ;;  %v7564_v7 = vmov 0.0   ;;  %v7428_v37 = vld [vmem:[%s9447_s3 + $0x48] sm:$0xff]  }
 0x165   : > { %6908 = vmatprep.subr.bf16.mxu1 %v7564_v7  ;;  %6924 = vmatprep.mubr.msk.bf16.mxu1 %vm7565_vm0, %v7564_v7 }
 0x166   : > { %6803 = vmatpush3.bf16.msra.mxu0 %v7386_v5  ;;  %v2851_v5 = vcombine.low %v2836_v28, %v8499_v29  ;;  %v3059_v27 = vrot.slane %v3051_v21, %v7632_v19  ;;  %6909 = vmatpush3.bf16.msra.mxu1 %v7427_v1  ;;  %v3225_v21 = vcombine.low %v8112_v50, %v3219_v63 }
 0x167   : > { %6808 = vmatprep.subr.bf16.mxu0 %v7387_v23  ;;  %6910 = vmatprep.subr.bf16.mxu1 %v7564_v7  ;;  %v3420_v1 = vcombine.low %v7988_v33, %v8053_v16  ;;  %v3278_v33 = vrot.slane %v3202_v43, %v7632_v19 }
 0x169   : > { %6805 = vmatmul.mubr.bf16.vlgmr.msra.gmra.mrb[0].mxu0 %v2654_v10  ;;  %v6130_v10 = vcombine.high %v8291_v14, %v8294_v51  ;;  %v2998_v14 = vunpack.i.l.s16 %v8495_v44 }
 0x16a   : > { %6809 = vmatpush3.bf16.msra.mxu0 %v7387_v23  ;;  %6824 = vmatprep.mubr.bf16.mxu0 %v2827_v49  ;;  %v7394_v23 = vld [vmem:[%s9445_s1 + $0x2f8] sm:$0xff]   ;;  %v3657_v49 = vcombine.low %v8521_v20, %v6129_v62  ;;  %v3068_v62 = vcombine.low %v8475_v53, %v8491_v61 }
 0x16b   : > { %6810 = vmatprep.subr.bf16.mxu0 %v7388_v3  ;;  %v3664_v24 = vrot.slane %v6130_v10, %v7632_v19  ;;  %6911 = vmatpush3.bf16.msra.mxu1 %v7428_v37  ;;  %v7408_v37 = vld [vmem:[%s9445_s1 + $0x368] sm:$0xff]  }
 0x16c   : > { %v3671_v46 = vrot.slane %v3657_v49, %v7632_v19  ;;  %6912 = vmatprep.subr.bf16.mxu1 %v7564_v7  ;;  %v3075_v60 = vrot.slane %v3068_v62, %v7632_v19  ;;  %v7410_v62 = vld [vmem:[%s9445_s1 + $0x378] sm:$0xff]  }
 0x16e   : > { %6811 = vmatpush3.bf16.msra.mxu0 %v7388_v3  ;;  %v2858_v3 = vrot.slane %v2851_v5, %v7632_v19  ;;  %v3679_v30 = vcombine.low %v3664_v24, %v3671_v46  ;;  %v3223_v5 = vcombine.low %v7882_v15, %v7719_v54  ;;  %v3246_v54 = vrot.slane %v3225_v21, %v7632_v19  ;;  %v7401_v15 = vld [vmem:[%s9445_s1 + $0x330] sm:$0xff]  }
 0x16f   : > { %6812 = vmatprep.subr.bf16.mxu0 %v7389_v31  ;;  %v3083_v10 = vcombine.low %v8376_v13, %v3075_v60  ;;  %v7413_v60 = vld [vmem:[%s9445_s1 + $0x390] sm:$0xff]  }
 0x170   : > { %v3686_v58 = vrot.slane %v3679_v30, %v7632_v19  ;;  %v2995_v30 = vunpack.i.h.s16 %v8475_v53  ;;  %v3419_v53 = vcombine.low %v8121_v57, %v7749_v4  ;;  %v7409_v4 = vld [vmem:[%s9445_s1 + $0x370] sm:$0xff]  }
 0x172   : > { %6813 = vmatpush3.bf16.msra.mxu0 %v7389_v31  ;;  %v2865_v31 = vrot.slane %v2850_v0, %v7632_v19  ;;  %v3224_v0 = vcombine.low %v7731_v59, %v8107_v42  ;;  %v3082_v42 = vrot.slane %v2998_v14, %v7632_v19  ;;  %v3428_v63 = vrot.slane %v3419_v53, %v7632_v19  ;;  %v7412_v14 = vld [vmem:[%s9445_s1 + $0x388] sm:$0xff]   ;;  %v6139_v53 = vld [vmem:[%s9446_s2] ss:$0 sm:$0xff] }
 0x173   : > { %6814 = vmatprep.subr.bf16.mxu0 %v7390_v36 }
 0x174   : > { %v2866_v47 = vcombine.low %v2858_v3, %v2865_v31  ;;  %v7402_v31 = vld [vmem:[%s9445_s1 + $0x338] sm:$0xff]   ;;  %v3097_v24 = vrot.slane %v3082_v42, %v7632_v19  ;;  %v3615_v42 = vcombine.low %v8177_v56, %v7731_v59 }
 0x176   : > { %6815 = vmatpush3.bf16.msra.mxu0 %v7390_v36  ;;  %v3594_v36 = vunpack.i.h.s16 %v8506_v22 }
 0x177   : > { %6816 = vmatprep.subr.bf16.mxu0 %v7391_v34 }
 0x178   : > { %v3678_v32 = vrot.slane %v3594_v36, %v7632_v19  ;;  %v3090_v36 = vrot.slane %v3083_v10, %v7632_v19  ;;  %v3616_v10 = vcombine.low %v7936_v8, %v8112_v50  ;;  %v7417_v8 = vld [vmem:[%s9445_s1 + $0x3b0] sm:$0xff]  }
 0x17a   : > { %6817 = vmatpush3.bf16.msra.mxu0 %v7391_v34  ;;  %v3066_v34 = vrot.slane %v3052_v38, %v7632_v19  ;;  %v3693_v26 = vrot.slane %v3678_v32, %v7632_v19  ;;  %v3232_v38 = vrot.slane %v3223_v5, %v7632_v19  ;;  %v3098_v13 = vcombine.low %v3090_v36, %v3097_v24  ;;  %v7405_v32 = vld [vmem:[%s9445_s1 + $0x350] sm:$0xff]  }
 0x17b   : > { %6818 = vmatprep.subr.bf16.mxu0 %v7392_v48 }
 0x17c   : > { %v3067_v45 = vcombine.low %v3059_v27, %v3066_v34  ;;  %v8545_v28 = vcombine.low %v3686_v58, %v3693_v26  ;;  %v3247_v49 = vcombine.low %v7865_v55, %v3232_v38  ;;  %v7403_v55 = vld [vmem:[%s9445_s1 + $0x340] sm:$0xff]   ;;  %v6110_v58 = vpack.i.b16 %v8491_v61, %v2995_v30  ;;  %v7414_v38 = vld [vmem:[%s9445_s1 + $0x398] sm:$0xff]  }
 0x17d   : > { %v6120_v26 = vpack.i.b16 %v8294_v51, %v8184_v52  ;;  %v3399_v51 = vunpack.i.l.s16 %v8506_v22  ;;  %v7426_v30 = vld [vmem:[%s9445_s1 + $0x3f8] sm:$0xff]  }
 0x17e   : > { %6819 = vmatpush3.bf16.msra.mxu0 %v7392_v48  ;;  %v7396_v48 = vld [vmem:[%s9445_s1 + $0x308] sm:$0xff]   ;;  %v3255_v46 = vrot.slane %v3247_v49, %v7632_v19  ;;  %v7418_v49 = vld [vmem:[%s9445_s1 + $0x3b8] sm:$0xff]  }
 0x17f   : > { %6820 = vmatprep.subr.bf16.mxu0 %v7393_v6  ;;  %v3474_v50 = vrot.slane %v3399_v51, %v7632_v19 }
 0x182   : > { %6821 = vmatpush3.bf16.msra.mxu0 %v7393_v6  ;;  %v7399_v6 = vld [vmem:[%s9445_s1 + $0x320] sm:$0xff]  }
 0x183   : > { %6822 = vmatprep.subr.bf16.mxu0 %v7394_v23 }
 0x186   : > { %6823 = vmatpush3.bf16.msra.mxu0 %v7394_v23  ;;  %v3239_v23 = vrot.slane %v3224_v0, %v7632_v19  ;;  %v3293_v0 = vrot.slane %v3278_v33, %v7632_v19 }
 0x187   : > { %6828 = vmatprep.subr.bf16.mxu0 %v7395_v17 }
 0x188   : > { %v3248_v3 = vcombine.low %v3239_v23, %v3246_v54  ;;  %v3611_v23 = vpack.i.b16 %v2145_v40, %v1904_v12  ;;  %v7415_v54 = vld [vmem:[%s9445_s1 + $0x3a0] sm:$0xff]   ;;  %v7416_v12 = vld [vmem:[%s9445_s1 + $0x3a8] sm:$0xff]  }
 0x189   : > { %6825 = vmatmul.mubr.bf16.vlgmr.msra.gmra.mrb[0].mxu0 %v2866_v47  ;;  %v7406_v47 = vld [vmem:[%s9445_s1 + $0x358] sm:$0xff]  }
 0x18a   : > { %6829 = vmatpush3.bf16.msra.mxu0 %v7395_v17  ;;  %6844 = vmatprep.mubr.bf16.mxu0 %v3067_v45  ;;  %v3262_v27 = vrot.slane %v3248_v3, %v7632_v19  ;;  %v7404_v17 = vld [vmem:[%s9445_s1 + $0x348] sm:$0xff]   ;;  %v7407_v45 = vld [vmem:[%s9445_s1 + $0x360] sm:$0xff]   ;;  %v3617_v52 = vcombine.low %v8233_v11, %v3611_v23 }
 0x18b   : > { %6830 = vmatprep.subr.bf16.mxu0 %v7396_v48 }
 0x18c   : > { %v3263_v34 = vcombine.low %v3255_v46, %v3262_v27  ;;  %v3638_v59 = vrot.slane %v3617_v52, %v7632_v19  ;;  %v7420_v27 = vld [vmem:[%s9445_s1 + $0x3c8] sm:$0xff]  }
 0x18e   : > { %6831 = vmatpush3.bf16.msra.mxu0 %v7396_v48  ;;  %v3264_v48 = vcombine.low %v6110_v58, %v8521_v20  ;;  %v3435_v20 = vrot.slane %v3420_v1, %v7632_v19  ;;  %v7430_v58 = vld [vmem:[%s9447_s3 + $0x58] sm:$0xff]  }
 0x18f   : > { %6832 = vmatprep.subr.bf16.mxu0 %v7397_v41 }
 0x192   : > { %6833 = vmatpush3.bf16.msra.mxu0 %v7397_v41  ;;  %v3421_v41 = vcombine.low %v8060_v25, %v6120_v26  ;;  %v3443_v25 = vcombine.low %v7760_v9, %v3428_v63  ;;  %v7411_v9 = vld [vmem:[%s9445_s1 + $0x380] sm:$0xff]  }
 0x193   : > { %6834 = vmatprep.subr.bf16.mxu0 %v7398_v35  ;;  %v7431_v26 = vld [vmem:[%s9447_s3 + $0x60] sm:$0xff]  }
 0x194   : > { %v3451_v21 = vrot.slane %v3443_v25, %v7632_v19 }
 0x196   : > { %6835 = vmatpush3.bf16.msra.mxu0 %v7398_v35  ;;  %v3271_v35 = vrot.slane %v3264_v48, %v7632_v19  ;;  %v7434_v48 = vld [vmem:[%s9447_s3 + $0x78] sm:$0xff]  }
 0x197   : > { %6836 = vmatprep.subr.bf16.mxu0 %v7399_v6 }
 0x198   : > { %v3279_v16 = vcombine.low %v8434_v39, %v3271_v35 }
 0x19a   : > { %6837 = vmatpush3.bf16.msra.mxu0 %v7399_v6  ;;  %v3442_v6 = vrot.slane %v3421_v41, %v7632_v19  ;;  %v3286_v5 = vrot.slane %v3279_v16, %v7632_v19 }
 0x19b   : > { %6838 = vmatprep.subr.bf16.mxu0 %v7400_v18 }
 0x19c   : > { %v3444_v57 = vcombine.low %v3435_v20, %v3442_v6  ;;  %v3294_v39 = vcombine.low %v3286_v5, %v3293_v0 }
 0x19e   : > { %6839 = vmatpush3.bf16.msra.mxu0 %v7400_v18  ;;  %v3458_v43 = vrot.slane %v3444_v57, %v7632_v19 }
 0x19f   : > { %6840 = vmatprep.subr.bf16.mxu0 %v7401_v15 }
 0x1a0   : > { %v3459_v18 = vcombine.low %v3451_v21, %v3458_v43 }
 0x1a2   : > { %6841 = vmatpush3.bf16.msra.mxu0 %v7401_v15  ;;  %v3460_v15 = vcombine.low %v8491_v61, %v8495_v44  ;;  %v3624_v61 = vrot.slane %v3615_v42, %v7632_v19  ;;  %v3631_v44 = vrot.slane %v3616_v10, %v7632_v19 }
 0x1a3   : > { %6842 = vmatprep.subr.bf16.mxu0 %v7402_v31 }
 0x1a4   : > { %v3467_v40 = vrot.slane %v3460_v15, %v7632_v19  ;;  %v3639_v11 = vcombine.low %v7951_v2, %v3624_v61  ;;  %v3640_v22 = vcombine.low %v3631_v44, %v3638_v59  ;;  %v7419_v2 = vld [vmem:[%s9445_s1 + $0x3c0] sm:$0xff]  }
 0x1a6   : > { %6843 = vmatpush3.bf16.msra.mxu0 %v7402_v31  ;;  %v3475_v56 = vcombine.low %v8499_v29, %v3467_v40  ;;  %v3489_v31 = vrot.slane %v3474_v50, %v7632_v19  ;;  %v3647_v36 = vrot.slane %v3639_v11, %v7632_v19  ;;  %v3654_v24 = vrot.slane %v3640_v22, %v7632_v19 }
 0x1a7   : > { %6848 = vmatprep.subr.bf16.mxu0 %v7403_v55 }
 0x1a8   : > { %v3482_v3 = vrot.slane %v3475_v56, %v7632_v19  ;;  %v3655_v46 = vcombine.low %v3647_v36, %v3654_v24 }
 0x1a9   : > { %6845 = vmatmul.mubr.bf16.vlgmr.msra.gmra.mrb[0].mxu0 %v3098_v13  ;;  %v7422_v13 = vld [vmem:[%s9445_s1 + $0x3d8] sm:$0xff]  }
 0x1aa   : > { %6849 = vmatpush3.bf16.msra.mxu0 %v7403_v55  ;;  %6864 = vmatprep.mubr.bf16.mxu0 %v3263_v34  ;;  %v3490_v29 = vcombine.low %v3482_v3, %v3489_v31  ;;  %v7421_v55 = vld [vmem:[%s9445_s1 + $0x3d0] sm:$0xff]   ;;  %v7423_v34 = vld [vmem:[%s9445_s1 + $0x3e0] sm:$0xff]  }
 0x1ab   : > { %6850 = vmatprep.subr.bf16.mxu0 %v7404_v17 }
 0x1ae   : > { %6851 = vmatpush3.bf16.msra.mxu0 %v7404_v17  ;;  %v7424_v17 = vld [vmem:[%s9445_s1 + $0x3e8] sm:$0xff]  }
 0x1af   : > { %6852 = vmatprep.subr.bf16.mxu0 %v7405_v32 }
 0x1b2   : > { %6853 = vmatpush3.bf16.msra.mxu0 %v7405_v32  ;;  %v7425_v32 = vld [vmem:[%s9445_s1 + $0x3f0] sm:$0xff]  }
 0x1b3   : > { %6854 = vmatprep.subr.bf16.mxu0 %v7406_v47 }
 0x1b6   : > { %6855 = vmatpush3.bf16.msra.mxu0 %v7406_v47  ;;  %v7429_v47 = vld [vmem:[%s9447_s3 + $0x50] sm:$0xff]  }
 0x1b7   : > { %6856 = vmatprep.subr.bf16.mxu0 %v7407_v45  ;;  %6913 = vmatpush3.bf16.msra.mxu1 %v7429_v47 }
 0x1b8   : > { %6914 = vmatprep.subr.bf16.mxu1 %v7564_v7 }
 0x1ba   : > { %6857 = vmatpush3.bf16.msra.mxu0 %v7407_v45  ;;  %v7433_v45 = vld [vmem:[%s9447_s3 + $0x70] sm:$0xff]  }
 0x1bb   : > { %6858 = vmatprep.subr.bf16.mxu0 %v7408_v37  ;;  %6915 = vmatpush3.bf16.msra.mxu1 %v7430_v58 }
 0x1bc   : > { %6916 = vmatprep.subr.bf16.mxu1 %v7564_v7 }
 0x1be   : > { %6859 = vmatpush3.bf16.msra.mxu0 %v7408_v37 }
 0x1bf   : > { %6860 = vmatprep.subr.bf16.mxu0 %v7409_v4  ;;  %6917 = vmatpush3.bf16.msra.mxu1 %v7431_v26 }
 0x1c0   : > { %6918 = vmatprep.subr.bf16.mxu1 %v7564_v7 }
 0x1c2   : > { %6861 = vmatpush3.bf16.msra.mxu0 %v7409_v4 }
 0x1c3   : > { %6862 = vmatprep.subr.bf16.mxu0 %v7410_v62 }
 0x1c6   : > { %6863 = vmatpush3.bf16.msra.mxu0 %v7410_v62 }
 0x1c7   : > { %6868 = vmatprep.subr.bf16.mxu0 %v7411_v9 }
 0x1c9   : > { %6865 = vmatmul.mubr.bf16.vlgmr.msra.gmra.mrb[0].mxu0 %v3294_v39 }
 0x1ca   : > { %6869 = vmatpush3.bf16.msra.mxu0 %v7411_v9  ;;  %6884 = vmatprep.mubr.bf16.mxu0 %v3459_v18 }
 0x1cb   : > { %6870 = vmatprep.subr.bf16.mxu0 %v7412_v14 }
 0x1ce   : > { %6871 = vmatpush3.bf16.msra.mxu0 %v7412_v14 }
 0x1cf   : > { %6872 = vmatprep.subr.bf16.mxu0 %v7413_v60 }
 0x1d2   : > { %6873 = vmatpush3.bf16.msra.mxu0 %v7413_v60 }
 0x1d3   : > { %6874 = vmatprep.subr.bf16.mxu0 %v7414_v38 }
 0x1d6   : > { %6875 = vmatpush3.bf16.msra.mxu0 %v7414_v38 }
 0x1d7   : > { %6876 = vmatprep.subr.bf16.mxu0 %v7415_v54 }
 0x1da   : > { %6877 = vmatpush3.bf16.msra.mxu0 %v7415_v54 }
 0x1db   : > { %6878 = vmatprep.subr.bf16.mxu0 %v7416_v12 }
 0x1de   : > { %6879 = vmatpush3.bf16.msra.mxu0 %v7416_v12 }
 0x1df   : > { %6880 = vmatprep.subr.bf16.mxu0 %v7417_v8 }
 0x1e2   : > { %6881 = vmatpush3.bf16.msra.mxu0 %v7417_v8 }
 0x1e3   : > { %6882 = vmatprep.subr.bf16.mxu0 %v7418_v49 }
 0x1e6   : > { %6883 = vmatpush3.bf16.msra.mxu0 %v7418_v49 }
 0x1e7   : > { %6888 = vmatprep.subr.bf16.mxu0 %v7419_v2 }
 0x1e9   : > { %6885 = vmatmul.mubr.bf16.vlgmr.msra.gmra.mrb[0].mxu0 %v3490_v29 }
 0x1ea   : > { %6889 = vmatpush3.bf16.msra.mxu0 %v7419_v2  ;;  %6904 = vmatprep.mubr.bf16.mxu0 %v3655_v46 }
 0x1eb   : > { %6890 = vmatprep.subr.bf16.mxu0 %v7420_v27 }
 0x1ee   : > { %6891 = vmatpush3.bf16.msra.mxu0 %v7420_v27 }
 0x1ef   : > { %6892 = vmatprep.subr.bf16.mxu0 %v7421_v55 }
 0x1f2   : > { %6893 = vmatpush3.bf16.msra.mxu0 %v7421_v55 }
 0x1f3   : > { %6894 = vmatprep.subr.bf16.mxu0 %v7422_v13 }
 0x1f6   : > { %6895 = vmatpush3.bf16.msra.mxu0 %v7422_v13 }
 0x1f7   : > { %6896 = vmatprep.subr.bf16.mxu0 %v7423_v34 }
 0x1fa   : > { %6897 = vmatpush3.bf16.msra.mxu0 %v7423_v34 }
 0x1fb   : > { %6898 = vmatprep.subr.bf16.mxu0 %v7424_v17 }
 0x1fe   : > { %6899 = vmatpush3.bf16.msra.mxu0 %v7424_v17 }
 0x1ff   : > { %6900 = vmatprep.subr.bf16.mxu0 %v7425_v32 }
 0x202   : > { %6901 = vmatpush3.bf16.msra.mxu0 %v7425_v32 }
 0x203   : > { %6902 = vmatprep.subr.bf16.mxu0 %v7426_v30 }
 0x206   : > { %6903 = vmatpush3.bf16.msra.mxu0 %v7426_v30 }
 0x209   : > { %6905 = vmatmul.mubr.bf16.vlgmr.msra.gmra.mrb[0].mxu0 %v8545_v28  ;;  %v7432_v28 = vld [vmem:[%s9447_s3 + $0x68] sm:$0xff]  }
 0x20a   : > { %6919 = vmatpush3.bf16.msra.mxu1 %v7432_v28 }
 0x20b   : > { %6920 = vmatprep.subr.bf16.mxu1 %v7564_v7 }
 0x20e   : > { %6921 = vmatpush3.bf16.msra.mxu1 %v7433_v45 }
 0x20f   : > { %6922 = vmatprep.subr.bf16.mxu1 %v7564_v7 }
 0x212   : > { %6923 = vmatpush3.bf16.msra.mxu1 %v7434_v48 }
 0x213   : > { %6928 = vmatprep.subr.bf16.mxu1 %v7564_v7 }
 0x2dc   : > { %v6906_v1 = vpop.f32.mrb[0].mxu0 }
 0x2dd   : > { %v3807_v41 = vadd.f32 %v6906_v1, %v6139_v53  ;;  %v3779_v37 = vpop.f32.mrb[1].mxu0 }
 0x2de   : > { %v3805_v35 = vadd.f32 %v6139_v53, %v3779_v37  ;;  %v6907_v63 = vpop.f32.mrb[2].mxu0 }
 0x2df   : > { %v3815_v20 = vmul.f32 0.2, %v3807_v41  ;;  %v3808_v6 = vadd.f32 %v6907_v63, %v6139_v53  ;;  %v3782_v4 = vpop.f32.mrb[3].mxu0  ;;  %vm3811_vm1 = vcmp.ge.f32.partialorder %v3807_v41, 0.0 }
 0x2e0   : > { %v3813_v33 = vmul.f32 0.2, %v3805_v35  ;;  %v3806_v16 = vadd.f32 %v6139_v53, %v3782_v4  ;;  %vm3809_vm2 = vcmp.ge.f32.partialorder %v3805_v35, 0.0 }
 0x2e1   : > { %vm3812_vm3 = vcmp.ge.f32.partialorder %v3808_v6, 0.0  ;;  %v3816_v25 = vmul.f32 0.2, %v3808_v6  ;;  %v3819_v62 = vsel %vm3811_vm1, %v3807_v41, %v3815_v20  ;;  %v7435_v41 = vld [vmem:[%s9447_s3] sm:$0xff]  }
 0x2e2   : > { %vm3810_vm4 = vcmp.ge.f32.partialorder %v3806_v16, 0.0  ;;  %v3814_v57 = vmul.f32 0.2, %v3806_v16  ;;  %v3817_v0 = vsel %vm3809_vm2, %v3805_v35, %v3813_v33  ;;  %v7436_v33 = vld [vmem:[%s9447_s3 + $0x8] sm:$0xff]  }
 0x2e3   : > { %v3820_v5 = vsel %vm3812_vm3, %v3808_v6, %v3816_v25 }
 0x2e4   : > { %v3822_v21 = vpack.c.bf16 %v3820_v5, %v3819_v62  ;;  %v6141_v43 = vpack.c.bf16 %v3820_v5, %v3820_v5  ;;  %v3818_v9 = vsel %vm3810_vm4, %v3806_v16, %v3814_v57 }
 0x2e5   : > { %v3821_v39 = vpack.c.bf16 %v3818_v9, %v3817_v0  ;;  %v6140_v18 = vpack.c.bf16 %v3818_v9, %v3818_v9 }
 0x2e6   : > { %v3881_v14 = vrot.slane %v3822_v21, %v7632_v19  ;;  %v3888_v23 = vrot.slane %v6141_v43, %v7632_v19  ;;  %v7437_v43 = vld [vmem:[%s9447_s3 + $0x10] sm:$0xff]  }
 0x2e7   : > { %v3832_v60 = vrot.slane %v3821_v39, %v7632_v19  ;;  %v3839_v38 = vrot.slane %v6140_v18, %v7632_v19  ;;  %v7438_v39 = vld [vmem:[%s9447_s3 + $0x18] sm:$0xff]   ;;  %v7439_v18 = vld [vmem:[%s9447_s3 + $0x20] sm:$0xff]  }
 0x2e8   : > { %v3889_v54 = vcombine.high %v3881_v14, %v3881_v14  ;;  %v8749_v15 = vrot.slane %v3881_v14, %v7632_v19  ;;  %v3903_v8 = vrot.slane %v3888_v23, %v7632_v19  ;;  %v7440_v14 = vld [vmem:[%s9447_s3 + $0x28] sm:$0xff]   ;;  %v7442_v23 = vld [vmem:[%s9447_s3 + $0x38] sm:$0xff]  }
 0x2e9   : > { %v3840_v42 = vcombine.high %v3832_v60, %v3832_v60  ;;  %v3841_v10 = vcombine.high %v3839_v38, %v3839_v38  ;;  %v8752_v52 = vrot.slane %v3832_v60, %v7632_v19  ;;  %v8755_v12 = vrot.slane %v3839_v38, %v7632_v19  ;;  %v7441_v60 = vld [vmem:[%s9447_s3 + $0x30] sm:$0xff]  }
 0x2ea   : > { %v8758_v51 = vrot.slane %v3889_v54, %v7632_v19  ;;  %v3930_v11 = vunpack.i.h.s16 %v8749_v15  ;;  %v8813_v28 = vcombine.high %v8749_v15, %v8749_v15 }
 0x2eb   : > { %v8761_v40 = vrot.slane %v3840_v42, %v7632_v19  ;;  %v8764_v61 = vrot.slane %v3841_v10, %v7632_v19  ;;  %v3870_v44 = vcombine.high %v8752_v52, %v8752_v52  ;;  %v8770_v59 = vcombine.high %v8755_v12, %v8755_v12  ;;  %v7443_v42 = vld [vmem:[%s9447_s3 + $0x80] sm:$0xff]  }
 0x2ec   : > { %v8775_v50 = vcombine.high %v8758_v51, %v8758_v51  ;;  %v3914_v56 = vunpack.i.h.s16 %v8752_v52  ;;  %v8829_v35 = vpack.i.b16 %v8758_v51, %v3930_v11  ;;  %v3934_v6 = vunpack.i.h.s16 %v8813_v28  ;;  %v7448_v11 = vld [vmem:[%s9447_s3 + $0xa8] sm:$0xff]  }
 0x2ed   : > { %v8781_v22 = vcombine.high %v8761_v40, %v8761_v40  ;;  %v3918_v49 = vunpack.i.h.s16 %v3870_v44  ;;  %v3916_v3 = vunpack.i.h.s16 %v8761_v40  ;;  %v3924_v31 = vunpack.i.h.s16 %v8764_v61 }
 0x2ee   : > { %v3936_v36 = vunpack.i.h.s16 %v8775_v50  ;;  %v6142_v24 = vpack.i.b16 %v8761_v40, %v3914_v56  ;;  %v3873_v2 = vcombine.high %v8764_v61, %v8764_v61  ;;  %v3926_v29 = vunpack.i.h.s16 %v8770_v59  ;;  %v7447_v56 = vld [vmem:[%s9447_s3 + $0xa0] sm:$0xff]  }
 0x2ef   : > { %v8791_v46 = vpack.i.b16 %v8781_v22, %v3918_v49  ;;  %v3920_v27 = vunpack.i.h.s16 %v8781_v22  ;;  %v8794_v55 = vpack.i.b16 %v3870_v44, %v3916_v3  ;;  %v8797_v13 = vpack.i.b16 %v8770_v59, %v3924_v31  ;;  %v7445_v44 = vld [vmem:[%s9447_s3 + $0x90] sm:$0xff]   ;;  %v7450_v3 = vld [vmem:[%s9447_s3 + $0xb8] sm:$0xff]  }
 0x2f0   : > { %v8799_v34 = vpack.i.b16 %v3903_v8, %v3936_v36  ;;  %v3972_v17 = vcombine.low %v6142_v24, %v8781_v22  ;;  %v8802_v32 = vpack.i.b16 %v3873_v2, %v3926_v29  ;;  %v3928_v30 = vunpack.i.h.s16 %v3873_v2  ;;  %v7446_v8 = vld [vmem:[%s9447_s3 + $0x98] sm:$0xff]   ;;  %v7449_v49 = vld [vmem:[%s9447_s3 + $0xb0] sm:$0xff]   ;;  %v7451_v36 = vld [vmem:[%s9447_s3 + $0xc0] sm:$0xff]  }
 0x2f1   : > { %v8805_v47 = vpack.i.b16 %v8755_v12, %v3920_v27  ;;  %v4323_v58 = vcombine.low %v8794_v55, %v8755_v12  ;;  %v4445_v26 = vcombine.low %v8791_v46, %v8764_v61  ;;  %v4567_v48 = vcombine.low %v8781_v22, %v8797_v13  ;;  %v7452_v2 = vld [vmem:[%s9447_s3 + $0xc8] sm:$0xff]   ;;  %v7454_v29 = vld [vmem:[%s9447_s3 + $0xd8] sm:$0xff]   ;;  %v7455_v27 = vld [vmem:[%s9447_s3 + $0xe0] sm:$0xff]  }
 0x2f2   : > { %v3979_v45 = vrot.slane %v3972_v17, %v7632_v19  ;;  %v4811_v53 = vcombine.low %v8755_v12, %v8802_v32  ;;  %v8821_v1 = vpack.i.b16 %v8749_v15, %v3928_v30  ;;  %v5055_v16 = vcombine.low %v8797_v13, %v8749_v15  ;;  %v7456_v17 = vld [vmem:[%s9447_s3 + $0xe8] sm:$0xff]   ;;  %v7457_v30 = vld [vmem:[%s9447_s3 + $0xf0] sm:$0xff]  }
 0x2f3   : > { %v4200_v37 = vcombine.low %v8761_v40, %v8805_v47  ;;  %v4689_v20 = vcombine.low %v8805_v47, %v8770_v59  ;;  %v5177_v25 = vcombine.low %v8770_v59, %v8829_v35  ;;  %v5299_v57 = vcombine.low %v8802_v32, %v8758_v51  ;;  %v7453_v40 = vld [vmem:[%s9447_s3 + $0xd0] sm:$0xff]  }
 0x2f4   : > { %v3986_v63 = vrot.slane %v3979_v45, %v7632_v19  ;;  %v4933_v4 = vcombine.low %v8764_v61, %v8821_v1  ;;  %v5421_v62 = vcombine.low %v8821_v1, %v8813_v28  ;;  %v8852_v5 = vpack.i.b16 %v8775_v50, %v3934_v6  ;;  %v7458_v45 = vld [vmem:[%s9447_s3 + $0xf8] sm:$0xff]   ;;  %v7460_v6 = vld [vmem:[%s9447_s3 + $0x108] sm:$0xff]   ;;  %v7461_v55 = vld [vmem:[%s9447_s3 + $0x110] sm:$0xff]  }
 0x2f5   : > { %v5665_v0 = vcombine.low %v8829_v35, %v8775_v50  ;;  %v5787_v21 = vcombine.low %v8758_v51, %v8799_v34  ;;  %v4078_v38 = vcombine.low %v8752_v52, %v8791_v46  ;;  %v7444_v52 = vld [vmem:[%s9447_s3 + $0x88] sm:$0xff]   ;;  %v4207_v31 = vrot.slane %v4200_v37, %v7632_v19  ;;  %v7459_v37 = vld [vmem:[%s9447_s3 + $0x100] sm:$0xff]   ;;  %v7469_v46 = vld [vmem:[%s9447_s3 + $0x150] sm:$0xff]  }
 0x2f6   : > { %6925 = vmatmul.mubr.bf16.vlgmr.msra.gmra.mrb[0].mxu1 %v3986_v63  ;;  %v5543_v9 = vcombine.low %v8749_v15, %v8852_v5  ;;  %v7477_v22 = vld [vmem:[%s9447_s3 + $0x190] sm:$0xff]   ;;  %v7534_v1 = vld [vmem:[%s9447_s3 + $0x358] sm:$0xff]  }
 0x2f7   : > { %6929 = vmatpush3.bf16.msra.mxu1 %v7435_v41  ;;  %6944 = vmatprep.mubr.msk.bf16.mxu1 %vm7565_vm0, %v7564_v7  ;;  %v4085_v54 = vrot.slane %v4078_v38, %v7632_v19  ;;  %v4214_v24 = vrot.slane %v4207_v31, %v7632_v19  ;;  %v4330_v41 = vrot.slane %v4323_v58, %v7632_v19  ;;  %v7462_v58 = vld [vmem:[%s9447_s3 + $0x118] sm:$0xff]   ;;  %v7481_v31 = vld [vmem:[%s9447_s3 + $0x1b0] sm:$0xff]  }
 0x2f8   : > { %6930 = vmatprep.subr.bf16.mxu1 %v7564_v7  ;;  %v7485_v47 = vld [vmem:[%s9447_s3 + $0x1d0] sm:$0xff]   ;;  %v7542_v5 = vld [vmem:[%s9447_s3 + $0x398] sm:$0xff]  }
 0x2f9   : > { %v4092_v10 = vrot.slane %v4085_v54, %v7632_v19  ;;  %v4337_v63 = vrot.slane %v4330_v41, %v7632_v19  ;;  %v7471_v54 = vld [vmem:[%s9447_s3 + $0x160] sm:$0xff]   ;;  %v7493_v12 = vld [vmem:[%s9447_s3 + $0x210] sm:$0xff]   ;;  %v7550_v35 = vld [vmem:[%s9447_s3 + $0x3d8] sm:$0xff]  }
 0x2fa   : > { %v7501_v61 = vld [vmem:[%s9447_s3 + $0x250] sm:$0xff]  }
 0x2fb   : > { %6931 = vmatpush3.bf16.msra.mxu1 %v7436_v33  ;;  %v7463_v33 = vld [vmem:[%s9447_s3 + $0x120] sm:$0xff]   ;;  %v7509_v13 = vld [vmem:[%s9447_s3 + $0x290] sm:$0xff]  }
 0x2fc   : > { %6932 = vmatprep.subr.bf16.mxu1 %v7564_v7  ;;  %v7517_v59 = vld [vmem:[%s9447_s3 + $0x2d0] sm:$0xff]  }
 0x2fd   : > { %v7525_v32 = vld [vmem:[%s9447_s3 + $0x310] sm:$0xff]  }
 0x2fe   : > { %v7533_v28 = vld [vmem:[%s9447_s3 + $0x350] sm:$0xff]  }
 0x2ff   : > { %6933 = vmatpush3.bf16.msra.mxu1 %v7437_v43  ;;  %v7464_v43 = vld [vmem:[%s9447_s3 + $0x128] sm:$0xff]   ;;  %v7541_v15 = vld [vmem:[%s9447_s3 + $0x390] sm:$0xff]  }
 0x300   : > { %6934 = vmatprep.subr.bf16.mxu1 %v7564_v7  ;;  %v7549_v50 = vld [vmem:[%s9447_s3 + $0x3d0] sm:$0xff]  }
 0x303   : > { %6935 = vmatpush3.bf16.msra.mxu1 %v7438_v39  ;;  %v7465_v39 = vld [vmem:[%s9447_s3 + $0x130] sm:$0xff]  }
 0x304   : > { %6936 = vmatprep.subr.bf16.mxu1 %v7564_v7 }
 0x307   : > { %6937 = vmatpush3.bf16.msra.mxu1 %v7439_v18  ;;  %v7466_v18 = vld [vmem:[%s9447_s3 + $0x138] sm:$0xff]  }
 0x308   : > { %6938 = vmatprep.subr.bf16.mxu1 %v7564_v7 }
 0x30b   : > { %6939 = vmatpush3.bf16.msra.mxu1 %v7440_v14  ;;  %v4452_v14 = vrot.slane %v4445_v26, %v7632_v19  ;;  %v7470_v26 = vld [vmem:[%s9447_s3 + $0x158] sm:$0xff]  }
 0x30c   : > { %6940 = vmatprep.subr.bf16.mxu1 %v7564_v7 }
 0x30d   : > { %v4459_v38 = vrot.slane %v4452_v14, %v7632_v19 }
 0x30f   : > { %6941 = vmatpush3.bf16.msra.mxu1 %v7441_v60  ;;  %v7467_v60 = vld [vmem:[%s9447_s3 + $0x140] sm:$0xff]  }
 0x310   : > { %6942 = vmatprep.subr.bf16.mxu1 %v7564_v7 }
 0x313   : > { %6943 = vmatpush3.bf16.msra.mxu1 %v7442_v23  ;;  %v7468_v23 = vld [vmem:[%s9447_s3 + $0x148] sm:$0xff]  }
 0x314   : > { %6948 = vmatprep.subr.bf16.mxu1 %v7564_v7 }
 0x316   : > { %6945 = vmatmul.mubr.bf16.vlgmr.msra.gmra.mrb[4].mxu1 %v4092_v10  ;;  %v7473_v10 = vld [vmem:[%s9447_s3 + $0x170] sm:$0xff]  }
 0x317   : > { %6949 = vmatpush3.bf16.msra.mxu1 %v7443_v42  ;;  %6964 = vmatprep.mubr.msk.bf16.mxu1 %vm7565_vm0, %v7564_v7  ;;  %v7472_v42 = vld [vmem:[%s9447_s3 + $0x168] sm:$0xff]  }
 0x318   : > { %6950 = vmatprep.subr.bf16.mxu1 %v7564_v7 }
 0x31b   : > { %6951 = vmatpush3.bf16.msra.mxu1 %v7444_v52  ;;  %v7474_v52 = vld [vmem:[%s9447_s3 + $0x178] sm:$0xff]  }
 0x31c   : > { %6952 = vmatprep.subr.bf16.mxu1 %v7564_v7 }
 0x31f   : > { %6953 = vmatpush3.bf16.msra.mxu1 %v7445_v44  ;;  %v4574_v44 = vrot.slane %v4567_v48, %v7632_v19  ;;  %v7478_v48 = vld [vmem:[%s9447_s3 + $0x198] sm:$0xff]  }
 0x320   : > { %6954 = vmatprep.subr.bf16.mxu1 %v7564_v7 }
 0x323   : > { %6955 = vmatpush3.bf16.msra.mxu1 %v7446_v8  ;;  %v7475_v8 = vld [vmem:[%s9447_s3 + $0x180] sm:$0xff]  }
 0x324   : > { %6956 = vmatprep.subr.bf16.mxu1 %v7564_v7 }
 0x327   : > { %6957 = vmatpush3.bf16.msra.mxu1 %v7447_v56  ;;  %v4581_v56 = vrot.slane %v4574_v44, %v7632_v19  ;;  %v7500_v44 = vld [vmem:[%s9447_s3 + $0x248] sm:$0xff]  }
 0x328   : > { %6958 = vmatprep.subr.bf16.mxu1 %v7564_v7 }
 0x32b   : > { %6959 = vmatpush3.bf16.msra.mxu1 %v7448_v11  ;;  %v7476_v11 = vld [vmem:[%s9447_s3 + $0x188] sm:$0xff]  }
 0x32c   : > { %6960 = vmatprep.subr.bf16.mxu1 %v7564_v7 }
 0x32f   : > { %6961 = vmatpush3.bf16.msra.mxu1 %v7449_v49  ;;  %v7479_v49 = vld [vmem:[%s9447_s3 + $0x1a0] sm:$0xff]  }
 0x330   : > { %6962 = vmatprep.subr.bf16.mxu1 %v7564_v7 }
 0x333   : > { %6963 = vmatpush3.bf16.msra.mxu1 %v7450_v3  ;;  %v7480_v3 = vld [vmem:[%s9447_s3 + $0x1a8] sm:$0xff]  }
 0x334   : > { %6968 = vmatprep.subr.bf16.mxu1 %v7564_v7 }
 0x336   : > { %6965 = vmatmul.mubr.bf16.vlgmr.msra.gmra.mrb[8].mxu1 %v4214_v24  ;;  %v4696_v24 = vrot.slane %v4689_v20, %v7632_v19  ;;  %v7486_v20 = vld [vmem:[%s9447_s3 + $0x1d8] sm:$0xff]  }
 0x337   : > { %6969 = vmatpush3.bf16.msra.mxu1 %v7451_v36  ;;  %6984 = vmatprep.mubr.msk.bf16.mxu1 %vm7565_vm0, %v7564_v7  ;;  %v7482_v36 = vld [vmem:[%s9447_s3 + $0x1b8] sm:$0xff]  }
 0x338   : > { %6970 = vmatprep.subr.bf16.mxu1 %v7564_v7 }
 0x33b   : > { %6971 = vmatpush3.bf16.msra.mxu1 %v7452_v2  ;;  %v7483_v2 = vld [vmem:[%s9447_s3 + $0x1c0] sm:$0xff]  }
 0x33c   : > { %6972 = vmatprep.subr.bf16.mxu1 %v7564_v7 }
 0x33f   : > { %6973 = vmatpush3.bf16.msra.mxu1 %v7453_v40  ;;  %v4703_v40 = vrot.slane %v4696_v24, %v7632_v19  ;;  %v5062_v24 = vrot.slane %v5055_v16, %v7632_v19  ;;  %v7510_v16 = vld [vmem:[%s9447_s3 + $0x298] sm:$0xff]  }
 0x340   : > { %6974 = vmatprep.subr.bf16.mxu1 %v7564_v7 }
 0x343   : > { %6975 = vmatpush3.bf16.msra.mxu1 %v7454_v29  ;;  %v7484_v29 = vld [vmem:[%s9447_s3 + $0x1c8] sm:$0xff]  }
 0x344   : > { %6976 = vmatprep.subr.bf16.mxu1 %v7564_v7 }
 0x347   : > { %6977 = vmatpush3.bf16.msra.mxu1 %v7455_v27  ;;  %v7487_v27 = vld [vmem:[%s9447_s3 + $0x1e0] sm:$0xff]  }
 0x348   : > { %6978 = vmatprep.subr.bf16.mxu1 %v7564_v7 }
 0x34b   : > { %6979 = vmatpush3.bf16.msra.mxu1 %v7456_v17  ;;  %v7488_v17 = vld [vmem:[%s9447_s3 + $0x1e8] sm:$0xff]  }
 0x34c   : > { %6980 = vmatprep.subr.bf16.mxu1 %v7564_v7 }
 0x34f   : > { %6981 = vmatpush3.bf16.msra.mxu1 %v7457_v30 }
 0x350   : > { %6982 = vmatprep.subr.bf16.mxu1 %v7564_v7 }
 0x353   : > { %6983 = vmatpush3.bf16.msra.mxu1 %v7458_v45 }
 0x354   : > { %6988 = vmatprep.subr.bf16.mxu1 %v7564_v7 }
 0x356   : > { %6985 = vmatmul.mubr.bf16.vlgmr.msra.gmra.mrb[12].mxu1 %v4337_v63 }
 0x357   : > { %6989 = vmatpush3.bf16.msra.mxu1 %v7459_v37  ;;  %7004 = vmatprep.mubr.msk.bf16.mxu1 %vm7565_vm0, %v7564_v7  ;;  %v7489_v37 = vld [vmem:[%s9447_s3 + $0x1f0] sm:$0xff]  }
 0x358   : > { %6990 = vmatprep.subr.bf16.mxu1 %v7564_v7 }
 0x35b   : > { %6991 = vmatpush3.bf16.msra.mxu1 %v7460_v6  ;;  %v7490_v6 = vld [vmem:[%s9447_s3 + $0x1f8] sm:$0xff]  }
 0x35c   : > { %6992 = vmatprep.subr.bf16.mxu1 %v7564_v7 }
 0x35f   : > { %6993 = vmatpush3.bf16.msra.mxu1 %v7461_v55  ;;  %v4818_v55 = vrot.slane %v4811_v53, %v7632_v19  ;;  %v7494_v53 = vld [vmem:[%s9447_s3 + $0x218] sm:$0xff]  }
 0x360   : > { %6994 = vmatprep.subr.bf16.mxu1 %v7564_v7 }
 0x363   : > { %6995 = vmatpush3.bf16.msra.mxu1 %v7462_v58  ;;  %v7491_v58 = vld [vmem:[%s9447_s3 + $0x200] sm:$0xff]  }
 0x364   : > { %6996 = vmatprep.subr.bf16.mxu1 %v7564_v7 }
 0x367   : > { %6997 = vmatpush3.bf16.msra.mxu1 %v7463_v33  ;;  %v4825_v33 = vrot.slane %v4818_v55, %v7632_v19  ;;  %v7515_v55 = vld [vmem:[%s9447_s3 + $0x2c0] sm:$0xff]  }
 0x368   : > { %6998 = vmatprep.subr.bf16.mxu1 %v7564_v7 }
 0x36b   : > { %6999 = vmatpush3.bf16.msra.mxu1 %v7464_v43  ;;  %v7492_v43 = vld [vmem:[%s9447_s3 + $0x208] sm:$0xff]  }
 0x36c   : > { %7000 = vmatprep.subr.bf16.mxu1 %v7564_v7 }
 0x36f   : > { %7001 = vmatpush3.bf16.msra.mxu1 %v7465_v39  ;;  %v7495_v39 = vld [vmem:[%s9447_s3 + $0x220] sm:$0xff]  }
 0x370   : > { %7002 = vmatprep.subr.bf16.mxu1 %v7564_v7 }
 0x373   : > { %7003 = vmatpush3.bf16.msra.mxu1 %v7466_v18  ;;  %v7496_v18 = vld [vmem:[%s9447_s3 + $0x228] sm:$0xff]  }
 0x374   : > { %7008 = vmatprep.subr.bf16.mxu1 %v7564_v7 }
 0x376   : > { %7005 = vmatmul.mubr.bf16.vlgmr.msra.gmra.mrb[16].mxu1 %v4459_v38 }
 0x377   : > { %7009 = vmatpush3.bf16.msra.mxu1 %v7467_v60  ;;  %7024 = vmatprep.mubr.msk.bf16.mxu1 %vm7565_vm0, %v7564_v7 }
 0x378   : > { %7010 = vmatprep.subr.bf16.mxu1 %v7564_v7 }
 0x37b   : > { %7011 = vmatpush3.bf16.msra.mxu1 %v7468_v23 }
 0x37c   : > { %7012 = vmatprep.subr.bf16.mxu1 %v7564_v7 }
 0x37f   : > { %7013 = vmatpush3.bf16.msra.mxu1 %v7469_v46  ;;  %v7497_v46 = vld [vmem:[%s9447_s3 + $0x230] sm:$0xff]  }
 0x380   : > { %7014 = vmatprep.subr.bf16.mxu1 %v7564_v7 }
 0x383   : > { %7015 = vmatpush3.bf16.msra.mxu1 %v7470_v26 }
 0x384   : > { %7016 = vmatprep.subr.bf16.mxu1 %v7564_v7 }
 0x387   : > { %7017 = vmatpush3.bf16.msra.mxu1 %v7471_v54  ;;  %v7498_v54 = vld [vmem:[%s9447_s3 + $0x238] sm:$0xff]  }
 0x388   : > { %7018 = vmatprep.subr.bf16.mxu1 %v7564_v7 }
 0x38b   : > { %7019 = vmatpush3.bf16.msra.mxu1 %v7472_v42  ;;  %v4940_v42 = vrot.slane %v4933_v4, %v7632_v19  ;;  %v7502_v4 = vld [vmem:[%s9447_s3 + $0x258] sm:$0xff]  }
 0x38c   : > { %7020 = vmatprep.subr.bf16.mxu1 %v7564_v7 }
 0x38f   : > { %7021 = vmatpush3.bf16.msra.mxu1 %v7473_v10  ;;  %v7499_v10 = vld [vmem:[%s9447_s3 + $0x240] sm:$0xff]  }
 0x390   : > { %7022 = vmatprep.subr.bf16.mxu1 %v7564_v7 }
 0x393   : > { %7023 = vmatpush3.bf16.msra.mxu1 %v7474_v52  ;;  %v4947_v52 = vrot.slane %v4940_v42, %v7632_v19  ;;  %v7524_v42 = vld [vmem:[%s9447_s3 + $0x308] sm:$0xff]  }
 0x394   : > { %7028 = vmatprep.subr.bf16.mxu1 %v7564_v7 }
 0x396   : > { %7025 = vmatmul.mubr.bf16.vlgmr.msra.gmra.mrb[20].mxu1 %v4581_v56  ;;  %v7504_v56 = vld [vmem:[%s9447_s3 + $0x268] sm:$0xff]  }
 0x397   : > { %7029 = vmatpush3.bf16.msra.mxu1 %v7475_v8  ;;  %7044 = vmatprep.mubr.msk.bf16.mxu1 %vm7565_vm0, %v7564_v7  ;;  %v7503_v8 = vld [vmem:[%s9447_s3 + $0x260] sm:$0xff]  }
 0x398   : > { %7030 = vmatprep.subr.bf16.mxu1 %v7564_v7 }
 0x39b   : > { %7031 = vmatpush3.bf16.msra.mxu1 %v7476_v11 }
 0x39c   : > { %7032 = vmatprep.subr.bf16.mxu1 %v7564_v7 }
 0x39f   : > { %7033 = vmatpush3.bf16.msra.mxu1 %v7477_v22 }
 0x3a0   : > { %7034 = vmatprep.subr.bf16.mxu1 %v7564_v7 }
 0x3a3   : > { %7035 = vmatpush3.bf16.msra.mxu1 %v7478_v48 }
 0x3a4   : > { %7036 = vmatprep.subr.bf16.mxu1 %v7564_v7 }
 0x3a7   : > { %7037 = vmatpush3.bf16.msra.mxu1 %v7479_v49 }
 0x3a8   : > { %7038 = vmatprep.subr.bf16.mxu1 %v7564_v7 }
 0x3ab   : > { %7039 = vmatpush3.bf16.msra.mxu1 %v7480_v3  ;;  %v7505_v3 = vld [vmem:[%s9447_s3 + $0x270] sm:$0xff]  }
 0x3ac   : > { %7040 = vmatprep.subr.bf16.mxu1 %v7564_v7 }
 0x3af   : > { %7041 = vmatpush3.bf16.msra.mxu1 %v7481_v31 }
 0x3b0   : > { %7042 = vmatprep.subr.bf16.mxu1 %v7564_v7 }
 0x3b3   : > { %7043 = vmatpush3.bf16.msra.mxu1 %v7482_v36  ;;  %v7506_v36 = vld [vmem:[%s9447_s3 + $0x278] sm:$0xff]  }
 0x3b4   : > { %7048 = vmatprep.subr.bf16.mxu1 %v7564_v7 }
 0x3b6   : > { %7045 = vmatmul.mubr.bf16.vlgmr.msra.gmra.mrb[24].mxu1 %v4703_v40  ;;  %v5069_v40 = vrot.slane %v5062_v24, %v7632_v19 }
 0x3b7   : > { %7049 = vmatpush3.bf16.msra.mxu1 %v7483_v2  ;;  %7064 = vmatprep.mubr.msk.bf16.mxu1 %vm7565_vm0, %v7564_v7  ;;  %v7507_v2 = vld [vmem:[%s9447_s3 + $0x280] sm:$0xff]  }
 0x3b8   : > { %7050 = vmatprep.subr.bf16.mxu1 %v7564_v7 }
 0x3bb   : > { %7051 = vmatpush3.bf16.msra.mxu1 %v7484_v29  ;;  %v7508_v29 = vld [vmem:[%s9447_s3 + $0x288] sm:$0xff]  }
 0x3bc   : > { %7052 = vmatprep.subr.bf16.mxu1 %v7564_v7 }
 0x3bf   : > { %7053 = vmatpush3.bf16.msra.mxu1 %v7485_v47  ;;  %v7511_v47 = vld [vmem:[%s9447_s3 + $0x2a0] sm:$0xff]  }
 0x3c0   : > { %7054 = vmatprep.subr.bf16.mxu1 %v7564_v7 }
 0x3c3   : > { %7055 = vmatpush3.bf16.msra.mxu1 %v7486_v20  ;;  %v7512_v20 = vld [vmem:[%s9447_s3 + $0x2a8] sm:$0xff]  }
 0x3c4   : > { %7056 = vmatprep.subr.bf16.mxu1 %v7564_v7 }
 0x3c7   : > { %7057 = vmatpush3.bf16.msra.mxu1 %v7487_v27 }
 0x3c8   : > { %7058 = vmatprep.subr.bf16.mxu1 %v7564_v7 }
 0x3c9   : > { %v4070_v30 = vpop.f32.mrb[0].mxu1 }
 0x3ca   : > { %v6926_v45 = vpop.f32.mrb[1].mxu1 }
 0x3cb   : > { %7059 = vmatpush3.bf16.msra.mxu1 %v7488_v17  ;;  %v4073_v41 = vpop.f32.mrb[2].mxu1 }
 0x3cc   : > { %v6927_v63 = vpop.f32.mrb[3].mxu1  ;;  %7060 = vmatprep.subr.bf16.mxu1 %v7564_v7  ;;  %v7513_v41 = vld [vmem:[%s9447_s3 + $0x2b0] sm:$0xff]  }
 0x3cd   : > { %v7514_v63 = vld [vmem:[%s9447_s3 + $0x2b8] sm:$0xff]  }
 0x3cf   : > { %7061 = vmatpush3.bf16.msra.mxu1 %v7489_v37 }
 0x3d0   : > { %7062 = vmatprep.subr.bf16.mxu1 %v7564_v7 }
 0x3d3   : > { %7063 = vmatpush3.bf16.msra.mxu1 %v7490_v6  ;;  %v5184_v6 = vrot.slane %v5177_v25, %v7632_v19  ;;  %v7518_v25 = vld [vmem:[%s9447_s3 + $0x2d8] sm:$0xff]  }
 0x3d4   : > { %7068 = vmatprep.subr.bf16.mxu1 %v7564_v7 }
 0x3d6   : > { %7065 = vmatmul.mubr.bf16.vlgmr.msra.gmra.mrb[28].mxu1 %v4825_v33  ;;  %v7516_v33 = vld [vmem:[%s9447_s3 + $0x2c8] sm:$0xff]  }
 0x3d7   : > { %7069 = vmatpush3.bf16.msra.mxu1 %v7491_v58  ;;  %7084 = vmatprep.mubr.msk.bf16.mxu1 %vm7565_vm0, %v7564_v7  ;;  %v5191_v58 = vrot.slane %v5184_v6, %v7632_v19 }
 0x3d8   : > { %7070 = vmatprep.subr.bf16.mxu1 %v7564_v7 }
 0x3db   : > { %7071 = vmatpush3.bf16.msra.mxu1 %v7492_v43  ;;  %v7519_v43 = vld [vmem:[%s9447_s3 + $0x2e0] sm:$0xff]  }
 0x3dc   : > { %7072 = vmatprep.subr.bf16.mxu1 %v7564_v7 }
 0x3df   : > { %7073 = vmatpush3.bf16.msra.mxu1 %v7493_v12  ;;  %v7520_v12 = vld [vmem:[%s9447_s3 + $0x2e8] sm:$0xff]  }
 0x3e0   : > { %7074 = vmatprep.subr.bf16.mxu1 %v7564_v7 }
 0x3e3   : > { %7075 = vmatpush3.bf16.msra.mxu1 %v7494_v53 }
 0x3e4   : > { %7076 = vmatprep.subr.bf16.mxu1 %v7564_v7 }
 0x3e7   : > { %7077 = vmatpush3.bf16.msra.mxu1 %v7495_v39 }
 0x3e8   : > { %7078 = vmatprep.subr.bf16.mxu1 %v7564_v7 }
 0x3e9   : > { %v4176_v14 = vpop.f32.mrb[4].mxu1 }
 0x3ea   : > { %v4177_v60 = vadd.f32 %v4176_v14, %v4070_v30  ;;  %v6946_v38 = vpop.f32.mrb[5].mxu1 }
 0x3eb   : > { %v4179_v23 = vpop.f32.mrb[6].mxu1  ;;  %7079 = vmatpush3.bf16.msra.mxu1 %v7496_v18 }
 0x3ec   : > { %v6947_v26 = vpop.f32.mrb[7].mxu1  ;;  %7080 = vmatprep.subr.bf16.mxu1 %v7564_v7  ;;  %v7522_v23 = vld [vmem:[%s9447_s3 + $0x2f8] sm:$0xff]  }
 0x3ed   : > { %v7523_v26 = vld [vmem:[%s9447_s3 + $0x300] sm:$0xff]  }
 0x3ef   : > { %7081 = vmatpush3.bf16.msra.mxu1 %v7497_v46  ;;  %v5306_v46 = vrot.slane %v5299_v57, %v7632_v19  ;;  %v7526_v57 = vld [vmem:[%s9447_s3 + $0x318] sm:$0xff]  }
 0x3f0   : > { %7082 = vmatprep.subr.bf16.mxu1 %v7564_v7 }
 0x3f3   : > { %7083 = vmatpush3.bf16.msra.mxu1 %v7498_v54  ;;  %v5313_v54 = vrot.slane %v5306_v46, %v7632_v19  ;;  %v7554_v46 = vld [vmem:[%s9447_s3 + $0x3f8] sm:$0xff]  }
 0x3f4   : > { %7088 = vmatprep.subr.bf16.mxu1 %v7564_v7 }
 0x3f6   : > { %7085 = vmatmul.mubr.bf16.vlgmr.msra.gmra.mrb[32].mxu1 %v4947_v52  ;;  %v7528_v52 = vld [vmem:[%s9447_s3 + $0x328] sm:$0xff]  }
 0x3f7   : > { %7089 = vmatpush3.bf16.msra.mxu1 %v7499_v10  ;;  %7104 = vmatprep.mubr.msk.bf16.mxu1 %vm7565_vm0, %v7564_v7  ;;  %v7527_v10 = vld [vmem:[%s9447_s3 + $0x320] sm:$0xff]  }
 0x3f8   : > { %7090 = vmatprep.subr.bf16.mxu1 %v7564_v7 }
 0x3fb   : > { %7091 = vmatpush3.bf16.msra.mxu1 %v7500_v44 }
 0x3fc   : > { %7092 = vmatprep.subr.bf16.mxu1 %v7564_v7 }
 0x3ff   : > { %7093 = vmatpush3.bf16.msra.mxu1 %v7501_v61 }
 0x400   : > { %7094 = vmatprep.subr.bf16.mxu1 %v7564_v7 }
 0x403   : > { %7095 = vmatpush3.bf16.msra.mxu1 %v7502_v4 }
 0x404   : > { %7096 = vmatprep.subr.bf16.mxu1 %v7564_v7 }
 0x407   : > { %7097 = vmatpush3.bf16.msra.mxu1 %v7503_v8 }
 0x408   : > { %7098 = vmatprep.subr.bf16.mxu1 %v7564_v7 }
 0x409   : > { %v4298_v11 = vpop.f32.mrb[8].mxu1 }
 0x40a   : > { %v4304_v22 = vadd.f32 %v4298_v11, %v4177_v60  ;;  %v6966_v48 = vpop.f32.mrb[9].mxu1  ;;  %v7521_v60 = vld [vmem:[%s9447_s3 + $0x2f0] sm:$0xff]  }
 0x40b   : > { %v4301_v49 = vpop.f32.mrb[10].mxu1  ;;  %7099 = vmatpush3.bf16.msra.mxu1 %v7504_v56  ;;  %v7529_v56 = vld [vmem:[%s9447_s3 + $0x330] sm:$0xff]   ;;  %v5428_v48 = vrot.slane %v5421_v62, %v7632_v19  ;;  %v7535_v62 = vld [vmem:[%s9447_s3 + $0x360] sm:$0xff]  }
 0x40c   : > { %v6967_v31 = vpop.f32.mrb[11].mxu1  ;;  %7100 = vmatprep.subr.bf16.mxu1 %v7564_v7  ;;  %v7531_v49 = vld [vmem:[%s9447_s3 + $0x340] sm:$0xff]  }
 0x40d   : > { %v7532_v31 = vld [vmem:[%s9447_s3 + $0x348] sm:$0xff]  }
 0x40f   : > { %7101 = vmatpush3.bf16.msra.mxu1 %v7505_v3  ;;  %v5435_v3 = vrot.slane %v5428_v48, %v7632_v19 }
 0x410   : > { %7102 = vmatprep.subr.bf16.mxu1 %v7564_v7 }
 0x413   : > { %7103 = vmatpush3.bf16.msra.mxu1 %v7506_v36  ;;  %v7536_v36 = vld [vmem:[%s9447_s3 + $0x368] sm:$0xff]  }
 0x414   : > { %7108 = vmatprep.subr.bf16.mxu1 %v7564_v7 }
 0x416   : > { %7105 = vmatmul.mubr.bf16.vlgmr.msra.gmra.mrb[36].mxu1 %v5069_v40 }
 0x417   : > { %7109 = vmatpush3.bf16.msra.mxu1 %v7507_v2  ;;  %7124 = vmatprep.mubr.msk.bf16.mxu1 %vm7565_vm0, %v7564_v7 }
 0x418   : > { %7110 = vmatprep.subr.bf16.mxu1 %v7564_v7 }
 0x41b   : > { %7111 = vmatpush3.bf16.msra.mxu1 %v7508_v29 }
 0x41c   : > { %7112 = vmatprep.subr.bf16.mxu1 %v7564_v7 }
 0x41f   : > { %7113 = vmatpush3.bf16.msra.mxu1 %v7509_v13  ;;  %v7537_v13 = vld [vmem:[%s9447_s3 + $0x370] sm:$0xff]  }
 0x420   : > { %7114 = vmatprep.subr.bf16.mxu1 %v7564_v7 }
 0x423   : > { %7115 = vmatpush3.bf16.msra.mxu1 %v7510_v16 }
 0x424   : > { %7116 = vmatprep.subr.bf16.mxu1 %v7564_v7 }
 0x427   : > { %7117 = vmatpush3.bf16.msra.mxu1 %v7511_v47  ;;  %v7538_v47 = vld [vmem:[%s9447_s3 + $0x378] sm:$0xff]  }
 0x428   : > { %7118 = vmatprep.subr.bf16.mxu1 %v7564_v7 }
 0x429   : > { %v4421_v27 = vpop.f32.mrb[12].mxu1 }
 0x42a   : > { %v4427_v17 = vadd.f32 %v4421_v27, %v4304_v22  ;;  %v6986_v30 = vpop.f32.mrb[13].mxu1  ;;  %v7530_v22 = vld [vmem:[%s9447_s3 + $0x338] sm:$0xff]   ;;  %v7539_v27 = vld [vmem:[%s9447_s3 + $0x380] sm:$0xff]  }
 0x42b   : > { %v4424_v45 = vpop.f32.mrb[14].mxu1  ;;  %7119 = vmatpush3.bf16.msra.mxu1 %v7512_v20  ;;  %v5550_v20 = vrot.slane %v5543_v9, %v7632_v19  ;;  %v7540_v30 = vld [vmem:[%s9447_s3 + $0x388] sm:$0xff]   ;;  %v7543_v9 = vld [vmem:[%s9447_s3 + $0x3a0] sm:$0xff]  }
 0x42c   : > { %v6987_v37 = vpop.f32.mrb[15].mxu1  ;;  %7120 = vmatprep.subr.bf16.mxu1 %v7564_v7  ;;  %v7544_v45 = vld [vmem:[%s9447_s3 + $0x3a8] sm:$0xff]  }
 0x42f   : > { %7121 = vmatpush3.bf16.msra.mxu1 %v7513_v41 }
 0x430   : > { %7122 = vmatprep.subr.bf16.mxu1 %v7564_v7 }
 0x433   : > { %7123 = vmatpush3.bf16.msra.mxu1 %v7514_v63 }
 0x434   : > { %7128 = vmatprep.subr.bf16.mxu1 %v7564_v7 }
 0x436   : > { %7125 = vmatmul.mubr.bf16.vlgmr.msra.gmra.mrb[40].mxu1 %v5191_v58 }
 0x437   : > { %7129 = vmatpush3.bf16.msra.mxu1 %v7515_v55  ;;  %7144 = vmatprep.mubr.msk.bf16.mxu1 %vm7565_vm0, %v7564_v7  ;;  %v7545_v55 = vld [vmem:[%s9447_s3 + $0x3b0] sm:$0xff]  }
 0x438   : > { %7130 = vmatprep.subr.bf16.mxu1 %v7564_v7 }
 0x43b   : > { %7131 = vmatpush3.bf16.msra.mxu1 %v7516_v33  ;;  %v7546_v33 = vld [vmem:[%s9447_s3 + $0x3b8] sm:$0xff]  }
 0x43c   : > { %7132 = vmatprep.subr.bf16.mxu1 %v7564_v7 }
 0x43f   : > { %7133 = vmatpush3.bf16.msra.mxu1 %v7517_v59  ;;  %v5672_v59 = vrot.slane %v5665_v0, %v7632_v19  ;;  %v7551_v0 = vld [vmem:[%s9447_s3 + $0x3e0] sm:$0xff]  }
 0x440   : > { %7134 = vmatprep.subr.bf16.mxu1 %v7564_v7 }
 0x443   : > { %7135 = vmatpush3.bf16.msra.mxu1 %v7518_v25  ;;  %v7547_v25 = vld [vmem:[%s9447_s3 + $0x3c0] sm:$0xff]  }
 0x444   : > { %7136 = vmatprep.subr.bf16.mxu1 %v7564_v7 }
 0x447   : > { %7137 = vmatpush3.bf16.msra.mxu1 %v7519_v43  ;;  %v5679_v43 = vrot.slane %v5672_v59, %v7632_v19 }
 0x448   : > { %7138 = vmatprep.subr.bf16.mxu1 %v7564_v7 }
 0x449   : > { %v4543_v53 = vpop.f32.mrb[16].mxu1 }
 0x44a   : > { %v4549_v39 = vadd.f32 %v4543_v53, %v4427_v17  ;;  %v7006_v18 = vpop.f32.mrb[17].mxu1  ;;  %v5557_v17 = vrot.slane %v5550_v20, %v7632_v19  ;;  %v7552_v53 = vld [vmem:[%s9447_s3 + $0x3e8] sm:$0xff]  }
 0x44b   : > { %v4546_v14 = vpop.f32.mrb[18].mxu1  ;;  %7139 = vmatpush3.bf16.msra.mxu1 %v7520_v12  ;;  %v7548_v12 = vld [vmem:[%s9447_s3 + $0x3c8] sm:$0xff]  }
 0x44c   : > { %v7007_v38 = vpop.f32.mrb[19].mxu1  ;;  %7140 = vmatprep.subr.bf16.mxu1 %v7564_v7 }
 0x44d   : > { %v7553_v38 = vld [vmem:[%s9447_s3 + $0x3f0] sm:$0xff]  }
 0x44f   : > { %7141 = vmatpush3.bf16.msra.mxu1 %v7521_v60 }
 0x450   : > { %7142 = vmatprep.subr.bf16.mxu1 %v7564_v7 }
 0x453   : > { %7143 = vmatpush3.bf16.msra.mxu1 %v7522_v23 }
 0x454   : > { %7148 = vmatprep.subr.bf16.mxu1 %v7564_v7 }
 0x456   : > { %7145 = vmatmul.mubr.bf16.vlgmr.msra.gmra.mrb[44].mxu1 %v5313_v54 }
 0x457   : > { %7149 = vmatpush3.bf16.msra.mxu1 %v7523_v26  ;;  %7164 = vmatprep.mubr.msk.bf16.mxu1 %vm7565_vm0, %v7564_v7  ;;  %v5794_v26 = vrot.slane %v5787_v21, %v7632_v19 }
 0x458   : > { %7150 = vmatprep.subr.bf16.mxu1 %v7564_v7 }
 0x459   : > { %v5801_v54 = vrot.slane %v5794_v26, %v7632_v19 }
 0x45b   : > { %7151 = vmatpush3.bf16.msra.mxu1 %v7524_v42 }
 0x45c   : > { %7152 = vmatprep.subr.bf16.mxu1 %v7564_v7 }
 0x45f   : > { %7153 = vmatpush3.bf16.msra.mxu1 %v7525_v32 }
 0x460   : > { %7154 = vmatprep.subr.bf16.mxu1 %v7564_v7 }
 0x463   : > { %7155 = vmatpush3.bf16.msra.mxu1 %v7526_v57 }
 0x464   : > { %7156 = vmatprep.subr.bf16.mxu1 %v7564_v7 }
 0x467   : > { %7157 = vmatpush3.bf16.msra.mxu1 %v7527_v10 }
 0x468   : > { %7158 = vmatprep.subr.bf16.mxu1 %v7564_v7 }
 0x469   : > { %v4665_v44 = vpop.f32.mrb[20].mxu1 }
 0x46a   : > { %v4671_v61 = vadd.f32 %v4665_v44, %v4549_v39  ;;  %v7026_v4 = vpop.f32.mrb[21].mxu1 }
 0x46b   : > { %v4668_v8 = vpop.f32.mrb[22].mxu1  ;;  %7159 = vmatpush3.bf16.msra.mxu1 %v7528_v52 }
 0x46c   : > { %v7027_v11 = vpop.f32.mrb[23].mxu1  ;;  %7160 = vmatprep.subr.bf16.mxu1 %v7564_v7 }
 0x46f   : > { %7161 = vmatpush3.bf16.msra.mxu1 %v7529_v56 }
 0x470   : > { %7162 = vmatprep.subr.bf16.mxu1 %v7564_v7 }
 0x473   : > { %7163 = vmatpush3.bf16.msra.mxu1 %v7530_v22 }
 0x474   : > { %7168 = vmatprep.subr.bf16.mxu1 %v7564_v7 }
 0x476   : > { %7165 = vmatmul.mubr.bf16.vlgmr.msra.gmra.mrb[48].mxu1 %v5435_v3 }
 0x477   : > { %7169 = vmatpush3.bf16.msra.mxu1 %v7531_v49  ;;  %7184 = vmatprep.mubr.msk.bf16.mxu1 %vm7565_vm0, %v7564_v7 }
 0x478   : > { %7170 = vmatprep.subr.bf16.mxu1 %v7564_v7 }
 0x47b   : > { %7171 = vmatpush3.bf16.msra.mxu1 %v7532_v31 }
 0x47c   : > { %7172 = vmatprep.subr.bf16.mxu1 %v7564_v7 }
 0x47f   : > { %7173 = vmatpush3.bf16.msra.mxu1 %v7533_v28 }
 0x480   : > { %7174 = vmatprep.subr.bf16.mxu1 %v7564_v7 }
 0x483   : > { %7175 = vmatpush3.bf16.msra.mxu1 %v7534_v1 }
 0x484   : > { %7176 = vmatprep.subr.bf16.mxu1 %v7564_v7 }
 0x487   : > { %7177 = vmatpush3.bf16.msra.mxu1 %v7535_v62 }
 0x488   : > { %7178 = vmatprep.subr.bf16.mxu1 %v7564_v7 }
 0x489   : > { %v4787_v24 = vpop.f32.mrb[24].mxu1 }
 0x48a   : > { %v4793_v2 = vadd.f32 %v4787_v24, %v4671_v61  ;;  %v7046_v40 = vpop.f32.mrb[25].mxu1 }
 0x48b   : > { %v4790_v29 = vpop.f32.mrb[26].mxu1  ;;  %7179 = vmatpush3.bf16.msra.mxu1 %v7536_v36 }
 0x48c   : > { %v7047_v16 = vpop.f32.mrb[27].mxu1  ;;  %7180 = vmatprep.subr.bf16.mxu1 %v7564_v7 }
 0x48f   : > { %7181 = vmatpush3.bf16.msra.mxu1 %v7537_v13 }
 0x490   : > { %7182 = vmatprep.subr.bf16.mxu1 %v7564_v7 }
 0x493   : > { %7183 = vmatpush3.bf16.msra.mxu1 %v7538_v47  ;;  %v6280_v47 = vld [vmem:[%s9448_s4] ss:$0 sm:$0xff] }
 0x494   : > { %7188 = vmatprep.subr.bf16.mxu1 %v7564_v7 }
 0x496   : > { %7185 = vmatmul.mubr.bf16.vlgmr.msra.gmra.mrb[52].mxu1 %v5557_v17 }
 0x497   : > { %7189 = vmatpush3.bf16.msra.mxu1 %v7539_v27  ;;  %7204 = vmatprep.mubr.msk.bf16.mxu1 %vm7565_vm0, %v7564_v7 }
 0x498   : > { %7190 = vmatprep.subr.bf16.mxu1 %v7564_v7 }
 0x49b   : > { %7191 = vmatpush3.bf16.msra.mxu1 %v7540_v30 }
 0x49c   : > { %7192 = vmatprep.subr.bf16.mxu1 %v7564_v7 }
 0x49f   : > { %7193 = vmatpush3.bf16.msra.mxu1 %v7541_v15 }
 0x4a0   : > { %7194 = vmatprep.subr.bf16.mxu1 %v7564_v7 }
 0x4a3   : > { %7195 = vmatpush3.bf16.msra.mxu1 %v7542_v5 }
 0x4a4   : > { %7196 = vmatprep.subr.bf16.mxu1 %v7564_v7 }
 0x4a7   : > { %7197 = vmatpush3.bf16.msra.mxu1 %v7543_v9 }
 0x4a8   : > { %7198 = vmatprep.subr.bf16.mxu1 %v7564_v7 }
 0x4a9   : > { %v4909_v41 = vpop.f32.mrb[28].mxu1 }
 0x4aa   : > { %v4915_v37 = vadd.f32 %v4909_v41, %v4793_v2  ;;  %v7066_v63 = vpop.f32.mrb[29].mxu1 }
 0x4ab   : > { %v4912_v6 = vpop.f32.mrb[30].mxu1  ;;  %7199 = vmatpush3.bf16.msra.mxu1 %v7544_v45 }
 0x4ac   : > { %v7067_v58 = vpop.f32.mrb[31].mxu1  ;;  %7200 = vmatprep.subr.bf16.mxu1 %v7564_v7 }
 0x4af   : > { %7201 = vmatpush3.bf16.msra.mxu1 %v7545_v55 }
 0x4b0   : > { %7202 = vmatprep.subr.bf16.mxu1 %v7564_v7 }
 0x4b3   : > { %7203 = vmatpush3.bf16.msra.mxu1 %v7546_v33 }
 0x4b4   : > { %7208 = vmatprep.subr.bf16.mxu1 %v7564_v7 }
 0x4b6   : > { %7205 = vmatmul.mubr.bf16.vlgmr.msra.gmra.mrb[56].mxu1 %v5679_v43 }
 0x4b7   : > { %7209 = vmatpush3.bf16.msra.mxu1 %v7547_v25  ;;  %7224 = vmatprep.mubr.msk.bf16.mxu1 %vm7565_vm0, %v7564_v7 }
 0x4b8   : > { %7210 = vmatprep.subr.bf16.mxu1 %v7564_v7 }
 0x4bb   : > { %7211 = vmatpush3.bf16.msra.mxu1 %v7548_v12 }
 0x4bc   : > { %7212 = vmatprep.subr.bf16.mxu1 %v7564_v7 }
 0x4bf   : > { %7213 = vmatpush3.bf16.msra.mxu1 %v7549_v50 }
 0x4c0   : > { %7214 = vmatprep.subr.bf16.mxu1 %v7564_v7 }
 0x4c3   : > { %7215 = vmatpush3.bf16.msra.mxu1 %v7550_v35 }
 0x4c4   : > { %7216 = vmatprep.subr.bf16.mxu1 %v7564_v7 }
 0x4c7   : > { %7217 = vmatpush3.bf16.msra.mxu1 %v7551_v0 }
 0x4c8   : > { %7218 = vmatprep.subr.bf16.mxu1 %v7564_v7 }
 0x4c9   : > { %v5031_v39 = vpop.f32.mrb[32].mxu1 }
 0x4ca   : > { %v5037_v18 = vadd.f32 %v5031_v39, %v4915_v37  ;;  %v7086_v14 = vpop.f32.mrb[33].mxu1 }
 0x4cb   : > { %v5034_v60 = vpop.f32.mrb[34].mxu1  ;;  %7219 = vmatpush3.bf16.msra.mxu1 %v7552_v53 }
 0x4cc   : > { %v7087_v23 = vpop.f32.mrb[35].mxu1  ;;  %7220 = vmatprep.subr.bf16.mxu1 %v7564_v7 }
 0x4cf   : > { %7221 = vmatpush3.bf16.msra.mxu1 %v7553_v38 }
 0x4d0   : > { %7222 = vmatprep.subr.bf16.mxu1 %v7564_v7 }
 0x4d3   : > { %7223 = vmatpush3.bf16.msra.mxu1 %v7554_v46 }
 0x4d6   : > { %7225 = vmatmul.mubr.bf16.vlgmr.msra.gmra.mrb[60].mxu1 %v5801_v54 }
 0x4e9   : > { %v5153_v42 = vpop.f32.mrb[36].mxu1 }
 0x4ea   : > { %v5159_v32 = vadd.f32 %v5153_v42, %v5037_v18  ;;  %v7106_v57 = vpop.f32.mrb[37].mxu1 }
 0x4eb   : > { %v5156_v10 = vpop.f32.mrb[38].mxu1 }
 0x4ec   : > { %v7107_v52 = vpop.f32.mrb[39].mxu1 }
 0x509   : > { %v5275_v44 = vpop.f32.mrb[40].mxu1 }
 0x50a   : > { %v5281_v61 = vadd.f32 %v5275_v44, %v5159_v32  ;;  %v7126_v4 = vpop.f32.mrb[41].mxu1 }
 0x50b   : > { %v5278_v8 = vpop.f32.mrb[42].mxu1 }
 0x50c   : > { %v7127_v56 = vpop.f32.mrb[43].mxu1 }
 0x529   : > { %v5397_v7 = vpop.f32.mrb[44].mxu1 }
 0x52a   : > { %v5403_v11 = vadd.f32 %v5397_v7, %v5281_v61  ;;  %v7146_v22 = vpop.f32.mrb[45].mxu1 }
 0x52b   : > { %v5400_v48 = vpop.f32.mrb[46].mxu1 }
 0x52c   : > { %v7147_v51 = vpop.f32.mrb[47].mxu1 }
 0x549   : > { %v5519_v34 = vpop.f32.mrb[48].mxu1 }
 0x54a   : > { %v5525_v21 = vadd.f32 %v5519_v34, %v5403_v11  ;;  %v7166_v19 = vpop.f32.mrb[49].mxu1 }
 0x54b   : > { %v5522_v49 = vpop.f32.mrb[50].mxu1 }
 0x54c   : > { %v7167_v3 = vpop.f32.mrb[51].mxu1 }
 0x569   : > { %v5641_v31 = vpop.f32.mrb[52].mxu1 }
 0x56a   : > { %v5647_v28 = vadd.f32 %v5641_v31, %v5525_v21  ;;  %v7186_v1 = vpop.f32.mrb[53].mxu1 }
 0x56b   : > { %v5644_v62 = vpop.f32.mrb[54].mxu1 }
 0x56c   : > { %v7187_v36 = vpop.f32.mrb[55].mxu1 }
 0x589   : > { %v5763_v24 = vpop.f32.mrb[56].mxu1 }
 0x58a   : > { %v5769_v2 = vadd.f32 %v5763_v24, %v5647_v28  ;;  %v7206_v40 = vpop.f32.mrb[57].mxu1 }
 0x58b   : > { %v5766_v29 = vpop.f32.mrb[58].mxu1 }
 0x58c   : > { %v7207_v13 = vpop.f32.mrb[59].mxu1 }
 0x5a9   : > { %v5885_v16 = vpop.f32.mrb[60].mxu1 }
 0x5aa   : > { %v5891_v20 = vadd.f32 %v5885_v16, %v5769_v2  ;;  %v7226_v27 = vpop.f32.mrb[61].mxu1 }
 0x5ab   : > { %v5888_v17 = vpop.f32.mrb[62].mxu1 }
 0x5ac   : > { %v5899_v30 = vadd.f32 %v6280_v47, %v5891_v20  ;;  %v7227_v15 = vpop.f32.mrb[63].mxu1 }
 0x5ae   : > { %5901 = vst.msk [vmem:[%s222_s21] sm:$0xf] %vm5900_vm5, %v5899_v30 }
 0x5af PF: > { %s15_s18 = sadd.s32 1, %s7561_s18  }
 0x5b0   : > { %p12_p4 = scmp.ge.s32.totalorder %s15_s18, 4  }
 0x5b2   :  { %14 = sbr.rel (!%p12_p4) target bundleno = 1 (0x1), region = 70 }

</bundles_post_ra>
